<compile_context>
chip_gen: v7x
topology: tpu7x:2x2x1
jax: 0.10.0
libtpu: 0.0.40
codegen_flags: <defaults>
</compile_context>

<pallas_src>
import functools

import jax
import jax.numpy as jnp
from jax.experimental import pallas as pl
from jax.experimental.pallas import tpu as pltpu


# ---------------------------------------------------------------------------
# Pallas kernels
# ---------------------------------------------------------------------------
def _gemm_bias_act_kernel(w_ref, x_ref, b_ref, o_ref, *, act):
    # out^T (tn, tm) = W (tn, K) @ cols^T (K, tm); f32 MXU accumulation,
    # f32 epilogue (bias + activation), store in o_ref.dtype (bf16 or f32).
    acc = jnp.dot(w_ref[...], x_ref[...], preferred_element_type=jnp.float32)
    acc = acc + b_ref[...]                       # (tn, 1) broadcast over lanes
    if act == "relu":
        acc = jnp.maximum(acc, 0.0)
    elif act == "sigmoid":
        acc = jax.nn.sigmoid(acc)
    o_ref[...] = acc.astype(o_ref.dtype)


def _bottleneck_kernel(flat_ref, wml_ref, bml_ref, eps_ref, wd_ref, bd_ref,
                       mu_ref, lv_ref, d_ref):
    # Fused: [fc_mu | fc_logvar] single GEMM + reparameterization + decoder fc.
    mulv = jnp.dot(flat_ref[...], wml_ref[...],
                   preferred_element_type=jnp.float32) + bml_ref[...]
    mu = mulv[:, 0:2]
    lv = mulv[:, 2:4]
    z = mu + eps_ref[...] * jnp.exp(0.5 * lv)
    d = jnp.dot(z.astype(wd_ref.dtype), wd_ref[...],
                preferred_element_type=jnp.float32) + bd_ref[...]
    mu_ref[...] = mu
    lv_ref[...] = lv
    d_ref[...] = d.astype(d_ref.dtype)


# ---------------------------------------------------------------------------
# GEMM wrapper (transposed / lane-dense orientation)
# ---------------------------------------------------------------------------
def _pick_tiles(N, M):
    # N (sublane) tile: 256-wide feeds the v6e/v7x 256x256 MXU and gives >=2
    # parallel grid steps for v7x's 2 TensorCores where N allows.
    if N >= 512 and N % 256 == 0:
        tn = 256
    elif N >= 256 and N % 128 == 0:
        tn = 128
    else:
        tn = N
    # M (lane) tile: full extent (blocks are tiny at these K; far below VMEM
    # limits), only splitting very wide outputs so v7x gets a 2nd parallel step.
    if M >= 2048 and M % 1024 == 0:
        tm = 1024
    else:
        tm = M
    return tn, tm


def gemm_bias_act(w_mat, x_cols, b_col, act="none", out_dtype=jnp.bfloat16):
    """w (N, K) bf16 @ x (K, M) bf16 + b (N, 1) f32 -> (N, M) out_dtype."""
    N, K = w_mat.shape
    K2, M = x_cols.shape
    assert K == K2
    tn, tm = _pick_tiles(N, M)
    grid = (N // tn, M // tm)
    return pl.pallas_call(
        functools.partial(_gemm_bias_act_kernel, act=act),
        out_shape=jax.ShapeDtypeStruct((N, M), out_dtype),
        grid=grid,
        in_specs=[
            pl.BlockSpec((tn, K), lambda n, m: (n, 0)),
            pl.BlockSpec((K, tm), lambda n, m: (0, m)),
            pl.BlockSpec((tn, 1), lambda n, m: (n, 0)),
        ],
        out_specs=pl.BlockSpec((tn, tm), lambda n, m: (n, m)),
        compiler_params=pltpu.CompilerParams(
            dimension_semantics=("parallel", "parallel")),
    )(w_mat, x_cols, b_col)


# ---------------------------------------------------------------------------
# Conv glue (CBHW layout; bf16 tap construction in XLA, GEMM in Pallas)
# ---------------------------------------------------------------------------
def _im2col_T(x, kh, kw, stride, pad):
    """x (C, B, H, W) -> cols^T (C*kh*kw, B*Ho*Wo); K first, lanes = B*Ho*Wo."""
    C, B, H, W = x.shape
    xp = jnp.pad(x, ((0, 0), (0, 0), (pad, pad), (pad, pad)))
    Ho = (H + 2 * pad - kh) // stride + 1
    Wo = (W + 2 * pad - kw) // stride + 1
    patches = [xp[:, :, i:i + stride * Ho:stride, j:j + stride * Wo:stride]
               for i in range(kh) for j in range(kw)]
    cols = jnp.stack(patches, axis=1).reshape(C * kh * kw, B * Ho * Wo)
    return cols, Ho, Wo


def conv2d(x, w_mat, b_col, kh, kw, stride, pad, act, out_dtype):
    """x (C_in, B, H, W) bf16; w_mat (C_out, C_in*kh*kw) bf16 -> (C_out, B, Ho, Wo)."""
    # TODO(synk): fold tap construction into the kernel to avoid the HBM im2col.
    C_out = w_mat.shape[0]
    B = x.shape[1]
    cols, Ho, Wo = _im2col_T(x, kh, kw, stride, pad)
    out = gemm_bias_act(w_mat, cols, b_col, act=act, out_dtype=out_dtype)
    return out.reshape(C_out, B, Ho, Wo)


def conv_transpose2d_s2(x, w_mat, b_col, C_out, act, out_dtype):
    """ConvTranspose2d(k=3, s=2, p=1, op=1) via 4-phase stride decomposition.
    x (C_in, B, H, W) bf16; w_mat (4*C_out, C_in*4) bf16 -> (C_out, B, 2H, 2W)."""
    C_in, B, H, W = x.shape
    # Taps only ever read input offsets (dy, dx) in {0,1}; pad right/bottom.
    xp = jnp.pad(x, ((0, 0), (0, 0), (0, 1), (0, 1)))
    taps = [xp[:, :, dy:dy + H, dx:dx + W] for dy in (0, 1) for dx in (0, 1)]
    cols = jnp.stack(taps, axis=1).reshape(C_in * 4, B * H * W)
    out = gemm_bias_act(w_mat, cols, b_col, act=act, out_dtype=out_dtype)
    out = out.reshape(2, 2, C_out, B, H, W)
    # Pixel-shuffle the 4 output phases back onto the 2H x 2W grid (bf16).
    # TODO(synk): fold this into the next layer's tap gather to skip the relayout.
    return out.transpose(2, 3, 4, 0, 5, 1).reshape(C_out, B, 2 * H, 2 * W)


def bottleneck(flat, w_mulv, b_mulv, eps, w_d, b_d):
    """Fused fc_mu + fc_logvar (one concatenated GEMM) + reparam + decoder fc."""
    B = flat.shape[0]
    D = w_d.shape[1]
    out_shapes = (
        jax.ShapeDtypeStruct((B, 2), jnp.float32),
        jax.ShapeDtypeStruct((B, 2), jnp.float32),
        jax.ShapeDtypeStruct((B, D), jnp.bfloat16),
    )
    return pl.pallas_call(_bottleneck_kernel, out_shape=out_shapes)(
        flat, w_mulv, b_mulv, eps, w_d, b_d)


# ---------------------------------------------------------------------------
# VAE forward
# ---------------------------------------------------------------------------
def vae_forward(gp, x, eps):
    B = x.shape[0]
    # NCHW -> CBHW + bf16 once at the model boundary.
    h = x.transpose(1, 0, 2, 3).astype(jnp.bfloat16)
    # Encoder
    h = conv2d(h, gp["e1_w"], gp["e1_b"], 3, 3, 2, 1, "relu", jnp.bfloat16)
    h = conv2d(h, gp["e2_w"], gp["e2_b"], 3, 3, 2, 1, "relu", jnp.bfloat16)
    h = conv2d(h, gp["e3_w"], gp["e3_b"], 3, 3, 2, 1, "relu", jnp.bfloat16)
    flat = h.transpose(1, 0, 2, 3).reshape(B, -1)          # torch view(B, -1) order
    # Fused bottleneck: z_mean / z_log_var / sampling / decoder fc in one kernel.
    z_mean, z_log_var, d = bottleneck(flat, gp["ml_w"], gp["ml_b"], eps,
                                      gp["d_w"], gp["d_b"])
    # Decoder
    d = d.reshape(B, 128, 4, 4).transpose(1, 0, 2, 3)      # -> CBHW
    d = conv_transpose2d_s2(d, gp["ct1_w"], gp["ct1_b"], 128, "relu", jnp.bfloat16)
    d = conv_transpose2d_s2(d, gp["ct2_w"], gp["ct2_b"], 64, "relu", jnp.bfloat16)
    d = conv_transpose2d_s2(d, gp["ct3_w"], gp["ct3_b"], 32, "relu", jnp.bfloat16)
    recon = conv2d(d, gp["f_w"], gp["f_b"], 3, 3, 1, 1, "sigmoid", jnp.float32)
    return z_mean, z_log_var, recon.transpose(1, 0, 2, 3)  # CBHW -> NCHW


# ---------------------------------------------------------------------------
# Parameter init (torch layouts) + one-time GEMM-layout preparation
# ---------------------------------------------------------------------------
def init_params(key):
    ks = jax.random.split(key, 20)

    def u(k, shape, fan_in):
        bound = 1.0 / float(fan_in) ** 0.5
        return jax.random.uniform(k, shape, jnp.float32, -bound, bound)

    p = {}
    p["e_conv1_w"] = u(ks[0], (32, 1, 3, 3), 1 * 9)
    p["e_conv1_b"] = u(ks[1], (32,), 1 * 9)
    p["e_conv2_w"] = u(ks[2], (64, 32, 3, 3), 32 * 9)
    p["e_conv2_b"] = u(ks[3], (64,), 32 * 9)
    p["e_conv3_w"] = u(ks[4], (128, 64, 3, 3), 64 * 9)
    p["e_conv3_b"] = u(ks[5], (128,), 64 * 9)
    p["fc_mu_w"] = u(ks[6], (2, 2048), 2048)     # torch Linear weight (out, in)
    p["fc_mu_b"] = u(ks[7], (2,), 2048)
    p["fc_logvar_w"] = u(ks[8], (2, 2048), 2048)
    p["fc_logvar_b"] = u(ks[9], (2,), 2048)
    p["d_fc_w"] = u(ks[10], (2048, 2), 2)
    p["d_fc_b"] = u(ks[11], (2048,), 2)
    p["ct1_w"] = u(ks[12], (128, 128, 3, 3), 128 * 9)   # ConvTranspose: (in, out, kh, kw)
    p["ct1_b"] = u(ks[13], (128,), 128 * 9)
    p["ct2_w"] = u(ks[14], (128, 64, 3, 3), 128 * 9)
    p["ct2_b"] = u(ks[15], (64,), 128 * 9)
    p["ct3_w"] = u(ks[16], (64, 32, 3, 3), 64 * 9)
    p["ct3_b"] = u(ks[17], (32,), 64 * 9)
    p["fconv_w"] = u(ks[18], (1, 32, 3, 3), 32 * 9)
    p["fconv_b"] = u(ks[19], (1,), 32 * 9)
    return p


def prepare_params(p):
    """One-time relayout/cast of torch-layout weights into bf16 GEMM layouts.
    Runs once at init so the jitted forward contains no weight-prep ops."""

    def conv_w(w):
        return w.reshape(w.shape[0], -1).astype(jnp.bfloat16)

    def col(b):
        return b.reshape(-1, 1).astype(jnp.float32)

    def phase_w(w):
        # torch ConvTranspose2d weight (C_in, C_out, 3, 3) -> (4*C_out, C_in*4):
        # out[2y+ey, 2x+ex] = sum_{dy,dx} x[y+dy, x+dx] * w[:, :, ey+1-2dy, ex+1-2dx]
        C_in, C_out = w.shape[0], w.shape[1]
        zero = jnp.zeros((C_out, C_in), w.dtype)
        phases = []
        for ey in (0, 1):
            for ex in (0, 1):
                rows = []
                for dy in (0, 1):
                    taps = []
                    for dx in (0, 1):
                        ky, kx = ey + 1 - 2 * dy, ex + 1 - 2 * dx
                        ok = (0 <= ky < 3) and (0 <= kx < 3)
                        taps.append(w[:, :, ky, kx].T if ok else zero)
                    rows.append(jnp.stack(taps, axis=-1))      # (C_out, C_in, 2)
                phases.append(jnp.stack(rows, axis=-2))        # (C_out, C_in, 2, 2)
        w_all = jnp.stack(phases, axis=0)                      # (4, C_out, C_in, 2, 2)
        return w_all.reshape(4 * C_out, C_in * 4).astype(jnp.bfloat16)

    gp = {
        "e1_w": conv_w(p["e_conv1_w"]), "e1_b": col(p["e_conv1_b"]),
        "e2_w": conv_w(p["e_conv2_w"]), "e2_b": col(p["e_conv2_b"]),
        "e3_w": conv_w(p["e_conv3_w"]), "e3_b": col(p["e_conv3_b"]),
        # Concatenated [mu | logvar] weight: one GEMM over K=2048 instead of two.
        "ml_w": jnp.concatenate([p["fc_mu_w"].T, p["fc_logvar_w"].T],
                                axis=1).astype(jnp.bfloat16),           # (2048, 4)
        "ml_b": jnp.concatenate([p["fc_mu_b"], p["fc_logvar_b"]]
                                ).reshape(1, 4).astype(jnp.float32),
        "d_w": p["d_fc_w"].T.astype(jnp.bfloat16),                       # (2, 2048)
        "d_b": p["d_fc_b"].reshape(1, -1).astype(jnp.float32),
        "ct1_w": phase_w(p["ct1_w"]), "ct1_b": col(jnp.tile(p["ct1_b"], 4)),
        "ct2_w": phase_w(p["ct2_w"]), "ct2_b": col(jnp.tile(p["ct2_b"], 4)),
        "ct3_w": phase_w(p["ct3_w"]), "ct3_b": col(jnp.tile(p["ct3_b"], 4)),
        "f_w": conv_w(p["fconv_w"]), "f_b": col(p["fconv_b"]),
    }
    return gp


if __name__ == "__main__":
    key = jax.random.PRNGKey(0)
    kx, keps, kp = jax.random.split(key, 3)
    params = init_params(kp)
    gemm_params = prepare_params(params)   # one-time weight relayout, not jitted

    # MNIST-sized input: (B=2, C=1, H=28, W=28) -> encoder bottleneck (128, 4, 4)
    x = jax.random.uniform(kx, (2, 1, 28, 28), jnp.float32)
    eps = jax.random.normal(keps, (2, 2), jnp.float32)   # reparameterization noise

    fwd = jax.jit(vae_forward)
    z_mean, z_log_var, recon_x = fwd(gemm_params, x, eps)
    jax.block_until_ready((z_mean, z_log_var, recon_x))

    assert z_mean.shape == (2, 2)
    assert z_log_var.shape == (2, 2)
    assert recon_x.shape == (2, 1, 32, 32)   # decoder upsamples 4 -> 8 -> 16 -> 32
    assert bool(jnp.all(jnp.isfinite(recon_x)))
    assert bool(jnp.all((recon_x >= 0.0) & (recon_x <= 1.0)))   # sigmoid range
    print("KERNEL_OK")
</pallas_src>

<mosaic_0001>
module attributes {stable_mosaic.version = 11 : i64} {
  func.func @_gemm_bias_act_kernel(%arg0: i32, %arg1: i32, %arg2: memref<32x9xbf16, #tpu.memory_space<vmem>>, %arg3: memref<9x392xbf16, #tpu.memory_space<vmem>>, %arg4: memref<32x1xf32, #tpu.memory_space<vmem>>, %arg5: memref<32x392xbf16, #tpu.memory_space<vmem>>) attributes {dimension_semantics = [#tpu.dimension_semantics<parallel>, #tpu.dimension_semantics<parallel>], iteration_bounds = array<i64: 1, 1>, scalar_prefetch = 0 : i64, scratch_operands = 0 : i64, tpu.core_type = #tpu.core_type<tc>, window_params = [{transform_indices = @transform_0, window_bounds = array<i64: 32, 9>}, {transform_indices = @transform_1, window_bounds = array<i64: 9, 392>}, {transform_indices = @transform_2, window_bounds = array<i64: 32, 1>}, {transform_indices = @transform_3, window_bounds = array<i64: 32, 392>}]} {
    %c0 = arith.constant 0 : index
    %c0_0 = arith.constant 0 : index
    %0 = vector.load %arg2[%c0, %c0_0] : memref<32x9xbf16, #tpu.memory_space<vmem>>, vector<32x9xbf16>
    %c0_1 = arith.constant 0 : index
    %c0_2 = arith.constant 0 : index
    %1 = vector.load %arg3[%c0_1, %c0_2] : memref<9x392xbf16, #tpu.memory_space<vmem>>, vector<9x392xbf16>
    %cst = arith.constant dense<0.000000e+00> : vector<32x392xf32>
    %2 = tpu.matmul %0, %1, %cst {dimension_numbers = #tpu.dot_dimension_numbers<[1], [0], [0], [1], [0, 0, 1, 1], [], []>} : vector<32x9xbf16>, vector<9x392xbf16>, vector<32x392xf32> -> vector<32x392xf32>
    %c0_3 = arith.constant 0 : index
    %c0_4 = arith.constant 0 : index
    %3 = vector.load %arg4[%c0_3, %c0_4] : memref<32x1xf32, #tpu.memory_space<vmem>>, vector<32x1xf32>
    %4 = vector.broadcast %3 : vector<32x1xf32> to vector<32x392xf32>
    %5 = arith.addf %2, %4 : vector<32x392xf32>
    %cst_5 = arith.constant 0.000000e+00 : f32
    %6 = vector.broadcast %cst_5 : f32 to vector<32x392xf32>
    %7 = arith.maximumf %5, %6 : vector<32x392xf32>
    %8 = arith.truncf %7 : vector<32x392xf32> to vector<32x392xbf16>
    %c0_6 = arith.constant 0 : index
    %c0_7 = arith.constant 0 : index
    %9 = vector.load %arg5[%c0_6, %c0_7] : memref<32x392xbf16, #tpu.memory_space<vmem>>, vector<32x392xbf16>
    tpu.vector_store %arg5[%c0_6, %c0_7], %8 {strides = array<i32>} : memref<32x392xbf16, #tpu.memory_space<vmem>>, vector<32x392xbf16>,
    return
  }
  func.func @transform_0(%arg0: i32, %arg1: i32) -> (i32, i32) {
    %c0_i32 = arith.constant 0 : i32
    %c0_i32_0 = arith.constant 0 : i32
    return %arg0, %c0_i32 : i32, i32
  }
  func.func @transform_1(%arg0: i32, %arg1: i32) -> (i32, i32) {
    %c0_i32 = arith.constant 0 : i32
    %c0_i32_0 = arith.constant 0 : i32
    return %c0_i32, %arg1 : i32, i32
  }
  func.func @transform_2(%arg0: i32, %arg1: i32) -> (i32, i32) {
    %c0_i32 = arith.constant 0 : i32
    %c0_i32_0 = arith.constant 0 : i32
    return %arg0, %c0_i32 : i32, i32
  }
  func.func @transform_3(%arg0: i32, %arg1: i32) -> (i32, i32) {
    %c0_i32 = arith.constant 0 : i32
    return %arg0, %arg1 : i32, i32
  }
}

module attributes {stable_mosaic.version = 11 : i64} {
  func.func @_gemm_bias_act_kernel(%arg0: i32, %arg1: i32, %arg2: memref<64x288xbf16, #tpu.memory_space<vmem>>, %arg3: memref<288x98xbf16, #tpu.memory_space<vmem>>, %arg4: memref<64x1xf32, #tpu.memory_space<vmem>>, %arg5: memref<64x98xbf16, #tpu.memory_space<vmem>>) attributes {dimension_semantics = [#tpu.dimension_semantics<parallel>, #tpu.dimension_semantics<parallel>], iteration_bounds = array<i64: 1, 1>, scalar_prefetch = 0 : i64, scratch_operands = 0 : i64, tpu.core_type = #tpu.core_type<tc>, window_params = [{transform_indices = @transform_0, window_bounds = array<i64: 64, 288>}, {transform_indices = @transform_1, window_bounds = array<i64: 288, 98>}, {transform_indices = @transform_2, window_bounds = array<i64: 64, 1>}, {transform_indices = @transform_3, window_bounds = array<i64: 64, 98>}]} {
    %c0 = arith.constant 0 : index
    %c0_0 = arith.constant 0 : index
    %0 = vector.load %arg2[%c0, %c0_0] : memref<64x288xbf16, #tpu.memory_space<vmem>>, vector<64x288xbf16>
    %c0_1 = arith.constant 0 : index
    %c0_2 = arith.constant 0 : index
    %1 = vector.load %arg3[%c0_1, %c0_2] : memref<288x98xbf16, #tpu.memory_space<vmem>>, vector<288x98xbf16>
    %cst = arith.constant dense<0.000000e+00> : vector<64x98xf32>
    %2 = tpu.matmul %0, %1, %cst {dimension_numbers = #tpu.dot_dimension_numbers<[1], [0], [0], [1], [0, 0, 1, 1], [], []>} : vector<64x288xbf16>, vector<288x98xbf16>, vector<64x98xf32> -> vector<64x98xf32>
    %c0_3 = arith.constant 0 : index
    %c0_4 = arith.constant 0 : index
    %3 = vector.load %arg4[%c0_3, %c0_4] : memref<64x1xf32, #tpu.memory_space<vmem>>, vector<64x1xf32>
    %4 = vector.broadcast %3 : vector<64x1xf32> to vector<64x98xf32>
    %5 = arith.addf %2, %4 : vector<64x98xf32>
    %cst_5 = arith.constant 0.000000e+00 : f32
    %6 = vector.broadcast %cst_5 : f32 to vector<64x98xf32>
    %7 = arith.maximumf %5, %6 : vector<64x98xf32>
    %8 = arith.truncf %7 : vector<64x98xf32> to vector<64x98xbf16>
    %c0_6 = arith.constant 0 : index
    %c0_7 = arith.constant 0 : index
    %9 = vector.load %arg5[%c0_6, %c0_7] : memref<64x98xbf16, #tpu.memory_space<vmem>>, vector<64x98xbf16>
    tpu.vector_store %arg5[%c0_6, %c0_7], %8 {strides = array<i32>} : memref<64x98xbf16, #tpu.memory_space<vmem>>, vector<64x98xbf16>,
    return
  }
  func.func @transform_0(%arg0: i32, %arg1: i32) -> (i32, i32) {
    %c0_i32 = arith.constant 0 : i32
    %c0_i32_0 = arith.constant 0 : i32
    return %arg0, %c0_i32 : i32, i32
  }
  func.func @transform_1(%arg0: i32, %arg1: i32) -> (i32, i32) {
    %c0_i32 = arith.constant 0 : i32
    %c0_i32_0 = arith.constant 0 : i32
    return %c0_i32, %arg1 : i32, i32
  }
  func.func @transform_2(%arg0: i32, %arg1: i32) -> (i32, i32) {
    %c0_i32 = arith.constant 0 : i32
    %c0_i32_0 = arith.constant 0 : i32
    return %arg0, %c0_i32 : i32, i32
  }
  func.func @transform_3(%arg0: i32, %arg1: i32) -> (i32, i32) {
    %c0_i32 = arith.constant 0 : i32
    return %arg0, %arg1 : i32, i32
  }
}

module attributes {stable_mosaic.version = 11 : i64} {
  func.func @_gemm_bias_act_kernel(%arg0: i32, %arg1: i32, %arg2: memref<128x576xbf16, #tpu.memory_space<vmem>>, %arg3: memref<576x32xbf16, #tpu.memory_space<vmem>>, %arg4: memref<128x1xf32, #tpu.memory_space<vmem>>, %arg5: memref<128x32xbf16, #tpu.memory_space<vmem>>) attributes {dimension_semantics = [#tpu.dimension_semantics<parallel>, #tpu.dimension_semantics<parallel>], iteration_bounds = array<i64: 1, 1>, scalar_prefetch = 0 : i64, scratch_operands = 0 : i64, tpu.core_type = #tpu.core_type<tc>, window_params = [{transform_indices = @transform_0, window_bounds = array<i64: 128, 576>}, {transform_indices = @transform_1, window_bounds = array<i64: 576, 32>}, {transform_indices = @transform_2, window_bounds = array<i64: 128, 1>}, {transform_indices = @transform_3, window_bounds = array<i64: 128, 32>}]} {
    %c0 = arith.constant 0 : index
    %c0_0 = arith.constant 0 : index
    %0 = vector.load %arg2[%c0, %c0_0] : memref<128x576xbf16, #tpu.memory_space<vmem>>, vector<128x576xbf16>
    %c0_1 = arith.constant 0 : index
    %c0_2 = arith.constant 0 : index
    %1 = vector.load %arg3[%c0_1, %c0_2] : memref<576x32xbf16, #tpu.memory_space<vmem>>, vector<576x32xbf16>
    %cst = arith.constant dense<0.000000e+00> : vector<128x32xf32>
    %2 = tpu.matmul %0, %1, %cst {dimension_numbers = #tpu.dot_dimension_numbers<[1], [0], [0], [1], [0, 0, 1, 1], [], []>} : vector<128x576xbf16>, vector<576x32xbf16>, vector<128x32xf32> -> vector<128x32xf32>
    %c0_3 = arith.constant 0 : index
    %c0_4 = arith.constant 0 : index
    %3 = vector.load %arg4[%c0_3, %c0_4] : memref<128x1xf32, #tpu.memory_space<vmem>>, vector<128x1xf32>
    %4 = vector.broadcast %3 : vector<128x1xf32> to vector<128x32xf32>
    %5 = arith.addf %2, %4 : vector<128x32xf32>
    %cst_5 = arith.constant 0.000000e+00 : f32
    %6 = vector.broadcast %cst_5 : f32 to vector<128x32xf32>
    %7 = arith.maximumf %5, %6 : vector<128x32xf32>
    %8 = arith.truncf %7 : vector<128x32xf32> to vector<128x32xbf16>
    %c0_6 = arith.constant 0 : index
    %c0_7 = arith.constant 0 : index
    %9 = vector.load %arg5[%c0_6, %c0_7] : memref<128x32xbf16, #tpu.memory_space<vmem>>, vector<128x32xbf16>
    tpu.vector_store %arg5[%c0_6, %c0_7], %8 {strides = array<i32>} : memref<128x32xbf16, #tpu.memory_space<vmem>>, vector<128x32xbf16>,
    return
  }
  func.func @transform_0(%arg0: i32, %arg1: i32) -> (i32, i32) {
    %c0_i32 = arith.constant 0 : i32
    %c0_i32_0 = arith.constant 0 : i32
    return %arg0, %c0_i32 : i32, i32
  }
  func.func @transform_1(%arg0: i32, %arg1: i32) -> (i32, i32) {
    %c0_i32 = arith.constant 0 : i32
    %c0_i32_0 = arith.constant 0 : i32
    return %c0_i32, %arg1 : i32, i32
  }
  func.func @transform_2(%arg0: i32, %arg1: i32) -> (i32, i32) {
    %c0_i32 = arith.constant 0 : i32
    %c0_i32_0 = arith.constant 0 : i32
    return %arg0, %c0_i32 : i32, i32
  }
  func.func @transform_3(%arg0: i32, %arg1: i32) -> (i32, i32) {
    %c0_i32 = arith.constant 0 : i32
    return %arg0, %arg1 : i32, i32
  }
}

module attributes {stable_mosaic.version = 11 : i64} {
  func.func @_bottleneck_kernel(%arg0: memref<2x2048xbf16, #tpu.memory_space<vmem>>, %arg1: memref<2048x4xbf16, #tpu.memory_space<vmem>>, %arg2: memref<1x4xf32, #tpu.memory_space<vmem>>, %arg3: memref<2x2xf32, #tpu.memory_space<vmem>>, %arg4: memref<2x2048xbf16, #tpu.memory_space<vmem>>, %arg5: memref<1x2048xf32, #tpu.memory_space<vmem>>, %arg6: memref<2x2xf32, #tpu.memory_space<vmem>>, %arg7: memref<2x2xf32, #tpu.memory_space<vmem>>, %arg8: memref<2x2048xbf16, #tpu.memory_space<vmem>>) attributes {dimension_semantics = [], scalar_prefetch = 0 : i64, scratch_operands = 0 : i64, tpu.core_type = #tpu.core_type<tc>} {
    %c0 = arith.constant 0 : index
    %c0_0 = arith.constant 0 : index
    %0 = vector.load %arg0[%c0, %c0_0] : memref<2x2048xbf16, #tpu.memory_space<vmem>>, vector<2x2048xbf16>
    %c0_1 = arith.constant 0 : index
    %c0_2 = arith.constant 0 : index
    %1 = vector.load %arg1[%c0_1, %c0_2] : memref<2048x4xbf16, #tpu.memory_space<vmem>>, vector<2048x4xbf16>
    %cst = arith.constant dense<0.000000e+00> : vector<2x4xf32>
    %2 = tpu.matmul %0, %1, %cst {dimension_numbers = #tpu.dot_dimension_numbers<[1], [0], [0], [1], [0, 0, 1, 1], [], []>} : vector<2x2048xbf16>, vector<2048x4xbf16>, vector<2x4xf32> -> vector<2x4xf32>
    %c0_3 = arith.constant 0 : index
    %c0_4 = arith.constant 0 : index
    %3 = vector.load %arg2[%c0_3, %c0_4] : memref<1x4xf32, #tpu.memory_space<vmem>>, vector<1x4xf32>
    %4 = vector.broadcast %3 : vector<1x4xf32> to vector<2x4xf32>
    %5 = arith.addf %2, %4 : vector<2x4xf32>
    %6 = vector.extract_strided_slice %5 {offsets = [0, 0], sizes = [2, 2], strides = [1, 1]} : vector<2x4xf32> to vector<2x2xf32>
    %7 = vector.extract_strided_slice %5 {offsets = [0, 2], sizes = [2, 2], strides = [1, 1]} : vector<2x4xf32> to vector<2x2xf32>
    %c0_5 = arith.constant 0 : index
    %c0_6 = arith.constant 0 : index
    %8 = vector.load %arg3[%c0_5, %c0_6] : memref<2x2xf32, #tpu.memory_space<vmem>>, vector<2x2xf32>
    %cst_7 = arith.constant 5.000000e-01 : f32
    %9 = vector.broadcast %cst_7 : f32 to vector<2x2xf32>
    %10 = arith.mulf %9, %7 : vector<2x2xf32>
    %11 = math.exp %10 : vector<2x2xf32>
    %12 = arith.mulf %8, %11 : vector<2x2xf32>
    %13 = arith.addf %6, %12 : vector<2x2xf32>
    %14 = arith.truncf %13 : vector<2x2xf32> to vector<2x2xbf16>
    %c0_8 = arith.constant 0 : index
    %c0_9 = arith.constant 0 : index
    %15 = vector.load %arg4[%c0_8, %c0_9] : memref<2x2048xbf16, #tpu.memory_space<vmem>>, vector<2x2048xbf16>
    %cst_10 = arith.constant dense<0.000000e+00> : vector<2x2048xf32>
    %16 = tpu.matmul %14, %15, %cst_10 {dimension_numbers = #tpu.dot_dimension_numbers<[1], [0], [0], [1], [0, 0, 1, 1], [], []>} : vector<2x2xbf16>, vector<2x2048xbf16>, vector<2x2048xf32> -> vector<2x2048xf32>
    %c0_11 = arith.constant 0 : index
    %c0_12 = arith.constant 0 : index
    %17 = vector.load %arg5[%c0_11, %c0_12] : memref<1x2048xf32, #tpu.memory_space<vmem>>, vector<1x2048xf32>
    %18 = vector.broadcast %17 : vector<1x2048xf32> to vector<2x2048xf32>
    %19 = arith.addf %16, %18 : vector<2x2048xf32>
    %c0_13 = arith.constant 0 : index
    %c0_14 = arith.constant 0 : index
    %20 = vector.load %arg6[%c0_13, %c0_14] : memref<2x2xf32, #tpu.memory_space<vmem>>, vector<2x2xf32>
    tpu.vector_store %arg6[%c0_13, %c0_14], %6 {strides = array<i32>} : memref<2x2xf32, #tpu.memory_space<vmem>>, vector<2x2xf32>,
    %c0_15 = arith.constant 0 : index
    %c0_16 = arith.constant 0 : index
    %21 = vector.load %arg7[%c0_15, %c0_16] : memref<2x2xf32, #tpu.memory_space<vmem>>, vector<2x2xf32>
    tpu.vector_store %arg7[%c0_15, %c0_16], %7 {strides = array<i32>} : memref<2x2xf32, #tpu.memory_space<vmem>>, vector<2x2xf32>,
    %22 = arith.truncf %19 : vector<2x2048xf32> to vector<2x2048xbf16>
    %c0_17 = arith.constant 0 : index
    %c0_18 = arith.constant 0 : index
    %23 = vector.load %arg8[%c0_17, %c0_18] : memref<2x2048xbf16, #tpu.memory_space<vmem>>, vector<2x2048xbf16>
    tpu.vector_store %arg8[%c0_17, %c0_18], %22 {strides = array<i32>} : memref<2x2048xbf16, #tpu.memory_space<vmem>>, vector<2x2048xbf16>,
    return
  }
}

module attributes {stable_mosaic.version = 11 : i64} {
  func.func @_gemm_bias_act_kernel(%arg0: i32, %arg1: i32, %arg2: memref<256x512xbf16, #tpu.memory_space<vmem>>, %arg3: memref<512x32xbf16, #tpu.memory_space<vmem>>, %arg4: memref<256x1xf32, #tpu.memory_space<vmem>>, %arg5: memref<256x32xbf16, #tpu.memory_space<vmem>>) attributes {dimension_semantics = [#tpu.dimension_semantics<parallel>, #tpu.dimension_semantics<parallel>], iteration_bounds = array<i64: 2, 1>, scalar_prefetch = 0 : i64, scratch_operands = 0 : i64, tpu.core_type = #tpu.core_type<tc>, window_params = [{transform_indices = @transform_0, window_bounds = array<i64: 256, 512>}, {transform_indices = @transform_1, window_bounds = array<i64: 512, 32>}, {transform_indices = @transform_2, window_bounds = array<i64: 256, 1>}, {transform_indices = @transform_3, window_bounds = array<i64: 256, 32>}]} {
    %c0 = arith.constant 0 : index
    %c0_0 = arith.constant 0 : index
    %0 = vector.load %arg2[%c0, %c0_0] : memref<256x512xbf16, #tpu.memory_space<vmem>>, vector<256x512xbf16>
    %c0_1 = arith.constant 0 : index
    %c0_2 = arith.constant 0 : index
    %1 = vector.load %arg3[%c0_1, %c0_2] : memref<512x32xbf16, #tpu.memory_space<vmem>>, vector<512x32xbf16>
    %cst = arith.constant dense<0.000000e+00> : vector<256x32xf32>
    %2 = tpu.matmul %0, %1, %cst {dimension_numbers = #tpu.dot_dimension_numbers<[1], [0], [0], [1], [0, 0, 1, 1], [], []>} : vector<256x512xbf16>, vector<512x32xbf16>, vector<256x32xf32> -> vector<256x32xf32>
    %c0_3 = arith.constant 0 : index
    %c0_4 = arith.constant 0 : index
    %3 = vector.load %arg4[%c0_3, %c0_4] : memref<256x1xf32, #tpu.memory_space<vmem>>, vector<256x1xf32>
    %4 = vector.broadcast %3 : vector<256x1xf32> to vector<256x32xf32>
    %5 = arith.addf %2, %4 : vector<256x32xf32>
    %cst_5 = arith.constant 0.000000e+00 : f32
    %6 = vector.broadcast %cst_5 : f32 to vector<256x32xf32>
    %7 = arith.maximumf %5, %6 : vector<256x32xf32>
    %8 = arith.truncf %7 : vector<256x32xf32> to vector<256x32xbf16>
    %c0_6 = arith.constant 0 : index
    %c0_7 = arith.constant 0 : index
    %9 = vector.load %arg5[%c0_6, %c0_7] : memref<256x32xbf16, #tpu.memory_space<vmem>>, vector<256x32xbf16>
    tpu.vector_store %arg5[%c0_6, %c0_7], %8 {strides = array<i32>} : memref<256x32xbf16, #tpu.memory_space<vmem>>, vector<256x32xbf16>,
    return
  }
  func.func @transform_0(%arg0: i32, %arg1: i32) -> (i32, i32) {
    %c0_i32 = arith.constant 0 : i32
    %c0_i32_0 = arith.constant 0 : i32
    return %arg0, %c0_i32 : i32, i32
  }
  func.func @transform_1(%arg0: i32, %arg1: i32) -> (i32, i32) {
    %c0_i32 = arith.constant 0 : i32
    %c0_i32_0 = arith.constant 0 : i32
    return %c0_i32, %arg1 : i32, i32
  }
  func.func @transform_2(%arg0: i32, %arg1: i32) -> (i32, i32) {
    %c0_i32 = arith.constant 0 : i32
    %c0_i32_0 = arith.constant 0 : i32
    return %arg0, %c0_i32 : i32, i32
  }
  func.func @transform_3(%arg0: i32, %arg1: i32) -> (i32, i32) {
    %c0_i32 = arith.constant 0 : i32
    return %arg0, %arg1 : i32, i32
  }
}

module attributes {stable_mosaic.version = 11 : i64} {
  func.func @_gemm_bias_act_kernel(%arg0: i32, %arg1: i32, %arg2: memref<128x512xbf16, #tpu.memory_space<vmem>>, %arg3: memref<512x128xbf16, #tpu.memory_space<vmem>>, %arg4: memref<128x1xf32, #tpu.memory_space<vmem>>, %arg5: memref<128x128xbf16, #tpu.memory_space<vmem>>) attributes {dimension_semantics = [#tpu.dimension_semantics<parallel>, #tpu.dimension_semantics<parallel>], iteration_bounds = array<i64: 2, 1>, scalar_prefetch = 0 : i64, scratch_operands = 0 : i64, tpu.core_type = #tpu.core_type<tc>, window_params = [{transform_indices = @transform_0, window_bounds = array<i64: 128, 512>}, {transform_indices = @transform_1, window_bounds = array<i64: 512, 128>}, {transform_indices = @transform_2, window_bounds = array<i64: 128, 1>}, {transform_indices = @transform_3, window_bounds = array<i64: 128, 128>}]} {
    %c0 = arith.constant 0 : index
    %c0_0 = arith.constant 0 : index
    %0 = vector.load %arg2[%c0, %c0_0] : memref<128x512xbf16, #tpu.memory_space<vmem>>, vector<128x512xbf16>
    %c0_1 = arith.constant 0 : index
    %c0_2 = arith.constant 0 : index
    %1 = vector.load %arg3[%c0_1, %c0_2] : memref<512x128xbf16, #tpu.memory_space<vmem>>, vector<512x128xbf16>
    %cst = arith.constant dense<0.000000e+00> : vector<128x128xf32>
    %2 = tpu.matmul %0, %1, %cst {dimension_numbers = #tpu.dot_dimension_numbers<[1], [0], [0], [1], [0, 0, 1, 1], [], []>} : vector<128x512xbf16>, vector<512x128xbf16>, vector<128x128xf32> -> vector<128x128xf32>
    %c0_3 = arith.constant 0 : index
    %c0_4 = arith.constant 0 : index
    %3 = vector.load %arg4[%c0_3, %c0_4] : memref<128x1xf32, #tpu.memory_space<vmem>>, vector<128x1xf32>
    %4 = vector.broadcast %3 : vector<128x1xf32> to vector<128x128xf32>
    %5 = arith.addf %2, %4 : vector<128x128xf32>
    %cst_5 = arith.constant 0.000000e+00 : f32
    %6 = vector.broadcast %cst_5 : f32 to vector<128x128xf32>
    %7 = arith.maximumf %5, %6 : vector<128x128xf32>
    %8 = arith.truncf %7 : vector<128x128xf32> to vector<128x128xbf16>
    %c0_6 = arith.constant 0 : index
    %c0_7 = arith.constant 0 : index
    %9 = vector.load %arg5[%c0_6, %c0_7] : memref<128x128xbf16, #tpu.memory_space<vmem>>, vector<128x128xbf16>
    tpu.vector_store %arg5[%c0_6, %c0_7], %8 {strides = array<i32>} : memref<128x128xbf16, #tpu.memory_space<vmem>>, vector<128x128xbf16>,
    return
  }
  func.func @transform_0(%arg0: i32, %arg1: i32) -> (i32, i32) {
    %c0_i32 = arith.constant 0 : i32
    %c0_i32_0 = arith.constant 0 : i32
    return %arg0, %c0_i32 : i32, i32
  }
  func.func @transform_1(%arg0: i32, %arg1: i32) -> (i32, i32) {
    %c0_i32 = arith.constant 0 : i32
    %c0_i32_0 = arith.constant 0 : i32
    return %c0_i32, %arg1 : i32, i32
  }
  func.func @transform_2(%arg0: i32, %arg1: i32) -> (i32, i32) {
    %c0_i32 = arith.constant 0 : i32
    %c0_i32_0 = arith.constant 0 : i32
    return %arg0, %c0_i32 : i32, i32
  }
  func.func @transform_3(%arg0: i32, %arg1: i32) -> (i32, i32) {
    %c0_i32 = arith.constant 0 : i32
    return %arg0, %arg1 : i32, i32
  }
}

module attributes {stable_mosaic.version = 11 : i64} {
  func.func @_gemm_bias_act_kernel(%arg0: i32, %arg1: i32, %arg2: memref<128x256xbf16, #tpu.memory_space<vmem>>, %arg3: memref<256x512xbf16, #tpu.memory_space<vmem>>, %arg4: memref<128x1xf32, #tpu.memory_space<vmem>>, %arg5: memref<128x512xbf16, #tpu.memory_space<vmem>>) attributes {dimension_semantics = [#tpu.dimension_semantics<parallel>, #tpu.dimension_semantics<parallel>], iteration_bounds = array<i64: 1, 1>, scalar_prefetch = 0 : i64, scratch_operands = 0 : i64, tpu.core_type = #tpu.core_type<tc>, window_params = [{transform_indices = @transform_0, window_bounds = array<i64: 128, 256>}, {transform_indices = @transform_1, window_bounds = array<i64: 256, 512>}, {transform_indices = @transform_2, window_bounds = array<i64: 128, 1>}, {transform_indices = @transform_3, window_bounds = array<i64: 128, 512>}]} {
    %c0 = arith.constant 0 : index
    %c0_0 = arith.constant 0 : index
    %0 = vector.load %arg2[%c0, %c0_0] : memref<128x256xbf16, #tpu.memory_space<vmem>>, vector<128x256xbf16>
    %c0_1 = arith.constant 0 : index
    %c0_2 = arith.constant 0 : index
    %1 = vector.load %arg3[%c0_1, %c0_2] : memref<256x512xbf16, #tpu.memory_space<vmem>>, vector<256x512xbf16>
    %cst = arith.constant dense<0.000000e+00> : vector<128x512xf32>
    %2 = tpu.matmul %0, %1, %cst {dimension_numbers = #tpu.dot_dimension_numbers<[1], [0], [0], [1], [0, 0, 1, 1], [], []>} : vector<128x256xbf16>, vector<256x512xbf16>, vector<128x512xf32> -> vector<128x512xf32>
    %c0_3 = arith.constant 0 : index
    %c0_4 = arith.constant 0 : index
    %3 = vector.load %arg4[%c0_3, %c0_4] : memref<128x1xf32, #tpu.memory_space<vmem>>, vector<128x1xf32>
    %4 = vector.broadcast %3 : vector<128x1xf32> to vector<128x512xf32>
    %5 = arith.addf %2, %4 : vector<128x512xf32>
    %cst_5 = arith.constant 0.000000e+00 : f32
    %6 = vector.broadcast %cst_5 : f32 to vector<128x512xf32>
    %7 = arith.maximumf %5, %6 : vector<128x512xf32>
    %8 = arith.truncf %7 : vector<128x512xf32> to vector<128x512xbf16>
    %c0_6 = arith.constant 0 : index
    %c0_7 = arith.constant 0 : index
    %9 = vector.load %arg5[%c0_6, %c0_7] : memref<128x512xbf16, #tpu.memory_space<vmem>>, vector<128x512xbf16>
    tpu.vector_store %arg5[%c0_6, %c0_7], %8 {strides = array<i32>} : memref<128x512xbf16, #tpu.memory_space<vmem>>, vector<128x512xbf16>,
    return
  }
  func.func @transform_0(%arg0: i32, %arg1: i32) -> (i32, i32) {
    %c0_i32 = arith.constant 0 : i32
    %c0_i32_0 = arith.constant 0 : i32
    return %arg0, %c0_i32 : i32, i32
  }
  func.func @transform_1(%arg0: i32, %arg1: i32) -> (i32, i32) {
    %c0_i32 = arith.constant 0 : i32
    %c0_i32_0 = arith.constant 0 : i32
    return %c0_i32, %arg1 : i32, i32
  }
  func.func @transform_2(%arg0: i32, %arg1: i32) -> (i32, i32) {
    %c0_i32 = arith.constant 0 : i32
    %c0_i32_0 = arith.constant 0 : i32
    return %arg0, %c0_i32 : i32, i32
  }
  func.func @transform_3(%arg0: i32, %arg1: i32) -> (i32, i32) {
    %c0_i32 = arith.constant 0 : i32
    return %arg0, %arg1 : i32, i32
  }
}

module attributes {stable_mosaic.version = 11 : i64} {
  func.func @_gemm_bias_act_kernel(%arg0: i32, %arg1: i32, %arg2: memref<1x288xbf16, #tpu.memory_space<vmem>>, %arg3: memref<288x1024xbf16, #tpu.memory_space<vmem>>, %arg4: memref<1x1xf32, #tpu.memory_space<vmem>>, %arg5: memref<1x1024xf32, #tpu.memory_space<vmem>>) attributes {dimension_semantics = [#tpu.dimension_semantics<parallel>, #tpu.dimension_semantics<parallel>], iteration_bounds = array<i64: 1, 2>, scalar_prefetch = 0 : i64, scratch_operands = 0 : i64, tpu.core_type = #tpu.core_type<tc>, window_params = [{transform_indices = @transform_0, window_bounds = array<i64: 1, 288>}, {transform_indices = @transform_1, window_bounds = array<i64: 288, 1024>}, {transform_indices = @transform_2, window_bounds = array<i64: 1, 1>}, {transform_indices = @transform_3, window_bounds = array<i64: 1, 1024>}]} {
    %c0 = arith.constant 0 : index
    %c0_0 = arith.constant 0 : index
    %0 = vector.load %arg2[%c0, %c0_0] : memref<1x288xbf16, #tpu.memory_space<vmem>>, vector<1x288xbf16>
    %c0_1 = arith.constant 0 : index
    %c0_2 = arith.constant 0 : index
    %1 = vector.load %arg3[%c0_1, %c0_2] : memref<288x1024xbf16, #tpu.memory_space<vmem>>, vector<288x1024xbf16>
    %cst = arith.constant dense<0.000000e+00> : vector<1x1024xf32>
    %2 = tpu.matmul %0, %1, %cst {dimension_numbers = #tpu.dot_dimension_numbers<[1], [0], [0], [1], [0, 0, 1, 1], [], []>} : vector<1x288xbf16>, vector<288x1024xbf16>, vector<1x1024xf32> -> vector<1x1024xf32>
    %c0_3 = arith.constant 0 : index
    %c0_4 = arith.constant 0 : index
    %3 = vector.load %arg4[%c0_3, %c0_4] : memref<1x1xf32, #tpu.memory_space<vmem>>, vector<1x1xf32>
    %4 = vector.broadcast %3 : vector<1x1xf32> to vector<1x1024xf32>
    %5 = arith.addf %2, %4 : vector<1x1024xf32>
    %6 = arith.negf %5 : vector<1x1024xf32>
    %7 = math.exp %6 : vector<1x1024xf32>
    %cst_5 = arith.constant 1.000000e+00 : f32
    %8 = vector.broadcast %cst_5 : f32 to vector<1x1024xf32>
    %9 = arith.addf %8, %7 : vector<1x1024xf32>
    %10 = arith.divf %8, %9 : vector<1x1024xf32>
    %c0_6 = arith.constant 0 : index
    %c0_7 = arith.constant 0 : index
    %11 = vector.load %arg5[%c0_6, %c0_7] : memref<1x1024xf32, #tpu.memory_space<vmem>>, vector<1x1024xf32>
    tpu.vector_store %arg5[%c0_6, %c0_7], %10 {strides = array<i32>} : memref<1x1024xf32, #tpu.memory_space<vmem>>, vector<1x1024xf32>,
    return
  }
  func.func @transform_0(%arg0: i32, %arg1: i32) -> (i32, i32) {
    %c0_i32 = arith.constant 0 : i32
    %c0_i32_0 = arith.constant 0 : i32
    return %arg0, %c0_i32 : i32, i32
  }
  func.func @transform_1(%arg0: i32, %arg1: i32) -> (i32, i32) {
    %c0_i32 = arith.constant 0 : i32
    %c0_i32_0 = arith.constant 0 : i32
    return %c0_i32, %arg1 : i32, i32
  }
  func.func @transform_2(%arg0: i32, %arg1: i32) -> (i32, i32) {
    %c0_i32 = arith.constant 0 : i32
    %c0_i32_0 = arith.constant 0 : i32
    return %arg0, %c0_i32 : i32, i32
  }
  func.func @transform_3(%arg0: i32, %arg1: i32) -> (i32, i32) {
    %c0_i32 = arith.constant 0 : i32
    return %arg0, %arg1 : i32, i32
  }
}

</mosaic_0001>

<bundles_post_ra>
// kernel: vae_forward.8
= control target key start
LH: loop header
LB: loop body
LE: loop exit
PB: predicated region body
PF: predicated region fallthrough
CT: control target
= control target key end

     0   :  { %vm80_vm0 = vcmask 1043456   ;;  %vm81_vm1 = vcmask 1044480   ;;  %v318_v1 = vmov 65535   ;;  %v319_v5 = vmov 0   ;;  %s409_s1 = inlined_call_operand.vmem [shape: bf16[9,392], index: 1, kind: input, shape index: {}]   ;;  %s410_s0 = inlined_call_operand.vmem [shape: bf16[32,9], index: 0, kind: input, shape index: {}]   ;;  %s411_s2 = inlined_call_operand.vmem [shape: f32[32,1], index: 2, kind: input, shape index: {}]   ;;  %s412_s3 = inlined_call_operand.vmem [shape: bf16[32,392], index: 3, kind: output, shape index: {}]  }
   0x1   :  { %v310_v0 = vld [vmem:[%s409_s1 + $0x4] ss:$16 sps:$4 sm:$0x1f]   ;;  %v82_v2 = vsel %vm80_vm0, 4294967295, %v318_v1  ;;  %128 = vmatprep.mubr.bf16.mxu0 %v319_v5  ;;  %181 = vmatprep.mubr.bf16.mxu1 %v319_v5  ;;  %vm73_vm2 = vcmask 72704   ;;  %v24_v15 = vld [vmem:[%s411_s2 + $0x8] sm:$0xff] }
   0x2   :  { %v83_v3 = vsel %vm81_vm1, %v82_v2, 0  ;;  %v312_v4 = vld [vmem:[%s409_s1 + $0xc] ss:$16 sps:$4 sm:$0x1f]   ;;  %308 = vset.pattern.permute.xlu0 %v319_v5  ;;  %309 = vset.pattern.permute.xlu1 %v319_v5  ;;  %v23_v12 = vld [vmem:[%s411_s2] sm:$0xff]  ;;  %v25_v14 = vld [vmem:[%s411_s2 + $0x10] sm:$0xff] }
   0x3   :  { %v88_v6 = vand.u32 %v310_v0, %v83_v3  ;;  %v314_v7 = vld [vmem:[%s409_s1] ss:$16 sps:$4 sm:$0x1f]   ;;  %v315_v8 = vld [vmem:[%s409_s1 + $0x8] ss:$16 sps:$4 sm:$0x1f]   ;;  %v94_v9 = vand.u32 %v312_v4, %v83_v3  ;;  %29 = vperm.xlu0 %308, %v23_v12   ;;  %39 = vperm.xlu1 %309, %v25_v14  }
   0x4   :  { %v85_v10 = vand.u32 %v314_v7, %v83_v3  ;;  %v91_v11 = vand.u32 %v315_v8, %v83_v3  ;;  %v316_v13 = vld [vmem:[%s410_s0] sm:$0xff]   ;;  %v26_v16 = vld [vmem:[%s411_s2 + $0x18] sm:$0xff]  ;;  %v317_v17 = vld [vmem:[%s410_s0 + $0x8] sm:$0xff]   ;;  %vm267_vm3 = vcmask 64516  }
   0x5   :  { %96 = vmatprep.subr.bf16.mxu0 %v88_v6  ;;  %149 = vmatprep.subr.bf16.mxu1 %v94_v9  ;;  %vm373_vm4 = vmor %vm267_vm3, %vm80_vm0 }
   0x6   :  { %97 = vmatpush1.bf16.msra.mxu0 %v85_v10  ;;  %150 = vmatpush1.bf16.msra.mxu1 %v91_v11 }
   0x7   :  { %34 = vperm.xlu0 %308, %v24_v15   ;;  %44 = vperm.xlu1 %309, %v26_v16  }
   0x9   :  { %286 = vmatmul.mubr.msk.bf16.vlgmr.msra.gmra.mrb[0].mxu0 %vm73_vm2, %v316_v13  ;;  %288 = vmatmul.mubr.msk.bf16.vlgmr.msra.gmra.mrb[0].mxu1 %vm73_vm2, %v316_v13 }
   0xa   :  { %138 = vmatprep.mubr.bf16.mxu0 %v319_v5  ;;  %191 = vmatprep.mubr.bf16.mxu1 %v319_v5 }
  0x11   :  { %287 = vmatmul.mubr.msk.bf16.gmra.mrb[4].mxu0 %vm73_vm2, %v317_v17  ;;  %289 = vmatmul.mubr.msk.bf16.gmra.mrb[4].mxu1 %vm73_vm2, %v317_v17 }
  0x82   :  { %v30_v18 = vpop.permute.xlu0 %29  ;;  %v40_v20 = vpop.permute.xlu1 %39 }
  0x86   :  { %v35_v19 = vpop.permute.xlu0 %34  ;;  %v45_v48 = vpop.permute.xlu1 %44 }
  0xdc   :  { %v130_v21 = vpop.f32.mrb[0].mxu0  ;;  %v183_v22 = vpop.f32.mrb[0].mxu1 }
  0xdd   :  { %v131_v23 = vadd.f32 %v130_v21, %v30_v18  ;;  %v184_v24 = vadd.f32 %v183_v22, %v30_v18  ;;  %v132_v25 = vpop.f32.mrb[1].mxu0  ;;  %v185_v26 = vpop.f32.mrb[1].mxu1 }
  0xde   :  { %v133_v27 = vadd.f32 %v132_v25, %v30_v18  ;;  %v186_v28 = vadd.f32 %v185_v26, %v30_v18  ;;  %v134_v29 = vpop.f32.mrb[2].mxu0  ;;  %v187_v30 = vpop.f32.mrb[2].mxu1 }
  0xdf   :  { %v202_v31 = vmax.f32 %v131_v23, 0.0  ;;  %v204_v32 = vmax.f32 %v184_v24, 0.0  ;;  %v135_v33 = vadd.f32 %v134_v29, %v35_v19  ;;  %v188_v34 = vadd.f32 %v187_v30, %v35_v19  ;;  %v136_v35 = vpop.f32.mrb[3].mxu0  ;;  %v189_v36 = vpop.f32.mrb[3].mxu1 }
  0xe0   :  { %v203_v37 = vmax.f32 %v133_v27, 0.0  ;;  %v205_v38 = vmax.f32 %v186_v28, 0.0  ;;  %v137_v39 = vadd.f32 %v136_v35, %v35_v19  ;;  %v190_v40 = vadd.f32 %v189_v36, %v35_v19 }
  0xe1   :  { %v206_v42 = vmax.f32 %v135_v33, 0.0  ;;  %v208_v43 = vmax.f32 %v188_v34, 0.0 }
  0xe2   :  { %v298_v44 = vpack.c.bf16 %v203_v37, %v202_v31  ;;  %v299_v45 = vpack.c.bf16 %v205_v38, %v204_v32  ;;  %v207_v46 = vmax.f32 %v137_v39, 0.0  ;;  %v209_v47 = vmax.f32 %v190_v40, 0.0 }
  0xe4   :  { %266 = vst [vmem:[%s412_s3] sm:$0xff] %v298_v44  ;;  %269 = vst.msk [vmem:[%s412_s3 + $0x8] sm:$0xff] %vm373_vm4, %v299_v45  ;;  %v300_v49 = vpack.c.bf16 %v207_v46, %v206_v42  ;;  %v301_v50 = vpack.c.bf16 %v209_v47, %v208_v43  ;;  %v140_v51 = vpop.f32.mrb[4].mxu0  ;;  %v193_v52 = vpop.f32.mrb[4].mxu1 }
  0xe5   :  { %v141_v53 = vadd.f32 %v140_v51, %v40_v20  ;;  %v194_v54 = vadd.f32 %v193_v52, %v40_v20  ;;  %v142_v55 = vpop.f32.mrb[5].mxu0  ;;  %v195_v56 = vpop.f32.mrb[5].mxu1 }
  0xe6   :  { %270 = vst [vmem:[%s412_s3 + $0x10] sm:$0xff] %v300_v49  ;;  %271 = vst.msk [vmem:[%s412_s3 + $0x18] sm:$0xff] %vm373_vm4, %v301_v50  ;;  %v143_v57 = vadd.f32 %v142_v55, %v40_v20  ;;  %v196_v58 = vadd.f32 %v195_v56, %v40_v20  ;;  %v144_v59 = vpop.f32.mrb[6].mxu0  ;;  %v197_v60 = vpop.f32.mrb[6].mxu1 }
  0xe7   :  { %v210_v61 = vmax.f32 %v141_v53, 0.0  ;;  %v212_v62 = vmax.f32 %v194_v54, 0.0  ;;  %v145_v63 = vadd.f32 %v144_v59, %v45_v48  ;;  %v198_v0 = vadd.f32 %v197_v60, %v45_v48  ;;  %v146_v1 = vpop.f32.mrb[7].mxu0  ;;  %v199_v2 = vpop.f32.mrb[7].mxu1 }
  0xe8   :  { %v211_v3 = vmax.f32 %v143_v57, 0.0  ;;  %v213_v4 = vmax.f32 %v196_v58, 0.0  ;;  %v147_v5 = vadd.f32 %v146_v1, %v45_v48  ;;  %v200_v6 = vadd.f32 %v199_v2, %v45_v48 }
  0xe9   :  { %v214_v7 = vmax.f32 %v145_v63, 0.0  ;;  %v216_v8 = vmax.f32 %v198_v0, 0.0 }
  0xea   :  { %v302_v9 = vpack.c.bf16 %v211_v3, %v210_v61  ;;  %v303_v10 = vpack.c.bf16 %v213_v4, %v212_v62  ;;  %v215_v11 = vmax.f32 %v147_v5, 0.0  ;;  %v217_v12 = vmax.f32 %v200_v6, 0.0 }
  0xec   :  { %272 = vst [vmem:[%s412_s3 + $0x20] sm:$0xff] %v302_v9  ;;  %273 = vst.msk [vmem:[%s412_s3 + $0x28] sm:$0xff] %vm373_vm4, %v303_v10  ;;  %v304_v13 = vpack.c.bf16 %v215_v11, %v214_v7  ;;  %v305_v14 = vpack.c.bf16 %v217_v12, %v216_v8 }
  0xee   :  { %274 = vst [vmem:[%s412_s3 + $0x30] sm:$0xff] %v304_v13  ;;  %275 = vst.msk [vmem:[%s412_s3 + $0x38] sm:$0xff] %vm373_vm4, %v305_v14 }

// kernel: vae_forward.9
= control target key start
LH: loop header
LB: loop body
LE: loop exit
PB: predicated region body
PF: predicated region fallthrough
CT: control target
= control target key end

     0   :  { %v640_v1 = vmov 0   ;;  %vm283_vm0 = vcmask 261120   ;;  %vm466_vm1 = vcmask 797696   ;;  %s811_s1 = inlined_call_operand.vmem [shape: bf16[288,98], index: 1, kind: input, shape index: {}]   ;;  %s812_s0 = inlined_call_operand.vmem [shape: bf16[64,288], index: 0, kind: input, shape index: {}]   ;;  %s813_s2 = inlined_call_operand.vmem [shape: f32[64,1], index: 2, kind: input, shape index: {}]   ;;  %s814_s3 = inlined_call_operand.vmem [shape: bf16[64,98], index: 3, kind: output, shape index: {}]  }
   0x1   :  { %v606_v0 = vld [vmem:[%s811_s1 + $0x40] sm:$0xff]   ;;  %605 = vset.pattern.permute.xlu1 %v640_v1  ;;  %604 = vset.pattern.permute.xlu0 %v640_v1  ;;  %v608_v3 = vld [vmem:[%s811_s1 + $0x48] sm:$0xff]   ;;  %v610_v5 = vld [vmem:[%s811_s1 + $0x50] sm:$0xff]  }
   0x2   :  { %v607_v2 = vld [vmem:[%s811_s1] sm:$0xff]   ;;  %529 = vmatprep.subr.bf16.mxu0 %v606_v0  ;;  %587 = vmatprep.subr.bf16.mxu1 %v606_v0  ;;  %v609_v4 = vld [vmem:[%s811_s1 + $0x8] sm:$0xff]   ;;  %v611_v6 = vld [vmem:[%s811_s1 + $0x10] sm:$0xff]  }
   0x3   :  { %530 = vmatpush3.bf16.msra.mxu0 %v607_v2  ;;  %595 = vmatpush3.bf16.msra.mxu1 %v607_v2  ;;  %v612_v7 = vld [vmem:[%s811_s1 + $0x58] sm:$0xff]   ;;  %v614_v9 = vld [vmem:[%s811_s1 + $0x60] sm:$0xff]   ;;  %v616_v11 = vld [vmem:[%s811_s1 + $0x68] sm:$0xff]  }
   0x4   :  { %531 = vmatprep.subr.bf16.mxu0 %v608_v3  ;;  %588 = vmatprep.subr.bf16.mxu1 %v608_v3  ;;  %v613_v8 = vld [vmem:[%s811_s1 + $0x18] sm:$0xff]   ;;  %v615_v10 = vld [vmem:[%s811_s1 + $0x20] sm:$0xff]   ;;  %v617_v14 = vld [vmem:[%s811_s1 + $0x28] sm:$0xff]  }
   0x5   :  { %v624_v12 = vld [vmem:[%s812_s0 + $0x4] ss:$12 sps:$4 sm:$0xff]   ;;  %v627_v13 = vld [vmem:[%s812_s0 + $0x4c] ss:$12 sps:$4 sm:$0xff]   ;;  %v625_v23 = vld [vmem:[%s812_s0 + $0x48] ss:$12 sps:$4 sm:$0xff]  }
   0x6   :  { %v618_v15 = vld [vmem:[%s811_s1 + $0x70] sm:$0xff]   ;;  %328 = vmatprep.mubr.bf16.mxu0 %v624_v12  ;;  %352 = vmatprep.mubr.bf16.mxu1 %v627_v13  ;;  %v620_v17 = vld [vmem:[%s811_s1 + $0x78] sm:$0xff]   ;;  %v67_v20 = vld [vmem:[%s813_s2] sm:$0xff] }
   0x7   :  { %532 = vmatpush3.bf16.msra.mxu0 %v609_v4  ;;  %596 = vmatpush3.bf16.msra.mxu1 %v609_v4  ;;  %v619_v16 = vld [vmem:[%s811_s1 + $0x30] sm:$0xff]   ;;  %v621_v18 = vld [vmem:[%s811_s1 + $0x38] sm:$0xff]   ;;  %v628_v21 = vld [vmem:[%s811_s1 + $0x80] sm:$0xff]  }
   0x8   :  { %533 = vmatprep.subr.bf16.mxu0 %v610_v5  ;;  %589 = vmatprep.subr.bf16.mxu1 %v610_v5  ;;  %v69_v19 = vld [vmem:[%s813_s2 + $0x10] sm:$0xff]  ;;  %v622_v22 = vld [vmem:[%s812_s0] ss:$12 sps:$4 sm:$0xff]   ;;  %v70_v24 = vld [vmem:[%s813_s2 + $0x18] sm:$0xff] }
   0x9   :  { %87 = vperm.xlu1 %605, %v69_v19   ;;  %77 = vperm.xlu0 %604, %v67_v20   ;;  %v68_v25 = vld [vmem:[%s813_s2 + $0x8] sm:$0xff]  ;;  %v71_v30 = vld [vmem:[%s813_s2 + $0x20] sm:$0xff]  ;;  %v74_v33 = vld [vmem:[%s813_s2 + $0x38] sm:$0xff] }
   0xa   :  { %v630_v26 = vld [vmem:[%s812_s0 + $0x1c] ss:$12 sps:$4 sm:$0xff]   ;;  %v633_v31 = vld [vmem:[%s812_s0 + $0x18] ss:$12 sps:$4 sm:$0xff]   ;;  %v634_v32 = vld [vmem:[%s812_s0 + $0x20] ss:$12 sps:$4 sm:$0xff]  }
   0xb   :  { %534 = vmatpush3.bf16.msra.mxu0 %v611_v6  ;;  %597 = vmatpush3.bf16.msra.mxu1 %v611_v6  ;;  %v629_v27 = vld [vmem:[%s811_s1 + $0x88] sm:$0xff]   ;;  %v73_v34 = vld [vmem:[%s813_s2 + $0x30] sm:$0xff]  ;;  %v637_v36 = vld [vmem:[%s812_s0 + $0x38] ss:$12 sps:$4 sm:$0xff]  }
   0xc   :  { %535 = vmatprep.subr.bf16.mxu0 %v612_v7  ;;  %590 = vmatprep.subr.bf16.mxu1 %v612_v7  ;;  %v632_v28 = vld [vmem:[%s812_s0 + $0x8] ss:$12 sps:$4 sm:$0xff]   ;;  %v638_v37 = vld [vmem:[%s812_s0 + $0x30] ss:$12 sps:$4 sm:$0xff]  }
   0xd   :  { %92 = vperm.xlu1 %605, %v70_v24   ;;  %82 = vperm.xlu0 %604, %v68_v25   ;;  %v72_v29 = vld [vmem:[%s813_s2 + $0x28] sm:$0xff]  ;;  %v635_v35 = vld [vmem:[%s812_s0 + $0x34] ss:$12 sps:$4 sm:$0xff]   ;;  %v639_v38 = vld [vmem:[%s812_s0 + $0x50] ss:$12 sps:$4 sm:$0xff]  }
   0xf   :  { %536 = vmatpush3.bf16.msra.mxu0 %v613_v8  ;;  %598 = vmatpush3.bf16.msra.mxu1 %v613_v8 }
  0x10   :  { %537 = vmatprep.subr.bf16.mxu0 %v614_v9  ;;  %591 = vmatprep.subr.bf16.mxu1 %v614_v9 }
  0x11   :  { %102 = vperm.xlu1 %605, %v72_v29   ;;  %97 = vperm.xlu0 %604, %v71_v30  }
  0x13   :  { %538 = vmatpush3.bf16.msra.mxu0 %v615_v10  ;;  %599 = vmatpush3.bf16.msra.mxu1 %v615_v10 }
  0x14   :  { %539 = vmatprep.subr.bf16.mxu0 %v616_v11  ;;  %592 = vmatprep.subr.bf16.mxu1 %v616_v11 }
  0x15   :  { %112 = vperm.xlu1 %605, %v74_v33   ;;  %107 = vperm.xlu0 %604, %v73_v34  }
  0x17   :  { %540 = vmatpush3.bf16.msra.mxu0 %v617_v14  ;;  %600 = vmatpush3.bf16.msra.mxu1 %v617_v14 }
  0x18   :  { %541 = vmatprep.subr.bf16.mxu0 %v618_v15  ;;  %593 = vmatprep.subr.bf16.mxu1 %v618_v15 }
  0x1b   :  { %542 = vmatpush3.bf16.msra.mxu0 %v619_v16  ;;  %601 = vmatpush3.bf16.msra.mxu1 %v619_v16 }
  0x1c   :  { %543 = vmatprep.subr.bf16.mxu0 %v620_v17  ;;  %594 = vmatprep.subr.bf16.mxu1 %v620_v17 }
  0x1f   :  { %544 = vmatpush3.bf16.msra.mxu0 %v621_v18  ;;  %602 = vmatpush3.bf16.msra.mxu1 %v621_v18 }
  0x20   :  { %575 = vmatprep.subr.bf16.mxu1 %v628_v21 }
  0x22   :  { %329 = vmatmul.mubr.bf16.vlgmr.msra.gmra.mrb[0].mxu0 %v622_v22  ;;  %353 = vmatmul.mubr.bf16.vlgmr.msra.gmra.mrb[0].mxu1 %v625_v23 }
  0x23   :  { %576 = vmatpush3.bf16.msra.mxu1 %v628_v21  ;;  %336 = vmatprep.mubr.bf16.mxu0 %v630_v26 }
  0x24   :  { %577 = vmatprep.subr.bf16.mxu1 %v629_v27  ;;  %579 = vmatprep.mubr.msk.bf16.mxu1 %vm283_vm0, %v632_v28 }
  0x27   :  { %578 = vmatpush3.bf16.msra.mxu1 %v629_v27 }
  0x2a   :  { %337 = vmatmul.mubr.bf16.gmra.mrb[4].mxu0 %v633_v31  ;;  %580 = vmatmul.mubr.msk.bf16.vlgmr.msra.gmra.mrb[4].mxu1 %vm283_vm0, %v634_v32 }
  0x2b   :  { %344 = vmatprep.mubr.bf16.mxu0 %v635_v35  ;;  %583 = vmatprep.mubr.msk.bf16.mxu1 %vm283_vm0, %v637_v36 }
  0x32   :  { %345 = vmatmul.mubr.bf16.gmra.mrb[8].mxu0 %v638_v37  ;;  %584 = vmatmul.mubr.msk.bf16.gmra.mrb[8].mxu1 %vm283_vm0, %v639_v38 }
  0x88   :  { %v88_v39 = vpop.permute.xlu1 %87  ;;  %v78_v40 = vpop.permute.xlu0 %77 }
  0x8c   :  { %v93_v41 = vpop.permute.xlu1 %92  ;;  %v83_v42 = vpop.permute.xlu0 %82 }
  0x90   :  { %v98_v55 = vpop.permute.xlu0 %97  ;;  %v103_v56 = vpop.permute.xlu1 %102 }
  0x94   :  { %v108_v5 = vpop.permute.xlu0 %107  ;;  %v113_v10 = vpop.permute.xlu1 %112 }
  0xf5   :  { %v545_v43 = vpop.f32.mrb[0].mxu0  ;;  %v563_v44 = vpop.f32.mrb[0].mxu1 }
  0xf6   :  { %v546_v45 = vpop.f32.mrb[1].mxu0  ;;  %v564_v46 = vpop.f32.mrb[1].mxu1 }
  0xf7   :  { %v547_v47 = vadd.f32 %v546_v45, %v545_v43  ;;  %v548_v48 = vpop.f32.mrb[2].mxu0  ;;  %v565_v49 = vadd.f32 %v564_v46, %v563_v44  ;;  %v566_v50 = vpop.f32.mrb[2].mxu1 }
  0xf8   :  { %v549_v51 = vpop.f32.mrb[3].mxu0  ;;  %v567_v52 = vpop.f32.mrb[3].mxu1 }
  0xf9   :  { %v550_v53 = vadd.f32 %v549_v51, %v548_v48  ;;  %v568_v54 = vadd.f32 %v567_v52, %v566_v50  ;;  %v331_v59 = vadd.f32 %v547_v47, %v78_v40  ;;  %v355_v15 = vadd.f32 %v565_v49, %v108_v5 }
  0xfb   :  { %v334_v2 = vadd.f32 %v550_v53, %v83_v42  ;;  %v358_v21 = vadd.f32 %v568_v54, %v113_v10 }
  0xfd   :  { %v551_v57 = vpop.f32.mrb[4].mxu0  ;;  %v581_v58 = vpop.f32.mrb[4].mxu1 }
  0xfe   :  { %v552_v60 = vpop.f32.mrb[5].mxu0  ;;  %v395_v61 = vpop.f32.mrb[5].mxu1 }
  0xff   :  { %v553_v62 = vadd.f32 %v552_v60, %v551_v57  ;;  %v396_v63 = vadd.f32 %v395_v61, %v331_v59  ;;  %v554_v0 = vpop.f32.mrb[6].mxu0  ;;  %v582_v1 = vpop.f32.mrb[6].mxu1 }
 0x100   :  { %v555_v3 = vpop.f32.mrb[7].mxu0  ;;  %v398_v4 = vpop.f32.mrb[7].mxu1 }
 0x101   :  { %v339_v6 = vadd.f32 %v553_v62, %v88_v39  ;;  %v426_v7 = vmax.f32 %v396_v63, 0.0  ;;  %v556_v8 = vadd.f32 %v555_v3, %v554_v0  ;;  %v399_v9 = vadd.f32 %v398_v4, %v334_v2 }
 0x103   :  { %v404_v11 = vadd.f32 %v581_v58, %v339_v6  ;;  %v521_v12 = vpack.c.bf16 %v426_v7, %v426_v7  ;;  %v342_v13 = vadd.f32 %v556_v8, %v93_v41  ;;  %v427_v14 = vmax.f32 %v399_v9, 0.0 }
 0x105   :  { %v428_v16 = vmax.f32 %v404_v11, 0.0  ;;  %467 = vst.msk [vmem:[%s814_s3] sm:$0xf] %vm466_vm1, %v521_v12  ;;  %v407_v17 = vadd.f32 %v582_v1, %v342_v13  ;;  %v522_v18 = vpack.c.bf16 %v427_v14, %v427_v14  ;;  %v557_v19 = vpop.f32.mrb[8].mxu0  ;;  %v585_v20 = vpop.f32.mrb[8].mxu1 }
 0x106   :  { %v420_v22 = vadd.f32 %v585_v20, %v355_v15  ;;  %v558_v23 = vpop.f32.mrb[9].mxu0  ;;  %v411_v24 = vpop.f32.mrb[9].mxu1 }
 0x107   :  { %v523_v25 = vpack.c.bf16 %v428_v16, %v428_v16  ;;  %v429_v26 = vmax.f32 %v407_v17, 0.0  ;;  %468 = vst.msk [vmem:[%s814_s3 + $0x4] sm:$0xf] %vm466_vm1, %v522_v18  ;;  %v559_v27 = vadd.f32 %v558_v23, %v557_v19  ;;  %v560_v28 = vpop.f32.mrb[10].mxu0  ;;  %v586_v29 = vpop.f32.mrb[10].mxu1 }
 0x108   :  { %v432_v30 = vmax.f32 %v420_v22, 0.0  ;;  %v423_v31 = vadd.f32 %v586_v29, %v358_v21  ;;  %v561_v32 = vpop.f32.mrb[11].mxu0  ;;  %v414_v33 = vpop.f32.mrb[11].mxu1 }
 0x109   :  { %469 = vst.msk [vmem:[%s814_s3 + $0x8] sm:$0xf] %vm466_vm1, %v523_v25  ;;  %v524_v34 = vpack.c.bf16 %v429_v26, %v429_v26  ;;  %v347_v35 = vadd.f32 %v559_v27, %v98_v55  ;;  %v562_v36 = vadd.f32 %v561_v32, %v560_v28 }
 0x10a   :  { %v527_v37 = vpack.c.bf16 %v432_v30, %v432_v30  ;;  %v433_v38 = vmax.f32 %v423_v31, 0.0 }
 0x10b   :  { %470 = vst.msk [vmem:[%s814_s3 + $0xc] sm:$0xf] %vm466_vm1, %v524_v34  ;;  %v412_v39 = vadd.f32 %v411_v24, %v347_v35  ;;  %v350_v40 = vadd.f32 %v562_v36, %v103_v56 }
 0x10c   :  { %473 = vst.msk [vmem:[%s814_s3 + $0x18] sm:$0xf] %vm466_vm1, %v527_v37  ;;  %v528_v41 = vpack.c.bf16 %v433_v38, %v433_v38 }
 0x10d   :  { %v430_v42 = vmax.f32 %v412_v39, 0.0  ;;  %v415_v43 = vadd.f32 %v414_v33, %v350_v40 }
 0x10e   :  { %474 = vst.msk [vmem:[%s814_s3 + $0x1c] sm:$0xf] %vm466_vm1, %v528_v41 }
 0x10f   :  { %v525_v44 = vpack.c.bf16 %v430_v42, %v430_v42  ;;  %v431_v45 = vmax.f32 %v415_v43, 0.0 }
 0x111   :  { %471 = vst.msk [vmem:[%s814_s3 + $0x10] sm:$0xf] %vm466_vm1, %v525_v44  ;;  %v526_v46 = vpack.c.bf16 %v431_v45, %v431_v45 }
 0x113   :  { %472 = vst.msk [vmem:[%s814_s3 + $0x14] sm:$0xf] %vm466_vm1, %v526_v46 }

// kernel: vae_forward.10
= control target key start
LH: loop header
LB: loop body
LE: loop exit
PB: predicated region body
PF: predicated region fallthrough
CT: control target
= control target key end

     0   :  { %v1447_v1 = vmov 0   ;;  %vm647_vm0 = vcmask 523264   ;;  %vm1043_vm1 = vcmask 257024   ;;  %s1852_s1 = inlined_call_operand.vmem [shape: bf16[576,32], index: 1, kind: input, shape index: {}]   ;;  %s1853_s0 = inlined_call_operand.vmem [shape: bf16[128,576], index: 0, kind: input, shape index: {}]   ;;  %s1854_s2 = inlined_call_operand.vmem [shape: f32[128,1], index: 2, kind: input, shape index: {}]   ;;  %s1855_s3 = inlined_call_operand.vmem [shape: bf16[128,32], index: 3, kind: output, shape index: {}]  }
   0x1   :  { %v1355_v0 = vld [vmem:[%s1852_s1 + $0x40] sm:$0xff]   ;;  %1353 = vset.pattern.permute.xlu0 %v1447_v1  ;;  %1354 = vset.pattern.permute.xlu1 %v1447_v1  ;;  %v1359_v5 = vld [vmem:[%s1852_s1 + $0x48] sm:$0xff]   ;;  %v1363_v9 = vld [vmem:[%s1852_s1 + $0x50] sm:$0xff]  }
   0x2   :  { %v1356_v2 = vld [vmem:[%s1852_s1 + $0xc0] sm:$0xff]   ;;  %1180 = vmatprep.subr.bf16.mxu0 %v1355_v0  ;;  %v1360_v6 = vld [vmem:[%s1852_s1 + $0xc8] sm:$0xff]   ;;  %v1364_v10 = vld [vmem:[%s1852_s1 + $0xd0] sm:$0xff]  }
   0x3   :  { %v1357_v3 = vld [vmem:[%s1852_s1] sm:$0xff]   ;;  %1244 = vmatprep.subr.bf16.mxu1 %v1356_v2  ;;  %v1361_v7 = vld [vmem:[%s1852_s1 + $0x8] sm:$0xff]   ;;  %v1365_v11 = vld [vmem:[%s1852_s1 + $0x10] sm:$0xff]  }
   0x4   :  { %v1358_v4 = vld [vmem:[%s1852_s1 + $0x80] sm:$0xff]   ;;  %1181 = vmatpush3.bf16.msra.mxu0 %v1357_v3  ;;  %v1362_v8 = vld [vmem:[%s1852_s1 + $0x88] sm:$0xff]   ;;  %v1366_v12 = vld [vmem:[%s1852_s1 + $0x90] sm:$0xff]  }
   0x5   :  { %1245 = vmatpush3.bf16.msra.mxu1 %v1358_v4  ;;  %1182 = vmatprep.subr.bf16.mxu0 %v1359_v5  ;;  %v1367_v13 = vld [vmem:[%s1852_s1 + $0x58] sm:$0xff]   ;;  %v1371_v17 = vld [vmem:[%s1852_s1 + $0x60] sm:$0xff]   ;;  %v1375_v21 = vld [vmem:[%s1852_s1 + $0x68] sm:$0xff]  }
   0x6   :  { %1246 = vmatprep.subr.bf16.mxu1 %v1360_v6  ;;  %v1368_v14 = vld [vmem:[%s1852_s1 + $0xd8] sm:$0xff]   ;;  %v1372_v18 = vld [vmem:[%s1852_s1 + $0xe0] sm:$0xff]   ;;  %v1376_v22 = vld [vmem:[%s1852_s1 + $0xe8] sm:$0xff]  }
   0x7   :  { %v1369_v15 = vld [vmem:[%s1852_s1 + $0x18] sm:$0xff]   ;;  %v1373_v19 = vld [vmem:[%s1852_s1 + $0x20] sm:$0xff]   ;;  %v1377_v23 = vld [vmem:[%s1852_s1 + $0x28] sm:$0xff]  }
   0x8   :  { %1183 = vmatpush3.bf16.msra.mxu0 %v1361_v7  ;;  %v1370_v16 = vld [vmem:[%s1852_s1 + $0x98] sm:$0xff]   ;;  %v1374_v20 = vld [vmem:[%s1852_s1 + $0xa0] sm:$0xff]   ;;  %v1378_v24 = vld [vmem:[%s1852_s1 + $0xa8] sm:$0xff]  }
   0x9   :  { %1247 = vmatpush3.bf16.msra.mxu1 %v1362_v8  ;;  %1184 = vmatprep.subr.bf16.mxu0 %v1363_v9  ;;  %v1379_v25 = vld [vmem:[%s1852_s1 + $0x70] sm:$0xff]   ;;  %v1383_v29 = vld [vmem:[%s1852_s1 + $0x78] sm:$0xff]   ;;  %v1392_v36 = vld [vmem:[%s1853_s0 + $0xc] ss:$20 sps:$4 sm:$0xff]  }
   0xa   :  { %1248 = vmatprep.subr.bf16.mxu1 %v1364_v10  ;;  %v1380_v26 = vld [vmem:[%s1852_s1 + $0xf0] sm:$0xff]   ;;  %v1384_v30 = vld [vmem:[%s1852_s1 + $0xf8] sm:$0xff]   ;;  %v1393_v37 = vld [vmem:[%s1852_s1 + $0x100] sm:$0xff]   ;;  %801 = vmatprep.mubr.bf16.mxu1 %v1392_v36 }
   0xb   :  { %v1381_v27 = vld [vmem:[%s1852_s1 + $0x30] sm:$0xff]   ;;  %v1385_v31 = vld [vmem:[%s1852_s1 + $0x38] sm:$0xff]   ;;  %v1394_v38 = vld [vmem:[%s1853_s0 + $0x2c] ss:$20 sps:$4 sm:$0xff]  }
   0xc   :  { %1185 = vmatpush3.bf16.msra.mxu0 %v1365_v11  ;;  %v1382_v28 = vld [vmem:[%s1852_s1 + $0xb0] sm:$0xff]   ;;  %v1386_v32 = vld [vmem:[%s1852_s1 + $0xb8] sm:$0xff]   ;;  %v1406_v43 = vld [vmem:[%s1852_s1 + $0x108] sm:$0xff]  }
   0xd   :  { %1249 = vmatpush3.bf16.msra.mxu1 %v1366_v12  ;;  %1186 = vmatprep.subr.bf16.mxu0 %v1367_v13  ;;  %v1387_v33 = vld [vmem:[%s1853_s0] ss:$20 sps:$4 sm:$0xff]   ;;  %v1389_v34 = vld [vmem:[%s1853_s0 + $0x4] ss:$20 sps:$4 sm:$0xff]   ;;  %v1390_v35 = vld [vmem:[%s1853_s0 + $0x8] ss:$20 sps:$4 sm:$0xff]  }
   0xe   :  { %1250 = vmatprep.subr.bf16.mxu1 %v1368_v14  ;;  %704 = vmatprep.mubr.bf16.mxu0 %v1389_v34  ;;  %v1396_v39 = vld [vmem:[%s1853_s0 + $0x34] ss:$20 sps:$4 sm:$0xff]   ;;  %v1399_v41 = vld [vmem:[%s1853_s0 + $0x30] ss:$20 sps:$4 sm:$0xff]   ;;  %v1405_v46 = vld [vmem:[%s1853_s0 + $0x58] ss:$20 sps:$4 sm:$0xff]  }
   0xf   :  { %v1398_v40 = vld [vmem:[%s1853_s0 + $0x28] ss:$20 sps:$4 sm:$0xff]   ;;  %v1404_v45 = vld [vmem:[%s1853_s0 + $0x50] ss:$20 sps:$4 sm:$0xff]   ;;  %v1411_v51 = vld [vmem:[%s1853_s0 + $0x78] ss:$20 sps:$4 sm:$0xff]  }
  0x10   :  { %1187 = vmatpush3.bf16.msra.mxu0 %v1369_v15  ;;  %v1400_v42 = vld [vmem:[%s1853_s0 + $0x54] ss:$20 sps:$4 sm:$0xff]   ;;  %v1402_v44 = vld [vmem:[%s1853_s0 + $0x5c] ss:$20 sps:$4 sm:$0xff]   ;;  %v1409_v49 = vld [vmem:[%s1853_s0 + $0x84] ss:$20 sps:$4 sm:$0xff]  }
  0x11   :  { %1251 = vmatpush3.bf16.msra.mxu1 %v1370_v16  ;;  %1188 = vmatprep.subr.bf16.mxu0 %v1371_v17  ;;  %v1419_v47 = vld [vmem:[%s1852_s1 + $0x110] sm:$0xff]   ;;  %v1432_v50 = vld [vmem:[%s1852_s1 + $0x118] sm:$0xff]   ;;  %v1415_v54 = vld [vmem:[%s1853_s0 + $0xac] ss:$20 sps:$4 sm:$0xff]  }
  0x12   :  { %1252 = vmatprep.subr.bf16.mxu1 %v1372_v18  ;;  %v1407_v48 = vld [vmem:[%s1853_s0 + $0x7c] ss:$20 sps:$4 sm:$0xff]   ;;  %v1412_v52 = vld [vmem:[%s1853_s0 + $0x80] ss:$20 sps:$4 sm:$0xff]   ;;  %v1413_v53 = vld [vmem:[%s1853_s0 + $0xa4] ss:$20 sps:$4 sm:$0xff]  }
  0x13   :  { %v1417_v55 = vld [vmem:[%s1853_s0 + $0xa0] ss:$20 sps:$4 sm:$0xff]   ;;  %v1418_v56 = vld [vmem:[%s1853_s0 + $0xa8] ss:$20 sps:$4 sm:$0xff]   ;;  %v1425_v2 = vld [vmem:[%s1853_s0 + $0xd0] ss:$20 sps:$4 sm:$0xff]  }
  0x14   :  { %1189 = vmatpush3.bf16.msra.mxu0 %v1373_v19  ;;  %v1420_v57 = vld [vmem:[%s1853_s0 + $0xcc] ss:$20 sps:$4 sm:$0xff]   ;;  %v1422_v59 = vld [vmem:[%s1853_s0 + $0xd4] ss:$20 sps:$4 sm:$0xff]   ;;  %v138_v62 = vld [vmem:[%s1854_s2 + $0x18] sm:$0xff] }
  0x15   :  { %1253 = vmatpush3.bf16.msra.mxu1 %v1374_v20  ;;  %1190 = vmatprep.subr.bf16.mxu0 %v1375_v21  ;;  %v135_v58 = vld [vmem:[%s1854_s2] sm:$0xff]  ;;  %v137_v60 = vld [vmem:[%s1854_s2 + $0x10] sm:$0xff]  ;;  %v136_v61 = vld [vmem:[%s1854_s2 + $0x8] sm:$0xff] }
  0x16   :  { %1254 = vmatprep.subr.bf16.mxu1 %v1376_v22  ;;  %153 = vperm.xlu0 %1353, %v135_v58   ;;  %v139_v63 = vld [vmem:[%s1854_s2 + $0x20] sm:$0xff]  ;;  %v1424_v0 = vld [vmem:[%s1853_s0 + $0xc8] ss:$20 sps:$4 sm:$0xff]   ;;  %v141_v5 = vld [vmem:[%s1854_s2 + $0x30] sm:$0xff] }
  0x17   :  { %163 = vperm.xlu1 %1354, %v137_v60   ;;  %v140_v1 = vld [vmem:[%s1854_s2 + $0x28] sm:$0xff]  ;;  %v1428_v4 = vld [vmem:[%s1853_s0 + $0xfc] ss:$20 sps:$4 sm:$0xff]   ;;  %v143_v7 = vld [vmem:[%s1854_s2 + $0x40] sm:$0xff] }
  0x18   :  { %1191 = vmatpush3.bf16.msra.mxu0 %v1377_v23  ;;  %v1426_v3 = vld [vmem:[%s1853_s0 + $0xf4] ss:$20 sps:$4 sm:$0xff]   ;;  %v142_v6 = vld [vmem:[%s1854_s2 + $0x38] sm:$0xff]  ;;  %v1430_v8 = vld [vmem:[%s1853_s0 + $0xf0] ss:$20 sps:$4 sm:$0xff]  }
  0x19   :  { %1255 = vmatpush3.bf16.msra.mxu1 %v1378_v24  ;;  %1192 = vmatprep.subr.bf16.mxu0 %v1379_v25  ;;  %v144_v9 = vld [vmem:[%s1854_s2 + $0x48] sm:$0xff]  ;;  %v1433_v11 = vld [vmem:[%s1853_s0 + $0x11c] ss:$20 sps:$4 sm:$0xff]   ;;  %v1435_v12 = vld [vmem:[%s1853_s0 + $0x124] ss:$20 sps:$4 sm:$0xff]  }
  0x1a   :  { %1256 = vmatprep.subr.bf16.mxu1 %v1380_v26  ;;  %158 = vperm.xlu0 %1353, %v136_v61   ;;  %v1431_v10 = vld [vmem:[%s1853_s0 + $0xf8] ss:$20 sps:$4 sm:$0xff]   ;;  %v145_v13 = vld [vmem:[%s1854_s2 + $0x50] sm:$0xff]  ;;  %v147_v15 = vld [vmem:[%s1854_s2 + $0x60] sm:$0xff] }
  0x1b   :  { %168 = vperm.xlu1 %1354, %v138_v62   ;;  %v146_v14 = vld [vmem:[%s1854_s2 + $0x58] sm:$0xff]  ;;  %v148_v17 = vld [vmem:[%s1854_s2 + $0x68] sm:$0xff]  ;;  %v1438_v18 = vld [vmem:[%s1853_s0 + $0x120] ss:$20 sps:$4 sm:$0xff]  }
  0x1c   :  { %1193 = vmatpush3.bf16.msra.mxu0 %v1381_v27  ;;  %v1437_v16 = vld [vmem:[%s1853_s0 + $0x118] ss:$20 sps:$4 sm:$0xff]   ;;  %v1439_v19 = vld [vmem:[%s1853_s0 + $0x10] ss:$20 sps:$4 sm:$0xff]   ;;  %v1443_v25 = vld [vmem:[%s1853_s0 + $0x60] ss:$20 sps:$4 sm:$0xff]  }
  0x1d   :  { %1257 = vmatpush3.bf16.msra.mxu1 %v1382_v28  ;;  %1194 = vmatprep.subr.bf16.mxu0 %v1383_v29  ;;  %v1440_v20 = vld [vmem:[%s1853_s0 + $0xb0] ss:$20 sps:$4 sm:$0xff]   ;;  %v150_v22 = vld [vmem:[%s1854_s2 + $0x78] sm:$0xff]  ;;  %v1444_v26 = vld [vmem:[%s1853_s0 + $0x100] ss:$20 sps:$4 sm:$0xff]  }
  0x1e   :  { %1258 = vmatprep.subr.bf16.mxu1 %v1384_v30  ;;  %173 = vperm.xlu0 %1353, %v139_v63   ;;  %v149_v21 = vld [vmem:[%s1854_s2 + $0x70] sm:$0xff]  ;;  %v1441_v23 = vld [vmem:[%s1853_s0 + $0x38] ss:$20 sps:$4 sm:$0xff]   ;;  %v1445_v27 = vld [vmem:[%s1853_s0 + $0x88] ss:$20 sps:$4 sm:$0xff]  }
  0x1f   :  { %178 = vperm.xlu1 %1354, %v140_v1   ;;  %v1442_v24 = vld [vmem:[%s1853_s0 + $0xd8] ss:$20 sps:$4 sm:$0xff]   ;;  %v1446_v28 = vld [vmem:[%s1853_s0 + $0x128] ss:$20 sps:$4 sm:$0xff]  }
  0x20   :  { %1195 = vmatpush3.bf16.msra.mxu0 %v1385_v31 }
  0x21   :  { %1259 = vmatpush3.bf16.msra.mxu1 %v1386_v32  ;;  %1320 = vmatprep.subr.bf16.mxu0 %v1393_v37 }
  0x22   :  { %1344 = vmatprep.subr.bf16.mxu1 %v1393_v37  ;;  %183 = vperm.xlu0 %1353, %v141_v5  }
  0x23   :  { %705 = vmatmul.mubr.bf16.vlgmr.msra.gmra.mrb[0].mxu0 %v1387_v33  ;;  %188 = vperm.xlu1 %1354, %v142_v6  }
  0x24   :  { %802 = vmatmul.mubr.bf16.vlgmr.msra.gmra.mrb[0].mxu1 %v1390_v35  ;;  %1321 = vmatpush3.bf16.msra.mxu0 %v1393_v37 }
  0x25   :  { %1348 = vmatpush3.bf16.msra.mxu1 %v1393_v37  ;;  %712 = vmatprep.mubr.bf16.mxu0 %v1394_v38 }
  0x26   :  { %809 = vmatprep.mubr.bf16.mxu1 %v1396_v39  ;;  %1322 = vmatprep.subr.bf16.mxu0 %v1406_v43 }
  0x27   :  { %1345 = vmatprep.subr.bf16.mxu1 %v1406_v43  ;;  %193 = vperm.xlu0 %1353, %v143_v7  }
  0x28   :  { %1323 = vmatpush3.bf16.msra.mxu0 %v1406_v43  ;;  %198 = vperm.xlu1 %1354, %v144_v9  }
  0x29   :  { %1349 = vmatpush3.bf16.msra.mxu1 %v1406_v43  ;;  %1324 = vmatprep.subr.bf16.mxu0 %v1419_v47 }
  0x2a   :  { %1346 = vmatprep.subr.bf16.mxu1 %v1419_v47 }
  0x2b   :  { %713 = vmatmul.mubr.bf16.gmra.mrb[4].mxu0 %v1398_v40  ;;  %203 = vperm.xlu0 %1353, %v145_v13  }
  0x2c   :  { %810 = vmatmul.mubr.bf16.gmra.mrb[4].mxu1 %v1399_v41  ;;  %720 = vmatprep.mubr.bf16.mxu0 %v1400_v42 }
  0x2d   :  { %817 = vmatprep.mubr.bf16.mxu1 %v1402_v44  ;;  %1325 = vmatpush3.bf16.msra.mxu0 %v1419_v47 }
  0x2e   :  { %1350 = vmatpush3.bf16.msra.mxu1 %v1419_v47  ;;  %1326 = vmatprep.subr.bf16.mxu0 %v1432_v50 }
  0x2f   :  { %1347 = vmatprep.subr.bf16.mxu1 %v1432_v50  ;;  %208 = vperm.xlu1 %1354, %v146_v14  }
  0x30   :  { %213 = vperm.xlu0 %1353, %v147_v15  }
  0x31   :  { %1327 = vmatpush3.bf16.msra.mxu0 %v1432_v50 }
  0x32   :  { %1351 = vmatpush3.bf16.msra.mxu1 %v1432_v50 }
  0x33   :  { %721 = vmatmul.mubr.bf16.gmra.mrb[8].mxu0 %v1404_v45  ;;  %218 = vperm.xlu1 %1354, %v148_v17  }
  0x34   :  { %818 = vmatmul.mubr.bf16.gmra.mrb[8].mxu1 %v1405_v46  ;;  %728 = vmatprep.mubr.bf16.mxu0 %v1407_v48 }
  0x35   :  { %825 = vmatprep.mubr.bf16.mxu1 %v1409_v49  ;;  %223 = vperm.xlu0 %1353, %v149_v21  }
  0x37   :  { %228 = vperm.xlu1 %1354, %v150_v22  }
  0x3b   :  { %729 = vmatmul.mubr.bf16.gmra.mrb[12].mxu0 %v1411_v51 }
  0x3c   :  { %826 = vmatmul.mubr.bf16.gmra.mrb[12].mxu1 %v1412_v52  ;;  %736 = vmatprep.mubr.bf16.mxu0 %v1413_v53 }
  0x3d   :  { %833 = vmatprep.mubr.bf16.mxu1 %v1415_v54 }
  0x43   :  { %737 = vmatmul.mubr.bf16.gmra.mrb[16].mxu0 %v1417_v55 }
  0x44   :  { %834 = vmatmul.mubr.bf16.gmra.mrb[16].mxu1 %v1418_v56  ;;  %744 = vmatprep.mubr.bf16.mxu0 %v1420_v57 }
  0x45   :  { %841 = vmatprep.mubr.bf16.mxu1 %v1422_v59 }
  0x4b   :  { %745 = vmatmul.mubr.bf16.gmra.mrb[20].mxu0 %v1424_v0 }
  0x4c   :  { %842 = vmatmul.mubr.bf16.gmra.mrb[20].mxu1 %v1425_v2  ;;  %752 = vmatprep.mubr.bf16.mxu0 %v1426_v3 }
  0x4d   :  { %849 = vmatprep.mubr.bf16.mxu1 %v1428_v4 }
  0x53   :  { %753 = vmatmul.mubr.bf16.gmra.mrb[24].mxu0 %v1430_v8 }
  0x54   :  { %850 = vmatmul.mubr.bf16.gmra.mrb[24].mxu1 %v1431_v10  ;;  %760 = vmatprep.mubr.bf16.mxu0 %v1433_v11 }
  0x55   :  { %857 = vmatprep.mubr.bf16.mxu1 %v1435_v12 }
  0x5b   :  { %761 = vmatmul.mubr.bf16.gmra.mrb[28].mxu0 %v1437_v16 }
  0x5c   :  { %858 = vmatmul.mubr.bf16.gmra.mrb[28].mxu1 %v1438_v18  ;;  %1328 = vmatprep.mubr.msk.bf16.mxu0 %vm647_vm0, %v1439_v19 }
  0x5d   :  { %1336 = vmatprep.mubr.msk.bf16.mxu1 %vm647_vm0, %v1440_v20 }
  0x63   :  { %1329 = vmatmul.mubr.msk.bf16.vlgmr.msra.gmra.mrb[32].mxu0 %vm647_vm0, %v1441_v23 }
  0x64   :  { %1337 = vmatmul.mubr.msk.bf16.vlgmr.msra.gmra.mrb[32].mxu1 %vm647_vm0, %v1442_v24  ;;  %1332 = vmatprep.mubr.msk.bf16.mxu0 %vm647_vm0, %v1443_v25 }
  0x65   :  { %1340 = vmatprep.mubr.msk.bf16.mxu1 %vm647_vm0, %v1444_v26 }
  0x6b   :  { %1333 = vmatmul.mubr.msk.bf16.gmra.mrb[36].mxu0 %vm647_vm0, %v1445_v27 }
  0x6c   :  { %1341 = vmatmul.mubr.msk.bf16.gmra.mrb[36].mxu1 %vm647_vm0, %v1446_v28 }
  0x95   :  { %v154_v29 = vpop.permute.xlu0 %153 }
  0x96   :  { %v164_v30 = vpop.permute.xlu1 %163 }
  0x99   :  { %v159_v32 = vpop.permute.xlu0 %158 }
  0x9a   :  { %v169_v48 = vpop.permute.xlu1 %168 }
  0x9d   :  { %v174_v0 = vpop.permute.xlu0 %173 }
  0x9e   :  { %v179_v2 = vpop.permute.xlu1 %178 }
  0xa1   :  { %v184_v19 = vpop.permute.xlu0 %183 }
  0xf6   :  { %v1196_v31 = vpop.f32.mrb[0].mxu0 }
  0xf7   :  { %v1260_v33 = vpop.f32.mrb[0].mxu1  ;;  %v1197_v34 = vpop.f32.mrb[1].mxu0 }
  0xf8   :  { %v1198_v35 = vadd.f32 %v1197_v34, %v1196_v31  ;;  %v1261_v36 = vpop.f32.mrb[1].mxu1  ;;  %v1199_v37 = vpop.f32.mrb[2].mxu0 }
  0xf9   :  { %v1262_v38 = vadd.f32 %v1261_v36, %v1260_v33  ;;  %v1263_v39 = vpop.f32.mrb[2].mxu1  ;;  %v1200_v40 = vpop.f32.mrb[3].mxu0 }
  0xfa   :  { %v707_v41 = vadd.f32 %v1198_v35, %v154_v29  ;;  %v1201_v42 = vadd.f32 %v1200_v40, %v1199_v37  ;;  %v1264_v43 = vpop.f32.mrb[3].mxu1  ;;  %v189_v33 = vpop.permute.xlu1 %188 }
  0xfb   :  { %v1265_v44 = vadd.f32 %v1264_v43, %v1263_v39  ;;  %v194_v36 = vpop.permute.xlu0 %193 }
  0xfc   :  { %v710_v45 = vadd.f32 %v1201_v42, %v159_v32  ;;  %v1752_v46 = vadd.f32 %v1262_v38, %v707_v41 }
  0xfe   :  { %v1202_v47 = vpop.f32.mrb[4].mxu0  ;;  %v1754_v49 = vadd.f32 %v1265_v44, %v710_v45 }
  0xff   :  { %v1266_v50 = vpop.f32.mrb[4].mxu1  ;;  %v1203_v51 = vpop.f32.mrb[5].mxu0 }
 0x100   :  { %v1204_v52 = vadd.f32 %v1203_v51, %v1202_v47  ;;  %v1267_v53 = vpop.f32.mrb[5].mxu1  ;;  %v1205_v54 = vpop.f32.mrb[6].mxu0 }
 0x101   :  { %v1268_v55 = vadd.f32 %v1267_v53, %v1266_v50  ;;  %v1269_v56 = vpop.f32.mrb[6].mxu1  ;;  %v1206_v57 = vpop.f32.mrb[7].mxu0 }
 0x102   :  { %v715_v58 = vadd.f32 %v1204_v52, %v164_v30  ;;  %v1207_v59 = vadd.f32 %v1206_v57, %v1205_v54  ;;  %v1270_v60 = vpop.f32.mrb[7].mxu1  ;;  %v199_v52 = vpop.permute.xlu1 %198 }
 0x103   :  { %v1271_v61 = vadd.f32 %v1270_v60, %v1269_v56  ;;  %v204_v56 = vpop.permute.xlu0 %203 }
 0x104   :  { %v718_v62 = vadd.f32 %v1207_v59, %v169_v48  ;;  %v1756_v63 = vadd.f32 %v1268_v55, %v715_v58 }
 0x106   :  { %v1208_v1 = vpop.f32.mrb[8].mxu0  ;;  %v1758_v3 = vadd.f32 %v1271_v61, %v718_v62 }
 0x107   :  { %v1272_v4 = vpop.f32.mrb[8].mxu1  ;;  %v1209_v5 = vpop.f32.mrb[9].mxu0 }
 0x108   :  { %v1210_v6 = vadd.f32 %v1209_v5, %v1208_v1  ;;  %v1273_v7 = vpop.f32.mrb[9].mxu1  ;;  %v1211_v8 = vpop.f32.mrb[10].mxu0 }
 0x109   :  { %v1274_v9 = vadd.f32 %v1273_v7, %v1272_v4  ;;  %v1275_v10 = vpop.f32.mrb[10].mxu1  ;;  %v1212_v11 = vpop.f32.mrb[11].mxu0 }
 0x10a   :  { %v723_v12 = vadd.f32 %v1210_v6, %v174_v0  ;;  %v1213_v13 = vadd.f32 %v1212_v11, %v1211_v8  ;;  %v1276_v14 = vpop.f32.mrb[11].mxu1  ;;  %v209_v8 = vpop.permute.xlu1 %208 }
 0x10b   :  { %v1277_v15 = vadd.f32 %v1276_v14, %v1275_v10 }
 0x10c   :  { %v726_v16 = vadd.f32 %v1213_v13, %v179_v2  ;;  %v1760_v17 = vadd.f32 %v1274_v9, %v723_v12  ;;  %v214_v12 = vpop.permute.xlu0 %213 }
 0x10e   :  { %v1214_v18 = vpop.f32.mrb[12].mxu0  ;;  %v1762_v20 = vadd.f32 %v1277_v15, %v726_v16 }
 0x10f   :  { %v1278_v21 = vpop.f32.mrb[12].mxu1  ;;  %v1215_v22 = vpop.f32.mrb[13].mxu0 }
 0x110   :  { %v1216_v23 = vadd.f32 %v1215_v22, %v1214_v18  ;;  %v1279_v24 = vpop.f32.mrb[13].mxu1  ;;  %v1217_v25 = vpop.f32.mrb[14].mxu0 }
 0x111   :  { %v1280_v26 = vadd.f32 %v1279_v24, %v1278_v21  ;;  %v1281_v27 = vpop.f32.mrb[14].mxu1  ;;  %v1218_v28 = vpop.f32.mrb[15].mxu0 }
 0x112   :  { %v731_v29 = vadd.f32 %v1216_v23, %v184_v19  ;;  %v1219_v30 = vadd.f32 %v1218_v28, %v1217_v25  ;;  %v1282_v31 = vpop.f32.mrb[15].mxu1  ;;  %v219_v28 = vpop.permute.xlu1 %218 }
 0x113   :  { %v1283_v32 = vadd.f32 %v1282_v31, %v1281_v27 }
 0x114   :  { %v734_v34 = vadd.f32 %v1219_v30, %v189_v33  ;;  %v1764_v35 = vadd.f32 %v1280_v26, %v731_v29 }
 0x116   :  { %v1220_v37 = vpop.f32.mrb[16].mxu0  ;;  %v1766_v38 = vadd.f32 %v1283_v32, %v734_v34  ;;  %v224_v32 = vpop.permute.xlu0 %223 }
 0x117   :  { %v1284_v39 = vpop.f32.mrb[16].mxu1  ;;  %v1221_v40 = vpop.f32.mrb[17].mxu0 }
 0x118   :  { %v1222_v41 = vadd.f32 %v1221_v40, %v1220_v37  ;;  %v1285_v42 = vpop.f32.mrb[17].mxu1  ;;  %v1223_v43 = vpop.f32.mrb[18].mxu0 }
 0x119   :  { %v1286_v44 = vadd.f32 %v1285_v42, %v1284_v39  ;;  %v1287_v45 = vpop.f32.mrb[18].mxu1  ;;  %v1224_v47 = vpop.f32.mrb[19].mxu0 }
 0x11a   :  { %v739_v48 = vadd.f32 %v1222_v41, %v194_v36  ;;  %v1225_v50 = vadd.f32 %v1224_v47, %v1223_v43  ;;  %v1288_v51 = vpop.f32.mrb[19].mxu1 }
 0x11b   :  { %v1289_v53 = vadd.f32 %v1288_v51, %v1287_v45 }
 0x11c   :  { %v742_v54 = vadd.f32 %v1225_v50, %v199_v52  ;;  %v1768_v55 = vadd.f32 %v1286_v44, %v739_v48  ;;  %v229_v50 = vpop.permute.xlu1 %228 }
 0x11e   :  { %v1226_v57 = vpop.f32.mrb[20].mxu0  ;;  %v1770_v58 = vadd.f32 %v1289_v53, %v742_v54 }
 0x11f   :  { %v1290_v59 = vpop.f32.mrb[20].mxu1  ;;  %v1227_v60 = vpop.f32.mrb[21].mxu0 }
 0x120   :  { %v1228_v61 = vadd.f32 %v1227_v60, %v1226_v57  ;;  %v1291_v62 = vpop.f32.mrb[21].mxu1  ;;  %v1229_v0 = vpop.f32.mrb[22].mxu0 }
 0x121   :  { %v1292_v1 = vadd.f32 %v1291_v62, %v1290_v59  ;;  %v1293_v2 = vpop.f32.mrb[22].mxu1  ;;  %v1230_v4 = vpop.f32.mrb[23].mxu0 }
 0x122   :  { %v747_v5 = vadd.f32 %v1228_v61, %v204_v56  ;;  %v1231_v6 = vadd.f32 %v1230_v4, %v1229_v0  ;;  %v1294_v7 = vpop.f32.mrb[23].mxu1 }
 0x123   :  { %v1295_v9 = vadd.f32 %v1294_v7, %v1293_v2 }
 0x124   :  { %v750_v10 = vadd.f32 %v1231_v6, %v209_v8  ;;  %v844_v11 = vadd.f32 %v1292_v1, %v747_v5 }
 0x126   :  { %v1232_v13 = vpop.f32.mrb[24].mxu0  ;;  %v847_v14 = vadd.f32 %v1295_v9, %v750_v10 }
 0x127   :  { %v1296_v15 = vpop.f32.mrb[24].mxu1  ;;  %v1233_v16 = vpop.f32.mrb[25].mxu0 }
 0x128   :  { %v1234_v18 = vadd.f32 %v1233_v16, %v1232_v13  ;;  %v1297_v19 = vpop.f32.mrb[25].mxu1  ;;  %v1235_v21 = vpop.f32.mrb[26].mxu0 }
 0x129   :  { %v1298_v22 = vadd.f32 %v1297_v19, %v1296_v15  ;;  %v1299_v23 = vpop.f32.mrb[26].mxu1  ;;  %v1236_v24 = vpop.f32.mrb[27].mxu0 }
 0x12a   :  { %v755_v25 = vadd.f32 %v1234_v18, %v214_v12  ;;  %v1237_v26 = vadd.f32 %v1236_v24, %v1235_v21  ;;  %v1300_v27 = vpop.f32.mrb[27].mxu1 }
 0x12b   :  { %v1301_v29 = vadd.f32 %v1300_v27, %v1299_v23 }
 0x12c   :  { %v758_v30 = vadd.f32 %v1237_v26, %v219_v28  ;;  %v1772_v31 = vadd.f32 %v1298_v22, %v755_v25 }
 0x12e   :  { %v1238_v33 = vpop.f32.mrb[28].mxu0  ;;  %v1774_v34 = vadd.f32 %v1301_v29, %v758_v30 }
 0x12f   :  { %v1302_v36 = vpop.f32.mrb[28].mxu1  ;;  %v1239_v37 = vpop.f32.mrb[29].mxu0 }
 0x130   :  { %v1240_v39 = vadd.f32 %v1239_v37, %v1238_v33  ;;  %v1303_v40 = vpop.f32.mrb[29].mxu1  ;;  %v1241_v41 = vpop.f32.mrb[30].mxu0 }
 0x131   :  { %v1304_v42 = vadd.f32 %v1303_v40, %v1302_v36  ;;  %v1305_v43 = vpop.f32.mrb[30].mxu1  ;;  %v1242_v44 = vpop.f32.mrb[31].mxu0 }
 0x132   :  { %v763_v45 = vadd.f32 %v1240_v39, %v224_v32  ;;  %v1243_v47 = vadd.f32 %v1242_v44, %v1241_v41  ;;  %v1306_v48 = vpop.f32.mrb[31].mxu1 }
 0x133   :  { %v1307_v51 = vadd.f32 %v1306_v48, %v1305_v43 }
 0x134   :  { %v766_v52 = vadd.f32 %v1243_v47, %v229_v50  ;;  %v860_v53 = vadd.f32 %v1304_v42, %v763_v45 }
 0x136   :  { %v1330_v54 = vpop.f32.mrb[32].mxu0  ;;  %v863_v56 = vadd.f32 %v1307_v51, %v766_v52 }
 0x137   :  { %v909_v57 = vadd.f32 %v1330_v54, %v1756_v63  ;;  %v1338_v59 = vpop.f32.mrb[32].mxu1  ;;  %v900_v60 = vpop.f32.mrb[33].mxu0 }
 0x138   :  { %v941_v61 = vadd.f32 %v1338_v59, %v844_v11  ;;  %v901_v62 = vadd.f32 %v900_v60, %v1752_v46  ;;  %v932_v0 = vpop.f32.mrb[33].mxu1  ;;  %v1331_v1 = vpop.f32.mrb[34].mxu0 }
 0x139   :  { %v965_v2 = vmax.f32 %v909_v57, 0.0  ;;  %v933_v4 = vadd.f32 %v932_v0, %v1768_v55  ;;  %v912_v5 = vadd.f32 %v1331_v1, %v1758_v3  ;;  %v1339_v6 = vpop.f32.mrb[34].mxu1  ;;  %v903_v7 = vpop.f32.mrb[35].mxu0 }
 0x13a   :  { %v973_v8 = vmax.f32 %v941_v61, 0.0  ;;  %v963_v9 = vmax.f32 %v901_v62, 0.0  ;;  %v944_v10 = vadd.f32 %v1339_v6, %v847_v14  ;;  %v904_v63 = vadd.f32 %v903_v7, %v1754_v49  ;;  %v935_v12 = vpop.f32.mrb[35].mxu1 }
 0x13b   :  { %v1166_v13 = vpack.c.bf16 %v965_v2, %v965_v2  ;;  %v971_v11 = vmax.f32 %v933_v4, 0.0  ;;  %v966_v15 = vmax.f32 %v912_v5, 0.0  ;;  %v936_v46 = vadd.f32 %v935_v12, %v1770_v58 }
 0x13c   :  { %v1174_v16 = vpack.c.bf16 %v973_v8, %v973_v8  ;;  %v1164_v18 = vpack.c.bf16 %v963_v9, %v963_v9  ;;  %v974_v19 = vmax.f32 %v944_v10, 0.0  ;;  %v964_v21 = vmax.f32 %v904_v63, 0.0 }
 0x13d   :  { %1046 = vst.msk [vmem:[%s1855_s3 + $0x8] sm:$0xf] %vm1043_vm1, %v1166_v13  ;;  %v1172_v3 = vpack.c.bf16 %v971_v11, %v971_v11  ;;  %v1167_v55 = vpack.c.bf16 %v966_v15, %v966_v15  ;;  %v972_v14 = vmax.f32 %v936_v46, 0.0 }
 0x13e   :  { %1054 = vst.msk [vmem:[%s1855_s3 + $0x28] sm:$0xf] %vm1043_vm1, %v1174_v16  ;;  %1044 = vst.msk [vmem:[%s1855_s3] sm:$0xf] %vm1043_vm1, %v1164_v18  ;;  %v1175_v49 = vpack.c.bf16 %v974_v19, %v974_v19  ;;  %v1165_v58 = vpack.c.bf16 %v964_v21, %v964_v21  ;;  %v1334_v22 = vpop.f32.mrb[36].mxu0 }
 0x13f   :  { %1052 = vst.msk [vmem:[%s1855_s3 + $0x20] sm:$0xf] %vm1043_vm1, %v1172_v3  ;;  %1047 = vst.msk [vmem:[%s1855_s3 + $0xc] sm:$0xf] %vm1043_vm1, %v1167_v55  ;;  %v1173_v23 = vpack.c.bf16 %v972_v14, %v972_v14  ;;  %v925_v24 = vadd.f32 %v1334_v22, %v1764_v35  ;;  %v1342_v25 = vpop.f32.mrb[36].mxu1  ;;  %v916_v26 = vpop.f32.mrb[37].mxu0 }
 0x140   :  { %1055 = vst.msk [vmem:[%s1855_s3 + $0x2c] sm:$0xf] %vm1043_vm1, %v1175_v49  ;;  %1045 = vst.msk [vmem:[%s1855_s3 + $0x4] sm:$0xf] %vm1043_vm1, %v1165_v58  ;;  %v957_v27 = vadd.f32 %v1342_v25, %v860_v53  ;;  %v917_v28 = vadd.f32 %v916_v26, %v1760_v17  ;;  %v948_v29 = vpop.f32.mrb[37].mxu1  ;;  %v1335_v30 = vpop.f32.mrb[38].mxu0 }
 0x141   :  { %1053 = vst.msk [vmem:[%s1855_s3 + $0x24] sm:$0xf] %vm1043_vm1, %v1173_v23  ;;  %v969_v35 = vmax.f32 %v925_v24, 0.0  ;;  %v949_v32 = vadd.f32 %v948_v29, %v1772_v31  ;;  %v928_v33 = vadd.f32 %v1335_v30, %v1766_v38  ;;  %v1343_v36 = vpop.f32.mrb[38].mxu1  ;;  %v919_v37 = vpop.f32.mrb[39].mxu0 }
 0x142   :  { %v977_v39 = vmax.f32 %v957_v27, 0.0  ;;  %v967_v40 = vmax.f32 %v917_v28, 0.0  ;;  %v960_v41 = vadd.f32 %v1343_v36, %v863_v56  ;;  %v920_v42 = vadd.f32 %v919_v37, %v1762_v20  ;;  %v951_v17 = vpop.f32.mrb[39].mxu1 }
 0x143   :  { %v1170_v43 = vpack.c.bf16 %v969_v35, %v969_v35  ;;  %v975_v44 = vmax.f32 %v949_v32, 0.0  ;;  %v970_v45 = vmax.f32 %v928_v33, 0.0  ;;  %v952_v47 = vadd.f32 %v951_v17, %v1774_v34 }
 0x144   :  { %v1178_v48 = vpack.c.bf16 %v977_v39, %v977_v39  ;;  %v1168_v50 = vpack.c.bf16 %v967_v40, %v967_v40  ;;  %v978_v51 = vmax.f32 %v960_v41, 0.0  ;;  %v968_v52 = vmax.f32 %v920_v42, 0.0 }
 0x145   :  { %1050 = vst.msk [vmem:[%s1855_s3 + $0x18] sm:$0xf] %vm1043_vm1, %v1170_v43  ;;  %v1176_v38 = vpack.c.bf16 %v975_v44, %v975_v44  ;;  %v1171_v31 = vpack.c.bf16 %v970_v45, %v970_v45  ;;  %v976_v53 = vmax.f32 %v952_v47, 0.0 }
 0x146   :  { %1058 = vst.msk [vmem:[%s1855_s3 + $0x38] sm:$0xf] %vm1043_vm1, %v1178_v48  ;;  %1048 = vst.msk [vmem:[%s1855_s3 + $0x10] sm:$0xf] %vm1043_vm1, %v1168_v50  ;;  %v1179_v20 = vpack.c.bf16 %v978_v51, %v978_v51  ;;  %v1169_v34 = vpack.c.bf16 %v968_v52, %v968_v52 }
 0x147   :  { %1056 = vst.msk [vmem:[%s1855_s3 + $0x30] sm:$0xf] %vm1043_vm1, %v1176_v38  ;;  %1051 = vst.msk [vmem:[%s1855_s3 + $0x1c] sm:$0xf] %vm1043_vm1, %v1171_v31  ;;  %v1177_v54 = vpack.c.bf16 %v976_v53, %v976_v53 }
 0x148   :  { %1059 = vst.msk [vmem:[%s1855_s3 + $0x3c] sm:$0xf] %vm1043_vm1, %v1179_v20  ;;  %1049 = vst.msk [vmem:[%s1855_s3 + $0x14] sm:$0xf] %vm1043_vm1, %v1169_v34 }
 0x149   :  { %1057 = vst.msk [vmem:[%s1855_s3 + $0x34] sm:$0xf] %vm1043_vm1, %v1177_v54 }

// kernel: vae_forward.11
= control target key start
LH: loop header
LB: loop body
LE: loop exit
PB: predicated region body
PF: predicated region fallthrough
CT: control target
= control target key end

     0   :  { %14 = vsyncpa [#allocation3], 0  ;;  %v300_v28 = vlaneseq  ;;  %v2764_v36 = vmov 1966171168   ;;  %s3342_s0 = inlined_call_operand.vmem [shape: bf16[2,2048], index: 0, kind: input, shape index: {}]   ;;  %s3343_s1 = inlined_call_operand.vmem [shape: bf16[2048,4], index: 1, kind: input, shape index: {}]   ;;  %s3344_s2 = inlined_call_operand.vmem [shape: f32[1,4], index: 2, kind: input, shape index: {}]   ;;  %s3345_s3 = inlined_call_operand.vmem [shape: f32[2,2], index: 3, kind: input, shape index: {}]   ;;  %s3346_s4 = inlined_call_operand.vmem [shape: bf16[2,2048], index: 4, kind: input, shape index: {}]   ;;  %s3347_s5 = inlined_call_operand.vmem [shape: f32[1,2048], index: 5, kind: input, shape index: {}]   ;;  %s3348_s6 = inlined_call_operand.hbm [shape: f32[2,2], index: 6, kind: output, shape index: {0}]   ;;  %s3349_s7 = inlined_call_operand.hbm [shape: f32[2,2], index: 7, kind: output, shape index: {1}]   ;;  %s3350_s8 = inlined_call_operand.vmem [shape: bf16[2,2048], index: 8, kind: output, shape index: {2}]  }
   0x1   :  { %v2583_v0 = vld [vmem:[%s3343_s1 + $0x40] sm:$0xff]   ;;  %v2587_v4 = vld [vmem:[%s3343_s1 + $0x48] sm:$0xff]   ;;  %v2591_v8 = vld [vmem:[%s3343_s1 + $0x50] sm:$0xff]   ;;  %v298_v37 = vunpack.c.l.s4 %v2764_v36 }
   0x2   :  { %v2584_v1 = vld [vmem:[%s3343_s1 + $0xc0] sm:$0xff]   ;;  %2402 = vmatprep.subr.bf16.mxu0 %v2583_v0  ;;  %v2588_v5 = vld [vmem:[%s3343_s1 + $0xc8] sm:$0xff]   ;;  %v2592_v9 = vld [vmem:[%s3343_s1 + $0xd0] sm:$0xff]   ;;  %v2910_v33 = vshrl.u32 %v300_v28, 7 }
   0x3   :  { %v2585_v2 = vld [vmem:[%s3343_s1] sm:$0xff]   ;;  %2424 = vmatprep.subr.bf16.mxu1 %v2584_v1  ;;  %v2589_v6 = vld [vmem:[%s3343_s1 + $0x8] sm:$0xff]   ;;  %v2593_v10 = vld [vmem:[%s3343_s1 + $0x10] sm:$0xff]   ;;  %v299_v40 = vunpack.c.0.s8 %v298_v37 }
   0x4   :  { %v2586_v3 = vld [vmem:[%s3343_s1 + $0x80] sm:$0xff]   ;;  %2403 = vmatpush3.bf16.msra.mxu0 %v2585_v2  ;;  %v2590_v7 = vld [vmem:[%s3343_s1 + $0x88] sm:$0xff]   ;;  %v2594_v11 = vld [vmem:[%s3343_s1 + $0x90] sm:$0xff]  }
   0x5   :  { %2425 = vmatpush3.bf16.msra.mxu1 %v2586_v3  ;;  %2404 = vmatprep.subr.bf16.mxu0 %v2587_v4  ;;  %v2595_v12 = vld [vmem:[%s3343_s1 + $0x58] sm:$0xff]   ;;  %v2599_v16 = vld [vmem:[%s3343_s1 + $0x60] sm:$0xff]   ;;  %v2603_v20 = vld [vmem:[%s3343_s1 + $0x68] sm:$0xff]   ;;  %v2922_v41 = vsub.s32 %v299_v40, %v2910_v33 }
   0x6   :  { %2426 = vmatprep.subr.bf16.mxu1 %v2588_v5  ;;  %v2596_v13 = vld [vmem:[%s3343_s1 + $0xd8] sm:$0xff]   ;;  %v2600_v17 = vld [vmem:[%s3343_s1 + $0xe0] sm:$0xff]   ;;  %v2604_v21 = vld [vmem:[%s3343_s1 + $0xe8] sm:$0xff]  }
   0x7   :  { %v2597_v14 = vld [vmem:[%s3343_s1 + $0x18] sm:$0xff]   ;;  %v2601_v18 = vld [vmem:[%s3343_s1 + $0x20] sm:$0xff]   ;;  %v2605_v22 = vld [vmem:[%s3343_s1 + $0x28] sm:$0xff]  }
   0x8   :  { %2405 = vmatpush3.bf16.msra.mxu0 %v2589_v6  ;;  %v2598_v15 = vld [vmem:[%s3343_s1 + $0x98] sm:$0xff]   ;;  %v2602_v19 = vld [vmem:[%s3343_s1 + $0xa0] sm:$0xff]   ;;  %v2606_v23 = vld [vmem:[%s3343_s1 + $0xa8] sm:$0xff]  }
   0x9   :  { %2427 = vmatpush3.bf16.msra.mxu1 %v2590_v7  ;;  %2406 = vmatprep.subr.bf16.mxu0 %v2591_v8  ;;  %v2607_v24 = vld [vmem:[%s3343_s1 + $0x70] sm:$0xff]   ;;  %v2611_v29 = vld [vmem:[%s3343_s1 + $0x78] sm:$0xff]   ;;  %v29_v34 = vld [vmem:[%s3342_s0] sm:$0xff] }
   0xa   :  { %2428 = vmatprep.subr.bf16.mxu1 %v2592_v9  ;;  %v2608_v25 = vld [vmem:[%s3343_s1 + $0xf0] sm:$0xff]   ;;  %v2612_v30 = vld [vmem:[%s3343_s1 + $0xf8] sm:$0xff]   ;;  %v2616_v35 = vld [vmem:[%s3343_s1 + $0x140] sm:$0xff]   ;;  %v296_v39 = vcombine.high %v29_v34, %v29_v34  ;;  %v303_v42 = vrot.slane %v29_v34, %v2922_v41 }
   0xb   :  { %v2609_v26 = vld [vmem:[%s3343_s1 + $0x30] sm:$0xff]   ;;  %v2613_v31 = vld [vmem:[%s3343_s1 + $0x38] sm:$0xff]   ;;  %v2617_v38 = vld [vmem:[%s3343_s1 + $0x1c0] sm:$0xff]  }
   0xc   :  { %2407 = vmatpush3.bf16.msra.mxu0 %v2593_v10  ;;  %v2610_v27 = vld [vmem:[%s3343_s1 + $0xb0] sm:$0xff]   ;;  %v2614_v32 = vld [vmem:[%s3343_s1 + $0xb8] sm:$0xff]   ;;  %v2926_v43 = vrot.slane %v296_v39, %v2922_v41  ;;  %v311_v44 = vcombine.high %v303_v42, %v303_v42  ;;  %v319_v45 = vrot.slane %v303_v42, %v2922_v41  ;;  %v2618_v48 = vld [vmem:[%s3343_s1 + $0x100] sm:$0xff]  }
   0xd   :  { %2429 = vmatpush3.bf16.msra.mxu1 %v2594_v11  ;;  %2408 = vmatprep.subr.bf16.mxu0 %v2595_v12  ;;  %v2620_v51 = vld [vmem:[%s3343_s1 + $0x148] sm:$0xff]   ;;  %v2619_v53 = vld [vmem:[%s3343_s1 + $0x180] sm:$0xff]   ;;  %v2624_v57 = vld [vmem:[%s3343_s1 + $0x150] sm:$0xff]  }
   0xe   :  { %2430 = vmatprep.subr.bf16.mxu1 %v2596_v13  ;;  %v312_v46 = vcombine.high %v2926_v43, %v2926_v43  ;;  %v333_v47 = vrot.slane %v311_v44, %v2922_v41  ;;  %v341_v50 = vcombine.high %v319_v45, %v319_v45  ;;  %v2621_v54 = vld [vmem:[%s3343_s1 + $0x1c8] sm:$0xff]   ;;  %v2625_v59 = vld [vmem:[%s3343_s1 + $0x1d0] sm:$0xff]   ;;  %v2628_v61 = vld [vmem:[%s3343_s1 + $0x158] sm:$0xff]  }
   0xf   :  { %v2622_v56 = vld [vmem:[%s3343_s1 + $0x108] sm:$0xff]   ;;  %v2626_v60 = vld [vmem:[%s3343_s1 + $0x110] sm:$0xff]   ;;  %v2629_v63 = vld [vmem:[%s3343_s1 + $0x1d8] sm:$0xff]  }
  0x10   :  { %2409 = vmatpush3.bf16.msra.mxu0 %v2597_v14  ;;  %v340_v49 = vrot.slane %v312_v46, %v2922_v41  ;;  %1210 = vmatprep.mubr.bf16.mxu0 %v333_v47  ;;  %v343_v52 = vcombine.high %v333_v47, %v333_v47  ;;  %v2623_v58 = vld [vmem:[%s3343_s1 + $0x188] sm:$0xff]   ;;  %v2627_v62 = vld [vmem:[%s3343_s1 + $0x190] sm:$0xff]   ;;  %v2630_v0 = vld [vmem:[%s3343_s1 + $0x118] sm:$0xff]  }
  0x11   :  { %2431 = vmatpush3.bf16.msra.mxu1 %v2598_v15  ;;  %2410 = vmatprep.subr.bf16.mxu0 %v2599_v16  ;;  %v2632_v1 = vld [vmem:[%s3343_s1 + $0x160] sm:$0xff]   ;;  %v2631_v2 = vld [vmem:[%s3343_s1 + $0x198] sm:$0xff]   ;;  %v2636_v5 = vld [vmem:[%s3343_s1 + $0x168] sm:$0xff]  }
  0x12   :  { %2432 = vmatprep.subr.bf16.mxu1 %v2600_v17  ;;  %v344_v55 = vcombine.high %v340_v49, %v340_v49  ;;  %1250 = vmatprep.mubr.bf16.mxu1 %v343_v52  ;;  %v2633_v3 = vld [vmem:[%s3343_s1 + $0x1e0] sm:$0xff]   ;;  %v2637_v7 = vld [vmem:[%s3343_s1 + $0x1e8] sm:$0xff]   ;;  %v2640_v9 = vld [vmem:[%s3343_s1 + $0x170] sm:$0xff]   ;;  %v326_v17 = vrot.slane %v2926_v43, %v2922_v41 }
  0x13   :  { %v2634_v4 = vld [vmem:[%s3343_s1 + $0x120] sm:$0xff]   ;;  %v2638_v8 = vld [vmem:[%s3343_s1 + $0x128] sm:$0xff]   ;;  %v2641_v11 = vld [vmem:[%s3343_s1 + $0x1f0] sm:$0xff]  }
  0x14   :  { %2411 = vmatpush3.bf16.msra.mxu0 %v2601_v18  ;;  %v2635_v6 = vld [vmem:[%s3343_s1 + $0x1a0] sm:$0xff]   ;;  %v2639_v10 = vld [vmem:[%s3343_s1 + $0x1a8] sm:$0xff]   ;;  %v2642_v12 = vld [vmem:[%s3343_s1 + $0x130] sm:$0xff]  }
  0x15   :  { %2433 = vmatpush3.bf16.msra.mxu1 %v2602_v19  ;;  %2412 = vmatprep.subr.bf16.mxu0 %v2603_v20  ;;  %v2644_v13 = vld [vmem:[%s3343_s1 + $0x178] sm:$0xff]   ;;  %v2643_v14 = vld [vmem:[%s3343_s1 + $0x1b0] sm:$0xff]   ;;  %v2648_v18 = vld [vmem:[%s3343_s1 + $0x240] sm:$0xff]  }
  0x16   :  { %2434 = vmatprep.subr.bf16.mxu1 %v2604_v21  ;;  %v2645_v15 = vld [vmem:[%s3343_s1 + $0x1f8] sm:$0xff]   ;;  %v2649_v20 = vld [vmem:[%s3343_s1 + $0x2c0] sm:$0xff]   ;;  %v2655_v28 = vld [vmem:[%s3343_s1 + $0x288] sm:$0xff]  }
  0x17   :  { %v2646_v16 = vld [vmem:[%s3343_s1 + $0x138] sm:$0xff]   ;;  %v2650_v21 = vld [vmem:[%s3343_s1 + $0x200] sm:$0xff]   ;;  %v2668_v40 = vld [vmem:[%s3343_s1 + $0x268] sm:$0xff]  }
  0x18   :  { %2413 = vmatpush3.bf16.msra.mxu0 %v2605_v22  ;;  %v2647_v19 = vld [vmem:[%s3343_s1 + $0x1b8] sm:$0xff]   ;;  %v342_v22 = vcombine.high %v326_v17, %v326_v17  ;;  %v2664_v36 = vld [vmem:[%s3343_s1 + $0x260] sm:$0xff]   ;;  %v2669_v43 = vld [vmem:[%s3343_s1 + $0x2e8] sm:$0xff]  }
  0x19   :  { %2435 = vmatpush3.bf16.msra.mxu1 %v2606_v23  ;;  %2414 = vmatprep.subr.bf16.mxu0 %v2607_v24  ;;  %v2652_v23 = vld [vmem:[%s3343_s1 + $0x248] sm:$0xff]   ;;  %v2651_v24 = vld [vmem:[%s3343_s1 + $0x280] sm:$0xff]   ;;  %v2661_v34 = vld [vmem:[%s3343_s1 + $0x2d8] sm:$0xff]  }
  0x1a   :  { %2436 = vmatprep.subr.bf16.mxu1 %v2608_v25  ;;  %v2653_v25 = vld [vmem:[%s3343_s1 + $0x2c8] sm:$0xff]   ;;  %v2663_v37 = vld [vmem:[%s3343_s1 + $0x298] sm:$0xff]   ;;  %v2666_v39 = vld [vmem:[%s3343_s1 + $0x220] sm:$0xff]  }
  0x1b   :  { %v2667_v42 = vld [vmem:[%s3343_s1 + $0x2a0] sm:$0xff]   ;;  %v2670_v44 = vld [vmem:[%s3343_s1 + $0x228] sm:$0xff]  }
  0x1c   :  { %2415 = vmatpush3.bf16.msra.mxu0 %v2609_v26  ;;  %v2654_v26 = vld [vmem:[%s3343_s1 + $0x208] sm:$0xff]  }
  0x1d   :  { %2437 = vmatpush3.bf16.msra.mxu1 %v2610_v27  ;;  %2416 = vmatprep.subr.bf16.mxu0 %v2611_v29  ;;  %v2656_v27 = vld [vmem:[%s3343_s1 + $0x250] sm:$0xff]   ;;  %v30_v46 = vld [vmem:[%s3342_s0 + $0x8] sm:$0xff] }
  0x1e   :  { %2438 = vmatprep.subr.bf16.mxu1 %v2612_v30  ;;  %v2657_v29 = vld [vmem:[%s3343_s1 + $0x2d0] sm:$0xff]   ;;  %v2671_v47 = vld [vmem:[%s3343_s1 + $0x2a8] sm:$0xff]  }
  0x1f   :  { %v2658_v30 = vld [vmem:[%s3343_s1 + $0x210] sm:$0xff]  }
  0x20   :  { %2417 = vmatpush3.bf16.msra.mxu0 %v2613_v31  ;;  %v2660_v31 = vld [vmem:[%s3343_s1 + $0x258] sm:$0xff]  }
  0x21   :  { %2439 = vmatpush3.bf16.msra.mxu1 %v2614_v32  ;;  %2446 = vmatprep.subr.bf16.mxu0 %v2616_v35  ;;  %v2659_v32 = vld [vmem:[%s3343_s1 + $0x290] sm:$0xff]   ;;  %v2662_v35 = vld [vmem:[%s3343_s1 + $0x218] sm:$0xff]  }
  0x22   :  { %2468 = vmatprep.subr.bf16.mxu1 %v2617_v38  ;;  %v2665_v38 = vld [vmem:[%s3343_s1 + $0x2e0] sm:$0xff]  }
  0x23   :  { %1211 = vmatmul.mubr.bf16.vlgmr.msra.gmra.mrb[0].mxu0 %v319_v45  ;;  %v2672_v45 = vld [vmem:[%s3343_s1 + $0x270] sm:$0xff]  }
  0x24   :  { %2447 = vmatpush3.bf16.msra.mxu0 %v2618_v48  ;;  %1251 = vmatmul.mubr.bf16.vlgmr.msra.gmra.mrb[0].mxu1 %v341_v50  ;;  %v352_v48 = vrot.slane %v30_v46, %v2922_v41  ;;  %v2673_v50 = vld [vmem:[%s3343_s1 + $0x2f0] sm:$0xff]  }
  0x25   :  { %2448 = vmatprep.subr.bf16.mxu0 %v2620_v51  ;;  %2469 = vmatpush3.bf16.msra.mxu1 %v2619_v53  ;;  %v2674_v51 = vld [vmem:[%s3343_s1 + $0x230] sm:$0xff]  }
  0x26   :  { %1290 = vmatprep.mubr.bf16.mxu0 %v340_v49  ;;  %2470 = vmatprep.subr.bf16.mxu1 %v2621_v54  ;;  %v345_v49 = vcombine.high %v30_v46, %v30_v46  ;;  %v360_v52 = vcombine.high %v352_v48, %v352_v48  ;;  %v2676_v54 = vld [vmem:[%s3343_s1 + $0x278] sm:$0xff]  }
  0x27   :  { %1330 = vmatprep.mubr.bf16.mxu1 %v344_v55  ;;  %v2675_v55 = vld [vmem:[%s3343_s1 + $0x2b0] sm:$0xff]  }
  0x28   :  { %2449 = vmatpush3.bf16.msra.mxu0 %v2622_v56  ;;  %v3111_v53 = vrot.slane %v345_v49, %v2922_v41  ;;  %v382_v56 = vrot.slane %v360_v52, %v2922_v41 }
  0x29   :  { %2450 = vmatprep.subr.bf16.mxu0 %v2624_v57  ;;  %2471 = vmatpush3.bf16.msra.mxu1 %v2623_v58  ;;  %v2677_v58 = vld [vmem:[%s3343_s1 + $0x2f8] sm:$0xff]  }
  0x2a   :  { %2472 = vmatprep.subr.bf16.mxu1 %v2625_v59  ;;  %v361_v57 = vcombine.high %v3111_v53, %v3111_v53  ;;  %v2678_v59 = vld [vmem:[%s3343_s1 + $0x238] sm:$0xff]  }
  0x2c   :  { %2451 = vmatpush3.bf16.msra.mxu0 %v2626_v60  ;;  %v392_v60 = vcombine.high %v382_v56, %v382_v56 }
  0x2d   :  { %2452 = vmatprep.subr.bf16.mxu0 %v2628_v61  ;;  %2473 = vmatpush3.bf16.msra.mxu1 %v2627_v62  ;;  %v368_v61 = vrot.slane %v352_v48, %v2922_v41  ;;  %v2680_v62 = vld [vmem:[%s3343_s1 + $0x340] sm:$0xff]  }
  0x2e   :  { %2474 = vmatprep.subr.bf16.mxu1 %v2629_v63  ;;  %v2679_v63 = vld [vmem:[%s3343_s1 + $0x2b8] sm:$0xff]  }
  0x30   :  { %2453 = vmatpush3.bf16.msra.mxu0 %v2630_v0  ;;  %v389_v0 = vrot.slane %v361_v57, %v2922_v41 }
  0x31   :  { %2454 = vmatprep.subr.bf16.mxu0 %v2632_v1  ;;  %2475 = vmatpush3.bf16.msra.mxu1 %v2631_v2  ;;  %v2681_v1 = vld [vmem:[%s3343_s1 + $0x3c0] sm:$0xff]  }
  0x32   :  { %2476 = vmatprep.subr.bf16.mxu1 %v2633_v3  ;;  %v2682_v2 = vld [vmem:[%s3343_s1 + $0x300] sm:$0xff]   ;;  %v390_v3 = vcombine.high %v368_v61, %v368_v61 }
  0x34   :  { %2455 = vmatpush3.bf16.msra.mxu0 %v2634_v4  ;;  %v2684_v4 = vld [vmem:[%s3343_s1 + $0x348] sm:$0xff]  }
  0x35   :  { %2456 = vmatprep.subr.bf16.mxu0 %v2636_v5  ;;  %2477 = vmatpush3.bf16.msra.mxu1 %v2635_v6  ;;  %v2683_v5 = vld [vmem:[%s3343_s1 + $0x380] sm:$0xff]   ;;  %v393_v6 = vcombine.high %v389_v0, %v389_v0 }
  0x36   :  { %2478 = vmatprep.subr.bf16.mxu1 %v2637_v7  ;;  %v2685_v7 = vld [vmem:[%s3343_s1 + $0x3c8] sm:$0xff]  }
  0x38   :  { %2457 = vmatpush3.bf16.msra.mxu0 %v2638_v8  ;;  %v2686_v8 = vld [vmem:[%s3343_s1 + $0x308] sm:$0xff]  }
  0x39   :  { %2458 = vmatprep.subr.bf16.mxu0 %v2640_v9  ;;  %2479 = vmatpush3.bf16.msra.mxu1 %v2639_v10  ;;  %v2688_v9 = vld [vmem:[%s3343_s1 + $0x350] sm:$0xff]   ;;  %v2687_v10 = vld [vmem:[%s3343_s1 + $0x388] sm:$0xff]  }
  0x3a   :  { %2480 = vmatprep.subr.bf16.mxu1 %v2641_v11  ;;  %v2689_v11 = vld [vmem:[%s3343_s1 + $0x3d0] sm:$0xff]  }
  0x3c   :  { %2459 = vmatpush3.bf16.msra.mxu0 %v2642_v12  ;;  %v2690_v12 = vld [vmem:[%s3343_s1 + $0x310] sm:$0xff]  }
  0x3d   :  { %2460 = vmatprep.subr.bf16.mxu0 %v2644_v13  ;;  %2481 = vmatpush3.bf16.msra.mxu1 %v2643_v14  ;;  %v2692_v13 = vld [vmem:[%s3343_s1 + $0x358] sm:$0xff]   ;;  %v2691_v14 = vld [vmem:[%s3343_s1 + $0x390] sm:$0xff]  }
  0x3e   :  { %2482 = vmatprep.subr.bf16.mxu1 %v2645_v15  ;;  %v2693_v15 = vld [vmem:[%s3343_s1 + $0x3d8] sm:$0xff]  }
  0x40   :  { %2461 = vmatpush3.bf16.msra.mxu0 %v2646_v16  ;;  %v2694_v16 = vld [vmem:[%s3343_s1 + $0x318] sm:$0xff]  }
  0x41   :  { %2490 = vmatprep.subr.bf16.mxu0 %v2648_v18  ;;  %2483 = vmatpush3.bf16.msra.mxu1 %v2647_v19  ;;  %v2695_v18 = vld [vmem:[%s3343_s1 + $0x398] sm:$0xff]   ;;  %v2697_v19 = vld [vmem:[%s3343_s1 + $0x3e0] sm:$0xff]  }
  0x42   :  { %2512 = vmatprep.subr.bf16.mxu1 %v2649_v20  ;;  %v2698_v20 = vld [vmem:[%s3343_s1 + $0x320] sm:$0xff]  }
  0x43   :  { %1291 = vmatmul.mubr.bf16.vlgmr.msra.gmra.mrb[4].mxu0 %v326_v17  ;;  %v2696_v17 = vld [vmem:[%s3343_s1 + $0x360] sm:$0xff]  }
  0x44   :  { %2491 = vmatpush3.bf16.msra.mxu0 %v2650_v21  ;;  %1331 = vmatmul.mubr.bf16.vlgmr.msra.gmra.mrb[4].mxu1 %v342_v22  ;;  %v2700_v21 = vld [vmem:[%s3343_s1 + $0x368] sm:$0xff]   ;;  %v2699_v22 = vld [vmem:[%s3343_s1 + $0x3a0] sm:$0xff]  }
  0x45   :  { %2492 = vmatprep.subr.bf16.mxu0 %v2652_v23  ;;  %2513 = vmatpush3.bf16.msra.mxu1 %v2651_v24  ;;  %v2701_v23 = vld [vmem:[%s3343_s1 + $0x3e8] sm:$0xff]  }
  0x46   :  { %2514 = vmatprep.subr.bf16.mxu1 %v2653_v25  ;;  %1370 = vmatprep.mubr.bf16.mxu0 %v382_v56  ;;  %v2702_v24 = vld [vmem:[%s3343_s1 + $0x328] sm:$0xff]   ;;  %v2704_v25 = vld [vmem:[%s3343_s1 + $0x370] sm:$0xff]  }
  0x47   :  { %1410 = vmatprep.mubr.bf16.mxu1 %v392_v60 }
  0x48   :  { %2493 = vmatpush3.bf16.msra.mxu0 %v2654_v26 }
  0x49   :  { %2494 = vmatprep.subr.bf16.mxu0 %v2656_v27  ;;  %2515 = vmatpush3.bf16.msra.mxu1 %v2655_v28 }
  0x4a   :  { %2516 = vmatprep.subr.bf16.mxu1 %v2657_v29 }
  0x4c   :  { %2495 = vmatpush3.bf16.msra.mxu0 %v2658_v30 }
  0x4d   :  { %2496 = vmatprep.subr.bf16.mxu0 %v2660_v31  ;;  %2517 = vmatpush3.bf16.msra.mxu1 %v2659_v32 }
  0x4e   :  { %2518 = vmatprep.subr.bf16.mxu1 %v2661_v34 }
  0x50   :  { %2497 = vmatpush3.bf16.msra.mxu0 %v2662_v35 }
  0x51   :  { %2498 = vmatprep.subr.bf16.mxu0 %v2664_v36  ;;  %2519 = vmatpush3.bf16.msra.mxu1 %v2663_v37 }
  0x52   :  { %2520 = vmatprep.subr.bf16.mxu1 %v2665_v38 }
  0x54   :  { %2499 = vmatpush3.bf16.msra.mxu0 %v2666_v39 }
  0x55   :  { %2500 = vmatprep.subr.bf16.mxu0 %v2668_v40  ;;  %2521 = vmatpush3.bf16.msra.mxu1 %v2667_v42 }
  0x56   :  { %2522 = vmatprep.subr.bf16.mxu1 %v2669_v43 }
  0x58   :  { %2501 = vmatpush3.bf16.msra.mxu0 %v2670_v44 }
  0x59   :  { %2502 = vmatprep.subr.bf16.mxu0 %v2672_v45  ;;  %2523 = vmatpush3.bf16.msra.mxu1 %v2671_v47 }
  0x5a   :  { %2524 = vmatprep.subr.bf16.mxu1 %v2673_v50 }
  0x5c   :  { %2503 = vmatpush3.bf16.msra.mxu0 %v2674_v51 }
  0x5d   :  { %2504 = vmatprep.subr.bf16.mxu0 %v2676_v54  ;;  %2525 = vmatpush3.bf16.msra.mxu1 %v2675_v55 }
  0x5e   :  { %2526 = vmatprep.subr.bf16.mxu1 %v2677_v58 }
  0x60   :  { %2505 = vmatpush3.bf16.msra.mxu0 %v2678_v59 }
  0x61   :  { %2534 = vmatprep.subr.bf16.mxu0 %v2680_v62  ;;  %2527 = vmatpush3.bf16.msra.mxu1 %v2679_v63 }
  0x62   :  { %2556 = vmatprep.subr.bf16.mxu1 %v2681_v1 }
  0x63   :  { %1371 = vmatmul.mubr.bf16.vlgmr.msra.gmra.mrb[8].mxu0 %v368_v61 }
  0x64   :  { %2535 = vmatpush3.bf16.msra.mxu0 %v2682_v2  ;;  %1450 = vmatprep.mubr.bf16.mxu0 %v389_v0 }
  0x65   :  { %1411 = vmatmul.mubr.bf16.vlgmr.msra.gmra.mrb[8].mxu1 %v390_v3  ;;  %2536 = vmatprep.subr.bf16.mxu0 %v2684_v4 }
  0x66   :  { %2557 = vmatpush3.bf16.msra.mxu1 %v2683_v5  ;;  %1490 = vmatprep.mubr.bf16.mxu1 %v393_v6 }
  0x67   :  { %2558 = vmatprep.subr.bf16.mxu1 %v2685_v7 }
  0x68   :  { %2537 = vmatpush3.bf16.msra.mxu0 %v2686_v8 }
  0x69   :  { %2538 = vmatprep.subr.bf16.mxu0 %v2688_v9 }
  0x6a   :  { %2559 = vmatpush3.bf16.msra.mxu1 %v2687_v10 }
  0x6b   :  { %2560 = vmatprep.subr.bf16.mxu1 %v2689_v11 }
  0x6c   :  { %2539 = vmatpush3.bf16.msra.mxu0 %v2690_v12 }
  0x6d   :  { %2540 = vmatprep.subr.bf16.mxu0 %v2692_v13 }
  0x6e   :  { %2561 = vmatpush3.bf16.msra.mxu1 %v2691_v14 }
  0x6f   :  { %2562 = vmatprep.subr.bf16.mxu1 %v2693_v15 }
  0x70   :  { %2541 = vmatpush3.bf16.msra.mxu0 %v2694_v16 }
  0x71   :  { %2542 = vmatprep.subr.bf16.mxu0 %v2696_v17 }
  0x72   :  { %2563 = vmatpush3.bf16.msra.mxu1 %v2695_v18 }
  0x73   :  { %2564 = vmatprep.subr.bf16.mxu1 %v2697_v19 }
  0x74   :  { %2543 = vmatpush3.bf16.msra.mxu0 %v2698_v20 }
  0x75   :  { %2544 = vmatprep.subr.bf16.mxu0 %v2700_v21 }
  0x76   :  { %15 = vsyncpa [#allocation5], 0  ;;  %2565 = vmatpush3.bf16.msra.mxu1 %v2699_v22  ;;  %v2703_v26 = vld [vmem:[%s3343_s1 + $0x3a8] sm:$0xff]   ;;  %v2705_v27 = vld [vmem:[%s3343_s1 + $0x3f0] sm:$0xff]   ;;  %v375_v34 = vrot.slane %v3111_v53, %v2922_v41  ;;  %vm1699_vm0 = vcmask 1040384   ;;  %vm2076_vm1 = vcmask 9216  }
  0x77   :  { %2566 = vmatprep.subr.bf16.mxu1 %v2701_v23  ;;  %v2706_v28 = vld [vmem:[%s3343_s1 + $0x330] sm:$0xff]   ;;  %v2708_v29 = vld [vmem:[%s3343_s1 + $0x378] sm:$0xff]   ;;  %v3234_v37 = vld [vmem:[%s3346_s4] sm:$0xff]  ;;  %vm1695_vm2 = vcmask 15360   ;;  %s2768_s26 = smov [#allocation4]  }
  0x78   :  { %2545 = vmatpush3.bf16.msra.mxu0 %v2702_v24  ;;  %v2707_v30 = vld [vmem:[%s3343_s1 + $0x3b0] sm:$0xff]   ;;  %v2709_v31 = vld [vmem:[%s3343_s1 + $0x3f8] sm:$0xff]   ;;  %v391_v36 = vcombine.high %v375_v34, %v375_v34  ;;  %v1604_v38 = vrot.slane %v3234_v37, %v2922_v41  ;;  %v2249_v46 = vld [vmem:[%s3344_s2] ss:$0 sm:$0xff]  ;;  %s2766_s2 = smov 126   ;;  %s2233_s27 = sshll.u32 %s2768_s26, 4  ;;  %s2234_s27 = int_to_ptr.vmem [resolvable:$true] %s2233_s27 }
  0x79   :  { %2546 = vmatprep.subr.bf16.mxu0 %v2704_v25  ;;  %v2710_v32 = vld [vmem:[%s3343_s1 + $0x338] sm:$0xff]  }
  0x7a   :  { %2567 = vmatpush3.bf16.msra.mxu1 %v2703_v26  ;;  %v2711_v35 = vld [vmem:[%s3343_s1 + $0x3b8] sm:$0xff]   ;;  %v1612_v39 = vcombine.high %v1604_v38, %v1604_v38  ;;  %v1620_v40 = vrot.slane %v1604_v38, %v2922_v41  ;;  %v2765_v38 = vmov 0  }
  0x7b   :  { %2568 = vmatprep.subr.bf16.mxu1 %v2705_v27 }
  0x7c   :  { %2547 = vmatpush3.bf16.msra.mxu0 %v2706_v28  ;;  %v1634_v43 = vrot.slane %v1612_v39, %v2922_v41  ;;  %v1701_v44 = vsel %vm1699_vm0, %v1620_v40, 0  ;;  %v1642_v45 = vcombine.high %v1620_v40, %v1620_v40 }
  0x7d   :  { %2548 = vmatprep.subr.bf16.mxu0 %v2708_v29 }
  0x7e   :  { %2569 = vmatpush3.bf16.msra.mxu1 %v2707_v30  ;;  %v1644_v51 = vcombine.high %v1634_v43, %v1634_v43  ;;  %v1707_v52 = vsel %vm1699_vm0, %v1642_v45, 0 }
  0x7f   :  { %2570 = vmatprep.subr.bf16.mxu1 %v2709_v31 }
  0x80   :  { %2549 = vmatpush3.bf16.msra.mxu0 %v2710_v32 }
  0x81   :  { %2378 = vmatprep.subr.msk.bf16.mxu0 %vm1699_vm0, %v1634_v43 }
  0x82   :  { %2571 = vmatpush3.bf16.msra.mxu1 %v2711_v35  ;;  %v1597_v35 = vcombine.high %v3234_v37, %v3234_v37  ;;  %v1510_v37 = vld [vmem:[%s3346_s4 + $0x8] sm:$0xff] }
  0x83   :  { %1451 = vmatmul.mubr.bf16.vlgmr.msra.gmra.mrb[12].mxu0 %v375_v34  ;;  %2380 = vmatprep.subr.msk.bf16.mxu1 %vm1699_vm0, %v1644_v51 }
  0x84   :  { %1749 = vmatpush1.bf16.msra.mxu0 %v1701_v44  ;;  %1780 = vmatprep.mubr.bf16.mxu0 %v2765_v38  ;;  %v1653_v44 = vrot.slane %v1510_v37, %v2922_v41 }
  0x85   :  { %1491 = vmatmul.mubr.bf16.vlgmr.msra.gmra.mrb[12].mxu1 %v391_v36  ;;  %v1611_v36 = vrot.slane %v1597_v35, %v2922_v41 }
  0x86   :  { %1790 = vmatpush1.bf16.msra.mxu1 %v1707_v52  ;;  %1821 = vmatprep.mubr.bf16.mxu1 %v2765_v38 }
  0x87   :  { %v1613_v39 = vcombine.high %v1611_v36, %v1611_v36  ;;  %v1627_v45 = vrot.slane %v1611_v36, %v2922_v41 }
  0x89   :  { %v1641_v40 = vrot.slane %v1613_v39, %v2922_v41  ;;  %v1643_v51 = vcombine.high %v1627_v45, %v1627_v45 }
  0x8b   :  { %2382 = vmatprep.subr.msk.bf16.mxu0 %vm1699_vm0, %v1641_v40 }
  0xf6   :  { %v2418_v42 = vpop.f32.mrb[0].mxu0 }
  0xf7   :  { %v2419_v47 = vpop.f32.mrb[1].mxu0  ;;  %v2440_v48 = vpop.f32.mrb[0].mxu1 }
  0xf8   :  { %v2420_v49 = vadd.f32 %v2419_v47, %v2418_v42  ;;  %v2421_v50 = vpop.f32.mrb[2].mxu0  ;;  %v2441_v53 = vpop.f32.mrb[1].mxu1  ;;  %v1645_v42 = vcombine.high %v1641_v40, %v1641_v40  ;;  %v1661_v47 = vcombine.high %v1653_v44, %v1653_v44 }
  0xf9   :  { %v2422_v54 = vpop.f32.mrb[3].mxu0  ;;  %v2442_v56 = vadd.f32 %v2441_v53, %v2440_v48  ;;  %v2443_v57 = vpop.f32.mrb[2].mxu1  ;;  %v1646_v48 = vcombine.high %v1510_v37, %v1510_v37 }
  0xfa   :  { %v1213_v55 = vadd.f32 %v2420_v49, %v2249_v46  ;;  %v2444_v58 = vpop.f32.mrb[3].mxu1  ;;  %2384 = vmatprep.subr.msk.bf16.mxu1 %vm1699_vm0, %v1645_v42  ;;  %v1498_v46 = vld [vmem:[%s3345_s3] sm:$0x3]  ;;  %v1683_v52 = vrot.slane %v1661_v47, %v2922_v41  ;;  %v1713_v57 = vsel %vm1699_vm0, %v1627_v45, 0  ;;  %s2767_s3 = smov [#allocation2]  }
  0xfb   :  { %v1660_v53 = vrot.slane %v1646_v48, %v2922_v41  ;;  %v1719_v58 = vsel %vm1699_vm0, %v1643_v51, 0  ;;  %s2223_s4 = sshll.u32 %s2767_s3, 4  ;;  %s2224_s4 = int_to_ptr.vmem [resolvable:$true] %s2223_s4 }
  0xfc   :  { %v1253_v59 = vadd.f32 %v2442_v56, %v1213_v55  ;;  %s2716_s28 = scalar_lea.vmem %s2224_s4, 32  ;;  %p2721_p1 = scmp.lt.s32.totalorder %s2224_s4, %s2224_s4 }
  0xfd   :  { %p2717_p0 = scmp.ne.s32.totalorder %s2224_s4, %s2716_s28  ;;  %p2722_p2 = scmp.lt.s32.totalorder %s2716_s28, %s2716_s28 }
  0xff   :  { %p2723_p3 = por %p2722_p2, %p2721_p1 }
 0x101   :  { %p2724_p4 = pnand %p2723_p3, %p2717_p0 }
 0x116   :  { %v2462_v60 = vpop.f32.mrb[4].mxu0 }
 0x117   :  { %v2463_v61 = vpop.f32.mrb[5].mxu0  ;;  %v2484_v62 = vpop.f32.mrb[4].mxu1 }
 0x118   :  { %v2464_v63 = vadd.f32 %v2463_v61, %v2462_v60  ;;  %v2465_v0 = vpop.f32.mrb[6].mxu0  ;;  %v2485_v1 = vpop.f32.mrb[5].mxu1  ;;  %v1693_v60 = vcombine.high %v1683_v52, %v1683_v52  ;;  %v1662_v61 = vcombine.high %v1660_v53, %v1660_v53 }
 0x119   :  { %v2466_v2 = vpop.f32.mrb[7].mxu0  ;;  %v2486_v4 = vadd.f32 %v2485_v1, %v2484_v62  ;;  %v2487_v5 = vpop.f32.mrb[6].mxu1 }
 0x11a   :  { %v1293_v3 = vadd.f32 %v2464_v63, %v1253_v59  ;;  %v2488_v6 = vpop.f32.mrb[7].mxu1  ;;  %v1669_v59 = vrot.slane %v1653_v44, %v2922_v41  ;;  %v1690_v63 = vrot.slane %v1662_v61, %v2922_v41  ;;  %v1676_v2 = vrot.slane %v1660_v53, %v2922_v41 }
 0x11c   :  { %v1333_v7 = vadd.f32 %v2486_v4, %v1293_v3  ;;  %v1691_v62 = vcombine.high %v1669_v59, %v1669_v59  ;;  %v1725_v0 = vsel %vm1699_vm0, %v1669_v59, 0  ;;  %v1694_v3 = vcombine.high %v1690_v63, %v1690_v63 }
 0x11d   :  { %v1692_v4 = vcombine.high %v1676_v2, %v1676_v2  ;;  %v1737_v5 = vsel %vm1699_vm0, %v1676_v2, 0 }
 0x11e   :  { %v1731_v1 = vsel %vm1699_vm0, %v1691_v62, 0 }
 0x11f   :  { %v1743_v6 = vsel %vm1699_vm0, %v1692_v4, 0 }
 0x136   :  { %v2506_v8 = vpop.f32.mrb[8].mxu0 }
 0x137   :  { %v2507_v9 = vpop.f32.mrb[9].mxu0 }
 0x138   :  { %v2528_v10 = vpop.f32.mrb[8].mxu1  ;;  %v2508_v11 = vadd.f32 %v2507_v9, %v2506_v8  ;;  %v2509_v12 = vpop.f32.mrb[10].mxu0 }
 0x139   :  { %v2529_v13 = vpop.f32.mrb[9].mxu1  ;;  %v2510_v14 = vpop.f32.mrb[11].mxu0 }
 0x13a   :  { %v1373_v15 = vadd.f32 %v2508_v11, %v1333_v7  ;;  %v2530_v16 = vadd.f32 %v2529_v13, %v2528_v10  ;;  %v2531_v17 = vpop.f32.mrb[10].mxu1 }
 0x13b   :  { %v2532_v18 = vpop.f32.mrb[11].mxu1 }
 0x13c   :  { %v1413_v19 = vadd.f32 %v2530_v16, %v1373_v15 }
 0x156   :  { %v2550_v20 = vpop.f32.mrb[12].mxu0 }
 0x157   :  { %v2551_v21 = vpop.f32.mrb[13].mxu0 }
 0x158   :  { %v2572_v22 = vpop.f32.mrb[12].mxu1  ;;  %v2552_v23 = vadd.f32 %v2551_v21, %v2550_v20  ;;  %v2553_v24 = vpop.f32.mrb[14].mxu0 }
 0x159   :  { %v2573_v25 = vpop.f32.mrb[13].mxu1  ;;  %v2554_v26 = vpop.f32.mrb[15].mxu0 }
 0x15a   :  { %v1453_v27 = vadd.f32 %v2552_v23, %v1413_v19  ;;  %v2574_v28 = vadd.f32 %v2573_v25, %v2572_v22  ;;  %v2575_v29 = vpop.f32.mrb[14].mxu1 }
 0x15b   :  { %v2576_v30 = vpop.f32.mrb[15].mxu1 }
 0x15c   :  { %v1493_v31 = vadd.f32 %v2574_v28, %v1453_v27 }
 0x15e   :  { %v1499_v32 = vmul.f32 0.5, %v1493_v31  ;;  %2077 = vst.msk [vmem:[#allocation2] sm:$0x3] %vm2076_vm1, %v1493_v31 }
 0x160   :  { %v1500_v34 = vmul.f32 1.442695, %v1499_v32 }
 0x162   :  { %2714 = vpow2.f32 %v1500_v34 }
 0x16c   :  { %v2715_v43 = vpop.eup %2714 }
 0x16d   :  { %1503 = vrot.lane.b32.xlu0 %v2715_v43, %s2766_s2 }
 0x171   :  { %2079 = vrot.lane.b32.xlu0 %v1493_v31, %s2766_s2 }
 0x1df   :  { %v1504_v49 = vpop.permute.xlu0 %1503 }
 0x1e0   :  { %v1506_v50 = vmul.f32 %v1504_v49, %v1498_v46 }
 0x1e2   :  { %v1507_v54 = vadd.f32 %v1506_v50, %v1493_v31 }
 0x1e3   :  { %v2080_v55 = vpop.permute.xlu0 %2079 }
 0x1e4   :  { %v1508_v56 = vpack.c.bf16 %v1507_v54, %v1507_v54  ;;  %2082 = vst.msk [vmem:[#allocation4] sm:$0x3] %vm2076_vm1, %v2080_v55 }
 0x1e6   :  { %2379 = vmatmul.mubr.msk.bf16.vlgmr.msra.gmra.mrb[16].mxu0 %vm1695_vm2, %v1508_v56  ;;  %2381 = vmatmul.mubr.msk.bf16.vlgmr.msra.gmra.mrb[16].mxu1 %vm1695_vm2, %v1508_v56 }
 0x1e7   :  { %1831 = vmatpush1.bf16.msra.mxu0 %v1713_v57  ;;  %1872 = vmatpush1.bf16.msra.mxu1 %v1719_v58 }
 0x1e8   :  { %1862 = vmatprep.mubr.bf16.mxu0 %v2765_v38  ;;  %1903 = vmatprep.mubr.bf16.mxu1 %v2765_v38 }
 0x1e9   :  { %2386 = vmatprep.subr.msk.bf16.mxu0 %vm1699_vm0, %v1683_v52  ;;  %2388 = vmatprep.subr.msk.bf16.mxu1 %vm1699_vm0, %v1693_v60 }
 0x1ee   :  { %2383 = vmatmul.mubr.msk.bf16.vlgmr.msra.gmra.mrb[20].mxu0 %vm1695_vm2, %v1508_v56  ;;  %2385 = vmatmul.mubr.msk.bf16.vlgmr.msra.gmra.mrb[20].mxu1 %vm1695_vm2, %v1508_v56 }
 0x1ef   :  { %1913 = vmatpush1.bf16.msra.mxu0 %v1725_v0  ;;  %1954 = vmatpush1.bf16.msra.mxu1 %v1731_v1 }
 0x1f0   :  { %1944 = vmatprep.mubr.bf16.mxu0 %v2765_v38  ;;  %1985 = vmatprep.mubr.bf16.mxu1 %v2765_v38 }
 0x1f1   :  { %2390 = vmatprep.subr.msk.bf16.mxu0 %vm1699_vm0, %v1690_v63  ;;  %2392 = vmatprep.subr.msk.bf16.mxu1 %vm1699_vm0, %v1694_v3 }
 0x1f6   :  { %2387 = vmatmul.mubr.msk.bf16.vlgmr.msra.gmra.mrb[24].mxu0 %vm1695_vm2, %v1508_v56  ;;  %2389 = vmatmul.mubr.msk.bf16.vlgmr.msra.gmra.mrb[24].mxu1 %vm1695_vm2, %v1508_v56 }
 0x1f7   :  { %1995 = vmatpush1.bf16.msra.mxu0 %v1737_v5  ;;  %2036 = vmatpush1.bf16.msra.mxu1 %v1743_v6 }
 0x1f8   :  { %2026 = vmatprep.mubr.bf16.mxu0 %v2765_v38  ;;  %2067 = vmatprep.mubr.bf16.mxu1 %v2765_v38 }
 0x1fe   :  { %2391 = vmatmul.mubr.msk.bf16.vlgmr.msra.gmra.mrb[28].mxu0 %vm1695_vm2, %v1508_v56  ;;  %2393 = vmatmul.mubr.msk.bf16.vlgmr.msra.gmra.mrb[28].mxu1 %vm1695_vm2, %v1508_v56 }
 0x1ff   :  { %2727 = shalt.err (!%p2724_p4)
}
 0x200   :  { %s2728_s9 = scalar_lea.hbm %s3348_s6, 32 }
 0x201   :  { %p2729_p5 = scmp.ne.s32.totalorder %s3348_s6, %s2728_s9  ;;  %p2732_p6 = scmp.lt.u32.totalorder %s2728_s9, %s3348_s6 }
 0x203   :  { %p2734_p7 = pnand %p2732_p6, %p2729_p5 }
 0x205   :  { %2737 = shalt.err (!%p2734_p7)
}
 0x206   :  { %2226 = dma.vmem_to_hbm [thread:$0]  %s2224_s4, 32, %s3348_s6, [#allocation3]  }
 0x207   :  { %s2738_s15 = scalar_lea.vmem %s2234_s27, 32  ;;  %p2743_p9 = scmp.lt.s32.totalorder %s2234_s27, %s2234_s27 }
 0x208   :  { %p2739_p8 = scmp.ne.s32.totalorder %s2234_s27, %s2738_s15  ;;  %p2744_p10 = scmp.lt.s32.totalorder %s2738_s15, %s2738_s15 }
 0x20a   :  { %p2745_p11 = por %p2744_p10, %p2743_p9 }
 0x20c   :  { %p2746_p12 = pnand %p2745_p11, %p2739_p8 }
 0x20e   :  { %2749 = shalt.err (!%p2746_p12)
}
 0x20f   :  { %s2750_s18 = scalar_lea.hbm %s3349_s7, 32 }
 0x210   :  { %p2751_p13 = scmp.ne.s32.totalorder %s3349_s7, %s2750_s18  ;;  %p2754_p0 = scmp.lt.u32.totalorder %s2750_s18, %s3349_s7 }
 0x212   :  { %p2756_p1 = pnand %p2754_p0, %p2751_p13 }
 0x214   :  { %2759 = shalt.err (!%p2756_p1)
}
 0x215   :  { %2236 = dma.vmem_to_hbm [thread:$0]  %s2234_s27, 32, %s3349_s7, [#allocation5]   ;;  %v1517_v7 = vsub.s32 0, %v2910_v33  ;;  %v1525_v8 = vsub.s32 2, %v2910_v33  ;;  %v1511_v9 = vld [vmem:[%s3347_s5] sm:$0xff]  ;;  %v1521_v10 = vsub.s32 1, %v2910_v33 }
 0x216   :  { %v1529_v11 = vsub.s32 3, %v2910_v33  ;;  %v1533_v22 = vsub.s32 4, %v2910_v33  ;;  %v1541_v23 = vsub.s32 6, %v2910_v33  ;;  %v1537_v28 = vsub.s32 5, %v2910_v33  ;;  %v1512_v52 = vld [vmem:[%s3347_s5 + $0x8] sm:$0xff] }
 0x217   :  { %v1518_v12 = vrot.slane %v1511_v9, %v1517_v7  ;;  %v1526_v13 = vrot.slane %v1511_v9, %v1525_v8  ;;  %v1522_v14 = vrot.slane %v1511_v9, %v1521_v10  ;;  %v1545_v29 = vsub.s32 7, %v2910_v33 }
 0x218   :  { %v1530_v15 = vrot.slane %v1511_v9, %v1529_v11  ;;  %v1534_v35 = vrot.slane %v1511_v9, %v1533_v22  ;;  %v1542_v36 = vrot.slane %v1511_v9, %v1541_v23  ;;  %v1538_v40 = vrot.slane %v1511_v9, %v1537_v28 }
 0x219   :  { %v1546_v42 = vrot.slane %v1511_v9, %v1545_v29  ;;  %v1550_v57 = vrot.slane %v1512_v52, %v1517_v7  ;;  %v1558_v58 = vrot.slane %v1512_v52, %v1525_v8  ;;  %v1554_v61 = vrot.slane %v1512_v52, %v1521_v10 }
 0x21a   :  { %v1562_v62 = vrot.slane %v1512_v52, %v1529_v11 }
 0x2b9   :  { %v1782_v16 = vpop.f32.mrb[16].mxu0  ;;  %v1823_v17 = vpop.f32.mrb[16].mxu1 }
 0x2ba   :  { %v1783_v18 = vadd.f32 %v1782_v16, %v1518_v12  ;;  %v1824_v19 = vadd.f32 %v1823_v17, %v1526_v13  ;;  %v1784_v20 = vpop.f32.mrb[17].mxu0  ;;  %v1825_v21 = vpop.f32.mrb[17].mxu1  ;;  %v1566_v17 = vrot.slane %v1512_v52, %v1533_v22 }
 0x2bb   :  { %v1785_v24 = vadd.f32 %v1784_v20, %v1522_v14  ;;  %v1826_v25 = vadd.f32 %v1825_v21, %v1530_v15  ;;  %v1786_v26 = vpop.f32.mrb[18].mxu0  ;;  %v1827_v27 = vpop.f32.mrb[18].mxu1  ;;  %v1570_v21 = vrot.slane %v1512_v52, %v1537_v28 }
 0x2bc   :  { %v1787_v30 = vpop.f32.mrb[19].mxu0  ;;  %v1828_v31 = vpop.f32.mrb[19].mxu1 }
 0x2bd   :  { %v2394_v32 = vpack.c.bf16 %v1785_v24, %v1783_v18  ;;  %v2395_v34 = vpack.c.bf16 %v1826_v25, %v1824_v19  ;;  %v1574_v18 = vrot.slane %v1512_v52, %v1541_v23  ;;  %v1578_v24 = vrot.slane %v1512_v52, %v1545_v29 }
 0x2bf   :  { %v2125_v38 = vrot.slane %v2394_v32, %v2922_v41  ;;  %v2132_v39 = vrot.slane %v2395_v34, %v2922_v41 }
 0x2c1   :  { %v2147_v43 = vcombine.low %v2125_v38, %v2132_v39  ;;  %v1864_v37 = vpop.f32.mrb[20].mxu0  ;;  %v1905_v44 = vpop.f32.mrb[20].mxu1 }
 0x2c2   :  { %v1865_v45 = vadd.f32 %v1864_v37, %v1534_v35  ;;  %v1906_v46 = vadd.f32 %v1905_v44, %v1542_v36  ;;  %v1866_v47 = vpop.f32.mrb[21].mxu0  ;;  %v1907_v48 = vpop.f32.mrb[21].mxu1 }
 0x2c3   :  { %v1867_v33 = vadd.f32 %v1866_v47, %v1538_v40  ;;  %v1908_v49 = vadd.f32 %v1907_v48, %v1546_v42  ;;  %v1868_v50 = vpop.f32.mrb[22].mxu0  ;;  %v1909_v51 = vpop.f32.mrb[22].mxu1  ;;  %v2155_v6 = vrot.slane %v2147_v43, %v2922_v41 }
 0x2c4   :  { %v1869_v53 = vpop.f32.mrb[23].mxu0  ;;  %v1910_v54 = vpop.f32.mrb[23].mxu1 }
 0x2c5   :  { %v2396_v55 = vpack.c.bf16 %v1867_v33, %v1865_v45  ;;  %v2397_v56 = vpack.c.bf16 %v1908_v49, %v1906_v46 }
 0x2c7   :  { %v2139_v59 = vrot.slane %v2396_v55, %v2922_v41  ;;  %v2146_v60 = vrot.slane %v2397_v56, %v2922_v41 }
 0x2c9   :  { %v2148_v63 = vcombine.low %v2139_v59, %v2146_v60  ;;  %v1946_v0 = vpop.f32.mrb[24].mxu0  ;;  %v1987_v1 = vpop.f32.mrb[24].mxu1 }
 0x2ca   :  { %v1947_v2 = vadd.f32 %v1946_v0, %v1550_v57  ;;  %v1988_v3 = vadd.f32 %v1987_v1, %v1558_v58  ;;  %v1948_v4 = vpop.f32.mrb[25].mxu0  ;;  %v1989_v5 = vpop.f32.mrb[25].mxu1 }
 0x2cb   :  { %v2162_v9 = vrot.slane %v2148_v63, %v2922_v41  ;;  %v1949_v12 = vadd.f32 %v1948_v4, %v1554_v61  ;;  %v1990_v7 = vadd.f32 %v1989_v5, %v1562_v62  ;;  %v1950_v8 = vpop.f32.mrb[26].mxu0  ;;  %v1991_v13 = vpop.f32.mrb[26].mxu1 }
 0x2cc   :  { %v1951_v14 = vpop.f32.mrb[27].mxu0  ;;  %v1992_v15 = vpop.f32.mrb[27].mxu1 }
 0x2cd   :  { %v2163_v16 = vcombine.low %v2155_v6, %v2162_v9  ;;  %v2398_v10 = vpack.c.bf16 %v1949_v12, %v1947_v2  ;;  %v2399_v11 = vpack.c.bf16 %v1990_v7, %v1988_v3 }
 0x2cf   :  { %2215 = vst [vmem:[%s3350_s8] sm:$0xff] %v2163_v16  ;;  %v2174_v19 = vrot.slane %v2398_v10, %v2922_v41  ;;  %v2181_v20 = vrot.slane %v2399_v11, %v2922_v41 }
 0x2d1   :  { %v2196_v25 = vcombine.low %v2174_v19, %v2181_v20  ;;  %v2028_v26 = vpop.f32.mrb[28].mxu0  ;;  %v2069_v27 = vpop.f32.mrb[28].mxu1 }
 0x2d2   :  { %v2029_v30 = vadd.f32 %v2028_v26, %v1566_v17  ;;  %v2070_v31 = vadd.f32 %v2069_v27, %v1574_v18  ;;  %v2030_v32 = vpop.f32.mrb[29].mxu0  ;;  %v2071_v34 = vpop.f32.mrb[29].mxu1 }
 0x2d3   :  { %v2031_v35 = vadd.f32 %v2030_v32, %v1570_v21  ;;  %v2072_v22 = vadd.f32 %v2071_v34, %v1578_v24  ;;  %v2032_v23 = vpop.f32.mrb[30].mxu0  ;;  %v2073_v36 = vpop.f32.mrb[30].mxu1  ;;  %v2204_v37 = vrot.slane %v2196_v25, %v2922_v41 }
 0x2d4   :  { %v2033_v38 = vpop.f32.mrb[31].mxu0  ;;  %v2074_v39 = vpop.f32.mrb[31].mxu1 }
 0x2d5   :  { %v2400_v40 = vpack.c.bf16 %v2031_v35, %v2029_v30  ;;  %v2401_v42 = vpack.c.bf16 %v2072_v22, %v2070_v31 }
 0x2d7   :  { %v2188_v43 = vrot.slane %v2400_v40, %v2922_v41  ;;  %v2195_v28 = vrot.slane %v2401_v42, %v2922_v41 }
 0x2d9   :  { %v2197_v29 = vcombine.low %v2188_v43, %v2195_v28 }
 0x2db   :  { %v2211_v44 = vrot.slane %v2197_v29, %v2922_v41 }
 0x2dd   :  { %v2212_v45 = vcombine.low %v2204_v37, %v2211_v44 }
 0x2df   :  { %2216 = vst [vmem:[%s3350_s8 + $0x8] sm:$0xff] %v2212_v45 }
 0x2e0   :  { %2760 = dma.done.wait [#allocation3], 32  }
 0x2e1   :  { %2761 = vsyncadd [#allocation3], 4294967264 }
 0x2e2   :  { %2762 = dma.done.wait [#allocation5], 32  }
 0x2e3   :  { %2763 = vsyncadd [#allocation5], 4294967264 }
 0x2e4   :  { %2247 = vsyncpa [#allocation3], 1 }
 0x2e5   :  { %2248 = vsyncpa [#allocation5], 1 }

// kernel: vae_forward.12
= control target key start
LH: loop header
LB: loop body
LE: loop exit
PB: predicated region body
PF: predicated region fallthrough
CT: control target
= control target key end

     0   :  { %s2286_s12 = smov 0   ;;  %s2288_s13 = smov 0   ;;  %s2592_s0 = inlined_call_operand.vmem [shape: bf16[512,512], index: 0, kind: input, shape index: {}]   ;;  %s2593_s1 = inlined_call_operand.vmem [shape: bf16[512,32], index: 1, kind: input, shape index: {}]   ;;  %s2594_s2 = inlined_call_operand.vmem [shape: f32[512,1], index: 2, kind: input, shape index: {}]   ;;  %s2595_s3 = inlined_call_operand.vmem [shape: bf16[512,32], index: 3, kind: output, shape index: {}]  }
   0x1   :  { %s2290_s14 = smov 0  }
   0x2 LB: > { %s25_s15 = sadd.s32 1, %s2259_s13  ;;  %p1691_p0 = scmp.ge.s32.totalorder %s2263_s14, 1  ;;  %s2263_s14 = sphi %s2290_s14, %s13_s14   ;;  %s2259_s13 = sphi %s2288_s13, %s2597_s13   ;;  %s2255_s12 = sphi %s2286_s12, %s2596_s12  }
   0x3   : > { %p27_p1 = scmp.ge.s32.totalorder %s25_s15, 2  ;;  %p173_p2 = scmp.lt.s32.totalorder %s2263_s14, 3 }
   0x5   : > { %s2599_s15 = smov (%p27_p1, %s25_s15), 0  ;;  %p174_p3 = pnand %p1691_p0, %p173_p2 }
   0x6   : > { %v2113_v0 = vld [vmem:[%s2593_s1 + $0x40] sm:$0xff] (!%p174_p3)   ;;  %v2265_v4 = vmov (!%p174_p3), 0   ;;  %v2117_v5 = vld [vmem:[%s2593_s1 + $0x48] sm:$0xff] (!%p174_p3)   ;;  %v2121_v9 = vld [vmem:[%s2593_s1 + $0x50] sm:$0xff] (!%p174_p3)   ;;  %s1692_s25 = sshll.u32 (!%p174_p3), %s2255_s12, 5  ;;  %vm1551_vm0 = vcmask (!%p174_p3), 257024  }
   0x7   : > { %177 = sbr.rel (%p174_p3) target bundleno = 386 (0x182), region = 32  ;;  %v2114_v1 = vld [vmem:[%s2593_s1 + $0xc0] sm:$0xff] (!%p174_p3)   ;;  %1862 = vmatprep.subr.bf16.mxu0 (!%p174_p3), %v2113_v0  ;;  %2111 = vset.pattern.permute.xlu0 (!%p174_p3), %v2265_v4  ;;  %v2118_v6 = vld [vmem:[%s2593_s1 + $0xc8] sm:$0xff] (!%p174_p3)   ;;  %v2122_v10 = vld [vmem:[%s2593_s1 + $0xd0] sm:$0xff] (!%p174_p3)   ;;  %p211_p4 = scmp.lt.s32.totalorder (!%p174_p3), %s1692_s25, 63 }
   0x8   : > { %v2115_v2 = vld [vmem:[%s2593_s1] sm:$0xff] (!%p174_p3)   ;;  %1974 = vmatprep.subr.bf16.mxu1 (!%p174_p3), %v2114_v1  ;;  %2112 = vset.pattern.permute.xlu1 (!%p174_p3), %v2265_v4  ;;  %v2119_v7 = vld [vmem:[%s2593_s1 + $0x8] sm:$0xff] (!%p174_p3)   ;;  %v2123_v11 = vld [vmem:[%s2593_s1 + $0x10] sm:$0xff] (!%p174_p3)  }
   0x9   : > { %v2116_v3 = vld [vmem:[%s2593_s1 + $0x80] sm:$0xff] (!%p174_p3)   ;;  %1863 = vmatpush3.bf16.msra.mxu0 (!%p174_p3), %v2115_v2  ;;  %v2120_v8 = vld [vmem:[%s2593_s1 + $0x88] sm:$0xff] (!%p174_p3)   ;;  %v2124_v12 = vld [vmem:[%s2593_s1 + $0x90] sm:$0xff] (!%p174_p3)  }
   0xa   : > { %1975 = vmatpush3.bf16.msra.mxu1 (!%p174_p3), %v2116_v3  ;;  %1864 = vmatprep.subr.bf16.mxu0 (!%p174_p3), %v2117_v5  ;;  %v2125_v13 = vld [vmem:[%s2593_s1 + $0x58] sm:$0xff] (!%p174_p3)   ;;  %v2129_v17 = vld [vmem:[%s2593_s1 + $0x60] sm:$0xff] (!%p174_p3)   ;;  %v2133_v21 = vld [vmem:[%s2593_s1 + $0x68] sm:$0xff] (!%p174_p3)  }
   0xb   : > { %1976 = vmatprep.subr.bf16.mxu1 (!%p174_p3), %v2118_v6  ;;  %v2126_v14 = vld [vmem:[%s2593_s1 + $0xd8] sm:$0xff] (!%p174_p3)   ;;  %v2130_v18 = vld [vmem:[%s2593_s1 + $0xe0] sm:$0xff] (!%p174_p3)   ;;  %v2134_v22 = vld [vmem:[%s2593_s1 + $0xe8] sm:$0xff] (!%p174_p3)  }
   0xc   : > { %v2127_v15 = vld [vmem:[%s2593_s1 + $0x18] sm:$0xff] (!%p174_p3)   ;;  %v2131_v19 = vld [vmem:[%s2593_s1 + $0x20] sm:$0xff] (!%p174_p3)   ;;  %v2135_v23 = vld [vmem:[%s2593_s1 + $0x28] sm:$0xff] (!%p174_p3)  }
   0xd   : > { %1865 = vmatpush3.bf16.msra.mxu0 (!%p174_p3), %v2119_v7  ;;  %v2128_v16 = vld [vmem:[%s2593_s1 + $0x98] sm:$0xff] (!%p174_p3)   ;;  %v2132_v20 = vld [vmem:[%s2593_s1 + $0xa0] sm:$0xff] (!%p174_p3)   ;;  %v2136_v24 = vld [vmem:[%s2593_s1 + $0xa8] sm:$0xff] (!%p174_p3)  }
   0xe   : > { %1977 = vmatpush3.bf16.msra.mxu1 %v2120_v8  ;;  %1866 = vmatprep.subr.bf16.mxu0 %v2121_v9  ;;  %s2601_s25 = smov (!%p211_p4, %s1692_s25), 63  ;;  %v2137_v25 = vld [vmem:[%s2593_s1 + $0x70] sm:$0xff]   ;;  %v2141_v29 = vld [vmem:[%s2593_s1 + $0x78] sm:$0xff]  }
   0xf   : > { %1978 = vmatprep.subr.bf16.mxu1 %v2122_v10  ;;  %v2138_v26 = vld [vmem:[%s2593_s1 + $0xf0] sm:$0xff]   ;;  %s1829_s24 = sshll.u32 %s2601_s25, 4  ;;  %v2142_v30 = vld [vmem:[%s2593_s1 + $0xf8] sm:$0xff]   ;;  %s1696_s11 = sshll.u32 %s2601_s25, 3 }
  0x10   : > { %v2139_v27 = vld [vmem:[%s2593_s1 + $0x30] sm:$0xff]   ;;  %s2403_s12 = scalar_lea.vmem %s2592_s0, %s1829_s24  ;;  %v2143_v31 = vld [vmem:[%s2593_s1 + $0x38] sm:$0xff]   ;;  %s2433_s18 = scalar_lea.vmem %s2594_s2, %s1696_s11 }
  0x11   : > { %1867 = vmatpush3.bf16.msra.mxu0 %v2123_v11  ;;  %v2140_v28 = vld [vmem:[%s2593_s1 + $0xb0] sm:$0xff]   ;;  %v2144_v32 = vld [vmem:[%s2593_s1 + $0xb8] sm:$0xff]   ;;  %v365_v51 = vld [vmem:[%s2433_s18] sm:$0xff]  ;;  %s1698_s19 = sshll.u32 %s2601_s25, 2 }
  0x12   : > { %1979 = vmatpush3.bf16.msra.mxu1 %v2124_v12  ;;  %1868 = vmatprep.subr.bf16.mxu0 %v2125_v13  ;;  %v2145_v33 = vld [vmem:[%s2403_s12] ss:$16 sps:$4 sm:$0xff]   ;;  %v2147_v34 = vld [vmem:[%s2403_s12 + $0x4] ss:$16 sps:$4 sm:$0xff]   ;;  %v2148_v35 = vld [vmem:[%s2403_s12 + $0x8] ss:$16 sps:$4 sm:$0xff]   ;;  %s2517_s22 = scalar_lea.vmem %s2595_s3, %s1698_s19 }
  0x13   : > { %1980 = vmatprep.subr.bf16.mxu1 %v2126_v14  ;;  %v2150_v36 = vld [vmem:[%s2403_s12 + $0xc] ss:$16 sps:$4 sm:$0xff]   ;;  %1101 = vmatprep.mubr.bf16.mxu0 %v2147_v34  ;;  %v2151_v37 = vld [vmem:[%s2403_s12 + $0x24] ss:$16 sps:$4 sm:$0xff]   ;;  %v2155_v39 = vld [vmem:[%s2403_s12 + $0x20] ss:$16 sps:$4 sm:$0xff]  }
  0x14   : > { %1262 = vmatprep.mubr.bf16.mxu1 %v2150_v36  ;;  %v2153_v38 = vld [vmem:[%s2403_s12 + $0x2c] ss:$16 sps:$4 sm:$0xff]   ;;  %v2156_v40 = vld [vmem:[%s2403_s12 + $0x28] ss:$16 sps:$4 sm:$0xff]   ;;  %v2157_v41 = vld [vmem:[%s2403_s12 + $0x44] ss:$16 sps:$4 sm:$0xff]   ;;  %399 = vperm.xlu0 %2111, %v365_v51  }
  0x15   : > { %1869 = vmatpush3.bf16.msra.mxu0 %v2127_v15  ;;  %v2159_v42 = vld [vmem:[%s2403_s12 + $0x4c] ss:$16 sps:$4 sm:$0xff]   ;;  %v2161_v43 = vld [vmem:[%s2403_s12 + $0x40] ss:$16 sps:$4 sm:$0xff]   ;;  %v2162_v44 = vld [vmem:[%s2403_s12 + $0x48] ss:$16 sps:$4 sm:$0xff]  }
  0x16   : > { %1981 = vmatpush3.bf16.msra.mxu1 %v2128_v16  ;;  %1870 = vmatprep.subr.bf16.mxu0 %v2129_v17  ;;  %v2163_v45 = vld [vmem:[%s2403_s12 + $0x64] ss:$16 sps:$4 sm:$0xff]   ;;  %v2165_v46 = vld [vmem:[%s2403_s12 + $0x6c] ss:$16 sps:$4 sm:$0xff]   ;;  %v2167_v47 = vld [vmem:[%s2403_s12 + $0x60] ss:$16 sps:$4 sm:$0xff]  }
  0x17   : > { %1982 = vmatprep.subr.bf16.mxu1 %v2130_v18  ;;  %v2168_v48 = vld [vmem:[%s2403_s12 + $0x68] ss:$16 sps:$4 sm:$0xff]   ;;  %v2169_v49 = vld [vmem:[%s2403_s12 + $0x84] ss:$16 sps:$4 sm:$0xff]   ;;  %v2171_v50 = vld [vmem:[%s2403_s12 + $0x8c] ss:$16 sps:$4 sm:$0xff]  }
  0x18   : > { %v2173_v52 = vld [vmem:[%s2403_s12 + $0x80] ss:$16 sps:$4 sm:$0xff]   ;;  %v2174_v53 = vld [vmem:[%s2403_s12 + $0x88] ss:$16 sps:$4 sm:$0xff]   ;;  %v2175_v56 = vld [vmem:[%s2403_s12 + $0xa4] ss:$16 sps:$4 sm:$0xff]  }
  0x19   : > { %1871 = vmatpush3.bf16.msra.mxu0 %v2131_v19  ;;  %v367_v54 = vld [vmem:[%s2433_s18 + $0x10] sm:$0xff]  ;;  %v366_v55 = vld [vmem:[%s2433_s18 + $0x8] sm:$0xff]  ;;  %v368_v58 = vld [vmem:[%s2433_s18 + $0x18] sm:$0xff] }
  0x1a   : > { %1983 = vmatpush3.bf16.msra.mxu1 %v2132_v20  ;;  %1872 = vmatprep.subr.bf16.mxu0 %v2133_v21  ;;  %v2177_v57 = vld [vmem:[%s2403_s12 + $0xac] ss:$16 sps:$4 sm:$0xff]   ;;  %v369_v59 = vld [vmem:[%s2433_s18 + $0x20] sm:$0xff]  ;;  %v2180_v62 = vld [vmem:[%s2403_s12 + $0xa8] ss:$16 sps:$4 sm:$0xff]  }
  0x1b   : > { %1984 = vmatprep.subr.bf16.mxu1 %v2134_v22  ;;  %409 = vperm.xlu1 %2112, %v367_v54   ;;  %v370_v60 = vld [vmem:[%s2433_s18 + $0x28] sm:$0xff]  ;;  %v2179_v61 = vld [vmem:[%s2403_s12 + $0xa0] ss:$16 sps:$4 sm:$0xff]   ;;  %v2181_v0 = vld [vmem:[%s2403_s12 + $0xc4] ss:$16 sps:$4 sm:$0xff]  }
  0x1c   : > { %404 = vperm.xlu0 %2111, %v366_v55   ;;  %v371_v63 = vld [vmem:[%s2433_s18 + $0x30] sm:$0xff]  ;;  %v2183_v1 = vld [vmem:[%s2403_s12 + $0xcc] ss:$16 sps:$4 sm:$0xff]   ;;  %v373_v3 = vld [vmem:[%s2433_s18 + $0x40] sm:$0xff] }
  0x1d   : > { %1873 = vmatpush3.bf16.msra.mxu0 %v2135_v23  ;;  %v372_v2 = vld [vmem:[%s2433_s18 + $0x38] sm:$0xff]  ;;  %v374_v4 = vld [vmem:[%s2433_s18 + $0x48] sm:$0xff]  ;;  %v2185_v5 = vld [vmem:[%s2403_s12 + $0xc0] ss:$16 sps:$4 sm:$0xff]  }
  0x1e   : > { %1985 = vmatpush3.bf16.msra.mxu1 %v2136_v24  ;;  %1874 = vmatprep.subr.bf16.mxu0 %v2137_v25  ;;  %v375_v6 = vld [vmem:[%s2433_s18 + $0x50] sm:$0xff]  ;;  %v2186_v7 = vld [vmem:[%s2403_s12 + $0xc8] ss:$16 sps:$4 sm:$0xff]   ;;  %v2189_v9 = vld [vmem:[%s2403_s12 + $0xec] ss:$16 sps:$4 sm:$0xff]  }
  0x1f   : > { %1986 = vmatprep.subr.bf16.mxu1 %v2138_v26  ;;  %414 = vperm.xlu1 %2112, %v368_v58   ;;  %v2187_v8 = vld [vmem:[%s2403_s12 + $0xe4] ss:$16 sps:$4 sm:$0xff]   ;;  %v376_v10 = vld [vmem:[%s2433_s18 + $0x58] sm:$0xff]  ;;  %v378_v12 = vld [vmem:[%s2433_s18 + $0x68] sm:$0xff] }
  0x20   : > { %419 = vperm.xlu0 %2111, %v369_v59   ;;  %v377_v11 = vld [vmem:[%s2433_s18 + $0x60] sm:$0xff]  ;;  %v379_v14 = vld [vmem:[%s2433_s18 + $0x70] sm:$0xff]  ;;  %v2192_v15 = vld [vmem:[%s2403_s12 + $0xe8] ss:$16 sps:$4 sm:$0xff]  }
  0x21   : > { %1875 = vmatpush3.bf16.msra.mxu0 %v2139_v27  ;;  %v2191_v13 = vld [vmem:[%s2403_s12 + $0xe0] ss:$16 sps:$4 sm:$0xff]   ;;  %v2193_v16 = vld [vmem:[%s2403_s12 + $0x104] ss:$16 sps:$4 sm:$0xff]   ;;  %v2195_v17 = vld [vmem:[%s2403_s12 + $0x10c] ss:$16 sps:$4 sm:$0xff]  }
  0x22   : > { %1987 = vmatpush3.bf16.msra.mxu1 %v2140_v28  ;;  %1876 = vmatprep.subr.bf16.mxu0 %v2141_v29  ;;  %v380_v18 = vld [vmem:[%s2433_s18 + $0x78] sm:$0xff]  ;;  %v381_v19 = vld [vmem:[%s2433_s18 + $0x80] sm:$0xff]  ;;  %v382_v20 = vld [vmem:[%s2433_s18 + $0x88] sm:$0xff] }
  0x23   : > { %1988 = vmatprep.subr.bf16.mxu1 %v2142_v30  ;;  %424 = vperm.xlu1 %2112, %v370_v60   ;;  %v2197_v21 = vld [vmem:[%s2403_s12 + $0x100] ss:$16 sps:$4 sm:$0xff]   ;;  %v2198_v23 = vld [vmem:[%s2403_s12 + $0x108] ss:$16 sps:$4 sm:$0xff]   ;;  %v2199_v24 = vld [vmem:[%s2403_s12 + $0x124] ss:$16 sps:$4 sm:$0xff]  }
  0x24   : > { %429 = vperm.xlu0 %2111, %v371_v63   ;;  %v383_v22 = vld [vmem:[%s2433_s18 + $0x90] sm:$0xff]  ;;  %v2201_v25 = vld [vmem:[%s2403_s12 + $0x12c] ss:$16 sps:$4 sm:$0xff]   ;;  %v385_v27 = vld [vmem:[%s2433_s18 + $0xa0] sm:$0xff] }
  0x25   : > { %1877 = vmatpush3.bf16.msra.mxu0 %v2143_v31  ;;  %v384_v26 = vld [vmem:[%s2433_s18 + $0x98] sm:$0xff]  ;;  %v386_v28 = vld [vmem:[%s2433_s18 + $0xa8] sm:$0xff]  ;;  %v2203_v29 = vld [vmem:[%s2403_s12 + $0x120] ss:$16 sps:$4 sm:$0xff]  }
  0x26   : > { %1989 = vmatpush3.bf16.msra.mxu1 %v2144_v32  ;;  %v387_v30 = vld [vmem:[%s2433_s18 + $0xb0] sm:$0xff]  ;;  %v2204_v31 = vld [vmem:[%s2403_s12 + $0x128] ss:$16 sps:$4 sm:$0xff]   ;;  %v2225_v54 = vld [vmem:[%s2403_s12 + $0x1ac] ss:$16 sps:$4 sm:$0xff]  }
  0x27   : > { %434 = vperm.xlu1 %2112, %v372_v2   ;;  %v2205_v32 = vld [vmem:[%s2403_s12 + $0x144] ss:$16 sps:$4 sm:$0xff]   ;;  %v388_v34 = vld [vmem:[%s2433_s18 + $0xb8] sm:$0xff]  ;;  %v390_v36 = vld [vmem:[%s2433_s18 + $0xc8] sm:$0xff] }
  0x28   : > { %1102 = vmatmul.mubr.bf16.vlgmr.msra.gmra.mrb[0].mxu0 %v2145_v33  ;;  %439 = vperm.xlu0 %2111, %v373_v3   ;;  %v2207_v33 = vld [vmem:[%s2403_s12 + $0x14c] ss:$16 sps:$4 sm:$0xff]   ;;  %v2221_v51 = vld [vmem:[%s2403_s12 + $0x180] ss:$16 sps:$4 sm:$0xff]   ;;  %v2234_v60 = vld [vmem:[%s2403_s12 + $0x1c8] ss:$16 sps:$4 sm:$0xff]  }
  0x29   : > { %1263 = vmatmul.mubr.bf16.vlgmr.msra.gmra.mrb[0].mxu1 %v2148_v35  ;;  %1109 = vmatprep.mubr.bf16.mxu0 %v2151_v37  ;;  %v389_v35 = vld [vmem:[%s2433_s18 + $0xc0] sm:$0xff]  ;;  %v2231_v58 = vld [vmem:[%s2403_s12 + $0x1cc] ss:$16 sps:$4 sm:$0xff]  }
  0x2a   : > { %1270 = vmatprep.mubr.bf16.mxu1 %v2153_v38  ;;  %v2209_v37 = vld [vmem:[%s2403_s12 + $0x140] ss:$16 sps:$4 sm:$0xff]  }
  0x2b   : > { %444 = vperm.xlu1 %2112, %v374_v4   ;;  %v391_v38 = vld [vmem:[%s2433_s18 + $0xd0] sm:$0xff] }
  0x2c   : > { %449 = vperm.xlu0 %2111, %v375_v6   ;;  %v2227_v55 = vld [vmem:[%s2403_s12 + $0x1a0] ss:$16 sps:$4 sm:$0xff]  }
  0x2d   : > { %v2233_v59 = vld [vmem:[%s2403_s12 + $0x1c0] ss:$16 sps:$4 sm:$0xff]  }
  0x2e   : > { %v2239_v63 = vld [vmem:[%s2403_s12 + $0x1e0] ss:$16 sps:$4 sm:$0xff]  }
  0x2f   : > { %454 = vperm.xlu1 %2112, %v376_v10  }
  0x30   : > { %1110 = vmatmul.mubr.bf16.gmra.mrb[4].mxu0 %v2155_v39  ;;  %459 = vperm.xlu0 %2111, %v377_v11   ;;  %v2210_v39 = vld [vmem:[%s2403_s12 + $0x148] ss:$16 sps:$4 sm:$0xff]  }
  0x31   : > { %1271 = vmatmul.mubr.bf16.gmra.mrb[4].mxu1 %v2156_v40  ;;  %1117 = vmatprep.mubr.bf16.mxu0 %v2157_v41  ;;  %v2211_v40 = vld [vmem:[%s2403_s12 + $0x164] ss:$16 sps:$4 sm:$0xff]   ;;  %v2213_v41 = vld [vmem:[%s2403_s12 + $0x16c] ss:$16 sps:$4 sm:$0xff]  }
  0x32   : > { %1278 = vmatprep.mubr.bf16.mxu1 %v2159_v42  ;;  %v392_v42 = vld [vmem:[%s2433_s18 + $0xd8] sm:$0xff] }
  0x33   : > { %464 = vperm.xlu1 %2112, %v378_v12  }
  0x34   : > { %469 = vperm.xlu0 %2111, %v379_v14  }
  0x37   : > { %474 = vperm.xlu1 %2112, %v380_v18  }
  0x38   : > { %1118 = vmatmul.mubr.bf16.gmra.mrb[8].mxu0 %v2161_v43  ;;  %479 = vperm.xlu0 %2111, %v381_v19   ;;  %v393_v43 = vld [vmem:[%s2433_s18 + $0xe0] sm:$0xff] }
  0x39   : > { %1279 = vmatmul.mubr.bf16.gmra.mrb[8].mxu1 %v2162_v44  ;;  %1125 = vmatprep.mubr.bf16.mxu0 %v2163_v45  ;;  %v394_v44 = vld [vmem:[%s2433_s18 + $0xe8] sm:$0xff]  ;;  %v2215_v45 = vld [vmem:[%s2403_s12 + $0x160] ss:$16 sps:$4 sm:$0xff]  }
  0x3a   : > { %1286 = vmatprep.mubr.bf16.mxu1 %v2165_v46  ;;  %v395_v46 = vld [vmem:[%s2433_s18 + $0xf0] sm:$0xff] }
  0x3b   : > { %484 = vperm.xlu1 %2112, %v382_v20  }
  0x3c   : > { %489 = vperm.xlu0 %2111, %v383_v22  }
  0x3f   : > { %494 = vperm.xlu1 %2112, %v384_v26  }
  0x40   : > { %1126 = vmatmul.mubr.bf16.gmra.mrb[12].mxu0 %v2167_v47  ;;  %499 = vperm.xlu0 %2111, %v385_v27   ;;  %v2216_v47 = vld [vmem:[%s2403_s12 + $0x168] ss:$16 sps:$4 sm:$0xff]  }
  0x41   : > { %1287 = vmatmul.mubr.bf16.gmra.mrb[12].mxu1 %v2168_v48  ;;  %1133 = vmatprep.mubr.bf16.mxu0 %v2169_v49  ;;  %v2217_v48 = vld [vmem:[%s2403_s12 + $0x184] ss:$16 sps:$4 sm:$0xff]   ;;  %v2219_v49 = vld [vmem:[%s2403_s12 + $0x18c] ss:$16 sps:$4 sm:$0xff]  }
  0x42   : > { %1294 = vmatprep.mubr.bf16.mxu1 %v2171_v50  ;;  %v396_v50 = vld [vmem:[%s2433_s18 + $0xf8] sm:$0xff] }
  0x43   : > { %504 = vperm.xlu1 %2112, %v386_v28  }
  0x44   : > { %509 = vperm.xlu0 %2111, %v387_v30  }
  0x47   : > { %514 = vperm.xlu1 %2112, %v388_v34  }
  0x48   : > { %1134 = vmatmul.mubr.bf16.gmra.mrb[16].mxu0 %v2173_v52  ;;  %519 = vperm.xlu0 %2111, %v389_v35   ;;  %v2222_v52 = vld [vmem:[%s2403_s12 + $0x188] ss:$16 sps:$4 sm:$0xff]  }
  0x49   : > { %1295 = vmatmul.mubr.bf16.gmra.mrb[16].mxu1 %v2174_v53  ;;  %1141 = vmatprep.mubr.bf16.mxu0 %v2175_v56  ;;  %v2223_v53 = vld [vmem:[%s2403_s12 + $0x1a4] ss:$16 sps:$4 sm:$0xff]   ;;  %v2228_v56 = vld [vmem:[%s2403_s12 + $0x1a8] ss:$16 sps:$4 sm:$0xff]  }
  0x4a   : > { %1302 = vmatprep.mubr.bf16.mxu1 %v2177_v57  ;;  %v2229_v57 = vld [vmem:[%s2403_s12 + $0x1c4] ss:$16 sps:$4 sm:$0xff]  }
  0x4b   : > { %524 = vperm.xlu1 %2112, %v390_v36  }
  0x4c   : > { %529 = vperm.xlu0 %2111, %v391_v38  }
  0x4f   : > { %534 = vperm.xlu1 %2112, %v392_v42  }
  0x50   : > { %1142 = vmatmul.mubr.bf16.gmra.mrb[20].mxu0 %v2179_v61  ;;  %539 = vperm.xlu0 %2111, %v393_v43   ;;  %v2235_v61 = vld [vmem:[%s2403_s12 + $0x1e4] ss:$16 sps:$4 sm:$0xff]  }
  0x51   : > { %1303 = vmatmul.mubr.bf16.gmra.mrb[20].mxu1 %v2180_v62  ;;  %1149 = vmatprep.mubr.bf16.mxu0 %v2181_v0  ;;  %v2237_v62 = vld [vmem:[%s2403_s12 + $0x1ec] ss:$16 sps:$4 sm:$0xff]   ;;  %v2240_v0 = vld [vmem:[%s2403_s12 + $0x1e8] ss:$16 sps:$4 sm:$0xff]  }
  0x52   : > { %1310 = vmatprep.mubr.bf16.mxu1 %v2183_v1 }
  0x53   : > { %544 = vperm.xlu1 %2112, %v394_v44  }
  0x54   : > { %549 = vperm.xlu0 %2111, %v395_v46  }
  0x57   : > { %554 = vperm.xlu1 %2112, %v396_v50  }
  0x58   : > { %1150 = vmatmul.mubr.bf16.gmra.mrb[24].mxu0 %v2185_v5 }
  0x59   : > { %1311 = vmatmul.mubr.bf16.gmra.mrb[24].mxu1 %v2186_v7  ;;  %1157 = vmatprep.mubr.bf16.mxu0 %v2187_v8 }
  0x5a   : > { %1318 = vmatprep.mubr.bf16.mxu1 %v2189_v9 }
  0x60   : > { %1158 = vmatmul.mubr.bf16.gmra.mrb[28].mxu0 %v2191_v13 }
  0x61   : > { %1319 = vmatmul.mubr.bf16.gmra.mrb[28].mxu1 %v2192_v15  ;;  %1165 = vmatprep.mubr.bf16.mxu0 %v2193_v16 }
  0x62   : > { %1326 = vmatprep.mubr.bf16.mxu1 %v2195_v17 }
  0x68   : > { %1166 = vmatmul.mubr.bf16.gmra.mrb[32].mxu0 %v2197_v21 }
  0x69   : > { %1327 = vmatmul.mubr.bf16.gmra.mrb[32].mxu1 %v2198_v23  ;;  %1173 = vmatprep.mubr.bf16.mxu0 %v2199_v24 }
  0x6a   : > { %1334 = vmatprep.mubr.bf16.mxu1 %v2201_v25 }
  0x70   : > { %1174 = vmatmul.mubr.bf16.gmra.mrb[36].mxu0 %v2203_v29 }
  0x71   : > { %1335 = vmatmul.mubr.bf16.gmra.mrb[36].mxu1 %v2204_v31  ;;  %1181 = vmatprep.mubr.bf16.mxu0 %v2205_v32 }
  0x72   : > { %1342 = vmatprep.mubr.bf16.mxu1 %v2207_v33 }
  0x78   : > { %1182 = vmatmul.mubr.bf16.gmra.mrb[40].mxu0 %v2209_v37 }
  0x79   : > { %1343 = vmatmul.mubr.bf16.gmra.mrb[40].mxu1 %v2210_v39  ;;  %1189 = vmatprep.mubr.bf16.mxu0 %v2211_v40 }
  0x7a   : > { %1350 = vmatprep.mubr.bf16.mxu1 %v2213_v41 }
  0x80   : > { %1190 = vmatmul.mubr.bf16.gmra.mrb[44].mxu0 %v2215_v45 }
  0x81   : > { %1351 = vmatmul.mubr.bf16.gmra.mrb[44].mxu1 %v2216_v47  ;;  %1197 = vmatprep.mubr.bf16.mxu0 %v2217_v48 }
  0x82   : > { %1358 = vmatprep.mubr.bf16.mxu1 %v2219_v49 }
  0x88   : > { %1198 = vmatmul.mubr.bf16.gmra.mrb[48].mxu0 %v2221_v51 }
  0x89   : > { %1359 = vmatmul.mubr.bf16.gmra.mrb[48].mxu1 %v2222_v52  ;;  %1205 = vmatprep.mubr.bf16.mxu0 %v2223_v53 }
  0x8a   : > { %1366 = vmatprep.mubr.bf16.mxu1 %v2225_v54 }
  0x90   : > { %1206 = vmatmul.mubr.bf16.gmra.mrb[52].mxu0 %v2227_v55 }
  0x91   : > { %1367 = vmatmul.mubr.bf16.gmra.mrb[52].mxu1 %v2228_v56  ;;  %1213 = vmatprep.mubr.bf16.mxu0 %v2229_v57 }
  0x92   : > { %1374 = vmatprep.mubr.bf16.mxu1 %v2231_v58 }
  0x93   : > { %v400_v1 = vpop.permute.xlu0 %399 }
  0x98   : > { %1214 = vmatmul.mubr.bf16.gmra.mrb[56].mxu0 %v2233_v59 }
  0x99   : > { %1375 = vmatmul.mubr.bf16.gmra.mrb[56].mxu1 %v2234_v60  ;;  %1221 = vmatprep.mubr.bf16.mxu0 %v2235_v61 }
  0x9a   : > { %1382 = vmatprep.mubr.bf16.mxu1 %v2237_v62  ;;  %v410_v18 = vpop.permute.xlu1 %409 }
  0x9b   : > { %v405_v3 = vpop.permute.xlu0 %404 }
  0x9e   : > { %v415_v36 = vpop.permute.xlu1 %414 }
  0x9f   : > { %v420_v42 = vpop.permute.xlu0 %419 }
  0xa0   : > { %1222 = vmatmul.mubr.bf16.gmra.mrb[60].mxu0 %v2239_v63 }
  0xa1   : > { %1383 = vmatmul.mubr.bf16.gmra.mrb[60].mxu1 %v2240_v0 }
  0xa2   : > { %v425_v58 = vpop.permute.xlu1 %424 }
  0xa3   : > { %v430_v62 = vpop.permute.xlu0 %429 }
  0xfb   : > { %v1878_v2 = vpop.f32.mrb[0].mxu0 }
  0xfc   : > { %v1990_v4 = vpop.f32.mrb[0].mxu1  ;;  %v1879_v5 = vpop.f32.mrb[1].mxu0 }
  0xfd   : > { %v1880_v6 = vadd.f32 %v1879_v5, %v1878_v2  ;;  %v1991_v7 = vpop.f32.mrb[1].mxu1  ;;  %v1881_v8 = vpop.f32.mrb[2].mxu0 }
  0xfe   : > { %v1992_v9 = vadd.f32 %v1991_v7, %v1990_v4  ;;  %v1993_v10 = vpop.f32.mrb[2].mxu1  ;;  %v1882_v11 = vpop.f32.mrb[3].mxu0 }
  0xff   : > { %v1104_v12 = vadd.f32 %v1880_v6, %v400_v1  ;;  %v1883_v13 = vadd.f32 %v1882_v11, %v1881_v8  ;;  %v1994_v14 = vpop.f32.mrb[3].mxu1 }
 0x100   : > { %v1995_v15 = vadd.f32 %v1994_v14, %v1993_v10 }
 0x101   : > { %v1265_v16 = vadd.f32 %v1992_v9, %v1104_v12  ;;  %v1107_v17 = vadd.f32 %v1883_v13, %v405_v3 }
 0x103   : > { %v1391_v19 = vmax.f32 %v1265_v16, 0.0  ;;  %v1268_v20 = vadd.f32 %v1995_v15, %v1107_v17  ;;  %v1884_v21 = vpop.f32.mrb[4].mxu0  ;;  %v435_v16 = vpop.permute.xlu1 %434 }
 0x104   : > { %v1996_v22 = vpop.f32.mrb[4].mxu1  ;;  %v1885_v23 = vpop.f32.mrb[5].mxu0 }
 0x105   : > { %v1830_v24 = vpack.c.bf16 %v1391_v19, %v1391_v19  ;;  %v1392_v25 = vmax.f32 %v1268_v20, 0.0  ;;  %v1886_v26 = vadd.f32 %v1885_v23, %v1884_v21  ;;  %v1997_v27 = vpop.f32.mrb[5].mxu1  ;;  %v1887_v28 = vpop.f32.mrb[6].mxu0 }
 0x106   : > { %v1998_v29 = vadd.f32 %v1997_v27, %v1996_v22  ;;  %v1999_v30 = vpop.f32.mrb[6].mxu1  ;;  %v1888_v31 = vpop.f32.mrb[7].mxu0 }
 0x107   : > { %1552 = vst.msk [vmem:[%s2517_s22] sm:$0xf] %vm1551_vm0, %v1830_v24  ;;  %v1831_v32 = vpack.c.bf16 %v1392_v25, %v1392_v25  ;;  %v1112_v33 = vadd.f32 %v1886_v26, %v410_v18  ;;  %v1889_v34 = vadd.f32 %v1888_v31, %v1887_v28  ;;  %v2000_v35 = vpop.f32.mrb[7].mxu1  ;;  %v440_v20 = vpop.permute.xlu0 %439 }
 0x108   : > { %v2001_v37 = vadd.f32 %v2000_v35, %v1999_v30 }
 0x109   : > { %1553 = vst.msk [vmem:[%s2517_s22 + $0x4] sm:$0xf] %vm1551_vm0, %v1831_v32  ;;  %v1273_v38 = vadd.f32 %v1998_v29, %v1112_v33  ;;  %v1115_v39 = vadd.f32 %v1889_v34, %v415_v36 }
 0x10b   : > { %v1393_v40 = vmax.f32 %v1273_v38, 0.0  ;;  %v1276_v41 = vadd.f32 %v2001_v37, %v1115_v39  ;;  %v1890_v43 = vpop.f32.mrb[8].mxu0  ;;  %v445_v38 = vpop.permute.xlu1 %444 }
 0x10c   : > { %v2002_v44 = vpop.f32.mrb[8].mxu1  ;;  %v1891_v45 = vpop.f32.mrb[9].mxu0 }
 0x10d   : > { %v1832_v46 = vpack.c.bf16 %v1393_v40, %v1393_v40  ;;  %v1394_v47 = vmax.f32 %v1276_v41, 0.0  ;;  %v1892_v48 = vadd.f32 %v1891_v45, %v1890_v43  ;;  %v2003_v49 = vpop.f32.mrb[9].mxu1  ;;  %v1893_v50 = vpop.f32.mrb[10].mxu0 }
 0x10e   : > { %v2004_v51 = vadd.f32 %v2003_v49, %v2002_v44  ;;  %v2005_v52 = vpop.f32.mrb[10].mxu1  ;;  %v1894_v53 = vpop.f32.mrb[11].mxu0 }
 0x10f   : > { %1554 = vst.msk [vmem:[%s2517_s22 + $0x8] sm:$0xf] %vm1551_vm0, %v1832_v46  ;;  %v1833_v54 = vpack.c.bf16 %v1394_v47, %v1394_v47  ;;  %v1120_v55 = vadd.f32 %v1892_v48, %v420_v42  ;;  %v1895_v56 = vadd.f32 %v1894_v53, %v1893_v50  ;;  %v2006_v57 = vpop.f32.mrb[11].mxu1  ;;  %v450_v42 = vpop.permute.xlu0 %449 }
 0x110   : > { %v2007_v59 = vadd.f32 %v2006_v57, %v2005_v52 }
 0x111   : > { %1555 = vst.msk [vmem:[%s2517_s22 + $0xc] sm:$0xf] %vm1551_vm0, %v1833_v54  ;;  %v1281_v60 = vadd.f32 %v2004_v51, %v1120_v55  ;;  %v1123_v61 = vadd.f32 %v1895_v56, %v425_v58 }
 0x113   : > { %v1395_v63 = vmax.f32 %v1281_v60, 0.0  ;;  %v1284_v0 = vadd.f32 %v2007_v59, %v1123_v61  ;;  %v1896_v1 = vpop.f32.mrb[12].mxu0  ;;  %v455_v60 = vpop.permute.xlu1 %454 }
 0x114   : > { %v2008_v2 = vpop.f32.mrb[12].mxu1  ;;  %v1897_v3 = vpop.f32.mrb[13].mxu0 }
 0x115   : > { %v1834_v4 = vpack.c.bf16 %v1395_v63, %v1395_v63  ;;  %v1396_v5 = vmax.f32 %v1284_v0, 0.0  ;;  %v1898_v6 = vadd.f32 %v1897_v3, %v1896_v1  ;;  %v2009_v7 = vpop.f32.mrb[13].mxu1  ;;  %v1899_v8 = vpop.f32.mrb[14].mxu0 }
 0x116   : > { %v2010_v9 = vadd.f32 %v2009_v7, %v2008_v2  ;;  %v2011_v10 = vpop.f32.mrb[14].mxu1  ;;  %v1900_v11 = vpop.f32.mrb[15].mxu0 }
 0x117   : > { %1556 = vst.msk [vmem:[%s2517_s22 + $0x10] sm:$0xf] %vm1551_vm0, %v1834_v4  ;;  %v1835_v12 = vpack.c.bf16 %v1396_v5, %v1396_v5  ;;  %v1128_v13 = vadd.f32 %v1898_v6, %v430_v62  ;;  %v1901_v14 = vadd.f32 %v1900_v11, %v1899_v8  ;;  %v2012_v15 = vpop.f32.mrb[15].mxu1  ;;  %v460_v0 = vpop.permute.xlu0 %459 }
 0x118   : > { %v2013_v17 = vadd.f32 %v2012_v15, %v2011_v10 }
 0x119   : > { %1557 = vst.msk [vmem:[%s2517_s22 + $0x14] sm:$0xf] %vm1551_vm0, %v1835_v12  ;;  %v1289_v18 = vadd.f32 %v2010_v9, %v1128_v13  ;;  %v1131_v19 = vadd.f32 %v1901_v14, %v435_v16 }
 0x11b   : > { %v1397_v21 = vmax.f32 %v1289_v18, 0.0  ;;  %v1292_v22 = vadd.f32 %v2013_v17, %v1131_v19  ;;  %v1902_v23 = vpop.f32.mrb[16].mxu0  ;;  %v465_v18 = vpop.permute.xlu1 %464 }
 0x11c   : > { %v2014_v24 = vpop.f32.mrb[16].mxu1  ;;  %v1903_v25 = vpop.f32.mrb[17].mxu0 }
 0x11d   : > { %v1836_v26 = vpack.c.bf16 %v1397_v21, %v1397_v21  ;;  %v1398_v27 = vmax.f32 %v1292_v22, 0.0  ;;  %v1904_v28 = vadd.f32 %v1903_v25, %v1902_v23  ;;  %v2015_v29 = vpop.f32.mrb[17].mxu1  ;;  %v1905_v30 = vpop.f32.mrb[18].mxu0 }
 0x11e   : > { %v2016_v31 = vadd.f32 %v2015_v29, %v2014_v24  ;;  %v2017_v32 = vpop.f32.mrb[18].mxu1  ;;  %v1906_v33 = vpop.f32.mrb[19].mxu0 }
 0x11f   : > { %1558 = vst.msk [vmem:[%s2517_s22 + $0x18] sm:$0xf] %vm1551_vm0, %v1836_v26  ;;  %v1837_v34 = vpack.c.bf16 %v1398_v27, %v1398_v27  ;;  %v1136_v35 = vadd.f32 %v1904_v28, %v440_v20  ;;  %v1907_v36 = vadd.f32 %v1906_v33, %v1905_v30  ;;  %v2018_v37 = vpop.f32.mrb[19].mxu1  ;;  %v470_v22 = vpop.permute.xlu0 %469 }
 0x120   : > { %v2019_v39 = vadd.f32 %v2018_v37, %v2017_v32 }
 0x121   : > { %1559 = vst.msk [vmem:[%s2517_s22 + $0x1c] sm:$0xf] %vm1551_vm0, %v1837_v34  ;;  %v1297_v40 = vadd.f32 %v2016_v31, %v1136_v35  ;;  %v1139_v41 = vadd.f32 %v1907_v36, %v445_v38 }
 0x123   : > { %v1399_v43 = vmax.f32 %v1297_v40, 0.0  ;;  %v1300_v44 = vadd.f32 %v2019_v39, %v1139_v41  ;;  %v1908_v45 = vpop.f32.mrb[20].mxu0  ;;  %v475_v40 = vpop.permute.xlu1 %474 }
 0x124   : > { %v2020_v46 = vpop.f32.mrb[20].mxu1  ;;  %v1909_v47 = vpop.f32.mrb[21].mxu0 }
 0x125   : > { %v1838_v48 = vpack.c.bf16 %v1399_v43, %v1399_v43  ;;  %v1400_v49 = vmax.f32 %v1300_v44, 0.0  ;;  %v1910_v50 = vadd.f32 %v1909_v47, %v1908_v45  ;;  %v2021_v51 = vpop.f32.mrb[21].mxu1  ;;  %v1911_v52 = vpop.f32.mrb[22].mxu0 }
 0x126   : > { %v2022_v53 = vadd.f32 %v2021_v51, %v2020_v46  ;;  %v2023_v54 = vpop.f32.mrb[22].mxu1  ;;  %v1912_v55 = vpop.f32.mrb[23].mxu0 }
 0x127   : > { %1560 = vst.msk [vmem:[%s2517_s22 + $0x20] sm:$0xf] %vm1551_vm0, %v1838_v48  ;;  %v1839_v56 = vpack.c.bf16 %v1400_v49, %v1400_v49  ;;  %v1144_v57 = vadd.f32 %v1910_v50, %v450_v42  ;;  %v1913_v58 = vadd.f32 %v1912_v55, %v1911_v52  ;;  %v2024_v59 = vpop.f32.mrb[23].mxu1  ;;  %v480_v44 = vpop.permute.xlu0 %479 }
 0x128   : > { %v2025_v61 = vadd.f32 %v2024_v59, %v2023_v54 }
 0x129   : > { %1561 = vst.msk [vmem:[%s2517_s22 + $0x24] sm:$0xf] %vm1551_vm0, %v1839_v56  ;;  %v1305_v62 = vadd.f32 %v2022_v53, %v1144_v57  ;;  %v1147_v63 = vadd.f32 %v1913_v58, %v455_v60 }
 0x12b   : > { %v1401_v1 = vmax.f32 %v1305_v62, 0.0  ;;  %v1308_v2 = vadd.f32 %v2025_v61, %v1147_v63  ;;  %v1914_v3 = vpop.f32.mrb[24].mxu0  ;;  %v485_v62 = vpop.permute.xlu1 %484 }
 0x12c   : > { %v2026_v4 = vpop.f32.mrb[24].mxu1  ;;  %v1915_v5 = vpop.f32.mrb[25].mxu0 }
 0x12d   : > { %v1840_v6 = vpack.c.bf16 %v1401_v1, %v1401_v1  ;;  %v1402_v7 = vmax.f32 %v1308_v2, 0.0  ;;  %v1916_v8 = vadd.f32 %v1915_v5, %v1914_v3  ;;  %v2027_v9 = vpop.f32.mrb[25].mxu1  ;;  %v1917_v10 = vpop.f32.mrb[26].mxu0 }
 0x12e   : > { %v2028_v11 = vadd.f32 %v2027_v9, %v2026_v4  ;;  %v2029_v12 = vpop.f32.mrb[26].mxu1  ;;  %v1918_v13 = vpop.f32.mrb[27].mxu0 }
 0x12f   : > { %1562 = vst.msk [vmem:[%s2517_s22 + $0x28] sm:$0xf] %vm1551_vm0, %v1840_v6  ;;  %v1841_v14 = vpack.c.bf16 %v1402_v7, %v1402_v7  ;;  %v1152_v15 = vadd.f32 %v1916_v8, %v460_v0  ;;  %v1919_v16 = vadd.f32 %v1918_v13, %v1917_v10  ;;  %v2030_v17 = vpop.f32.mrb[27].mxu1  ;;  %v490_v2 = vpop.permute.xlu0 %489 }
 0x130   : > { %v2031_v19 = vadd.f32 %v2030_v17, %v2029_v12 }
 0x131   : > { %1563 = vst.msk [vmem:[%s2517_s22 + $0x2c] sm:$0xf] %vm1551_vm0, %v1841_v14  ;;  %v1313_v20 = vadd.f32 %v2028_v11, %v1152_v15  ;;  %v1155_v21 = vadd.f32 %v1919_v16, %v465_v18 }
 0x133   : > { %v1403_v23 = vmax.f32 %v1313_v20, 0.0  ;;  %v1316_v24 = vadd.f32 %v2031_v19, %v1155_v21  ;;  %v1920_v25 = vpop.f32.mrb[28].mxu0  ;;  %v495_v20 = vpop.permute.xlu1 %494 }
 0x134   : > { %v2032_v26 = vpop.f32.mrb[28].mxu1  ;;  %v1921_v27 = vpop.f32.mrb[29].mxu0 }
 0x135   : > { %v1842_v28 = vpack.c.bf16 %v1403_v23, %v1403_v23  ;;  %v1404_v29 = vmax.f32 %v1316_v24, 0.0  ;;  %v1922_v30 = vadd.f32 %v1921_v27, %v1920_v25  ;;  %v2033_v31 = vpop.f32.mrb[29].mxu1  ;;  %v1923_v32 = vpop.f32.mrb[30].mxu0 }
 0x136   : > { %v2034_v33 = vadd.f32 %v2033_v31, %v2032_v26  ;;  %v2035_v34 = vpop.f32.mrb[30].mxu1  ;;  %v1924_v35 = vpop.f32.mrb[31].mxu0 }
 0x137   : > { %1564 = vst.msk [vmem:[%s2517_s22 + $0x30] sm:$0xf] %vm1551_vm0, %v1842_v28  ;;  %v1843_v36 = vpack.c.bf16 %v1404_v29, %v1404_v29  ;;  %v1160_v37 = vadd.f32 %v1922_v30, %v470_v22  ;;  %v1925_v38 = vadd.f32 %v1924_v35, %v1923_v32  ;;  %v2036_v39 = vpop.f32.mrb[31].mxu1  ;;  %v500_v24 = vpop.permute.xlu0 %499 }
 0x138   : > { %v2037_v41 = vadd.f32 %v2036_v39, %v2035_v34 }
 0x139   : > { %1565 = vst.msk [vmem:[%s2517_s22 + $0x34] sm:$0xf] %vm1551_vm0, %v1843_v36  ;;  %v1321_v42 = vadd.f32 %v2034_v33, %v1160_v37  ;;  %v1163_v43 = vadd.f32 %v1925_v38, %v475_v40 }
 0x13b   : > { %v1405_v45 = vmax.f32 %v1321_v42, 0.0  ;;  %v1324_v46 = vadd.f32 %v2037_v41, %v1163_v43  ;;  %v1926_v47 = vpop.f32.mrb[32].mxu0  ;;  %v505_v42 = vpop.permute.xlu1 %504 }
 0x13c   : > { %v2038_v48 = vpop.f32.mrb[32].mxu1  ;;  %v1927_v49 = vpop.f32.mrb[33].mxu0 }
 0x13d   : > { %v1844_v50 = vpack.c.bf16 %v1405_v45, %v1405_v45  ;;  %v1406_v51 = vmax.f32 %v1324_v46, 0.0  ;;  %v1928_v52 = vadd.f32 %v1927_v49, %v1926_v47  ;;  %v2039_v53 = vpop.f32.mrb[33].mxu1  ;;  %v1929_v54 = vpop.f32.mrb[34].mxu0 }
 0x13e   : > { %v2040_v55 = vadd.f32 %v2039_v53, %v2038_v48  ;;  %v2041_v56 = vpop.f32.mrb[34].mxu1  ;;  %v1930_v57 = vpop.f32.mrb[35].mxu0 }
 0x13f   : > { %1566 = vst.msk [vmem:[%s2517_s22 + $0x38] sm:$0xf] %vm1551_vm0, %v1844_v50  ;;  %v1845_v58 = vpack.c.bf16 %v1406_v51, %v1406_v51  ;;  %v1168_v59 = vadd.f32 %v1928_v52, %v480_v44  ;;  %v1931_v60 = vadd.f32 %v1930_v57, %v1929_v54  ;;  %v2042_v61 = vpop.f32.mrb[35].mxu1  ;;  %v510_v46 = vpop.permute.xlu0 %509 }
 0x140   : > { %v2043_v63 = vadd.f32 %v2042_v61, %v2041_v56 }
 0x141   : > { %1567 = vst.msk [vmem:[%s2517_s22 + $0x3c] sm:$0xf] %vm1551_vm0, %v1845_v58  ;;  %v1329_v0 = vadd.f32 %v2040_v55, %v1168_v59  ;;  %v1171_v1 = vadd.f32 %v1931_v60, %v485_v62 }
 0x143   : > { %v1407_v3 = vmax.f32 %v1329_v0, 0.0  ;;  %v1332_v4 = vadd.f32 %v2043_v63, %v1171_v1  ;;  %v1932_v5 = vpop.f32.mrb[36].mxu0  ;;  %v515_v0 = vpop.permute.xlu1 %514 }
 0x144   : > { %v2044_v6 = vpop.f32.mrb[36].mxu1  ;;  %v1933_v7 = vpop.f32.mrb[37].mxu0 }
 0x145   : > { %v1846_v8 = vpack.c.bf16 %v1407_v3, %v1407_v3  ;;  %v1408_v9 = vmax.f32 %v1332_v4, 0.0  ;;  %v1934_v10 = vadd.f32 %v1933_v7, %v1932_v5  ;;  %v2045_v11 = vpop.f32.mrb[37].mxu1  ;;  %v1935_v12 = vpop.f32.mrb[38].mxu0 }
 0x146   : > { %v2046_v13 = vadd.f32 %v2045_v11, %v2044_v6  ;;  %v2047_v14 = vpop.f32.mrb[38].mxu1  ;;  %v1936_v15 = vpop.f32.mrb[39].mxu0 }
 0x147   : > { %1568 = vst.msk [vmem:[%s2517_s22 + $0x40] sm:$0xf] %vm1551_vm0, %v1846_v8  ;;  %v1847_v16 = vpack.c.bf16 %v1408_v9, %v1408_v9  ;;  %v1176_v17 = vadd.f32 %v1934_v10, %v490_v2  ;;  %v1937_v18 = vadd.f32 %v1936_v15, %v1935_v12  ;;  %v2048_v19 = vpop.f32.mrb[39].mxu1  ;;  %v520_v4 = vpop.permute.xlu0 %519 }
 0x148   : > { %v2049_v21 = vadd.f32 %v2048_v19, %v2047_v14 }
 0x149   : > { %1569 = vst.msk [vmem:[%s2517_s22 + $0x44] sm:$0xf] %vm1551_vm0, %v1847_v16  ;;  %v1337_v22 = vadd.f32 %v2046_v13, %v1176_v17  ;;  %v1179_v23 = vadd.f32 %v1937_v18, %v495_v20 }
 0x14b   : > { %v1409_v25 = vmax.f32 %v1337_v22, 0.0  ;;  %v1340_v26 = vadd.f32 %v2049_v21, %v1179_v23  ;;  %v1938_v27 = vpop.f32.mrb[40].mxu0  ;;  %v525_v22 = vpop.permute.xlu1 %524 }
 0x14c   : > { %v2050_v28 = vpop.f32.mrb[40].mxu1  ;;  %v1939_v29 = vpop.f32.mrb[41].mxu0 }
 0x14d   : > { %v1848_v30 = vpack.c.bf16 %v1409_v25, %v1409_v25  ;;  %v1410_v31 = vmax.f32 %v1340_v26, 0.0  ;;  %v1940_v32 = vadd.f32 %v1939_v29, %v1938_v27  ;;  %v2051_v33 = vpop.f32.mrb[41].mxu1  ;;  %v1941_v34 = vpop.f32.mrb[42].mxu0 }
 0x14e   : > { %v2052_v35 = vadd.f32 %v2051_v33, %v2050_v28  ;;  %v2053_v36 = vpop.f32.mrb[42].mxu1  ;;  %v1942_v37 = vpop.f32.mrb[43].mxu0 }
 0x14f   : > { %1570 = vst.msk [vmem:[%s2517_s22 + $0x48] sm:$0xf] %vm1551_vm0, %v1848_v30  ;;  %v1849_v38 = vpack.c.bf16 %v1410_v31, %v1410_v31  ;;  %v1184_v39 = vadd.f32 %v1940_v32, %v500_v24  ;;  %v1943_v40 = vadd.f32 %v1942_v37, %v1941_v34  ;;  %v2054_v41 = vpop.f32.mrb[43].mxu1  ;;  %v530_v26 = vpop.permute.xlu0 %529 }
 0x150   : > { %v2055_v43 = vadd.f32 %v2054_v41, %v2053_v36 }
 0x151   : > { %1571 = vst.msk [vmem:[%s2517_s22 + $0x4c] sm:$0xf] %vm1551_vm0, %v1849_v38  ;;  %v1345_v44 = vadd.f32 %v2052_v35, %v1184_v39  ;;  %v1187_v45 = vadd.f32 %v1943_v40, %v505_v42 }
 0x153   : > { %v1411_v47 = vmax.f32 %v1345_v44, 0.0  ;;  %v1348_v48 = vadd.f32 %v2055_v43, %v1187_v45  ;;  %v1944_v49 = vpop.f32.mrb[44].mxu0  ;;  %v535_v44 = vpop.permute.xlu1 %534 }
 0x154   : > { %v2056_v50 = vpop.f32.mrb[44].mxu1  ;;  %v1945_v51 = vpop.f32.mrb[45].mxu0 }
 0x155   : > { %v1850_v52 = vpack.c.bf16 %v1411_v47, %v1411_v47  ;;  %v1412_v53 = vmax.f32 %v1348_v48, 0.0  ;;  %v1946_v54 = vadd.f32 %v1945_v51, %v1944_v49  ;;  %v2057_v55 = vpop.f32.mrb[45].mxu1  ;;  %v1947_v56 = vpop.f32.mrb[46].mxu0 }
 0x156   : > { %v2058_v57 = vadd.f32 %v2057_v55, %v2056_v50  ;;  %v2059_v58 = vpop.f32.mrb[46].mxu1  ;;  %v1948_v59 = vpop.f32.mrb[47].mxu0 }
 0x157   : > { %1572 = vst.msk [vmem:[%s2517_s22 + $0x50] sm:$0xf] %vm1551_vm0, %v1850_v52  ;;  %v1851_v60 = vpack.c.bf16 %v1412_v53, %v1412_v53  ;;  %v1192_v61 = vadd.f32 %v1946_v54, %v510_v46  ;;  %v1949_v62 = vadd.f32 %v1948_v59, %v1947_v56  ;;  %v2060_v63 = vpop.f32.mrb[47].mxu1  ;;  %v540_v48 = vpop.permute.xlu0 %539 }
 0x158   : > { %v2061_v1 = vadd.f32 %v2060_v63, %v2059_v58 }
 0x159   : > { %1573 = vst.msk [vmem:[%s2517_s22 + $0x54] sm:$0xf] %vm1551_vm0, %v1851_v60  ;;  %v1353_v2 = vadd.f32 %v2058_v57, %v1192_v61  ;;  %v1195_v3 = vadd.f32 %v1949_v62, %v515_v0 }
 0x15b   : > { %v1413_v5 = vmax.f32 %v1353_v2, 0.0  ;;  %v1356_v6 = vadd.f32 %v2061_v1, %v1195_v3  ;;  %v1950_v7 = vpop.f32.mrb[48].mxu0  ;;  %v545_v2 = vpop.permute.xlu1 %544 }
 0x15c   : > { %v2062_v8 = vpop.f32.mrb[48].mxu1  ;;  %v1951_v9 = vpop.f32.mrb[49].mxu0 }
 0x15d   : > { %v1852_v10 = vpack.c.bf16 %v1413_v5, %v1413_v5  ;;  %v1414_v11 = vmax.f32 %v1356_v6, 0.0  ;;  %v1952_v12 = vadd.f32 %v1951_v9, %v1950_v7  ;;  %v2063_v13 = vpop.f32.mrb[49].mxu1  ;;  %v1953_v14 = vpop.f32.mrb[50].mxu0 }
 0x15e   : > { %v2064_v15 = vadd.f32 %v2063_v13, %v2062_v8  ;;  %v2065_v16 = vpop.f32.mrb[50].mxu1  ;;  %v1954_v17 = vpop.f32.mrb[51].mxu0 }
 0x15f   : > { %1574 = vst.msk [vmem:[%s2517_s22 + $0x58] sm:$0xf] %vm1551_vm0, %v1852_v10  ;;  %v1853_v18 = vpack.c.bf16 %v1414_v11, %v1414_v11  ;;  %v1200_v19 = vadd.f32 %v1952_v12, %v520_v4  ;;  %v1955_v20 = vadd.f32 %v1954_v17, %v1953_v14  ;;  %v2066_v21 = vpop.f32.mrb[51].mxu1  ;;  %v550_v6 = vpop.permute.xlu0 %549 }
 0x160   : > { %v2067_v23 = vadd.f32 %v2066_v21, %v2065_v16 }
 0x161   : > { %1575 = vst.msk [vmem:[%s2517_s22 + $0x5c] sm:$0xf] %vm1551_vm0, %v1853_v18  ;;  %v1361_v24 = vadd.f32 %v2064_v15, %v1200_v19  ;;  %v1203_v25 = vadd.f32 %v1955_v20, %v525_v22 }
 0x163   : > { %v1415_v27 = vmax.f32 %v1361_v24, 0.0  ;;  %v1364_v28 = vadd.f32 %v2067_v23, %v1203_v25  ;;  %v1956_v29 = vpop.f32.mrb[52].mxu0  ;;  %v555_v24 = vpop.permute.xlu1 %554 }
 0x164   : > { %v2068_v30 = vpop.f32.mrb[52].mxu1  ;;  %v1957_v31 = vpop.f32.mrb[53].mxu0 }
 0x165   : > { %v1854_v32 = vpack.c.bf16 %v1415_v27, %v1415_v27  ;;  %v1416_v33 = vmax.f32 %v1364_v28, 0.0  ;;  %v1958_v34 = vadd.f32 %v1957_v31, %v1956_v29  ;;  %v2069_v35 = vpop.f32.mrb[53].mxu1  ;;  %v1959_v36 = vpop.f32.mrb[54].mxu0 }
 0x166   : > { %v2070_v37 = vadd.f32 %v2069_v35, %v2068_v30  ;;  %v2071_v38 = vpop.f32.mrb[54].mxu1  ;;  %v1960_v39 = vpop.f32.mrb[55].mxu0 }
 0x167   : > { %1576 = vst.msk [vmem:[%s2517_s22 + $0x60] sm:$0xf] %vm1551_vm0, %v1854_v32  ;;  %v1855_v40 = vpack.c.bf16 %v1416_v33, %v1416_v33  ;;  %v1208_v41 = vadd.f32 %v1958_v34, %v530_v26  ;;  %v1961_v42 = vadd.f32 %v1960_v39, %v1959_v36  ;;  %v2072_v43 = vpop.f32.mrb[55].mxu1 }
 0x168   : > { %v2073_v45 = vadd.f32 %v2072_v43, %v2071_v38 }
 0x169   : > { %1577 = vst.msk [vmem:[%s2517_s22 + $0x64] sm:$0xf] %vm1551_vm0, %v1855_v40  ;;  %v1369_v46 = vadd.f32 %v2070_v37, %v1208_v41  ;;  %v1211_v47 = vadd.f32 %v1961_v42, %v535_v44 }
 0x16b   : > { %v1417_v49 = vmax.f32 %v1369_v46, 0.0  ;;  %v1372_v50 = vadd.f32 %v2073_v45, %v1211_v47  ;;  %v1962_v51 = vpop.f32.mrb[56].mxu0 }
 0x16c   : > { %v2074_v52 = vpop.f32.mrb[56].mxu1  ;;  %v1963_v53 = vpop.f32.mrb[57].mxu0 }
 0x16d   : > { %v1856_v54 = vpack.c.bf16 %v1417_v49, %v1417_v49  ;;  %v1418_v55 = vmax.f32 %v1372_v50, 0.0  ;;  %v1964_v56 = vadd.f32 %v1963_v53, %v1962_v51  ;;  %v2075_v57 = vpop.f32.mrb[57].mxu1  ;;  %v1965_v58 = vpop.f32.mrb[58].mxu0 }
 0x16e   : > { %v2076_v59 = vadd.f32 %v2075_v57, %v2074_v52  ;;  %v2077_v60 = vpop.f32.mrb[58].mxu1  ;;  %v1966_v61 = vpop.f32.mrb[59].mxu0 }
 0x16f   : > { %1578 = vst.msk [vmem:[%s2517_s22 + $0x68] sm:$0xf] %vm1551_vm0, %v1856_v54  ;;  %v1857_v62 = vpack.c.bf16 %v1418_v55, %v1418_v55  ;;  %v1216_v63 = vadd.f32 %v1964_v56, %v540_v48  ;;  %v1967_v0 = vadd.f32 %v1966_v61, %v1965_v58  ;;  %v2078_v1 = vpop.f32.mrb[59].mxu1 }
 0x170   : > { %v2079_v3 = vadd.f32 %v2078_v1, %v2077_v60 }
 0x171   : > { %1579 = vst.msk [vmem:[%s2517_s22 + $0x6c] sm:$0xf] %vm1551_vm0, %v1857_v62  ;;  %v1377_v4 = vadd.f32 %v2076_v59, %v1216_v63  ;;  %v1219_v5 = vadd.f32 %v1967_v0, %v545_v2 }
 0x173   : > { %v1419_v7 = vmax.f32 %v1377_v4, 0.0  ;;  %v1380_v8 = vadd.f32 %v2079_v3, %v1219_v5  ;;  %v1968_v9 = vpop.f32.mrb[60].mxu0 }
 0x174   : > { %v2080_v10 = vpop.f32.mrb[60].mxu1  ;;  %v1969_v11 = vpop.f32.mrb[61].mxu0 }
 0x175   : > { %v1858_v12 = vpack.c.bf16 %v1419_v7, %v1419_v7  ;;  %v1420_v13 = vmax.f32 %v1380_v8, 0.0  ;;  %v1970_v14 = vadd.f32 %v1969_v11, %v1968_v9  ;;  %v2081_v15 = vpop.f32.mrb[61].mxu1  ;;  %v1971_v16 = vpop.f32.mrb[62].mxu0 }
 0x176   : > { %v2082_v17 = vadd.f32 %v2081_v15, %v2080_v10  ;;  %v2083_v18 = vpop.f32.mrb[62].mxu1  ;;  %v1972_v19 = vpop.f32.mrb[63].mxu0 }
 0x177   : > { %1580 = vst.msk [vmem:[%s2517_s22 + $0x70] sm:$0xf] %vm1551_vm0, %v1858_v12  ;;  %v1859_v20 = vpack.c.bf16 %v1420_v13, %v1420_v13  ;;  %v1224_v21 = vadd.f32 %v1970_v14, %v550_v6  ;;  %v1973_v22 = vadd.f32 %v1972_v19, %v1971_v16  ;;  %v2084_v23 = vpop.f32.mrb[63].mxu1 }
 0x178   : > { %v2085_v25 = vadd.f32 %v2084_v23, %v2083_v18 }
 0x179   : > { %1581 = vst.msk [vmem:[%s2517_s22 + $0x74] sm:$0xf] %vm1551_vm0, %v1859_v20  ;;  %v1385_v26 = vadd.f32 %v2082_v17, %v1224_v21  ;;  %v1227_v27 = vadd.f32 %v1973_v22, %v555_v24 }
 0x17b   : > { %v1421_v28 = vmax.f32 %v1385_v26, 0.0  ;;  %v1388_v29 = vadd.f32 %v2085_v25, %v1227_v27 }
 0x17d   : > { %v1860_v30 = vpack.c.bf16 %v1421_v28, %v1421_v28  ;;  %v1422_v31 = vmax.f32 %v1388_v29, 0.0 }
 0x17f   : > { %1582 = vst.msk [vmem:[%s2517_s22 + $0x78] sm:$0xf] %vm1551_vm0, %v1860_v30  ;;  %v1861_v32 = vpack.c.bf16 %v1422_v31, %v1422_v31 }
 0x181   : > { %1583 = vst.msk [vmem:[%s2517_s22 + $0x7c] sm:$0xf] %vm1551_vm0, %v1861_v32 }
 0x182 PF: > { %s13_s14 = sadd.s32 1, %s2263_s14   ;;  %s2596_s12 = smov %s2259_s13 }
 0x183   : > { %p10_p5 = scmp.ge.s32.totalorder %s13_s14, 4   ;;  %s2597_s13 = smov %s2599_s15 }
 0x185   :  { %12 = sbr.rel (!%p10_p5) target bundleno = 2 (0x2), region = 68 }

// kernel: vae_forward.13
= control target key start
LH: loop header
LB: loop body
LE: loop exit
PB: predicated region body
PF: predicated region fallthrough
CT: control target
= control target key end

     0   :  { %s1612_s12 = smov 0   ;;  %s1614_s13 = smov 0   ;;  %s1814_s0 = inlined_call_operand.vmem [shape: bf16[256,512], index: 0, kind: input, shape index: {}]   ;;  %s1815_s1 = inlined_call_operand.vmem [shape: bf16[512,128], index: 1, kind: input, shape index: {}]   ;;  %s1816_s2 = inlined_call_operand.vmem [shape: f32[256,1], index: 2, kind: input, shape index: {}]   ;;  %s1817_s3 = inlined_call_operand.vmem [shape: bf16[256,128], index: 3, kind: output, shape index: {}]  }
   0x1   :  { %s1616_s14 = smov 0  }
   0x2 LB: > { %s25_s15 = sadd.s32 1, %s1585_s13  ;;  %p1178_p0 = scmp.ge.s32.totalorder %s1589_s14, 1  ;;  %s1589_s14 = sphi %s1616_s14, %s13_s14   ;;  %s1585_s13 = sphi %s1614_s13, %s1819_s13   ;;  %s1581_s12 = sphi %s1612_s12, %s1818_s12  }
   0x3   : > { %p27_p1 = scmp.ge.s32.totalorder %s25_s15, 2  ;;  %p173_p2 = scmp.lt.s32.totalorder %s1589_s14, 3 }
   0x5   : > { %s1821_s15 = smov (%p27_p1, %s25_s15), 0  ;;  %p174_p3 = pnand %p1178_p0, %p173_p2 }
   0x6   : > { %v1487_v0 = vld [vmem:[%s1815_s1 + $0x40] sm:$0xff] (!%p174_p3)   ;;  %v1591_v4 = vmov (!%p174_p3), 0   ;;  %v1491_v5 = vld [vmem:[%s1815_s1 + $0x48] sm:$0xff] (!%p174_p3)   ;;  %v1495_v9 = vld [vmem:[%s1815_s1 + $0x50] sm:$0xff] (!%p174_p3)   ;;  %s1179_s25 = sshll.u32 (!%p174_p3), %s1581_s12, 4 }
   0x7   : > { %177 = sbr.rel (%p174_p3) target bundleno = 322 (0x142), region = 32  ;;  %v1488_v1 = vld [vmem:[%s1815_s1 + $0xc0] sm:$0xff] (!%p174_p3)   ;;  %1332 = vmatprep.subr.bf16.mxu0 (!%p174_p3), %v1487_v0  ;;  %1485 = vset.pattern.permute.xlu0 (!%p174_p3), %v1591_v4  ;;  %v1492_v6 = vld [vmem:[%s1815_s1 + $0xc8] sm:$0xff] (!%p174_p3)   ;;  %v1496_v10 = vld [vmem:[%s1815_s1 + $0xd0] sm:$0xff] (!%p174_p3)   ;;  %p211_p4 = scmp.lt.s32.totalorder (!%p174_p3), %s1179_s25, 31 }
   0x8   : > { %v1489_v2 = vld [vmem:[%s1815_s1] sm:$0xff] (!%p174_p3)   ;;  %1396 = vmatprep.subr.bf16.mxu1 (!%p174_p3), %v1488_v1  ;;  %1486 = vset.pattern.permute.xlu1 (!%p174_p3), %v1591_v4  ;;  %v1493_v7 = vld [vmem:[%s1815_s1 + $0x8] sm:$0xff] (!%p174_p3)   ;;  %v1497_v11 = vld [vmem:[%s1815_s1 + $0x10] sm:$0xff] (!%p174_p3)  }
   0x9   : > { %v1490_v3 = vld [vmem:[%s1815_s1 + $0x80] sm:$0xff] (!%p174_p3)   ;;  %1333 = vmatpush3.bf16.msra.mxu0 (!%p174_p3), %v1489_v2  ;;  %v1494_v8 = vld [vmem:[%s1815_s1 + $0x88] sm:$0xff] (!%p174_p3)   ;;  %v1498_v12 = vld [vmem:[%s1815_s1 + $0x90] sm:$0xff] (!%p174_p3)  }
   0xa   : > { %1397 = vmatpush3.bf16.msra.mxu1 (!%p174_p3), %v1490_v3  ;;  %1334 = vmatprep.subr.bf16.mxu0 (!%p174_p3), %v1491_v5  ;;  %v1499_v13 = vld [vmem:[%s1815_s1 + $0x58] sm:$0xff] (!%p174_p3)   ;;  %v1503_v17 = vld [vmem:[%s1815_s1 + $0x60] sm:$0xff] (!%p174_p3)   ;;  %v1507_v21 = vld [vmem:[%s1815_s1 + $0x68] sm:$0xff] (!%p174_p3)  }
   0xb   : > { %1398 = vmatprep.subr.bf16.mxu1 (!%p174_p3), %v1492_v6  ;;  %v1500_v14 = vld [vmem:[%s1815_s1 + $0xd8] sm:$0xff] (!%p174_p3)   ;;  %v1504_v18 = vld [vmem:[%s1815_s1 + $0xe0] sm:$0xff] (!%p174_p3)   ;;  %v1508_v22 = vld [vmem:[%s1815_s1 + $0xe8] sm:$0xff] (!%p174_p3)  }
   0xc   : > { %v1501_v15 = vld [vmem:[%s1815_s1 + $0x18] sm:$0xff] (!%p174_p3)   ;;  %v1505_v19 = vld [vmem:[%s1815_s1 + $0x20] sm:$0xff] (!%p174_p3)   ;;  %v1509_v23 = vld [vmem:[%s1815_s1 + $0x28] sm:$0xff] (!%p174_p3)  }
   0xd   : > { %1335 = vmatpush3.bf16.msra.mxu0 (!%p174_p3), %v1493_v7  ;;  %v1502_v16 = vld [vmem:[%s1815_s1 + $0x98] sm:$0xff] (!%p174_p3)   ;;  %v1506_v20 = vld [vmem:[%s1815_s1 + $0xa0] sm:$0xff] (!%p174_p3)   ;;  %v1510_v24 = vld [vmem:[%s1815_s1 + $0xa8] sm:$0xff] (!%p174_p3)  }
   0xe   : > { %1399 = vmatpush3.bf16.msra.mxu1 %v1494_v8  ;;  %1336 = vmatprep.subr.bf16.mxu0 %v1495_v9  ;;  %s1823_s25 = smov (!%p211_p4, %s1179_s25), 31  ;;  %v1511_v25 = vld [vmem:[%s1815_s1 + $0x70] sm:$0xff]   ;;  %v1515_v29 = vld [vmem:[%s1815_s1 + $0x78] sm:$0xff]  }
   0xf   : > { %1400 = vmatprep.subr.bf16.mxu1 %v1496_v10  ;;  %v1512_v26 = vld [vmem:[%s1815_s1 + $0xf0] sm:$0xff]   ;;  %s1268_s24 = sshll.u32 %s1823_s25, 4  ;;  %v1516_v30 = vld [vmem:[%s1815_s1 + $0xf8] sm:$0xff]   ;;  %s1183_s11 = sshll.u32 %s1823_s25, 3 }
  0x10   : > { %v1513_v27 = vld [vmem:[%s1815_s1 + $0x30] sm:$0xff]   ;;  %s1729_s12 = scalar_lea.vmem %s1814_s0, %s1268_s24  ;;  %v1517_v31 = vld [vmem:[%s1815_s1 + $0x38] sm:$0xff]   ;;  %s1755_s18 = scalar_lea.vmem %s1816_s2, %s1183_s11 }
  0x11   : > { %1337 = vmatpush3.bf16.msra.mxu0 %v1497_v11  ;;  %v1514_v28 = vld [vmem:[%s1815_s1 + $0xb0] sm:$0xff]   ;;  %v1518_v32 = vld [vmem:[%s1815_s1 + $0xb8] sm:$0xff]   ;;  %v333_v47 = vld [vmem:[%s1755_s18] sm:$0xff]  ;;  %s1185_s19 = sshll.u32 %s1823_s25, 2 }
  0x12   : > { %1401 = vmatpush3.bf16.msra.mxu1 %v1498_v12  ;;  %1338 = vmatprep.subr.bf16.mxu0 %v1499_v13  ;;  %v1519_v33 = vld [vmem:[%s1729_s12] ss:$16 sps:$4 sm:$0xff]   ;;  %v1521_v34 = vld [vmem:[%s1729_s12 + $0x4] ss:$16 sps:$4 sm:$0xff]   ;;  %v1522_v35 = vld [vmem:[%s1729_s12 + $0x8] ss:$16 sps:$4 sm:$0xff]   ;;  %s1795_s22 = scalar_lea.vmem %s1817_s3, %s1185_s19 }
  0x13   : > { %1402 = vmatprep.subr.bf16.mxu1 %v1500_v14  ;;  %v1524_v36 = vld [vmem:[%s1729_s12 + $0xc] ss:$16 sps:$4 sm:$0xff]   ;;  %813 = vmatprep.mubr.bf16.mxu0 %v1521_v34  ;;  %v1525_v37 = vld [vmem:[%s1729_s12 + $0x24] ss:$16 sps:$4 sm:$0xff]   ;;  %v1529_v39 = vld [vmem:[%s1729_s12 + $0x20] ss:$16 sps:$4 sm:$0xff]  }
  0x14   : > { %910 = vmatprep.mubr.bf16.mxu1 %v1524_v36  ;;  %v1527_v38 = vld [vmem:[%s1729_s12 + $0x2c] ss:$16 sps:$4 sm:$0xff]   ;;  %v1530_v40 = vld [vmem:[%s1729_s12 + $0x28] ss:$16 sps:$4 sm:$0xff]   ;;  %v1531_v41 = vld [vmem:[%s1729_s12 + $0x44] ss:$16 sps:$4 sm:$0xff]   ;;  %351 = vperm.xlu0 %1485, %v333_v47  }
  0x15   : > { %1339 = vmatpush3.bf16.msra.mxu0 %v1501_v15  ;;  %v1533_v42 = vld [vmem:[%s1729_s12 + $0x4c] ss:$16 sps:$4 sm:$0xff]   ;;  %v1535_v43 = vld [vmem:[%s1729_s12 + $0x40] ss:$16 sps:$4 sm:$0xff]   ;;  %v1536_v44 = vld [vmem:[%s1729_s12 + $0x48] ss:$16 sps:$4 sm:$0xff]  }
  0x16   : > { %1403 = vmatpush3.bf16.msra.mxu1 %v1502_v16  ;;  %1340 = vmatprep.subr.bf16.mxu0 %v1503_v17  ;;  %v1537_v45 = vld [vmem:[%s1729_s12 + $0x64] ss:$16 sps:$4 sm:$0xff]   ;;  %v1539_v46 = vld [vmem:[%s1729_s12 + $0x6c] ss:$16 sps:$4 sm:$0xff]   ;;  %v1541_v50 = vld [vmem:[%s1729_s12 + $0x60] ss:$16 sps:$4 sm:$0xff]  }
  0x17   : > { %1404 = vmatprep.subr.bf16.mxu1 %v1504_v18  ;;  %v335_v48 = vld [vmem:[%s1755_s18 + $0x10] sm:$0xff]  ;;  %v334_v49 = vld [vmem:[%s1755_s18 + $0x8] sm:$0xff]  ;;  %v336_v51 = vld [vmem:[%s1755_s18 + $0x18] sm:$0xff] }
  0x18   : > { %361 = vperm.xlu1 %1486, %v335_v48   ;;  %v1542_v52 = vld [vmem:[%s1729_s12 + $0x68] ss:$16 sps:$4 sm:$0xff]   ;;  %v1543_v53 = vld [vmem:[%s1729_s12 + $0x84] ss:$16 sps:$4 sm:$0xff]   ;;  %v1545_v54 = vld [vmem:[%s1729_s12 + $0x8c] ss:$16 sps:$4 sm:$0xff]   ;;  %356 = vperm.xlu0 %1485, %v334_v49  }
  0x19   : > { %1341 = vmatpush3.bf16.msra.mxu0 %v1505_v19  ;;  %v337_v55 = vld [vmem:[%s1755_s18 + $0x20] sm:$0xff]  ;;  %v338_v56 = vld [vmem:[%s1755_s18 + $0x28] sm:$0xff]  ;;  %v339_v57 = vld [vmem:[%s1755_s18 + $0x30] sm:$0xff] }
  0x1a   : > { %1405 = vmatpush3.bf16.msra.mxu1 %v1506_v20  ;;  %1342 = vmatprep.subr.bf16.mxu0 %v1507_v21  ;;  %v1547_v58 = vld [vmem:[%s1729_s12 + $0x80] ss:$16 sps:$4 sm:$0xff]   ;;  %v340_v59 = vld [vmem:[%s1755_s18 + $0x38] sm:$0xff]  ;;  %v1549_v61 = vld [vmem:[%s1729_s12 + $0xa4] ss:$16 sps:$4 sm:$0xff]  }
  0x1b   : > { %1406 = vmatprep.subr.bf16.mxu1 %v1508_v22  ;;  %v1548_v60 = vld [vmem:[%s1729_s12 + $0x88] ss:$16 sps:$4 sm:$0xff]   ;;  %v1551_v62 = vld [vmem:[%s1729_s12 + $0xac] ss:$16 sps:$4 sm:$0xff]   ;;  %v341_v63 = vld [vmem:[%s1755_s18 + $0x40] sm:$0xff] }
  0x1c   : > { %366 = vperm.xlu1 %1486, %v336_v51   ;;  %371 = vperm.xlu0 %1485, %v337_v55   ;;  %v342_v0 = vld [vmem:[%s1755_s18 + $0x48] sm:$0xff]  ;;  %v343_v1 = vld [vmem:[%s1755_s18 + $0x50] sm:$0xff]  ;;  %v344_v3 = vld [vmem:[%s1755_s18 + $0x58] sm:$0xff] }
  0x1d   : > { %1343 = vmatpush3.bf16.msra.mxu0 %v1509_v23  ;;  %v1553_v2 = vld [vmem:[%s1729_s12 + $0xa0] ss:$16 sps:$4 sm:$0xff]   ;;  %v1554_v4 = vld [vmem:[%s1729_s12 + $0xa8] ss:$16 sps:$4 sm:$0xff]   ;;  %v1555_v5 = vld [vmem:[%s1729_s12 + $0xc4] ss:$16 sps:$4 sm:$0xff]  }
  0x1e   : > { %1407 = vmatpush3.bf16.msra.mxu1 %v1510_v24  ;;  %1344 = vmatprep.subr.bf16.mxu0 %v1511_v25  ;;  %v1557_v6 = vld [vmem:[%s1729_s12 + $0xcc] ss:$16 sps:$4 sm:$0xff]   ;;  %v345_v7 = vld [vmem:[%s1755_s18 + $0x60] sm:$0xff]  ;;  %v347_v9 = vld [vmem:[%s1755_s18 + $0x70] sm:$0xff] }
  0x1f   : > { %1408 = vmatprep.subr.bf16.mxu1 %v1512_v26  ;;  %v346_v8 = vld [vmem:[%s1755_s18 + $0x68] sm:$0xff]  ;;  %v1559_v10 = vld [vmem:[%s1729_s12 + $0xc0] ss:$16 sps:$4 sm:$0xff]   ;;  %v348_v11 = vld [vmem:[%s1755_s18 + $0x78] sm:$0xff] }
  0x20   : > { %376 = vperm.xlu1 %1486, %v338_v56   ;;  %381 = vperm.xlu0 %1485, %v339_v57   ;;  %v1560_v12 = vld [vmem:[%s1729_s12 + $0xc8] ss:$16 sps:$4 sm:$0xff]   ;;  %v1561_v13 = vld [vmem:[%s1729_s12 + $0xe4] ss:$16 sps:$4 sm:$0xff]   ;;  %v1563_v14 = vld [vmem:[%s1729_s12 + $0xec] ss:$16 sps:$4 sm:$0xff]  }
  0x21   : > { %1345 = vmatpush3.bf16.msra.mxu0 %v1513_v27  ;;  %v1565_v15 = vld [vmem:[%s1729_s12 + $0xe0] ss:$16 sps:$4 sm:$0xff]   ;;  %v1566_v16 = vld [vmem:[%s1729_s12 + $0xe8] ss:$16 sps:$4 sm:$0xff]  }
  0x22   : > { %1409 = vmatpush3.bf16.msra.mxu1 %v1514_v28  ;;  %1346 = vmatprep.subr.bf16.mxu0 %v1515_v29 }
  0x23   : > { %1410 = vmatprep.subr.bf16.mxu1 %v1516_v30 }
  0x24   : > { %386 = vperm.xlu1 %1486, %v340_v59   ;;  %391 = vperm.xlu0 %1485, %v341_v63  }
  0x25   : > { %1347 = vmatpush3.bf16.msra.mxu0 %v1517_v31 }
  0x26   : > { %1411 = vmatpush3.bf16.msra.mxu1 %v1518_v32 }
  0x28   : > { %814 = vmatmul.mubr.bf16.vlgmr.msra.gmra.mrb[0].mxu0 %v1519_v33  ;;  %396 = vperm.xlu1 %1486, %v342_v0  }
  0x29   : > { %911 = vmatmul.mubr.bf16.vlgmr.msra.gmra.mrb[0].mxu1 %v1522_v35  ;;  %821 = vmatprep.mubr.bf16.mxu0 %v1525_v37 }
  0x2a   : > { %918 = vmatprep.mubr.bf16.mxu1 %v1527_v38  ;;  %401 = vperm.xlu0 %1485, %v343_v1  }
  0x2c   : > { %406 = vperm.xlu1 %1486, %v344_v3  }
  0x2e   : > { %411 = vperm.xlu0 %1485, %v345_v7  }
  0x30   : > { %822 = vmatmul.mubr.bf16.gmra.mrb[4].mxu0 %v1529_v39  ;;  %416 = vperm.xlu1 %1486, %v346_v8  }
  0x31   : > { %919 = vmatmul.mubr.bf16.gmra.mrb[4].mxu1 %v1530_v40  ;;  %829 = vmatprep.mubr.bf16.mxu0 %v1531_v41 }
  0x32   : > { %926 = vmatprep.mubr.bf16.mxu1 %v1533_v42  ;;  %421 = vperm.xlu0 %1485, %v347_v9  }
  0x34   : > { %426 = vperm.xlu1 %1486, %v348_v11  }
  0x38   : > { %830 = vmatmul.mubr.bf16.gmra.mrb[8].mxu0 %v1535_v43 }
  0x39   : > { %927 = vmatmul.mubr.bf16.gmra.mrb[8].mxu1 %v1536_v44  ;;  %837 = vmatprep.mubr.bf16.mxu0 %v1537_v45 }
  0x3a   : > { %934 = vmatprep.mubr.bf16.mxu1 %v1539_v46 }
  0x40   : > { %838 = vmatmul.mubr.bf16.gmra.mrb[12].mxu0 %v1541_v50 }
  0x41   : > { %935 = vmatmul.mubr.bf16.gmra.mrb[12].mxu1 %v1542_v52  ;;  %845 = vmatprep.mubr.bf16.mxu0 %v1543_v53 }
  0x42   : > { %942 = vmatprep.mubr.bf16.mxu1 %v1545_v54 }
  0x48   : > { %846 = vmatmul.mubr.bf16.gmra.mrb[16].mxu0 %v1547_v58 }
  0x49   : > { %943 = vmatmul.mubr.bf16.gmra.mrb[16].mxu1 %v1548_v60  ;;  %853 = vmatprep.mubr.bf16.mxu0 %v1549_v61 }
  0x4a   : > { %950 = vmatprep.mubr.bf16.mxu1 %v1551_v62 }
  0x50   : > { %854 = vmatmul.mubr.bf16.gmra.mrb[20].mxu0 %v1553_v2 }
  0x51   : > { %951 = vmatmul.mubr.bf16.gmra.mrb[20].mxu1 %v1554_v4  ;;  %861 = vmatprep.mubr.bf16.mxu0 %v1555_v5 }
  0x52   : > { %958 = vmatprep.mubr.bf16.mxu1 %v1557_v6 }
  0x58   : > { %862 = vmatmul.mubr.bf16.gmra.mrb[24].mxu0 %v1559_v10 }
  0x59   : > { %959 = vmatmul.mubr.bf16.gmra.mrb[24].mxu1 %v1560_v12  ;;  %869 = vmatprep.mubr.bf16.mxu0 %v1561_v13 }
  0x5a   : > { %966 = vmatprep.mubr.bf16.mxu1 %v1563_v14 }
  0x60   : > { %870 = vmatmul.mubr.bf16.gmra.mrb[28].mxu0 %v1565_v15 }
  0x61   : > { %967 = vmatmul.mubr.bf16.gmra.mrb[28].mxu1 %v1566_v16 }
  0x93   : > { %v352_v17 = vpop.permute.xlu0 %351 }
  0x97   : > { %v357_v19 = vpop.permute.xlu0 %356  ;;  %v362_v34 = vpop.permute.xlu1 %361 }
  0x9b   : > { %v367_v51 = vpop.permute.xlu1 %366  ;;  %v372_v56 = vpop.permute.xlu0 %371 }
  0x9f   : > { %v377_v8 = vpop.permute.xlu1 %376  ;;  %v382_v12 = vpop.permute.xlu0 %381 }
  0xfb   : > { %v1348_v18 = vpop.f32.mrb[0].mxu0 }
  0xfc   : > { %v1412_v20 = vpop.f32.mrb[0].mxu1  ;;  %v1349_v21 = vpop.f32.mrb[1].mxu0 }
  0xfd   : > { %v1350_v22 = vadd.f32 %v1349_v21, %v1348_v18  ;;  %v1413_v23 = vpop.f32.mrb[1].mxu1  ;;  %v1351_v24 = vpop.f32.mrb[2].mxu0 }
  0xfe   : > { %v1414_v25 = vadd.f32 %v1413_v23, %v1412_v20  ;;  %v1415_v26 = vpop.f32.mrb[2].mxu1  ;;  %v1352_v27 = vpop.f32.mrb[3].mxu0 }
  0xff   : > { %v816_v28 = vadd.f32 %v1350_v22, %v352_v17  ;;  %v1353_v29 = vadd.f32 %v1352_v27, %v1351_v24  ;;  %v1416_v30 = vpop.f32.mrb[3].mxu1 }
 0x100   : > { %v1417_v31 = vadd.f32 %v1416_v30, %v1415_v26 }
 0x101   : > { %v913_v32 = vadd.f32 %v1414_v25, %v816_v28  ;;  %v819_v33 = vadd.f32 %v1353_v29, %v357_v19  ;;  %v387_v29 = vpop.permute.xlu1 %386 }
 0x103   : > { %v916_v35 = vadd.f32 %v1417_v31, %v819_v33  ;;  %v1354_v36 = vpop.f32.mrb[4].mxu0  ;;  %v975_v39 = vmax.f32 %v913_v32, 0.0  ;;  %v392_v33 = vpop.permute.xlu0 %391 }
 0x104   : > { %v1418_v37 = vpop.f32.mrb[4].mxu1  ;;  %v1355_v38 = vpop.f32.mrb[5].mxu0 }
 0x105   : > { %v976_v40 = vmax.f32 %v916_v35, 0.0  ;;  %v1356_v41 = vadd.f32 %v1355_v38, %v1354_v36  ;;  %v1419_v42 = vpop.f32.mrb[5].mxu1  ;;  %v1357_v43 = vpop.f32.mrb[6].mxu0 }
 0x106   : > { %v1420_v44 = vadd.f32 %v1419_v42, %v1418_v37  ;;  %v1421_v45 = vpop.f32.mrb[6].mxu1  ;;  %v1358_v46 = vpop.f32.mrb[7].mxu0 }
 0x107   : > { %v1288_v47 = vpack.c.bf16 %v976_v40, %v975_v39  ;;  %v824_v48 = vadd.f32 %v1356_v41, %v362_v34  ;;  %v1359_v49 = vadd.f32 %v1358_v46, %v1357_v43  ;;  %v1422_v50 = vpop.f32.mrb[7].mxu1 }
 0x108   : > { %v1423_v52 = vadd.f32 %v1422_v50, %v1421_v45  ;;  %v397_v50 = vpop.permute.xlu1 %396 }
 0x109   : > { %1289 = vst [vmem:[%s1795_s22] sm:$0xff] %v1288_v47   ;;  %v921_v53 = vadd.f32 %v1420_v44, %v824_v48  ;;  %v827_v54 = vadd.f32 %v1359_v49, %v367_v51 }
 0x10b   : > { %v924_v55 = vadd.f32 %v1423_v52, %v827_v54  ;;  %v1360_v57 = vpop.f32.mrb[8].mxu0  ;;  %v977_v60 = vmax.f32 %v921_v53, 0.0  ;;  %v402_v54 = vpop.permute.xlu0 %401 }
 0x10c   : > { %v1424_v58 = vpop.f32.mrb[8].mxu1  ;;  %v1361_v59 = vpop.f32.mrb[9].mxu0 }
 0x10d   : > { %v978_v61 = vmax.f32 %v924_v55, 0.0  ;;  %v1362_v62 = vadd.f32 %v1361_v59, %v1360_v57  ;;  %v1425_v63 = vpop.f32.mrb[9].mxu1  ;;  %v1363_v0 = vpop.f32.mrb[10].mxu0 }
 0x10e   : > { %v1426_v1 = vadd.f32 %v1425_v63, %v1424_v58  ;;  %v1427_v2 = vpop.f32.mrb[10].mxu1  ;;  %v1364_v3 = vpop.f32.mrb[11].mxu0 }
 0x10f   : > { %v1293_v4 = vpack.c.bf16 %v978_v61, %v977_v60  ;;  %v832_v5 = vadd.f32 %v1362_v62, %v372_v56  ;;  %v1365_v6 = vadd.f32 %v1364_v3, %v1363_v0  ;;  %v1428_v7 = vpop.f32.mrb[11].mxu1 }
 0x110   : > { %v1429_v9 = vadd.f32 %v1428_v7, %v1427_v2  ;;  %v407_v7 = vpop.permute.xlu1 %406 }
 0x111   : > { %1325 = vst [vmem:[%s1795_s22 + $0x8] sm:$0xff] %v1293_v4   ;;  %v929_v10 = vadd.f32 %v1426_v1, %v832_v5  ;;  %v835_v11 = vadd.f32 %v1365_v6, %v377_v8 }
 0x113   : > { %v932_v13 = vadd.f32 %v1429_v9, %v835_v11  ;;  %v1366_v14 = vpop.f32.mrb[12].mxu0  ;;  %v979_v17 = vmax.f32 %v929_v10, 0.0  ;;  %v412_v11 = vpop.permute.xlu0 %411 }
 0x114   : > { %v1430_v15 = vpop.f32.mrb[12].mxu1  ;;  %v1367_v16 = vpop.f32.mrb[13].mxu0 }
 0x115   : > { %v980_v18 = vmax.f32 %v932_v13, 0.0  ;;  %v1368_v19 = vadd.f32 %v1367_v16, %v1366_v14  ;;  %v1431_v20 = vpop.f32.mrb[13].mxu1  ;;  %v1369_v21 = vpop.f32.mrb[14].mxu0 }
 0x116   : > { %v1432_v22 = vadd.f32 %v1431_v20, %v1430_v15  ;;  %v1433_v23 = vpop.f32.mrb[14].mxu1  ;;  %v1370_v24 = vpop.f32.mrb[15].mxu0 }
 0x117   : > { %v1298_v25 = vpack.c.bf16 %v980_v18, %v979_v17  ;;  %v840_v26 = vadd.f32 %v1368_v19, %v382_v12  ;;  %v1371_v27 = vadd.f32 %v1370_v24, %v1369_v21  ;;  %v1434_v28 = vpop.f32.mrb[15].mxu1 }
 0x118   : > { %v1435_v30 = vadd.f32 %v1434_v28, %v1433_v23  ;;  %v417_v28 = vpop.permute.xlu1 %416 }
 0x119   : > { %1326 = vst [vmem:[%s1795_s22 + $0x10] sm:$0xff] %v1298_v25   ;;  %v937_v31 = vadd.f32 %v1432_v22, %v840_v26  ;;  %v843_v32 = vadd.f32 %v1371_v27, %v387_v29 }
 0x11b   : > { %v940_v34 = vadd.f32 %v1435_v30, %v843_v32  ;;  %v1372_v35 = vpop.f32.mrb[16].mxu0  ;;  %v981_v38 = vmax.f32 %v937_v31, 0.0  ;;  %v422_v32 = vpop.permute.xlu0 %421 }
 0x11c   : > { %v1436_v36 = vpop.f32.mrb[16].mxu1  ;;  %v1373_v37 = vpop.f32.mrb[17].mxu0 }
 0x11d   : > { %v982_v39 = vmax.f32 %v940_v34, 0.0  ;;  %v1374_v40 = vadd.f32 %v1373_v37, %v1372_v35  ;;  %v1437_v41 = vpop.f32.mrb[17].mxu1  ;;  %v1375_v42 = vpop.f32.mrb[18].mxu0 }
 0x11e   : > { %v1438_v43 = vadd.f32 %v1437_v41, %v1436_v36  ;;  %v1439_v44 = vpop.f32.mrb[18].mxu1  ;;  %v1376_v45 = vpop.f32.mrb[19].mxu0 }
 0x11f   : > { %v1303_v46 = vpack.c.bf16 %v982_v39, %v981_v38  ;;  %v848_v47 = vadd.f32 %v1374_v40, %v392_v33  ;;  %v1377_v48 = vadd.f32 %v1376_v45, %v1375_v42  ;;  %v1440_v49 = vpop.f32.mrb[19].mxu1 }
 0x120   : > { %v1441_v51 = vadd.f32 %v1440_v49, %v1439_v44  ;;  %v427_v49 = vpop.permute.xlu1 %426 }
 0x121   : > { %1327 = vst [vmem:[%s1795_s22 + $0x18] sm:$0xff] %v1303_v46   ;;  %v945_v52 = vadd.f32 %v1438_v43, %v848_v47  ;;  %v851_v53 = vadd.f32 %v1377_v48, %v397_v50 }
 0x123   : > { %v948_v55 = vadd.f32 %v1441_v51, %v851_v53  ;;  %v1378_v56 = vpop.f32.mrb[20].mxu0  ;;  %v983_v59 = vmax.f32 %v945_v52, 0.0 }
 0x124   : > { %v1442_v57 = vpop.f32.mrb[20].mxu1  ;;  %v1379_v58 = vpop.f32.mrb[21].mxu0 }
 0x125   : > { %v984_v60 = vmax.f32 %v948_v55, 0.0  ;;  %v1380_v61 = vadd.f32 %v1379_v58, %v1378_v56  ;;  %v1443_v62 = vpop.f32.mrb[21].mxu1  ;;  %v1381_v63 = vpop.f32.mrb[22].mxu0 }
 0x126   : > { %v1444_v0 = vadd.f32 %v1443_v62, %v1442_v57  ;;  %v1445_v1 = vpop.f32.mrb[22].mxu1  ;;  %v1382_v2 = vpop.f32.mrb[23].mxu0 }
 0x127   : > { %v1308_v3 = vpack.c.bf16 %v984_v60, %v983_v59  ;;  %v856_v4 = vadd.f32 %v1380_v61, %v402_v54  ;;  %v1383_v5 = vadd.f32 %v1382_v2, %v1381_v63  ;;  %v1446_v6 = vpop.f32.mrb[23].mxu1 }
 0x128   : > { %v1447_v8 = vadd.f32 %v1446_v6, %v1445_v1 }
 0x129   : > { %1328 = vst [vmem:[%s1795_s22 + $0x20] sm:$0xff] %v1308_v3   ;;  %v953_v9 = vadd.f32 %v1444_v0, %v856_v4  ;;  %v859_v10 = vadd.f32 %v1383_v5, %v407_v7 }
 0x12b   : > { %v956_v12 = vadd.f32 %v1447_v8, %v859_v10  ;;  %v1384_v13 = vpop.f32.mrb[24].mxu0  ;;  %v985_v16 = vmax.f32 %v953_v9, 0.0 }
 0x12c   : > { %v1448_v14 = vpop.f32.mrb[24].mxu1  ;;  %v1385_v15 = vpop.f32.mrb[25].mxu0 }
 0x12d   : > { %v986_v17 = vmax.f32 %v956_v12, 0.0  ;;  %v1386_v18 = vadd.f32 %v1385_v15, %v1384_v13  ;;  %v1449_v19 = vpop.f32.mrb[25].mxu1  ;;  %v1387_v20 = vpop.f32.mrb[26].mxu0 }
 0x12e   : > { %v1450_v21 = vadd.f32 %v1449_v19, %v1448_v14  ;;  %v1451_v22 = vpop.f32.mrb[26].mxu1  ;;  %v1388_v23 = vpop.f32.mrb[27].mxu0 }
 0x12f   : > { %v1313_v24 = vpack.c.bf16 %v986_v17, %v985_v16  ;;  %v864_v25 = vadd.f32 %v1386_v18, %v412_v11  ;;  %v1389_v26 = vadd.f32 %v1388_v23, %v1387_v20  ;;  %v1452_v27 = vpop.f32.mrb[27].mxu1 }
 0x130   : > { %v1453_v29 = vadd.f32 %v1452_v27, %v1451_v22 }
 0x131   : > { %1329 = vst [vmem:[%s1795_s22 + $0x28] sm:$0xff] %v1313_v24   ;;  %v961_v30 = vadd.f32 %v1450_v21, %v864_v25  ;;  %v867_v31 = vadd.f32 %v1389_v26, %v417_v28 }
 0x133   : > { %v964_v33 = vadd.f32 %v1453_v29, %v867_v31  ;;  %v1390_v34 = vpop.f32.mrb[28].mxu0  ;;  %v987_v37 = vmax.f32 %v961_v30, 0.0 }
 0x134   : > { %v1454_v35 = vpop.f32.mrb[28].mxu1  ;;  %v1391_v36 = vpop.f32.mrb[29].mxu0 }
 0x135   : > { %v988_v38 = vmax.f32 %v964_v33, 0.0  ;;  %v1392_v39 = vadd.f32 %v1391_v36, %v1390_v34  ;;  %v1455_v40 = vpop.f32.mrb[29].mxu1  ;;  %v1393_v41 = vpop.f32.mrb[30].mxu0 }
 0x136   : > { %v1456_v42 = vadd.f32 %v1455_v40, %v1454_v35  ;;  %v1457_v43 = vpop.f32.mrb[30].mxu1  ;;  %v1394_v44 = vpop.f32.mrb[31].mxu0 }
 0x137   : > { %v1318_v45 = vpack.c.bf16 %v988_v38, %v987_v37  ;;  %v872_v46 = vadd.f32 %v1392_v39, %v422_v32  ;;  %v1395_v47 = vadd.f32 %v1394_v44, %v1393_v41  ;;  %v1458_v48 = vpop.f32.mrb[31].mxu1 }
 0x138   : > { %v1459_v50 = vadd.f32 %v1458_v48, %v1457_v43 }
 0x139   : > { %1330 = vst [vmem:[%s1795_s22 + $0x30] sm:$0xff] %v1318_v45   ;;  %v969_v51 = vadd.f32 %v1456_v42, %v872_v46  ;;  %v875_v52 = vadd.f32 %v1395_v47, %v427_v49 }
 0x13b   : > { %v972_v53 = vadd.f32 %v1459_v50, %v875_v52  ;;  %v989_v54 = vmax.f32 %v969_v51, 0.0 }
 0x13d   : > { %v990_v55 = vmax.f32 %v972_v53, 0.0 }
 0x13f   : > { %v1323_v56 = vpack.c.bf16 %v990_v55, %v989_v54 }
 0x141   : > { %1331 = vst [vmem:[%s1795_s22 + $0x38] sm:$0xff] %v1323_v56  }
 0x142 PF: > { %s13_s14 = sadd.s32 1, %s1589_s14   ;;  %s1818_s12 = smov %s1585_s13 }
 0x143   : > { %p10_p5 = scmp.ge.s32.totalorder %s13_s14, 4   ;;  %s1819_s13 = smov %s1821_s15 }
 0x145   :  { %12 = sbr.rel (!%p10_p5) target bundleno = 2 (0x2), region = 68 }

// kernel: vae_forward.14
= control target key start
LH: loop header
LB: loop body
LE: loop exit
PB: predicated region body
PF: predicated region fallthrough
CT: control target
= control target key end

     0   :  { %v1375_v1 = vmov 0   ;;  %s1780_s1 = inlined_call_operand.vmem [shape: bf16[256,512], index: 1, kind: input, shape index: {}]   ;;  %s1781_s0 = inlined_call_operand.vmem [shape: bf16[128,256], index: 0, kind: input, shape index: {}]   ;;  %s1782_s2 = inlined_call_operand.vmem [shape: f32[128,1], index: 2, kind: input, shape index: {}]   ;;  %s1783_s3 = inlined_call_operand.vmem [shape: bf16[128,512], index: 3, kind: output, shape index: {}]  }
   0x1   :  { %v1255_v0 = vld [vmem:[%s1780_s1 + $0x4] ss:$16 sps:$4 sm:$0xff]   ;;  %1253 = vset.pattern.permute.xlu0 %v1375_v1  ;;  %1254 = vset.pattern.permute.xlu1 %v1375_v1  ;;  %v1257_v2 = vld [vmem:[%s1780_s1 + $0xc] ss:$16 sps:$4 sm:$0xff]   ;;  %v1259_v3 = vld [vmem:[%s1780_s1] ss:$16 sps:$4 sm:$0xff]  }
   0x2   :  { %590 = vmatprep.subr.bf16.mxu0 %v1255_v0  ;;  %v1260_v4 = vld [vmem:[%s1780_s1 + $0x8] ss:$16 sps:$4 sm:$0xff]   ;;  %703 = vmatprep.subr.bf16.mxu1 %v1257_v2  ;;  %v1261_v5 = vld [vmem:[%s1780_s1 + $0x24] ss:$16 sps:$4 sm:$0xff]   ;;  %v1263_v6 = vld [vmem:[%s1780_s1 + $0x2c] ss:$16 sps:$4 sm:$0xff]  }
   0x3   :  { %591 = vmatpush1.bf16.msra.mxu0 %v1259_v3  ;;  %704 = vmatpush1.bf16.msra.mxu1 %v1260_v4  ;;  %v1265_v7 = vld [vmem:[%s1780_s1 + $0x20] ss:$16 sps:$4 sm:$0xff]   ;;  %v1266_v8 = vld [vmem:[%s1780_s1 + $0x28] ss:$16 sps:$4 sm:$0xff]   ;;  %v1267_v9 = vld [vmem:[%s1780_s1 + $0x44] ss:$16 sps:$4 sm:$0xff]  }
   0x4   :  { %592 = vmatprep.subr.bf16.mxu0 %v1261_v5  ;;  %705 = vmatprep.subr.bf16.mxu1 %v1263_v6  ;;  %v1269_v10 = vld [vmem:[%s1780_s1 + $0x4c] ss:$16 sps:$4 sm:$0xff]   ;;  %v1271_v11 = vld [vmem:[%s1780_s1 + $0x40] ss:$16 sps:$4 sm:$0xff]   ;;  %v1272_v12 = vld [vmem:[%s1780_s1 + $0x48] ss:$16 sps:$4 sm:$0xff]  }
   0x5   :  { %v1273_v13 = vld [vmem:[%s1780_s1 + $0x64] ss:$16 sps:$4 sm:$0xff]   ;;  %v1275_v14 = vld [vmem:[%s1780_s1 + $0x6c] ss:$16 sps:$4 sm:$0xff]   ;;  %v1277_v15 = vld [vmem:[%s1780_s1 + $0x60] ss:$16 sps:$4 sm:$0xff]  }
   0x6   :  { %v1278_v16 = vld [vmem:[%s1780_s1 + $0x68] ss:$16 sps:$4 sm:$0xff]   ;;  %v1279_v17 = vld [vmem:[%s1780_s1 + $0x84] ss:$16 sps:$4 sm:$0xff]   ;;  %v1281_v18 = vld [vmem:[%s1780_s1 + $0x8c] ss:$16 sps:$4 sm:$0xff]  }
   0x7   :  { %593 = vmatpush1.bf16.msra.mxu0 %v1265_v7  ;;  %706 = vmatpush1.bf16.msra.mxu1 %v1266_v8  ;;  %v1283_v19 = vld [vmem:[%s1780_s1 + $0x80] ss:$16 sps:$4 sm:$0xff]   ;;  %v1284_v20 = vld [vmem:[%s1780_s1 + $0x88] ss:$16 sps:$4 sm:$0xff]   ;;  %v1285_v21 = vld [vmem:[%s1780_s1 + $0xa4] ss:$16 sps:$4 sm:$0xff]  }
   0x8   :  { %594 = vmatprep.subr.bf16.mxu0 %v1267_v9  ;;  %707 = vmatprep.subr.bf16.mxu1 %v1269_v10  ;;  %v1287_v22 = vld [vmem:[%s1780_s1 + $0xac] ss:$16 sps:$4 sm:$0xff]   ;;  %v1289_v23 = vld [vmem:[%s1780_s1 + $0xa0] ss:$16 sps:$4 sm:$0xff]   ;;  %v1290_v24 = vld [vmem:[%s1780_s1 + $0xa8] ss:$16 sps:$4 sm:$0xff]  }
   0x9   :  { %v1291_v25 = vld [vmem:[%s1780_s1 + $0xc4] ss:$16 sps:$4 sm:$0xff]   ;;  %v1293_v26 = vld [vmem:[%s1780_s1 + $0xcc] ss:$16 sps:$4 sm:$0xff]   ;;  %v1295_v27 = vld [vmem:[%s1780_s1 + $0xc0] ss:$16 sps:$4 sm:$0xff]  }
   0xa   :  { %v1296_v28 = vld [vmem:[%s1780_s1 + $0xc8] ss:$16 sps:$4 sm:$0xff]   ;;  %v1297_v29 = vld [vmem:[%s1780_s1 + $0xe4] ss:$16 sps:$4 sm:$0xff]   ;;  %v1299_v30 = vld [vmem:[%s1780_s1 + $0xec] ss:$16 sps:$4 sm:$0xff]  }
   0xb   :  { %595 = vmatpush1.bf16.msra.mxu0 %v1271_v11  ;;  %708 = vmatpush1.bf16.msra.mxu1 %v1272_v12  ;;  %v1301_v31 = vld [vmem:[%s1780_s1 + $0xe0] ss:$16 sps:$4 sm:$0xff]   ;;  %v1302_v32 = vld [vmem:[%s1780_s1 + $0xe8] ss:$16 sps:$4 sm:$0xff]   ;;  %v1303_v33 = vld [vmem:[%s1780_s1 + $0x104] ss:$16 sps:$4 sm:$0xff]  }
   0xc   :  { %596 = vmatprep.subr.bf16.mxu0 %v1273_v13  ;;  %709 = vmatprep.subr.bf16.mxu1 %v1275_v14  ;;  %v1305_v34 = vld [vmem:[%s1780_s1 + $0x10c] ss:$16 sps:$4 sm:$0xff]   ;;  %v1307_v35 = vld [vmem:[%s1780_s1 + $0x100] ss:$16 sps:$4 sm:$0xff]   ;;  %v1308_v36 = vld [vmem:[%s1780_s1 + $0x108] ss:$16 sps:$4 sm:$0xff]  }
   0xd   :  { %v1309_v37 = vld [vmem:[%s1780_s1 + $0x124] ss:$16 sps:$4 sm:$0xff]   ;;  %v1311_v38 = vld [vmem:[%s1780_s1 + $0x12c] ss:$16 sps:$4 sm:$0xff]   ;;  %v1313_v39 = vld [vmem:[%s1780_s1 + $0x120] ss:$16 sps:$4 sm:$0xff]  }
   0xe   :  { %v1314_v40 = vld [vmem:[%s1780_s1 + $0x128] ss:$16 sps:$4 sm:$0xff]   ;;  %v1315_v41 = vld [vmem:[%s1780_s1 + $0x144] ss:$16 sps:$4 sm:$0xff]   ;;  %v1317_v42 = vld [vmem:[%s1780_s1 + $0x14c] ss:$16 sps:$4 sm:$0xff]  }
   0xf   :  { %597 = vmatpush1.bf16.msra.mxu0 %v1277_v15  ;;  %710 = vmatpush1.bf16.msra.mxu1 %v1278_v16  ;;  %v1319_v43 = vld [vmem:[%s1780_s1 + $0x140] ss:$16 sps:$4 sm:$0xff]   ;;  %v1320_v44 = vld [vmem:[%s1780_s1 + $0x148] ss:$16 sps:$4 sm:$0xff]   ;;  %v1321_v45 = vld [vmem:[%s1780_s1 + $0x164] ss:$16 sps:$4 sm:$0xff]  }
  0x10   :  { %598 = vmatprep.subr.bf16.mxu0 %v1279_v17  ;;  %711 = vmatprep.subr.bf16.mxu1 %v1281_v18  ;;  %v1323_v46 = vld [vmem:[%s1780_s1 + $0x16c] ss:$16 sps:$4 sm:$0xff]   ;;  %v1325_v47 = vld [vmem:[%s1780_s1 + $0x160] ss:$16 sps:$4 sm:$0xff]   ;;  %v1326_v48 = vld [vmem:[%s1780_s1 + $0x168] ss:$16 sps:$4 sm:$0xff]  }
  0x11   :  { %v1353_v49 = vld [vmem:[%s1781_s0 + $0x4] ss:$8 sps:$4 sm:$0xff]   ;;  %v1331_v52 = vld [vmem:[%s1780_s1 + $0x180] ss:$16 sps:$4 sm:$0xff]   ;;  %v1332_v53 = vld [vmem:[%s1780_s1 + $0x188] ss:$16 sps:$4 sm:$0xff]  }
  0x12   :  { %v1327_v50 = vld [vmem:[%s1780_s1 + $0x184] ss:$16 sps:$4 sm:$0xff]   ;;  %v1329_v51 = vld [vmem:[%s1780_s1 + $0x18c] ss:$16 sps:$4 sm:$0xff]   ;;  %622 = vmatprep.mubr.bf16.mxu0 %v1353_v49  ;;  %735 = vmatprep.mubr.bf16.mxu1 %v1353_v49  ;;  %v1337_v56 = vld [vmem:[%s1780_s1 + $0x1a0] ss:$16 sps:$4 sm:$0xff]  }
  0x13   :  { %599 = vmatpush1.bf16.msra.mxu0 %v1283_v19  ;;  %712 = vmatpush1.bf16.msra.mxu1 %v1284_v20  ;;  %v1333_v54 = vld [vmem:[%s1780_s1 + $0x1a4] ss:$16 sps:$4 sm:$0xff]   ;;  %v1335_v55 = vld [vmem:[%s1780_s1 + $0x1ac] ss:$16 sps:$4 sm:$0xff]   ;;  %v1338_v57 = vld [vmem:[%s1780_s1 + $0x1a8] ss:$16 sps:$4 sm:$0xff]  }
  0x14   :  { %600 = vmatprep.subr.bf16.mxu0 %v1285_v21  ;;  %713 = vmatprep.subr.bf16.mxu1 %v1287_v22  ;;  %v1339_v58 = vld [vmem:[%s1780_s1 + $0x1c4] ss:$16 sps:$4 sm:$0xff]   ;;  %v1341_v59 = vld [vmem:[%s1780_s1 + $0x1cc] ss:$16 sps:$4 sm:$0xff]   ;;  %v1343_v63 = vld [vmem:[%s1780_s1 + $0x1c0] ss:$16 sps:$4 sm:$0xff]  }
  0x15   :  { %v94_v60 = vld [vmem:[%s1782_s2] sm:$0xff]  ;;  %v96_v61 = vld [vmem:[%s1782_s2 + $0x10] sm:$0xff]  ;;  %v95_v62 = vld [vmem:[%s1782_s2 + $0x8] sm:$0xff] }
  0x16   :  { %112 = vperm.xlu0 %1253, %v94_v60   ;;  %122 = vperm.xlu1 %1254, %v96_v61   ;;  %v1344_v0 = vld [vmem:[%s1780_s1 + $0x1c8] ss:$16 sps:$4 sm:$0xff]   ;;  %v1345_v2 = vld [vmem:[%s1780_s1 + $0x1e4] ss:$16 sps:$4 sm:$0xff]   ;;  %v1347_v3 = vld [vmem:[%s1780_s1 + $0x1ec] ss:$16 sps:$4 sm:$0xff]  }
  0x17   :  { %601 = vmatpush1.bf16.msra.mxu0 %v1289_v23  ;;  %714 = vmatpush1.bf16.msra.mxu1 %v1290_v24  ;;  %v97_v1 = vld [vmem:[%s1782_s2 + $0x18] sm:$0xff]  ;;  %v98_v4 = vld [vmem:[%s1782_s2 + $0x20] sm:$0xff]  ;;  %v99_v7 = vld [vmem:[%s1782_s2 + $0x28] sm:$0xff] }
  0x18   :  { %602 = vmatprep.subr.bf16.mxu0 %v1291_v25  ;;  %715 = vmatprep.subr.bf16.mxu1 %v1293_v26  ;;  %v1349_v5 = vld [vmem:[%s1780_s1 + $0x1e0] ss:$16 sps:$4 sm:$0xff]   ;;  %v1350_v6 = vld [vmem:[%s1780_s1 + $0x1e8] ss:$16 sps:$4 sm:$0xff]   ;;  %v1354_v10 = vld [vmem:[%s1781_s0 + $0x14] ss:$8 sps:$4 sm:$0xff]  }
  0x19   :  { %v1351_v8 = vld [vmem:[%s1781_s0] ss:$8 sps:$4 sm:$0xff]   ;;  %v100_v9 = vld [vmem:[%s1782_s2 + $0x30] sm:$0xff]  ;;  %v101_v11 = vld [vmem:[%s1782_s2 + $0x38] sm:$0xff] }
  0x1a   :  { %117 = vperm.xlu0 %1253, %v95_v62   ;;  %127 = vperm.xlu1 %1254, %v97_v1   ;;  %v102_v12 = vld [vmem:[%s1782_s2 + $0x40] sm:$0xff]  ;;  %v103_v13 = vld [vmem:[%s1782_s2 + $0x48] sm:$0xff]  ;;  %v1356_v14 = vld [vmem:[%s1781_s0 + $0x10] ss:$8 sps:$4 sm:$0xff]  }
  0x1b   :  { %603 = vmatpush1.bf16.msra.mxu0 %v1295_v27  ;;  %716 = vmatpush1.bf16.msra.mxu1 %v1296_v28  ;;  %v104_v15 = vld [vmem:[%s1782_s2 + $0x50] sm:$0xff]  ;;  %v1357_v16 = vld [vmem:[%s1781_s0 + $0x24] ss:$8 sps:$4 sm:$0xff]   ;;  %v105_v17 = vld [vmem:[%s1782_s2 + $0x58] sm:$0xff] }
  0x1c   :  { %604 = vmatprep.subr.bf16.mxu0 %v1297_v29  ;;  %717 = vmatprep.subr.bf16.mxu1 %v1299_v30  ;;  %v106_v18 = vld [vmem:[%s1782_s2 + $0x60] sm:$0xff]  ;;  %v107_v19 = vld [vmem:[%s1782_s2 + $0x68] sm:$0xff]  ;;  %v108_v21 = vld [vmem:[%s1782_s2 + $0x70] sm:$0xff] }
  0x1d   :  { %v1359_v20 = vld [vmem:[%s1781_s0 + $0x20] ss:$8 sps:$4 sm:$0xff]   ;;  %v1360_v22 = vld [vmem:[%s1781_s0 + $0x34] ss:$8 sps:$4 sm:$0xff]   ;;  %v1362_v24 = vld [vmem:[%s1781_s0 + $0x30] ss:$8 sps:$4 sm:$0xff]  }
  0x1e   :  { %132 = vperm.xlu0 %1253, %v98_v4   ;;  %137 = vperm.xlu1 %1254, %v99_v7   ;;  %v109_v23 = vld [vmem:[%s1782_s2 + $0x78] sm:$0xff]  ;;  %v1363_v25 = vld [vmem:[%s1781_s0 + $0x44] ss:$8 sps:$4 sm:$0xff]   ;;  %v1365_v26 = vld [vmem:[%s1781_s0 + $0x40] ss:$8 sps:$4 sm:$0xff]  }
  0x1f   :  { %605 = vmatpush1.bf16.msra.mxu0 %v1301_v31  ;;  %718 = vmatpush1.bf16.msra.mxu1 %v1302_v32  ;;  %v1366_v27 = vld [vmem:[%s1781_s0 + $0x54] ss:$8 sps:$4 sm:$0xff]   ;;  %v1368_v28 = vld [vmem:[%s1781_s0 + $0x50] ss:$8 sps:$4 sm:$0xff]   ;;  %v1369_v29 = vld [vmem:[%s1781_s0 + $0x64] ss:$8 sps:$4 sm:$0xff]  }
  0x20   :  { %606 = vmatprep.subr.bf16.mxu0 %v1303_v33  ;;  %719 = vmatprep.subr.bf16.mxu1 %v1305_v34  ;;  %v1371_v30 = vld [vmem:[%s1781_s0 + $0x60] ss:$8 sps:$4 sm:$0xff]   ;;  %v1372_v31 = vld [vmem:[%s1781_s0 + $0x74] ss:$8 sps:$4 sm:$0xff]   ;;  %v1374_v32 = vld [vmem:[%s1781_s0 + $0x70] ss:$8 sps:$4 sm:$0xff]  }
  0x22   :  { %142 = vperm.xlu0 %1253, %v100_v9   ;;  %147 = vperm.xlu1 %1254, %v101_v11  }
  0x23   :  { %607 = vmatpush1.bf16.msra.mxu0 %v1307_v35  ;;  %720 = vmatpush1.bf16.msra.mxu1 %v1308_v36 }
  0x24   :  { %608 = vmatprep.subr.bf16.mxu0 %v1309_v37  ;;  %721 = vmatprep.subr.bf16.mxu1 %v1311_v38 }
  0x26   :  { %152 = vperm.xlu0 %1253, %v102_v12   ;;  %157 = vperm.xlu1 %1254, %v103_v13  }
  0x27   :  { %609 = vmatpush1.bf16.msra.mxu0 %v1313_v39  ;;  %722 = vmatpush1.bf16.msra.mxu1 %v1314_v40 }
  0x28   :  { %610 = vmatprep.subr.bf16.mxu0 %v1315_v41  ;;  %723 = vmatprep.subr.bf16.mxu1 %v1317_v42 }
  0x2a   :  { %162 = vperm.xlu0 %1253, %v104_v15   ;;  %167 = vperm.xlu1 %1254, %v105_v17  }
  0x2b   :  { %611 = vmatpush1.bf16.msra.mxu0 %v1319_v43  ;;  %724 = vmatpush1.bf16.msra.mxu1 %v1320_v44 }
  0x2c   :  { %612 = vmatprep.subr.bf16.mxu0 %v1321_v45  ;;  %725 = vmatprep.subr.bf16.mxu1 %v1323_v46 }
  0x2e   :  { %172 = vperm.xlu0 %1253, %v106_v18   ;;  %177 = vperm.xlu1 %1254, %v107_v19  }
  0x2f   :  { %613 = vmatpush1.bf16.msra.mxu0 %v1325_v47  ;;  %726 = vmatpush1.bf16.msra.mxu1 %v1326_v48 }
  0x30   :  { %614 = vmatprep.subr.bf16.mxu0 %v1327_v50  ;;  %727 = vmatprep.subr.bf16.mxu1 %v1329_v51 }
  0x32   :  { %182 = vperm.xlu0 %1253, %v108_v21   ;;  %187 = vperm.xlu1 %1254, %v109_v23  }
  0x33   :  { %615 = vmatpush1.bf16.msra.mxu0 %v1331_v52  ;;  %728 = vmatpush1.bf16.msra.mxu1 %v1332_v53 }
  0x34   :  { %616 = vmatprep.subr.bf16.mxu0 %v1333_v54  ;;  %729 = vmatprep.subr.bf16.mxu1 %v1335_v55 }
  0x37   :  { %617 = vmatpush1.bf16.msra.mxu0 %v1337_v56  ;;  %730 = vmatpush1.bf16.msra.mxu1 %v1338_v57 }
  0x38   :  { %618 = vmatprep.subr.bf16.mxu0 %v1339_v58  ;;  %731 = vmatprep.subr.bf16.mxu1 %v1341_v59 }
  0x3b   :  { %619 = vmatpush1.bf16.msra.mxu0 %v1343_v63  ;;  %732 = vmatpush1.bf16.msra.mxu1 %v1344_v0 }
  0x3c   :  { %620 = vmatprep.subr.bf16.mxu0 %v1345_v2  ;;  %733 = vmatprep.subr.bf16.mxu1 %v1347_v3 }
  0x3f   :  { %621 = vmatpush1.bf16.msra.mxu0 %v1349_v5  ;;  %734 = vmatpush1.bf16.msra.mxu1 %v1350_v6 }
  0x42   :  { %623 = vmatmul.mubr.bf16.vlgmr.msra.gmra.mrb[0].mxu0 %v1351_v8  ;;  %736 = vmatmul.mubr.bf16.vlgmr.msra.gmra.mrb[0].mxu1 %v1351_v8 }
  0x43   :  { %632 = vmatprep.mubr.bf16.mxu0 %v1354_v10  ;;  %745 = vmatprep.mubr.bf16.mxu1 %v1354_v10 }
  0x4a   :  { %633 = vmatmul.mubr.bf16.gmra.mrb[4].mxu0 %v1356_v14  ;;  %746 = vmatmul.mubr.bf16.gmra.mrb[4].mxu1 %v1356_v14 }
  0x4b   :  { %642 = vmatprep.mubr.bf16.mxu0 %v1357_v16  ;;  %755 = vmatprep.mubr.bf16.mxu1 %v1357_v16 }
  0x52   :  { %643 = vmatmul.mubr.bf16.gmra.mrb[8].mxu0 %v1359_v20  ;;  %756 = vmatmul.mubr.bf16.gmra.mrb[8].mxu1 %v1359_v20 }
  0x53   :  { %652 = vmatprep.mubr.bf16.mxu0 %v1360_v22  ;;  %765 = vmatprep.mubr.bf16.mxu1 %v1360_v22 }
  0x5a   :  { %653 = vmatmul.mubr.bf16.gmra.mrb[12].mxu0 %v1362_v24  ;;  %766 = vmatmul.mubr.bf16.gmra.mrb[12].mxu1 %v1362_v24 }
  0x5b   :  { %662 = vmatprep.mubr.bf16.mxu0 %v1363_v25  ;;  %775 = vmatprep.mubr.bf16.mxu1 %v1363_v25 }
  0x62   :  { %663 = vmatmul.mubr.bf16.gmra.mrb[16].mxu0 %v1365_v26  ;;  %776 = vmatmul.mubr.bf16.gmra.mrb[16].mxu1 %v1365_v26 }
  0x63   :  { %672 = vmatprep.mubr.bf16.mxu0 %v1366_v27  ;;  %785 = vmatprep.mubr.bf16.mxu1 %v1366_v27 }
  0x6a   :  { %673 = vmatmul.mubr.bf16.gmra.mrb[20].mxu0 %v1368_v28  ;;  %786 = vmatmul.mubr.bf16.gmra.mrb[20].mxu1 %v1368_v28 }
  0x6b   :  { %682 = vmatprep.mubr.bf16.mxu0 %v1369_v29  ;;  %795 = vmatprep.mubr.bf16.mxu1 %v1369_v29 }
  0x72   :  { %683 = vmatmul.mubr.bf16.gmra.mrb[24].mxu0 %v1371_v30  ;;  %796 = vmatmul.mubr.bf16.gmra.mrb[24].mxu1 %v1371_v30 }
  0x73   :  { %692 = vmatprep.mubr.bf16.mxu0 %v1372_v31  ;;  %805 = vmatprep.mubr.bf16.mxu1 %v1372_v31 }
  0x7a   :  { %693 = vmatmul.mubr.bf16.gmra.mrb[28].mxu0 %v1374_v32  ;;  %806 = vmatmul.mubr.bf16.gmra.mrb[28].mxu1 %v1374_v32 }
  0x95   :  { %v113_v33 = vpop.permute.xlu0 %112  ;;  %v123_v35 = vpop.permute.xlu1 %122 }
  0x99   :  { %v118_v34 = vpop.permute.xlu0 %117  ;;  %v128_v62 = vpop.permute.xlu1 %127 }
  0x9d   :  { %v138_v27 = vpop.permute.xlu1 %137  ;;  %v133_v28 = vpop.permute.xlu0 %132 }
 0x115   :  { %v624_v36 = vpop.f32.mrb[0].mxu0  ;;  %v737_v37 = vpop.f32.mrb[0].mxu1 }
 0x116   :  { %v625_v38 = vadd.f32 %v624_v36, %v113_v33  ;;  %v738_v39 = vadd.f32 %v737_v37, %v113_v33  ;;  %v626_v40 = vpop.f32.mrb[1].mxu0  ;;  %v739_v41 = vpop.f32.mrb[1].mxu1 }
 0x117   :  { %v627_v42 = vadd.f32 %v626_v40, %v113_v33  ;;  %v740_v43 = vadd.f32 %v739_v41, %v113_v33  ;;  %v628_v44 = vpop.f32.mrb[2].mxu0  ;;  %v741_v45 = vpop.f32.mrb[2].mxu1 }
 0x118   :  { %v816_v46 = vmax.f32 %v625_v38, 0.0  ;;  %v818_v47 = vmax.f32 %v738_v39, 0.0  ;;  %v629_v48 = vadd.f32 %v628_v44, %v118_v34  ;;  %v742_v49 = vadd.f32 %v741_v45, %v118_v34  ;;  %v630_v50 = vpop.f32.mrb[3].mxu0  ;;  %v743_v51 = vpop.f32.mrb[3].mxu1 }
 0x119   :  { %v817_v52 = vmax.f32 %v627_v42, 0.0  ;;  %v819_v53 = vmax.f32 %v740_v43, 0.0  ;;  %v631_v54 = vadd.f32 %v630_v50, %v118_v34  ;;  %v744_v55 = vadd.f32 %v743_v51, %v118_v34 }
 0x11a   :  { %v820_v56 = vmax.f32 %v629_v48, 0.0  ;;  %v822_v57 = vmax.f32 %v742_v49, 0.0 }
 0x11b   :  { %v1220_v58 = vpack.c.bf16 %v817_v52, %v816_v46  ;;  %v1221_v59 = vpack.c.bf16 %v819_v53, %v818_v47  ;;  %v821_v60 = vmax.f32 %v631_v54, 0.0  ;;  %v823_v61 = vmax.f32 %v744_v55, 0.0 }
 0x11d   :  { %1072 = vst [vmem:[%s1783_s3] sm:$0xff] %v1220_v58  ;;  %1073 = vst [vmem:[%s1783_s3 + $0x8] sm:$0xff] %v1221_v59  ;;  %v1222_v63 = vpack.c.bf16 %v821_v60, %v820_v56  ;;  %v1223_v0 = vpack.c.bf16 %v823_v61, %v822_v57  ;;  %v634_v1 = vpop.f32.mrb[4].mxu0  ;;  %v747_v2 = vpop.f32.mrb[4].mxu1 }
 0x11e   :  { %v635_v3 = vadd.f32 %v634_v1, %v123_v35  ;;  %v748_v4 = vadd.f32 %v747_v2, %v123_v35  ;;  %v636_v5 = vpop.f32.mrb[5].mxu0  ;;  %v749_v6 = vpop.f32.mrb[5].mxu1 }
 0x11f   :  { %1074 = vst [vmem:[%s1783_s3 + $0x10] sm:$0xff] %v1222_v63  ;;  %1075 = vst [vmem:[%s1783_s3 + $0x18] sm:$0xff] %v1223_v0  ;;  %v637_v7 = vadd.f32 %v636_v5, %v123_v35  ;;  %v750_v8 = vadd.f32 %v749_v6, %v123_v35  ;;  %v638_v9 = vpop.f32.mrb[6].mxu0  ;;  %v751_v10 = vpop.f32.mrb[6].mxu1 }
 0x120   :  { %v824_v11 = vmax.f32 %v635_v3, 0.0  ;;  %v826_v12 = vmax.f32 %v748_v4, 0.0  ;;  %v639_v13 = vadd.f32 %v638_v9, %v128_v62  ;;  %v752_v14 = vadd.f32 %v751_v10, %v128_v62  ;;  %v640_v15 = vpop.f32.mrb[7].mxu0  ;;  %v753_v16 = vpop.f32.mrb[7].mxu1 }
 0x121   :  { %v825_v17 = vmax.f32 %v637_v7, 0.0  ;;  %v827_v18 = vmax.f32 %v750_v8, 0.0  ;;  %v641_v19 = vadd.f32 %v640_v15, %v128_v62  ;;  %v754_v20 = vadd.f32 %v753_v16, %v128_v62  ;;  %v148_v57 = vpop.permute.xlu1 %147  ;;  %v143_v58 = vpop.permute.xlu0 %142 }
 0x122   :  { %v828_v21 = vmax.f32 %v639_v13, 0.0  ;;  %v830_v22 = vmax.f32 %v752_v14, 0.0 }
 0x123   :  { %v1224_v23 = vpack.c.bf16 %v825_v17, %v824_v11  ;;  %v1225_v24 = vpack.c.bf16 %v827_v18, %v826_v12  ;;  %v829_v25 = vmax.f32 %v641_v19, 0.0  ;;  %v831_v26 = vmax.f32 %v754_v20, 0.0 }
 0x125   :  { %1076 = vst [vmem:[%s1783_s3 + $0x20] sm:$0xff] %v1224_v23  ;;  %1077 = vst [vmem:[%s1783_s3 + $0x28] sm:$0xff] %v1225_v24  ;;  %v1226_v29 = vpack.c.bf16 %v829_v25, %v828_v21  ;;  %v1227_v30 = vpack.c.bf16 %v831_v26, %v830_v22  ;;  %v644_v31 = vpop.f32.mrb[8].mxu0  ;;  %v757_v32 = vpop.f32.mrb[8].mxu1 }
 0x126   :  { %v645_v33 = vadd.f32 %v644_v31, %v133_v28  ;;  %v758_v34 = vadd.f32 %v757_v32, %v133_v28  ;;  %v646_v35 = vpop.f32.mrb[9].mxu0  ;;  %v759_v36 = vpop.f32.mrb[9].mxu1 }
 0x127   :  { %1078 = vst [vmem:[%s1783_s3 + $0x30] sm:$0xff] %v1226_v29  ;;  %1079 = vst [vmem:[%s1783_s3 + $0x38] sm:$0xff] %v1227_v30  ;;  %v647_v37 = vadd.f32 %v646_v35, %v133_v28  ;;  %v760_v38 = vadd.f32 %v759_v36, %v133_v28  ;;  %v648_v39 = vpop.f32.mrb[10].mxu0  ;;  %v761_v40 = vpop.f32.mrb[10].mxu1 }
 0x128   :  { %v832_v41 = vmax.f32 %v645_v33, 0.0  ;;  %v834_v42 = vmax.f32 %v758_v34, 0.0  ;;  %v649_v43 = vadd.f32 %v648_v39, %v138_v27  ;;  %v762_v44 = vadd.f32 %v761_v40, %v138_v27  ;;  %v650_v45 = vpop.f32.mrb[11].mxu0  ;;  %v763_v46 = vpop.f32.mrb[11].mxu1 }
 0x129   :  { %v833_v47 = vmax.f32 %v647_v37, 0.0  ;;  %v835_v48 = vmax.f32 %v760_v38, 0.0  ;;  %v651_v49 = vadd.f32 %v650_v45, %v138_v27  ;;  %v764_v50 = vadd.f32 %v763_v46, %v138_v27  ;;  %v158_v23 = vpop.permute.xlu1 %157  ;;  %v153_v24 = vpop.permute.xlu0 %152 }
 0x12a   :  { %v836_v51 = vmax.f32 %v649_v43, 0.0  ;;  %v838_v52 = vmax.f32 %v762_v44, 0.0 }
 0x12b   :  { %v1228_v53 = vpack.c.bf16 %v833_v47, %v832_v41  ;;  %v1229_v54 = vpack.c.bf16 %v835_v48, %v834_v42  ;;  %v837_v55 = vmax.f32 %v651_v49, 0.0  ;;  %v839_v56 = vmax.f32 %v764_v50, 0.0 }
 0x12d   :  { %1080 = vst [vmem:[%s1783_s3 + $0x40] sm:$0xff] %v1228_v53  ;;  %1081 = vst [vmem:[%s1783_s3 + $0x48] sm:$0xff] %v1229_v54  ;;  %v1230_v59 = vpack.c.bf16 %v837_v55, %v836_v51  ;;  %v1231_v60 = vpack.c.bf16 %v839_v56, %v838_v52  ;;  %v654_v61 = vpop.f32.mrb[12].mxu0  ;;  %v767_v62 = vpop.f32.mrb[12].mxu1 }
 0x12e   :  { %v655_v63 = vadd.f32 %v654_v61, %v143_v58  ;;  %v768_v0 = vadd.f32 %v767_v62, %v143_v58  ;;  %v656_v1 = vpop.f32.mrb[13].mxu0  ;;  %v769_v2 = vpop.f32.mrb[13].mxu1 }
 0x12f   :  { %1082 = vst [vmem:[%s1783_s3 + $0x50] sm:$0xff] %v1230_v59  ;;  %1083 = vst [vmem:[%s1783_s3 + $0x58] sm:$0xff] %v1231_v60  ;;  %v657_v3 = vadd.f32 %v656_v1, %v143_v58  ;;  %v770_v4 = vadd.f32 %v769_v2, %v143_v58  ;;  %v658_v5 = vpop.f32.mrb[14].mxu0  ;;  %v771_v6 = vpop.f32.mrb[14].mxu1 }
 0x130   :  { %v840_v7 = vmax.f32 %v655_v63, 0.0  ;;  %v842_v8 = vmax.f32 %v768_v0, 0.0  ;;  %v659_v9 = vadd.f32 %v658_v5, %v148_v57  ;;  %v772_v10 = vadd.f32 %v771_v6, %v148_v57  ;;  %v660_v11 = vpop.f32.mrb[15].mxu0  ;;  %v773_v12 = vpop.f32.mrb[15].mxu1 }
 0x131   :  { %v841_v13 = vmax.f32 %v657_v3, 0.0  ;;  %v843_v14 = vmax.f32 %v770_v4, 0.0  ;;  %v661_v15 = vadd.f32 %v660_v11, %v148_v57  ;;  %v774_v16 = vadd.f32 %v773_v12, %v148_v57  ;;  %v168_v53 = vpop.permute.xlu1 %167  ;;  %v163_v54 = vpop.permute.xlu0 %162 }
 0x132   :  { %v844_v17 = vmax.f32 %v659_v9, 0.0  ;;  %v846_v18 = vmax.f32 %v772_v10, 0.0 }
 0x133   :  { %v1232_v19 = vpack.c.bf16 %v841_v13, %v840_v7  ;;  %v1233_v20 = vpack.c.bf16 %v843_v14, %v842_v8  ;;  %v845_v21 = vmax.f32 %v661_v15, 0.0  ;;  %v847_v22 = vmax.f32 %v774_v16, 0.0 }
 0x135   :  { %1084 = vst [vmem:[%s1783_s3 + $0x60] sm:$0xff] %v1232_v19  ;;  %1085 = vst [vmem:[%s1783_s3 + $0x68] sm:$0xff] %v1233_v20  ;;  %v1234_v25 = vpack.c.bf16 %v845_v21, %v844_v17  ;;  %v1235_v26 = vpack.c.bf16 %v847_v22, %v846_v18  ;;  %v664_v27 = vpop.f32.mrb[16].mxu0  ;;  %v777_v28 = vpop.f32.mrb[16].mxu1 }
 0x136   :  { %v665_v29 = vadd.f32 %v664_v27, %v153_v24  ;;  %v778_v30 = vadd.f32 %v777_v28, %v153_v24  ;;  %v666_v31 = vpop.f32.mrb[17].mxu0  ;;  %v779_v32 = vpop.f32.mrb[17].mxu1 }
 0x137   :  { %1086 = vst [vmem:[%s1783_s3 + $0x70] sm:$0xff] %v1234_v25  ;;  %1087 = vst [vmem:[%s1783_s3 + $0x78] sm:$0xff] %v1235_v26  ;;  %v667_v33 = vadd.f32 %v666_v31, %v153_v24  ;;  %v780_v34 = vadd.f32 %v779_v32, %v153_v24  ;;  %v668_v35 = vpop.f32.mrb[18].mxu0  ;;  %v781_v36 = vpop.f32.mrb[18].mxu1 }
 0x138   :  { %v848_v37 = vmax.f32 %v665_v29, 0.0  ;;  %v850_v38 = vmax.f32 %v778_v30, 0.0  ;;  %v669_v39 = vadd.f32 %v668_v35, %v158_v23  ;;  %v782_v40 = vadd.f32 %v781_v36, %v158_v23  ;;  %v670_v41 = vpop.f32.mrb[19].mxu0  ;;  %v783_v42 = vpop.f32.mrb[19].mxu1 }
 0x139   :  { %v849_v43 = vmax.f32 %v667_v33, 0.0  ;;  %v851_v44 = vmax.f32 %v780_v34, 0.0  ;;  %v671_v45 = vadd.f32 %v670_v41, %v158_v23  ;;  %v784_v46 = vadd.f32 %v783_v42, %v158_v23  ;;  %v178_v19 = vpop.permute.xlu1 %177  ;;  %v173_v20 = vpop.permute.xlu0 %172 }
 0x13a   :  { %v852_v47 = vmax.f32 %v669_v39, 0.0  ;;  %v854_v48 = vmax.f32 %v782_v40, 0.0 }
 0x13b   :  { %v1236_v49 = vpack.c.bf16 %v849_v43, %v848_v37  ;;  %v1237_v50 = vpack.c.bf16 %v851_v44, %v850_v38  ;;  %v853_v51 = vmax.f32 %v671_v45, 0.0  ;;  %v855_v52 = vmax.f32 %v784_v46, 0.0 }
 0x13d   :  { %1088 = vst [vmem:[%s1783_s3 + $0x80] sm:$0xff] %v1236_v49  ;;  %1089 = vst [vmem:[%s1783_s3 + $0x88] sm:$0xff] %v1237_v50  ;;  %v1238_v55 = vpack.c.bf16 %v853_v51, %v852_v47  ;;  %v1239_v56 = vpack.c.bf16 %v855_v52, %v854_v48  ;;  %v674_v57 = vpop.f32.mrb[20].mxu0  ;;  %v787_v58 = vpop.f32.mrb[20].mxu1 }
 0x13e   :  { %v675_v59 = vadd.f32 %v674_v57, %v163_v54  ;;  %v788_v60 = vadd.f32 %v787_v58, %v163_v54  ;;  %v676_v61 = vpop.f32.mrb[21].mxu0  ;;  %v789_v62 = vpop.f32.mrb[21].mxu1 }
 0x13f   :  { %1090 = vst [vmem:[%s1783_s3 + $0x90] sm:$0xff] %v1238_v55  ;;  %1091 = vst [vmem:[%s1783_s3 + $0x98] sm:$0xff] %v1239_v56  ;;  %v677_v63 = vadd.f32 %v676_v61, %v163_v54  ;;  %v790_v0 = vadd.f32 %v789_v62, %v163_v54  ;;  %v678_v1 = vpop.f32.mrb[22].mxu0  ;;  %v791_v2 = vpop.f32.mrb[22].mxu1 }
 0x140   :  { %v856_v3 = vmax.f32 %v675_v59, 0.0  ;;  %v858_v4 = vmax.f32 %v788_v60, 0.0  ;;  %v679_v5 = vadd.f32 %v678_v1, %v168_v53  ;;  %v792_v6 = vadd.f32 %v791_v2, %v168_v53  ;;  %v680_v7 = vpop.f32.mrb[23].mxu0  ;;  %v793_v8 = vpop.f32.mrb[23].mxu1 }
 0x141   :  { %v857_v9 = vmax.f32 %v677_v63, 0.0  ;;  %v859_v10 = vmax.f32 %v790_v0, 0.0  ;;  %v681_v11 = vadd.f32 %v680_v7, %v168_v53  ;;  %v794_v12 = vadd.f32 %v793_v8, %v168_v53  ;;  %v188_v49 = vpop.permute.xlu1 %187  ;;  %v183_v50 = vpop.permute.xlu0 %182 }
 0x142   :  { %v860_v13 = vmax.f32 %v679_v5, 0.0  ;;  %v862_v14 = vmax.f32 %v792_v6, 0.0 }
 0x143   :  { %v1240_v15 = vpack.c.bf16 %v857_v9, %v856_v3  ;;  %v1241_v16 = vpack.c.bf16 %v859_v10, %v858_v4  ;;  %v861_v17 = vmax.f32 %v681_v11, 0.0  ;;  %v863_v18 = vmax.f32 %v794_v12, 0.0 }
 0x145   :  { %1092 = vst [vmem:[%s1783_s3 + $0xa0] sm:$0xff] %v1240_v15  ;;  %1093 = vst [vmem:[%s1783_s3 + $0xa8] sm:$0xff] %v1241_v16  ;;  %v1242_v21 = vpack.c.bf16 %v861_v17, %v860_v13  ;;  %v1243_v22 = vpack.c.bf16 %v863_v18, %v862_v14  ;;  %v684_v23 = vpop.f32.mrb[24].mxu0  ;;  %v797_v24 = vpop.f32.mrb[24].mxu1 }
 0x146   :  { %v685_v25 = vadd.f32 %v684_v23, %v173_v20  ;;  %v798_v26 = vadd.f32 %v797_v24, %v173_v20  ;;  %v686_v27 = vpop.f32.mrb[25].mxu0  ;;  %v799_v28 = vpop.f32.mrb[25].mxu1 }
 0x147   :  { %1094 = vst [vmem:[%s1783_s3 + $0xb0] sm:$0xff] %v1242_v21  ;;  %1095 = vst [vmem:[%s1783_s3 + $0xb8] sm:$0xff] %v1243_v22  ;;  %v687_v29 = vadd.f32 %v686_v27, %v173_v20  ;;  %v800_v30 = vadd.f32 %v799_v28, %v173_v20  ;;  %v688_v31 = vpop.f32.mrb[26].mxu0  ;;  %v801_v32 = vpop.f32.mrb[26].mxu1 }
 0x148   :  { %v864_v33 = vmax.f32 %v685_v25, 0.0  ;;  %v866_v34 = vmax.f32 %v798_v26, 0.0  ;;  %v689_v35 = vadd.f32 %v688_v31, %v178_v19  ;;  %v802_v36 = vadd.f32 %v801_v32, %v178_v19  ;;  %v690_v37 = vpop.f32.mrb[27].mxu0  ;;  %v803_v38 = vpop.f32.mrb[27].mxu1 }
 0x149   :  { %v865_v39 = vmax.f32 %v687_v29, 0.0  ;;  %v867_v40 = vmax.f32 %v800_v30, 0.0  ;;  %v691_v41 = vadd.f32 %v690_v37, %v178_v19  ;;  %v804_v42 = vadd.f32 %v803_v38, %v178_v19 }
 0x14a   :  { %v868_v43 = vmax.f32 %v689_v35, 0.0  ;;  %v870_v44 = vmax.f32 %v802_v36, 0.0 }
 0x14b   :  { %v1244_v45 = vpack.c.bf16 %v865_v39, %v864_v33  ;;  %v1245_v46 = vpack.c.bf16 %v867_v40, %v866_v34  ;;  %v869_v47 = vmax.f32 %v691_v41, 0.0  ;;  %v871_v48 = vmax.f32 %v804_v42, 0.0 }
 0x14d   :  { %1096 = vst [vmem:[%s1783_s3 + $0xc0] sm:$0xff] %v1244_v45  ;;  %1097 = vst [vmem:[%s1783_s3 + $0xc8] sm:$0xff] %v1245_v46  ;;  %v1246_v51 = vpack.c.bf16 %v869_v47, %v868_v43  ;;  %v1247_v52 = vpack.c.bf16 %v871_v48, %v870_v44  ;;  %v694_v53 = vpop.f32.mrb[28].mxu0  ;;  %v807_v54 = vpop.f32.mrb[28].mxu1 }
 0x14e   :  { %v695_v55 = vadd.f32 %v694_v53, %v183_v50  ;;  %v808_v56 = vadd.f32 %v807_v54, %v183_v50  ;;  %v696_v57 = vpop.f32.mrb[29].mxu0  ;;  %v809_v58 = vpop.f32.mrb[29].mxu1 }
 0x14f   :  { %1098 = vst [vmem:[%s1783_s3 + $0xd0] sm:$0xff] %v1246_v51  ;;  %1099 = vst [vmem:[%s1783_s3 + $0xd8] sm:$0xff] %v1247_v52  ;;  %v697_v59 = vadd.f32 %v696_v57, %v183_v50  ;;  %v810_v60 = vadd.f32 %v809_v58, %v183_v50  ;;  %v698_v61 = vpop.f32.mrb[30].mxu0  ;;  %v811_v62 = vpop.f32.mrb[30].mxu1 }
 0x150   :  { %v872_v63 = vmax.f32 %v695_v55, 0.0  ;;  %v874_v0 = vmax.f32 %v808_v56, 0.0  ;;  %v699_v1 = vadd.f32 %v698_v61, %v188_v49  ;;  %v812_v2 = vadd.f32 %v811_v62, %v188_v49  ;;  %v700_v3 = vpop.f32.mrb[31].mxu0  ;;  %v813_v4 = vpop.f32.mrb[31].mxu1 }
 0x151   :  { %v873_v5 = vmax.f32 %v697_v59, 0.0  ;;  %v875_v6 = vmax.f32 %v810_v60, 0.0  ;;  %v701_v7 = vadd.f32 %v700_v3, %v188_v49  ;;  %v814_v8 = vadd.f32 %v813_v4, %v188_v49 }
 0x152   :  { %v876_v9 = vmax.f32 %v699_v1, 0.0  ;;  %v878_v10 = vmax.f32 %v812_v2, 0.0 }
 0x153   :  { %v1248_v11 = vpack.c.bf16 %v873_v5, %v872_v63  ;;  %v1249_v12 = vpack.c.bf16 %v875_v6, %v874_v0  ;;  %v877_v13 = vmax.f32 %v701_v7, 0.0  ;;  %v879_v14 = vmax.f32 %v814_v8, 0.0 }
 0x155   :  { %1100 = vst [vmem:[%s1783_s3 + $0xe0] sm:$0xff] %v1248_v11  ;;  %1101 = vst [vmem:[%s1783_s3 + $0xe8] sm:$0xff] %v1249_v12  ;;  %v1250_v15 = vpack.c.bf16 %v877_v13, %v876_v9  ;;  %v1251_v16 = vpack.c.bf16 %v879_v14, %v878_v10 }
 0x157   :  { %1102 = vst [vmem:[%s1783_s3 + $0xf0] sm:$0xff] %v1250_v15  ;;  %1103 = vst [vmem:[%s1783_s3 + $0xf8] sm:$0xff] %v1251_v16 }

// kernel: vae_forward.15
= control target key start
LH: loop header
LB: loop body
LE: loop exit
PB: predicated region body
PF: predicated region fallthrough
CT: control target
= control target key end

     0   :  { %s2871_s0 = inlined_call_operand.vmem [shape: bf16[1,288], index: 0, kind: input, shape index: {}]   ;;  %s2872_s1 = inlined_call_operand.vmem [shape: bf16[288,2048], index: 1, kind: input, shape index: {}]   ;;  %s2873_s2 = inlined_call_operand.<no memory space> [shape: f32[1,1], index: 2, kind: input, shape index: {}]   ;;  %s2874_s3 = inlined_call_operand.vmem [shape: f32[1,2048], index: 3, kind: output, shape index: {}]  }
   0x1   :  { %v8_v0 = vstv %s2873_s2 }
   0x2   :  { %9 = vst [vmem:[#allocation2] sm:$0x1] %v8_v0 }
   0x3   :  { %s2317_s14 = smov 0   ;;  %s2319_s15 = smov 0  }
   0x4   :  { %s2321_s16 = smov 0   ;;  %s2323_s17 = smov 0  }
   0x5   :  { %s2325_s18 = smov 0  }
   0x6 LB: > { %s24_s2 = sadd.s32 1, %s2286_s17  ;;  %p67_p1 = scmp.ne.s32.totalorder %s2278_s15, %s2274_s14  ;;  %s2290_s18 = sphi %s2325_s18, %s15_s18   ;;  %s2286_s17 = sphi %s2323_s17, %s2878_s17   ;;  %s2282_s16 = sphi %s2321_s16, %s2877_s16   ;;  %s2278_s15 = sphi %s2319_s15, %s2876_s15   ;;  %s2274_s14 = sphi %s2317_s14, %s2875_s14  }
   0x7   : > { %p25_p0 = scmp.ge.s32.totalorder %s24_s2, 2  ;;  %p68_p2 = scmp.eq.s32.totalorder %s2290_s18, 0 }
   0x8   : > { %s60_s20 = sadd.s32 1, %s2278_s15  ;;  %p1986_p5 = scmp.ge.s32.totalorder %s2290_s18, 2 }
   0x9   : > { %s2880_s2 = smov (%p25_p0, %s24_s2), 0  ;;  %p69_p3 = por %p68_p2, %p67_p1 }
   0xa   : > { %s57_s19 = ssub.s32 %s2286_s17, %s2880_s2  ;;  %160 = sbr.rel (%p1986_p5) target bundleno = 94 (0x5e), region = 24 }
   0xb   : > { %p58_p4 = scmp.eq.s32.totalorder %s57_s19, 0 }
   0xd   : > { %s2352_s21 = scalar_select %p58_p4, %s2278_s15, %s60_s20  }
  0x11   : > { %163 = sbr.rel (!%p69_p3) target bundleno = 94 (0x5e), region = 28  ;;  %s165_s22 = sand.u32 (%p69_p3), 1, %s2278_s15  }
  0x12   : > { %s2150_s23 = sshll.u32 (%p69_p3), %s2286_s17, 5  ;;  %s2175_s24 = smul.u32 (%p69_p3), 1152, %s165_s22 }
  0x13   : > { %s2360_s27 = scalar_lea.vmem (%p69_p3), %s2872_s1, %s2150_s23 }
  0x14   : > { %v183_v1 = vld [vmem:[%s2360_s27] sm:$0xff] (%p69_p3)  ;;  %v185_v2 = vld [vmem:[%s2360_s27 + $0x8] sm:$0xff] (%p69_p3)  ;;  %v187_v3 = vld [vmem:[%s2360_s27 + $0x10] sm:$0xff] (%p69_p3)  ;;  %s2368_s28 = scalar_lea.vmem (%p69_p3), [#allocation3], %s2175_s24 }
  0x15   : > { %v189_v4 = vld [vmem:[%s2360_s27 + $0x18] sm:$0xff] (%p69_p3)  ;;  %v191_v5 = vld [vmem:[%s2360_s27 + $0x40] sm:$0xff] (%p69_p3)  ;;  %v193_v6 = vld [vmem:[%s2360_s27 + $0x48] sm:$0xff] (%p69_p3)  ;;  %184 = vst [vmem:[%s2368_s28] sm:$0xff] (%p69_p3), %v183_v1 }
  0x16   : > { %186 = vst [vmem:[%s2368_s28 + $0x8] sm:$0xff] (%p69_p3), %v185_v2  ;;  %188 = vst [vmem:[%s2368_s28 + $0x10] sm:$0xff] (%p69_p3), %v187_v3  ;;  %v195_v7 = vld [vmem:[%s2360_s27 + $0x50] sm:$0xff] (%p69_p3)  ;;  %v197_v8 = vld [vmem:[%s2360_s27 + $0x58] sm:$0xff] (%p69_p3) }
  0x17   : > { %190 = vst [vmem:[%s2368_s28 + $0x18] sm:$0xff] (%p69_p3), %v189_v4  ;;  %192 = vst [vmem:[%s2368_s28 + $0x20] sm:$0xff] (%p69_p3), %v191_v5  ;;  %v199_v9 = vld [vmem:[%s2360_s27 + $0x80] sm:$0xff] (%p69_p3)  ;;  %v201_v10 = vld [vmem:[%s2360_s27 + $0x88] sm:$0xff] (%p69_p3) }
  0x18   : > { %194 = vst [vmem:[%s2368_s28 + $0x28] sm:$0xff] %v193_v6  ;;  %196 = vst [vmem:[%s2368_s28 + $0x30] sm:$0xff] %v195_v7  ;;  %v203_v11 = vld [vmem:[%s2360_s27 + $0x90] sm:$0xff]  ;;  %v205_v12 = vld [vmem:[%s2360_s27 + $0x98] sm:$0xff] }
  0x19   : > { %198 = vst [vmem:[%s2368_s28 + $0x38] sm:$0xff] %v197_v8  ;;  %200 = vst [vmem:[%s2368_s28 + $0x40] sm:$0xff] %v199_v9  ;;  %v207_v13 = vld [vmem:[%s2360_s27 + $0xc0] sm:$0xff]  ;;  %v209_v14 = vld [vmem:[%s2360_s27 + $0xc8] sm:$0xff] }
  0x1a   : > { %202 = vst [vmem:[%s2368_s28 + $0x48] sm:$0xff] %v201_v10  ;;  %204 = vst [vmem:[%s2368_s28 + $0x50] sm:$0xff] %v203_v11  ;;  %v211_v15 = vld [vmem:[%s2360_s27 + $0xd0] sm:$0xff]  ;;  %v213_v16 = vld [vmem:[%s2360_s27 + $0xd8] sm:$0xff] }
  0x1b   : > { %206 = vst [vmem:[%s2368_s28 + $0x58] sm:$0xff] %v205_v12  ;;  %208 = vst [vmem:[%s2368_s28 + $0x60] sm:$0xff] %v207_v13  ;;  %v215_v17 = vld [vmem:[%s2360_s27 + $0x100] sm:$0xff]  ;;  %v217_v18 = vld [vmem:[%s2360_s27 + $0x108] sm:$0xff] }
  0x1c   : > { %210 = vst [vmem:[%s2368_s28 + $0x68] sm:$0xff] %v209_v14  ;;  %212 = vst [vmem:[%s2368_s28 + $0x70] sm:$0xff] %v211_v15  ;;  %v219_v19 = vld [vmem:[%s2360_s27 + $0x110] sm:$0xff]  ;;  %v221_v20 = vld [vmem:[%s2360_s27 + $0x118] sm:$0xff] }
  0x1d   : > { %214 = vst [vmem:[%s2368_s28 + $0x78] sm:$0xff] %v213_v16  ;;  %216 = vst [vmem:[%s2368_s28 + $0x80] sm:$0xff] %v215_v17  ;;  %v223_v21 = vld [vmem:[%s2360_s27 + $0x140] sm:$0xff]  ;;  %v225_v22 = vld [vmem:[%s2360_s27 + $0x148] sm:$0xff] }
  0x1e   : > { %218 = vst [vmem:[%s2368_s28 + $0x88] sm:$0xff] %v217_v18  ;;  %220 = vst [vmem:[%s2368_s28 + $0x90] sm:$0xff] %v219_v19  ;;  %v227_v23 = vld [vmem:[%s2360_s27 + $0x150] sm:$0xff]  ;;  %v229_v24 = vld [vmem:[%s2360_s27 + $0x158] sm:$0xff] }
  0x1f   : > { %222 = vst [vmem:[%s2368_s28 + $0x98] sm:$0xff] %v221_v20  ;;  %224 = vst [vmem:[%s2368_s28 + $0xa0] sm:$0xff] %v223_v21  ;;  %v231_v25 = vld [vmem:[%s2360_s27 + $0x180] sm:$0xff]  ;;  %v233_v26 = vld [vmem:[%s2360_s27 + $0x188] sm:$0xff] }
  0x20   : > { %226 = vst [vmem:[%s2368_s28 + $0xa8] sm:$0xff] %v225_v22  ;;  %228 = vst [vmem:[%s2368_s28 + $0xb0] sm:$0xff] %v227_v23  ;;  %v235_v27 = vld [vmem:[%s2360_s27 + $0x190] sm:$0xff]  ;;  %v237_v28 = vld [vmem:[%s2360_s27 + $0x198] sm:$0xff] }
  0x21   : > { %230 = vst [vmem:[%s2368_s28 + $0xb8] sm:$0xff] %v229_v24  ;;  %232 = vst [vmem:[%s2368_s28 + $0xc0] sm:$0xff] %v231_v25  ;;  %v239_v29 = vld [vmem:[%s2360_s27 + $0x1c0] sm:$0xff]  ;;  %v241_v30 = vld [vmem:[%s2360_s27 + $0x1c8] sm:$0xff] }
  0x22   : > { %234 = vst [vmem:[%s2368_s28 + $0xc8] sm:$0xff] %v233_v26  ;;  %236 = vst [vmem:[%s2368_s28 + $0xd0] sm:$0xff] %v235_v27  ;;  %v243_v31 = vld [vmem:[%s2360_s27 + $0x1d0] sm:$0xff]  ;;  %v245_v32 = vld [vmem:[%s2360_s27 + $0x1d8] sm:$0xff] }
  0x23   : > { %238 = vst [vmem:[%s2368_s28 + $0xd8] sm:$0xff] %v237_v28  ;;  %240 = vst [vmem:[%s2368_s28 + $0xe0] sm:$0xff] %v239_v29  ;;  %v247_v33 = vld [vmem:[%s2360_s27 + $0x200] sm:$0xff]  ;;  %v249_v34 = vld [vmem:[%s2360_s27 + $0x208] sm:$0xff] }
  0x24   : > { %242 = vst [vmem:[%s2368_s28 + $0xe8] sm:$0xff] %v241_v30  ;;  %244 = vst [vmem:[%s2368_s28 + $0xf0] sm:$0xff] %v243_v31  ;;  %v251_v35 = vld [vmem:[%s2360_s27 + $0x210] sm:$0xff]  ;;  %v253_v36 = vld [vmem:[%s2360_s27 + $0x218] sm:$0xff] }
  0x25   : > { %246 = vst [vmem:[%s2368_s28 + $0xf8] sm:$0xff] %v245_v32  ;;  %248 = vst [vmem:[%s2368_s28 + $0x100] sm:$0xff] %v247_v33  ;;  %v255_v37 = vld [vmem:[%s2360_s27 + $0x240] sm:$0xff]  ;;  %v257_v38 = vld [vmem:[%s2360_s27 + $0x248] sm:$0xff] }
  0x26   : > { %250 = vst [vmem:[%s2368_s28 + $0x108] sm:$0xff] %v249_v34  ;;  %252 = vst [vmem:[%s2368_s28 + $0x110] sm:$0xff] %v251_v35  ;;  %v259_v39 = vld [vmem:[%s2360_s27 + $0x250] sm:$0xff]  ;;  %v261_v40 = vld [vmem:[%s2360_s27 + $0x258] sm:$0xff] }
  0x27   : > { %254 = vst [vmem:[%s2368_s28 + $0x118] sm:$0xff] %v253_v36  ;;  %256 = vst [vmem:[%s2368_s28 + $0x120] sm:$0xff] %v255_v37  ;;  %v263_v41 = vld [vmem:[%s2360_s27 + $0x280] sm:$0xff]  ;;  %v265_v42 = vld [vmem:[%s2360_s27 + $0x288] sm:$0xff] }
  0x28   : > { %258 = vst [vmem:[%s2368_s28 + $0x128] sm:$0xff] %v257_v38  ;;  %260 = vst [vmem:[%s2368_s28 + $0x130] sm:$0xff] %v259_v39  ;;  %v267_v43 = vld [vmem:[%s2360_s27 + $0x290] sm:$0xff]  ;;  %v269_v44 = vld [vmem:[%s2360_s27 + $0x298] sm:$0xff] }
  0x29   : > { %262 = vst [vmem:[%s2368_s28 + $0x138] sm:$0xff] %v261_v40  ;;  %264 = vst [vmem:[%s2368_s28 + $0x140] sm:$0xff] %v263_v41  ;;  %v271_v45 = vld [vmem:[%s2360_s27 + $0x2c0] sm:$0xff]  ;;  %v273_v46 = vld [vmem:[%s2360_s27 + $0x2c8] sm:$0xff] }
  0x2a   : > { %266 = vst [vmem:[%s2368_s28 + $0x148] sm:$0xff] %v265_v42  ;;  %268 = vst [vmem:[%s2368_s28 + $0x150] sm:$0xff] %v267_v43  ;;  %v275_v47 = vld [vmem:[%s2360_s27 + $0x2d0] sm:$0xff]  ;;  %v277_v48 = vld [vmem:[%s2360_s27 + $0x2d8] sm:$0xff] }
  0x2b   : > { %270 = vst [vmem:[%s2368_s28 + $0x158] sm:$0xff] %v269_v44  ;;  %272 = vst [vmem:[%s2368_s28 + $0x160] sm:$0xff] %v271_v45  ;;  %v279_v49 = vld [vmem:[%s2360_s27 + $0x300] sm:$0xff]  ;;  %v281_v50 = vld [vmem:[%s2360_s27 + $0x308] sm:$0xff] }
  0x2c   : > { %274 = vst [vmem:[%s2368_s28 + $0x168] sm:$0xff] %v273_v46  ;;  %276 = vst [vmem:[%s2368_s28 + $0x170] sm:$0xff] %v275_v47  ;;  %v283_v51 = vld [vmem:[%s2360_s27 + $0x310] sm:$0xff]  ;;  %v285_v52 = vld [vmem:[%s2360_s27 + $0x318] sm:$0xff] }
  0x2d   : > { %278 = vst [vmem:[%s2368_s28 + $0x178] sm:$0xff] %v277_v48  ;;  %280 = vst [vmem:[%s2368_s28 + $0x180] sm:$0xff] %v279_v49  ;;  %v287_v53 = vld [vmem:[%s2360_s27 + $0x340] sm:$0xff]  ;;  %v289_v54 = vld [vmem:[%s2360_s27 + $0x348] sm:$0xff] }
  0x2e   : > { %282 = vst [vmem:[%s2368_s28 + $0x188] sm:$0xff] %v281_v50  ;;  %284 = vst [vmem:[%s2368_s28 + $0x190] sm:$0xff] %v283_v51  ;;  %v291_v55 = vld [vmem:[%s2360_s27 + $0x350] sm:$0xff]  ;;  %v293_v56 = vld [vmem:[%s2360_s27 + $0x358] sm:$0xff] }
  0x2f   : > { %286 = vst [vmem:[%s2368_s28 + $0x198] sm:$0xff] %v285_v52  ;;  %288 = vst [vmem:[%s2368_s28 + $0x1a0] sm:$0xff] %v287_v53  ;;  %v295_v57 = vld [vmem:[%s2360_s27 + $0x380] sm:$0xff]  ;;  %v297_v58 = vld [vmem:[%s2360_s27 + $0x388] sm:$0xff] }
  0x30   : > { %290 = vst [vmem:[%s2368_s28 + $0x1a8] sm:$0xff] %v289_v54  ;;  %292 = vst [vmem:[%s2368_s28 + $0x1b0] sm:$0xff] %v291_v55  ;;  %v299_v59 = vld [vmem:[%s2360_s27 + $0x390] sm:$0xff]  ;;  %v301_v60 = vld [vmem:[%s2360_s27 + $0x398] sm:$0xff] }
  0x31   : > { %294 = vst [vmem:[%s2368_s28 + $0x1b8] sm:$0xff] %v293_v56  ;;  %296 = vst [vmem:[%s2368_s28 + $0x1c0] sm:$0xff] %v295_v57  ;;  %v303_v61 = vld [vmem:[%s2360_s27 + $0x3c0] sm:$0xff]  ;;  %v305_v62 = vld [vmem:[%s2360_s27 + $0x3c8] sm:$0xff] }
  0x32   : > { %298 = vst [vmem:[%s2368_s28 + $0x1c8] sm:$0xff] %v297_v58  ;;  %300 = vst [vmem:[%s2368_s28 + $0x1d0] sm:$0xff] %v299_v59  ;;  %v307_v63 = vld [vmem:[%s2360_s27 + $0x3d0] sm:$0xff]  ;;  %v309_v0 = vld [vmem:[%s2360_s27 + $0x3d8] sm:$0xff] }
  0x33   : > { %302 = vst [vmem:[%s2368_s28 + $0x1d8] sm:$0xff] %v301_v60  ;;  %304 = vst [vmem:[%s2368_s28 + $0x1e0] sm:$0xff] %v303_v61  ;;  %v311_v1 = vld [vmem:[%s2360_s27 + $0x400] sm:$0xff]  ;;  %v313_v2 = vld [vmem:[%s2360_s27 + $0x408] sm:$0xff] }
  0x34   : > { %306 = vst [vmem:[%s2368_s28 + $0x1e8] sm:$0xff] %v305_v62  ;;  %308 = vst [vmem:[%s2368_s28 + $0x1f0] sm:$0xff] %v307_v63  ;;  %v315_v3 = vld [vmem:[%s2360_s27 + $0x410] sm:$0xff]  ;;  %v317_v4 = vld [vmem:[%s2360_s27 + $0x418] sm:$0xff] }
  0x35   : > { %310 = vst [vmem:[%s2368_s28 + $0x1f8] sm:$0xff] %v309_v0  ;;  %312 = vst [vmem:[%s2368_s28 + $0x200] sm:$0xff] %v311_v1  ;;  %v319_v5 = vld [vmem:[%s2360_s27 + $0x440] sm:$0xff]  ;;  %v321_v6 = vld [vmem:[%s2360_s27 + $0x448] sm:$0xff] }
  0x36   : > { %314 = vst [vmem:[%s2368_s28 + $0x208] sm:$0xff] %v313_v2  ;;  %316 = vst [vmem:[%s2368_s28 + $0x210] sm:$0xff] %v315_v3  ;;  %v323_v7 = vld [vmem:[%s2360_s27 + $0x450] sm:$0xff]  ;;  %v325_v8 = vld [vmem:[%s2360_s27 + $0x458] sm:$0xff] }
  0x37   : > { %318 = vst [vmem:[%s2368_s28 + $0x218] sm:$0xff] %v317_v4  ;;  %320 = vst [vmem:[%s2368_s28 + $0x220] sm:$0xff] %v319_v5  ;;  %v327_v9 = vld [vmem:[%s2360_s27 + $0x480] sm:$0xff]  ;;  %v329_v10 = vld [vmem:[%s2360_s27 + $0x488] sm:$0xff] }
  0x38   : > { %322 = vst [vmem:[%s2368_s28 + $0x228] sm:$0xff] %v321_v6  ;;  %324 = vst [vmem:[%s2368_s28 + $0x230] sm:$0xff] %v323_v7  ;;  %v331_v11 = vld [vmem:[%s2360_s27 + $0x490] sm:$0xff]  ;;  %v333_v12 = vld [vmem:[%s2360_s27 + $0x498] sm:$0xff] }
  0x39   : > { %326 = vst [vmem:[%s2368_s28 + $0x238] sm:$0xff] %v325_v8  ;;  %328 = vst [vmem:[%s2368_s28 + $0x240] sm:$0xff] %v327_v9  ;;  %v335_v13 = vld [vmem:[%s2360_s27 + $0x4c0] sm:$0xff]  ;;  %v337_v14 = vld [vmem:[%s2360_s27 + $0x4c8] sm:$0xff] }
  0x3a   : > { %330 = vst [vmem:[%s2368_s28 + $0x248] sm:$0xff] %v329_v10  ;;  %332 = vst [vmem:[%s2368_s28 + $0x250] sm:$0xff] %v331_v11  ;;  %v339_v15 = vld [vmem:[%s2360_s27 + $0x4d0] sm:$0xff]  ;;  %v341_v16 = vld [vmem:[%s2360_s27 + $0x4d8] sm:$0xff] }
  0x3b   : > { %334 = vst [vmem:[%s2368_s28 + $0x258] sm:$0xff] %v333_v12  ;;  %336 = vst [vmem:[%s2368_s28 + $0x260] sm:$0xff] %v335_v13  ;;  %v343_v17 = vld [vmem:[%s2360_s27 + $0x500] sm:$0xff]  ;;  %v345_v18 = vld [vmem:[%s2360_s27 + $0x508] sm:$0xff] }
  0x3c   : > { %338 = vst [vmem:[%s2368_s28 + $0x268] sm:$0xff] %v337_v14  ;;  %340 = vst [vmem:[%s2368_s28 + $0x270] sm:$0xff] %v339_v15  ;;  %v347_v19 = vld [vmem:[%s2360_s27 + $0x510] sm:$0xff]  ;;  %v349_v20 = vld [vmem:[%s2360_s27 + $0x518] sm:$0xff] }
  0x3d   : > { %342 = vst [vmem:[%s2368_s28 + $0x278] sm:$0xff] %v341_v16  ;;  %344 = vst [vmem:[%s2368_s28 + $0x280] sm:$0xff] %v343_v17  ;;  %v351_v21 = vld [vmem:[%s2360_s27 + $0x540] sm:$0xff]  ;;  %v353_v22 = vld [vmem:[%s2360_s27 + $0x548] sm:$0xff] }
  0x3e   : > { %346 = vst [vmem:[%s2368_s28 + $0x288] sm:$0xff] %v345_v18  ;;  %348 = vst [vmem:[%s2368_s28 + $0x290] sm:$0xff] %v347_v19  ;;  %v355_v23 = vld [vmem:[%s2360_s27 + $0x550] sm:$0xff]  ;;  %v357_v24 = vld [vmem:[%s2360_s27 + $0x558] sm:$0xff] }
  0x3f   : > { %350 = vst [vmem:[%s2368_s28 + $0x298] sm:$0xff] %v349_v20  ;;  %352 = vst [vmem:[%s2368_s28 + $0x2a0] sm:$0xff] %v351_v21  ;;  %v359_v25 = vld [vmem:[%s2360_s27 + $0x580] sm:$0xff]  ;;  %v361_v26 = vld [vmem:[%s2360_s27 + $0x588] sm:$0xff] }
  0x40   : > { %354 = vst [vmem:[%s2368_s28 + $0x2a8] sm:$0xff] %v353_v22  ;;  %356 = vst [vmem:[%s2368_s28 + $0x2b0] sm:$0xff] %v355_v23  ;;  %v363_v27 = vld [vmem:[%s2360_s27 + $0x590] sm:$0xff]  ;;  %v365_v28 = vld [vmem:[%s2360_s27 + $0x598] sm:$0xff] }
  0x41   : > { %358 = vst [vmem:[%s2368_s28 + $0x2b8] sm:$0xff] %v357_v24  ;;  %360 = vst [vmem:[%s2368_s28 + $0x2c0] sm:$0xff] %v359_v25  ;;  %v367_v29 = vld [vmem:[%s2360_s27 + $0x5c0] sm:$0xff]  ;;  %v369_v30 = vld [vmem:[%s2360_s27 + $0x5c8] sm:$0xff] }
  0x42   : > { %362 = vst [vmem:[%s2368_s28 + $0x2c8] sm:$0xff] %v361_v26  ;;  %364 = vst [vmem:[%s2368_s28 + $0x2d0] sm:$0xff] %v363_v27  ;;  %v371_v31 = vld [vmem:[%s2360_s27 + $0x5d0] sm:$0xff]  ;;  %v373_v32 = vld [vmem:[%s2360_s27 + $0x5d8] sm:$0xff] }
  0x43   : > { %366 = vst [vmem:[%s2368_s28 + $0x2d8] sm:$0xff] %v365_v28  ;;  %368 = vst [vmem:[%s2368_s28 + $0x2e0] sm:$0xff] %v367_v29  ;;  %v375_v33 = vld [vmem:[%s2360_s27 + $0x600] sm:$0xff]  ;;  %v377_v34 = vld [vmem:[%s2360_s27 + $0x608] sm:$0xff] }
  0x44   : > { %370 = vst [vmem:[%s2368_s28 + $0x2e8] sm:$0xff] %v369_v30  ;;  %372 = vst [vmem:[%s2368_s28 + $0x2f0] sm:$0xff] %v371_v31  ;;  %v379_v35 = vld [vmem:[%s2360_s27 + $0x610] sm:$0xff]  ;;  %v381_v36 = vld [vmem:[%s2360_s27 + $0x618] sm:$0xff] }
  0x45   : > { %374 = vst [vmem:[%s2368_s28 + $0x2f8] sm:$0xff] %v373_v32  ;;  %376 = vst [vmem:[%s2368_s28 + $0x300] sm:$0xff] %v375_v33  ;;  %v383_v37 = vld [vmem:[%s2360_s27 + $0x640] sm:$0xff]  ;;  %v385_v38 = vld [vmem:[%s2360_s27 + $0x648] sm:$0xff] }
  0x46   : > { %378 = vst [vmem:[%s2368_s28 + $0x308] sm:$0xff] %v377_v34  ;;  %380 = vst [vmem:[%s2368_s28 + $0x310] sm:$0xff] %v379_v35  ;;  %v387_v39 = vld [vmem:[%s2360_s27 + $0x650] sm:$0xff]  ;;  %v389_v40 = vld [vmem:[%s2360_s27 + $0x658] sm:$0xff] }
  0x47   : > { %382 = vst [vmem:[%s2368_s28 + $0x318] sm:$0xff] %v381_v36  ;;  %384 = vst [vmem:[%s2368_s28 + $0x320] sm:$0xff] %v383_v37  ;;  %v391_v41 = vld [vmem:[%s2360_s27 + $0x680] sm:$0xff]  ;;  %v393_v42 = vld [vmem:[%s2360_s27 + $0x688] sm:$0xff] }
  0x48   : > { %386 = vst [vmem:[%s2368_s28 + $0x328] sm:$0xff] %v385_v38  ;;  %388 = vst [vmem:[%s2368_s28 + $0x330] sm:$0xff] %v387_v39  ;;  %v395_v43 = vld [vmem:[%s2360_s27 + $0x690] sm:$0xff]  ;;  %v397_v44 = vld [vmem:[%s2360_s27 + $0x698] sm:$0xff] }
  0x49   : > { %390 = vst [vmem:[%s2368_s28 + $0x338] sm:$0xff] %v389_v40  ;;  %392 = vst [vmem:[%s2368_s28 + $0x340] sm:$0xff] %v391_v41  ;;  %v399_v45 = vld [vmem:[%s2360_s27 + $0x6c0] sm:$0xff]  ;;  %v401_v46 = vld [vmem:[%s2360_s27 + $0x6c8] sm:$0xff] }
  0x4a   : > { %394 = vst [vmem:[%s2368_s28 + $0x348] sm:$0xff] %v393_v42  ;;  %396 = vst [vmem:[%s2368_s28 + $0x350] sm:$0xff] %v395_v43  ;;  %v403_v47 = vld [vmem:[%s2360_s27 + $0x6d0] sm:$0xff]  ;;  %v405_v48 = vld [vmem:[%s2360_s27 + $0x6d8] sm:$0xff] }
  0x4b   : > { %398 = vst [vmem:[%s2368_s28 + $0x358] sm:$0xff] %v397_v44  ;;  %400 = vst [vmem:[%s2368_s28 + $0x360] sm:$0xff] %v399_v45  ;;  %v407_v49 = vld [vmem:[%s2360_s27 + $0x700] sm:$0xff]  ;;  %v409_v50 = vld [vmem:[%s2360_s27 + $0x708] sm:$0xff] }
  0x4c   : > { %402 = vst [vmem:[%s2368_s28 + $0x368] sm:$0xff] %v401_v46  ;;  %404 = vst [vmem:[%s2368_s28 + $0x370] sm:$0xff] %v403_v47  ;;  %v411_v51 = vld [vmem:[%s2360_s27 + $0x710] sm:$0xff]  ;;  %v413_v52 = vld [vmem:[%s2360_s27 + $0x718] sm:$0xff] }
  0x4d   : > { %406 = vst [vmem:[%s2368_s28 + $0x378] sm:$0xff] %v405_v48  ;;  %408 = vst [vmem:[%s2368_s28 + $0x380] sm:$0xff] %v407_v49  ;;  %v415_v53 = vld [vmem:[%s2360_s27 + $0x740] sm:$0xff]  ;;  %v417_v54 = vld [vmem:[%s2360_s27 + $0x748] sm:$0xff] }
  0x4e   : > { %410 = vst [vmem:[%s2368_s28 + $0x388] sm:$0xff] %v409_v50  ;;  %412 = vst [vmem:[%s2368_s28 + $0x390] sm:$0xff] %v411_v51  ;;  %v419_v55 = vld [vmem:[%s2360_s27 + $0x750] sm:$0xff]  ;;  %v421_v56 = vld [vmem:[%s2360_s27 + $0x758] sm:$0xff] }
  0x4f   : > { %414 = vst [vmem:[%s2368_s28 + $0x398] sm:$0xff] %v413_v52  ;;  %416 = vst [vmem:[%s2368_s28 + $0x3a0] sm:$0xff] %v415_v53  ;;  %v423_v57 = vld [vmem:[%s2360_s27 + $0x780] sm:$0xff]  ;;  %v425_v58 = vld [vmem:[%s2360_s27 + $0x788] sm:$0xff] }
  0x50   : > { %418 = vst [vmem:[%s2368_s28 + $0x3a8] sm:$0xff] %v417_v54  ;;  %420 = vst [vmem:[%s2368_s28 + $0x3b0] sm:$0xff] %v419_v55  ;;  %v427_v59 = vld [vmem:[%s2360_s27 + $0x790] sm:$0xff]  ;;  %v429_v60 = vld [vmem:[%s2360_s27 + $0x798] sm:$0xff] }
  0x51   : > { %422 = vst [vmem:[%s2368_s28 + $0x3b8] sm:$0xff] %v421_v56  ;;  %424 = vst [vmem:[%s2368_s28 + $0x3c0] sm:$0xff] %v423_v57  ;;  %v431_v61 = vld [vmem:[%s2360_s27 + $0x7c0] sm:$0xff]  ;;  %v433_v62 = vld [vmem:[%s2360_s27 + $0x7c8] sm:$0xff] }
  0x52   : > { %426 = vst [vmem:[%s2368_s28 + $0x3c8] sm:$0xff] %v425_v58  ;;  %428 = vst [vmem:[%s2368_s28 + $0x3d0] sm:$0xff] %v427_v59  ;;  %v435_v63 = vld [vmem:[%s2360_s27 + $0x7d0] sm:$0xff]  ;;  %v437_v0 = vld [vmem:[%s2360_s27 + $0x7d8] sm:$0xff] }
  0x53   : > { %430 = vst [vmem:[%s2368_s28 + $0x3d8] sm:$0xff] %v429_v60  ;;  %432 = vst [vmem:[%s2368_s28 + $0x3e0] sm:$0xff] %v431_v61  ;;  %v439_v1 = vld [vmem:[%s2360_s27 + $0x800] sm:$0xff]  ;;  %v441_v2 = vld [vmem:[%s2360_s27 + $0x808] sm:$0xff] }
  0x54   : > { %434 = vst [vmem:[%s2368_s28 + $0x3e8] sm:$0xff] %v433_v62  ;;  %436 = vst [vmem:[%s2368_s28 + $0x3f0] sm:$0xff] %v435_v63  ;;  %v443_v3 = vld [vmem:[%s2360_s27 + $0x810] sm:$0xff]  ;;  %v445_v4 = vld [vmem:[%s2360_s27 + $0x818] sm:$0xff] }
  0x55   : > { %438 = vst [vmem:[%s2368_s28 + $0x3f8] sm:$0xff] %v437_v0  ;;  %440 = vst [vmem:[%s2368_s28 + $0x400] sm:$0xff] %v439_v1  ;;  %v447_v5 = vld [vmem:[%s2360_s27 + $0x840] sm:$0xff]  ;;  %v449_v6 = vld [vmem:[%s2360_s27 + $0x848] sm:$0xff] }
  0x56   : > { %442 = vst [vmem:[%s2368_s28 + $0x408] sm:$0xff] %v441_v2  ;;  %444 = vst [vmem:[%s2368_s28 + $0x410] sm:$0xff] %v443_v3  ;;  %v451_v7 = vld [vmem:[%s2360_s27 + $0x850] sm:$0xff]  ;;  %v453_v8 = vld [vmem:[%s2360_s27 + $0x858] sm:$0xff] }
  0x57   : > { %446 = vst [vmem:[%s2368_s28 + $0x418] sm:$0xff] %v445_v4  ;;  %448 = vst [vmem:[%s2368_s28 + $0x420] sm:$0xff] %v447_v5  ;;  %v455_v9 = vld [vmem:[%s2360_s27 + $0x880] sm:$0xff]  ;;  %v457_v10 = vld [vmem:[%s2360_s27 + $0x888] sm:$0xff] }
  0x58   : > { %450 = vst [vmem:[%s2368_s28 + $0x428] sm:$0xff] %v449_v6  ;;  %452 = vst [vmem:[%s2368_s28 + $0x430] sm:$0xff] %v451_v7  ;;  %v459_v11 = vld [vmem:[%s2360_s27 + $0x890] sm:$0xff]  ;;  %v461_v12 = vld [vmem:[%s2360_s27 + $0x898] sm:$0xff] }
  0x59   : > { %454 = vst [vmem:[%s2368_s28 + $0x438] sm:$0xff] %v453_v8  ;;  %456 = vst [vmem:[%s2368_s28 + $0x440] sm:$0xff] %v455_v9  ;;  %v463_v13 = vld [vmem:[%s2360_s27 + $0x8c0] sm:$0xff]  ;;  %v465_v14 = vld [vmem:[%s2360_s27 + $0x8c8] sm:$0xff] }
  0x5a   : > { %458 = vst [vmem:[%s2368_s28 + $0x448] sm:$0xff] %v457_v10  ;;  %460 = vst [vmem:[%s2368_s28 + $0x450] sm:$0xff] %v459_v11  ;;  %v467_v15 = vld [vmem:[%s2360_s27 + $0x8d0] sm:$0xff]  ;;  %v469_v16 = vld [vmem:[%s2360_s27 + $0x8d8] sm:$0xff] }
  0x5b   : > { %462 = vst [vmem:[%s2368_s28 + $0x458] sm:$0xff] %v461_v12  ;;  %464 = vst [vmem:[%s2368_s28 + $0x460] sm:$0xff] %v463_v13 }
  0x5c   : > { %466 = vst [vmem:[%s2368_s28 + $0x468] sm:$0xff] %v465_v14  ;;  %468 = vst [vmem:[%s2368_s28 + $0x470] sm:$0xff] %v467_v15 }
  0x5d   : > { %470 = vst [vmem:[%s2368_s28 + $0x478] sm:$0xff] %v469_v16 }
  0x5e PF: > { %p1989_p6 = scmp.ge.s32.totalorder %s2290_s18, 1  ;;  %p475_p7 = scmp.lt.s32.totalorder %s2290_s18, 3 }
  0x60   : > { %p476_p8 = pnand %p1989_p6, %p475_p7 }
  0x61   : > { %s482_s29 = sand.u32 (!%p476_p8), 1, %s2274_s14   ;;  %v684_v17 = vlaneseq (!%p476_p8)  ;;  %v2292_v18 = vmov (!%p476_p8), 0   ;;  %v2293_v19 = vmov (!%p476_p8), 1966171168   ;;  %vm1434_vm0 = vcmask (!%p476_p8), 261120   ;;  %s1990_s7 = sshll.u32 (!%p476_p8), %s2282_s16, 3 }
  0x62   : > { %479 = sbr.rel (%p476_p8) target bundleno = 512 (0x200), region = 51  ;;  %2219 = vset.pattern.permute.xlu0 (!%p476_p8), %v2292_v18  ;;  %v698_v20 = vunpack.c.l.s4 (!%p476_p8), %v2293_v19  ;;  %v2659_v21 = vld.sshfl [vmem:[%s2871_s0] sm:$0x13 pattern:$0x75316420] (!%p476_p8)  ;;  %p526_p9 = scmp.lt.s32.totalorder (!%p476_p8), %s1990_s7, 15 }
  0x63   : > { %s2176_s30 = smul.u32 (!%p476_p8), 1152, %s482_s29  ;;  %v2661_v22 = vshrl.u32 (!%p476_p8), %v684_v17, 7  ;;  %v696_v42 = vcombine.high (!%p476_p8), %v2659_v21, %v2659_v21 }
  0x64   : > { %v699_v26 = vunpack.c.0.s8 (!%p476_p8), %v698_v20 }
  0x65   : > { %s2663_s6 = scalar_lea.vmem (!%p476_p8), [#allocation3], %s2176_s30 }
  0x66   : > { %v534_v23 = vld [vmem:[%s2663_s6] sm:$0xff] (!%p476_p8)  ;;  %v535_v25 = vld [vmem:[%s2663_s6 + $0x8] sm:$0xff] (!%p476_p8)  ;;  %v2680_v43 = vsub.s32 (!%p476_p8), %v699_v26, %v2661_v22 }
  0x67   : > { %v538_v24 = vld [vmem:[%s2663_s6 + $0x20] sm:$0xff] (!%p476_p8)  ;;  %v539_v28 = vld [vmem:[%s2663_s6 + $0x28] sm:$0xff] (!%p476_p8) }
  0x68   : > { %v1993_v27 = vcombine.high (!%p476_p8), %v534_v23, %v538_v24  ;;  %v1992_v29 = vcombine.low (!%p476_p8), %v534_v23, %v538_v24  ;;  %v542_v30 = vld [vmem:[%s2663_s6 + $0x40] sm:$0xff] (!%p476_p8)  ;;  %v1995_v32 = vcombine.high (!%p476_p8), %v535_v25, %v539_v28  ;;  %v1994_v33 = vcombine.low (!%p476_p8), %v535_v25, %v539_v28  ;;  %v543_v35 = vld [vmem:[%s2663_s6 + $0x48] sm:$0xff] (!%p476_p8) }
  0x69   : > { %v546_v31 = vld [vmem:[%s2663_s6 + $0x60] sm:$0xff]  ;;  %v547_v36 = vld [vmem:[%s2663_s6 + $0x68] sm:$0xff]  ;;  %v2687_v52 = vrot.slane %v696_v42, %v2680_v43  ;;  %s2882_s7 = smov (!%p526_p9, %s1990_s7), 15 }
  0x6a   : > { %v2001_v34 = vcombine.high %v542_v30, %v546_v31  ;;  %v550_v37 = vld [vmem:[%s2663_s6 + $0x80] sm:$0xff]  ;;  %1438 = vmatprep.subr.bf16.mxu0 %v1993_v27  ;;  %v2003_v38 = vcombine.high %v543_v35, %v547_v36  ;;  %v551_v40 = vld [vmem:[%s2663_s6 + $0x88] sm:$0xff]  ;;  %1520 = vmatprep.subr.bf16.mxu1 %v1995_v32  ;;  %v2000_v44 = vcombine.low %v542_v30, %v546_v31  ;;  %s530_s10 = scalar_lea.vmem %s2874_s3, %s2882_s7 }
  0x6b   : > { %v554_v39 = vld [vmem:[%s2663_s6 + $0xa0] sm:$0xff]  ;;  %v555_v41 = vld [vmem:[%s2663_s6 + $0xa8] sm:$0xff]  ;;  %1439 = vmatpush1.bf16.msra.mxu0 %v1992_v29  ;;  %1521 = vmatpush1.bf16.msra.mxu1 %v1994_v33  ;;  %v2002_v45 = vcombine.low %v543_v35, %v547_v36 }
  0x6c   : > { %1440 = vmatprep.subr.bf16.mxu0 %v2001_v34  ;;  %v2009_v46 = vcombine.high %v550_v37, %v554_v39  ;;  %1522 = vmatprep.subr.bf16.mxu1 %v2003_v38  ;;  %v2011_v47 = vcombine.high %v551_v40, %v555_v41  ;;  %v558_v48 = vld [vmem:[%s2663_s6 + $0xc0] sm:$0xff]  ;;  %v559_v50 = vld [vmem:[%s2663_s6 + $0xc8] sm:$0xff]  ;;  %v2008_v53 = vcombine.low %v550_v37, %v554_v39 }
  0x6d   : > { %v562_v49 = vld [vmem:[%s2663_s6 + $0xe0] sm:$0xff]  ;;  %v563_v51 = vld [vmem:[%s2663_s6 + $0xe8] sm:$0xff]  ;;  %v2010_v54 = vcombine.low %v551_v40, %v555_v41  ;;  %1470 = vmatprep.mubr.bf16.mxu0 %v2687_v52  ;;  %1552 = vmatprep.mubr.bf16.mxu1 %v2687_v52 }
  0x6e   : > { %v2017_v55 = vcombine.high %v558_v48, %v562_v49  ;;  %v2019_v56 = vcombine.high %v559_v50, %v563_v51  ;;  %v566_v57 = vld [vmem:[%s2663_s6 + $0x100] sm:$0xff]  ;;  %v567_v59 = vld [vmem:[%s2663_s6 + $0x108] sm:$0xff]  ;;  %v2016_v61 = vcombine.low %v558_v48, %v562_v49  ;;  %v2018_v62 = vcombine.low %v559_v50, %v563_v51 }
  0x6f   : > { %1441 = vmatpush1.bf16.msra.mxu0 %v2000_v44  ;;  %1523 = vmatpush1.bf16.msra.mxu1 %v2002_v45  ;;  %v570_v58 = vld [vmem:[%s2663_s6 + $0x120] sm:$0xff]  ;;  %v571_v60 = vld [vmem:[%s2663_s6 + $0x128] sm:$0xff] }
  0x70   : > { %1442 = vmatprep.subr.bf16.mxu0 %v2009_v46  ;;  %1524 = vmatprep.subr.bf16.mxu1 %v2011_v47  ;;  %v2025_v63 = vcombine.high %v566_v57, %v570_v58  ;;  %v2027_v0 = vcombine.high %v567_v59, %v571_v60  ;;  %v574_v1 = vld [vmem:[%s2663_s6 + $0x140] sm:$0xff]  ;;  %v575_v3 = vld [vmem:[%s2663_s6 + $0x148] sm:$0xff]  ;;  %v2024_v5 = vcombine.low %v566_v57, %v570_v58 }
  0x71   : > { %v578_v2 = vld [vmem:[%s2663_s6 + $0x160] sm:$0xff]  ;;  %v579_v4 = vld [vmem:[%s2663_s6 + $0x168] sm:$0xff]  ;;  %v2026_v6 = vcombine.low %v567_v59, %v571_v60 }
  0x72   : > { %v2033_v7 = vcombine.high %v574_v1, %v578_v2  ;;  %v2035_v8 = vcombine.high %v575_v3, %v579_v4  ;;  %v582_v9 = vld [vmem:[%s2663_s6 + $0x180] sm:$0xff]  ;;  %v583_v11 = vld [vmem:[%s2663_s6 + $0x188] sm:$0xff]  ;;  %v2032_v13 = vcombine.low %v574_v1, %v578_v2  ;;  %v2034_v14 = vcombine.low %v575_v3, %v579_v4 }
  0x73   : > { %1443 = vmatpush1.bf16.msra.mxu0 %v2008_v53  ;;  %1525 = vmatpush1.bf16.msra.mxu1 %v2010_v54  ;;  %v586_v10 = vld [vmem:[%s2663_s6 + $0x1a0] sm:$0xff]  ;;  %v587_v12 = vld [vmem:[%s2663_s6 + $0x1a8] sm:$0xff] }
  0x74   : > { %1444 = vmatprep.subr.bf16.mxu0 %v2017_v55  ;;  %1526 = vmatprep.subr.bf16.mxu1 %v2019_v56  ;;  %v2041_v15 = vcombine.high %v582_v9, %v586_v10  ;;  %v2043_v16 = vcombine.high %v583_v11, %v587_v12  ;;  %v590_v17 = vld [vmem:[%s2663_s6 + $0x1c0] sm:$0xff]  ;;  %v591_v20 = vld [vmem:[%s2663_s6 + $0x1c8] sm:$0xff]  ;;  %v2040_v24 = vcombine.low %v582_v9, %v586_v10 }
  0x75   : > { %v594_v19 = vld [vmem:[%s2663_s6 + $0x1e0] sm:$0xff]  ;;  %v595_v23 = vld [vmem:[%s2663_s6 + $0x1e8] sm:$0xff]  ;;  %v2042_v25 = vcombine.low %v583_v11, %v587_v12  ;;  %v678_v11 = vld [vmem:[#allocation2] sm:$0x1] }
  0x76   : > { %v2049_v26 = vcombine.high %v590_v17, %v594_v19  ;;  %v2051_v27 = vcombine.high %v591_v20, %v595_v23  ;;  %v598_v28 = vld [vmem:[%s2663_s6 + $0x200] sm:$0xff]  ;;  %v599_v30 = vld [vmem:[%s2663_s6 + $0x208] sm:$0xff]  ;;  %v2048_v32 = vcombine.low %v590_v17, %v594_v19  ;;  %v2050_v33 = vcombine.low %v591_v20, %v595_v23  ;;  %681 = vperm.xlu0 %2219, %v678_v11  }
  0x77   : > { %1445 = vmatpush1.bf16.msra.mxu0 %v2016_v61  ;;  %1527 = vmatpush1.bf16.msra.mxu1 %v2018_v62  ;;  %v602_v29 = vld [vmem:[%s2663_s6 + $0x220] sm:$0xff]  ;;  %v603_v31 = vld [vmem:[%s2663_s6 + $0x228] sm:$0xff] }
  0x78   : > { %1446 = vmatprep.subr.bf16.mxu0 %v2025_v63  ;;  %1528 = vmatprep.subr.bf16.mxu1 %v2027_v0  ;;  %v2057_v34 = vcombine.high %v598_v28, %v602_v29  ;;  %v2059_v35 = vcombine.high %v599_v30, %v603_v31  ;;  %v606_v36 = vld [vmem:[%s2663_s6 + $0x240] sm:$0xff]  ;;  %v607_v38 = vld [vmem:[%s2663_s6 + $0x248] sm:$0xff]  ;;  %v2056_v40 = vcombine.low %v598_v28, %v602_v29 }
  0x79   : > { %v610_v37 = vld [vmem:[%s2663_s6 + $0x260] sm:$0xff]  ;;  %v611_v39 = vld [vmem:[%s2663_s6 + $0x268] sm:$0xff]  ;;  %v2058_v41 = vcombine.low %v599_v30, %v603_v31 }
  0x7a   : > { %v2065_v42 = vcombine.high %v606_v36, %v610_v37  ;;  %v2067_v44 = vcombine.high %v607_v38, %v611_v39  ;;  %v614_v45 = vld [vmem:[%s2663_s6 + $0x280] sm:$0xff]  ;;  %v615_v47 = vld [vmem:[%s2663_s6 + $0x288] sm:$0xff]  ;;  %v2064_v49 = vcombine.low %v606_v36, %v610_v37  ;;  %v2066_v50 = vcombine.low %v607_v38, %v611_v39 }
  0x7b   : > { %1447 = vmatpush1.bf16.msra.mxu0 %v2024_v5  ;;  %1529 = vmatpush1.bf16.msra.mxu1 %v2026_v6  ;;  %v618_v46 = vld [vmem:[%s2663_s6 + $0x2a0] sm:$0xff]  ;;  %v619_v48 = vld [vmem:[%s2663_s6 + $0x2a8] sm:$0xff] }
  0x7c   : > { %1448 = vmatprep.subr.bf16.mxu0 %v2033_v7  ;;  %1530 = vmatprep.subr.bf16.mxu1 %v2035_v8  ;;  %v2073_v51 = vcombine.high %v614_v45, %v618_v46  ;;  %v2075_v53 = vcombine.high %v615_v47, %v619_v48  ;;  %v622_v54 = vld [vmem:[%s2663_s6 + $0x2c0] sm:$0xff]  ;;  %v623_v56 = vld [vmem:[%s2663_s6 + $0x2c8] sm:$0xff]  ;;  %v2072_v58 = vcombine.low %v614_v45, %v618_v46 }
  0x7d   : > { %v626_v55 = vld [vmem:[%s2663_s6 + $0x2e0] sm:$0xff]  ;;  %v627_v57 = vld [vmem:[%s2663_s6 + $0x2e8] sm:$0xff]  ;;  %v2074_v59 = vcombine.low %v615_v47, %v619_v48  ;;  %v2747_v45 = vrot.slane %v2659_v21, %v2680_v43 }
  0x7e   : > { %v2081_v60 = vcombine.high %v622_v54, %v626_v55  ;;  %v2083_v61 = vcombine.high %v623_v56, %v627_v57  ;;  %v630_v62 = vld [vmem:[%s2663_s6 + $0x300] sm:$0xff]  ;;  %v631_v0 = vld [vmem:[%s2663_s6 + $0x308] sm:$0xff]  ;;  %v2080_v2 = vcombine.low %v622_v54, %v626_v55  ;;  %v2082_v3 = vcombine.low %v623_v56, %v627_v57  ;;  %v540_v54 = vld [vmem:[%s2663_s6 + $0x30] sm:$0xff] }
  0x7f   : > { %1449 = vmatpush1.bf16.msra.mxu0 %v2032_v13  ;;  %1531 = vmatpush1.bf16.msra.mxu1 %v2034_v14  ;;  %v634_v63 = vld [vmem:[%s2663_s6 + $0x320] sm:$0xff]  ;;  %v635_v1 = vld [vmem:[%s2663_s6 + $0x328] sm:$0xff]  ;;  %v537_v55 = vld [vmem:[%s2663_s6 + $0x18] sm:$0xff] }
  0x80   : > { %1450 = vmatprep.subr.bf16.mxu0 %v2041_v15  ;;  %1532 = vmatprep.subr.bf16.mxu1 %v2043_v16  ;;  %v2089_v4 = vcombine.high %v630_v62, %v634_v63  ;;  %v2091_v5 = vcombine.high %v631_v0, %v635_v1  ;;  %v638_v6 = vld [vmem:[%s2663_s6 + $0x340] sm:$0xff]  ;;  %v639_v8 = vld [vmem:[%s2663_s6 + $0x348] sm:$0xff]  ;;  %v2088_v10 = vcombine.low %v630_v62, %v634_v63  ;;  %v541_v56 = vld [vmem:[%s2663_s6 + $0x38] sm:$0xff] }
  0x81   : > { %v642_v7 = vld [vmem:[%s2663_s6 + $0x360] sm:$0xff]  ;;  %v643_v9 = vld [vmem:[%s2663_s6 + $0x368] sm:$0xff]  ;;  %v2090_v12 = vcombine.low %v631_v0, %v635_v1  ;;  %v2763_v62 = vcombine.high %v2747_v45, %v2747_v45  ;;  %v545_v63 = vld [vmem:[%s2663_s6 + $0x58] sm:$0xff] }
  0x82   : > { %v2097_v13 = vcombine.high %v638_v6, %v642_v7  ;;  %v2099_v14 = vcombine.high %v639_v8, %v643_v9  ;;  %v646_v15 = vld [vmem:[%s2663_s6 + $0x380] sm:$0xff]  ;;  %v647_v17 = vld [vmem:[%s2663_s6 + $0x388] sm:$0xff]  ;;  %v2096_v20 = vcombine.low %v638_v6, %v642_v7  ;;  %v2098_v23 = vcombine.low %v639_v8, %v643_v9  ;;  %v549_v0 = vld [vmem:[%s2663_s6 + $0x78] sm:$0xff] }
  0x83   : > { %1451 = vmatpush1.bf16.msra.mxu0 %v2040_v24  ;;  %1533 = vmatpush1.bf16.msra.mxu1 %v2042_v25  ;;  %v650_v16 = vld [vmem:[%s2663_s6 + $0x3a0] sm:$0xff]  ;;  %v651_v19 = vld [vmem:[%s2663_s6 + $0x3a8] sm:$0xff]  ;;  %v556_v6 = vld [vmem:[%s2663_s6 + $0xb0] sm:$0xff] }
  0x84   : > { %1452 = vmatprep.subr.bf16.mxu0 %v2049_v26  ;;  %1534 = vmatprep.subr.bf16.mxu1 %v2051_v27  ;;  %v2105_v24 = vcombine.high %v646_v15, %v650_v16  ;;  %v2107_v25 = vcombine.high %v647_v17, %v651_v19  ;;  %v654_v26 = vld [vmem:[%s2663_s6 + $0x3c0] sm:$0xff]  ;;  %v655_v28 = vld [vmem:[%s2663_s6 + $0x3c8] sm:$0xff]  ;;  %v2104_v30 = vcombine.low %v646_v15, %v650_v16  ;;  %v553_v7 = vld [vmem:[%s2663_s6 + $0x98] sm:$0xff] }
  0x85   : > { %v658_v27 = vld [vmem:[%s2663_s6 + $0x3e0] sm:$0xff]  ;;  %v659_v29 = vld [vmem:[%s2663_s6 + $0x3e8] sm:$0xff]  ;;  %v2106_v31 = vcombine.low %v647_v17, %v651_v19  ;;  %v557_v8 = vld [vmem:[%s2663_s6 + $0xb8] sm:$0xff] }
  0x86   : > { %v663_v36 = vld [vmem:[%s2663_s6 + $0x408] sm:$0xff]  ;;  %v2112_v38 = vcombine.low %v654_v26, %v658_v27  ;;  %v2114_v39 = vcombine.low %v655_v28, %v659_v29  ;;  %v561_v15 = vld [vmem:[%s2663_s6 + $0xd8] sm:$0xff]  ;;  %v2014_v19 = vcombine.low %v553_v7, %v557_v8 }
  0x87   : > { %1453 = vmatpush1.bf16.msra.mxu0 %v2048_v32  ;;  %1535 = vmatpush1.bf16.msra.mxu1 %v2050_v33  ;;  %v2113_v32 = vcombine.high %v654_v26, %v658_v27  ;;  %v2115_v33 = vcombine.high %v655_v28, %v659_v29  ;;  %v667_v37 = vld [vmem:[%s2663_s6 + $0x428] sm:$0xff]  ;;  %v565_v16 = vld [vmem:[%s2663_s6 + $0xf8] sm:$0xff] }
  0x88   : > { %1454 = vmatprep.subr.bf16.mxu0 %v2057_v34  ;;  %1536 = vmatprep.subr.bf16.mxu1 %v2059_v35  ;;  %v662_v34 = vld [vmem:[%s2663_s6 + $0x400] sm:$0xff]  ;;  %v671_v46 = vld [vmem:[%s2663_s6 + $0x448] sm:$0xff]  ;;  %v569_v26 = vld [vmem:[%s2663_s6 + $0x118] sm:$0xff] }
  0x89   : > { %v666_v35 = vld [vmem:[%s2663_s6 + $0x420] sm:$0xff]  ;;  %v675_v47 = vld [vmem:[%s2663_s6 + $0x468] sm:$0xff]  ;;  %v573_v27 = vld [vmem:[%s2663_s6 + $0x138] sm:$0xff] }
  0x8a   : > { %v2120_v48 = vcombine.low %v662_v34, %v666_v35  ;;  %v2130_v57 = vcombine.low %v671_v46, %v675_v47 }
  0x8b   : > { %1455 = vmatpush1.bf16.msra.mxu0 %v2056_v40  ;;  %1537 = vmatpush1.bf16.msra.mxu1 %v2058_v41  ;;  %v2121_v40 = vcombine.high %v662_v34, %v666_v35  ;;  %v2123_v41 = vcombine.high %v663_v36, %v667_v37  ;;  %v581_v34 = vld [vmem:[%s2663_s6 + $0x178] sm:$0xff] }
  0x8c   : > { %1456 = vmatprep.subr.bf16.mxu0 %v2065_v42  ;;  %1538 = vmatprep.subr.bf16.mxu1 %v2067_v44  ;;  %v670_v42 = vld [vmem:[%s2663_s6 + $0x440] sm:$0xff] }
  0x8d   : > { %v674_v44 = vld [vmem:[%s2663_s6 + $0x460] sm:$0xff] }
  0x8e   : > { %v2128_v21 = vcombine.low %v670_v42, %v674_v44 }
  0x8f   : > { %1457 = vmatpush1.bf16.msra.mxu0 %v2064_v49  ;;  %1539 = vmatpush1.bf16.msra.mxu1 %v2066_v50  ;;  %v2122_v49 = vcombine.low %v663_v36, %v667_v37  ;;  %v2129_v50 = vcombine.high %v670_v42, %v674_v44  ;;  %v2030_v36 = vcombine.low %v569_v26, %v573_v27  ;;  %v589_v42 = vld [vmem:[%s2663_s6 + $0x1b8] sm:$0xff] }
  0x90   : > { %1458 = vmatprep.subr.bf16.mxu0 %v2073_v51  ;;  %1540 = vmatprep.subr.bf16.mxu1 %v2075_v53  ;;  %v2131_v51 = vcombine.high %v671_v46, %v675_v47  ;;  %v536_v53 = vld [vmem:[%s2663_s6 + $0x10] sm:$0xff] }
  0x91   : > { %v1996_v1 = vcombine.low %v536_v53, %v540_v54 }
  0x93   : > { %1459 = vmatpush1.bf16.msra.mxu0 %v2072_v58  ;;  %1541 = vmatpush1.bf16.msra.mxu1 %v2074_v59  ;;  %v1997_v58 = vcombine.high %v536_v53, %v540_v54  ;;  %v1999_v59 = vcombine.high %v537_v55, %v541_v56  ;;  %v597_v53 = vld [vmem:[%s2663_s6 + $0x1f8] sm:$0xff] }
  0x94   : > { %1460 = vmatprep.subr.bf16.mxu0 %v2081_v60  ;;  %1542 = vmatprep.subr.bf16.mxu1 %v2083_v61  ;;  %v544_v60 = vld [vmem:[%s2663_s6 + $0x50] sm:$0xff] }
  0x95   : > { %v548_v61 = vld [vmem:[%s2663_s6 + $0x70] sm:$0xff] }
  0x96   : > { %v2004_v9 = vcombine.low %v544_v60, %v548_v61 }
  0x97   : > { %1461 = vmatpush1.bf16.msra.mxu0 %v2080_v2  ;;  %1543 = vmatpush1.bf16.msra.mxu1 %v2082_v3  ;;  %v1998_v2 = vcombine.low %v537_v55, %v541_v56  ;;  %v2005_v3 = vcombine.high %v544_v60, %v548_v61  ;;  %v605_v60 = vld [vmem:[%s2663_s6 + $0x238] sm:$0xff] }
  0x98   : > { %1462 = vmatprep.subr.bf16.mxu0 %v2089_v4  ;;  %1544 = vmatprep.subr.bf16.mxu1 %v2091_v5  ;;  %v2007_v4 = vcombine.high %v545_v63, %v549_v0  ;;  %v552_v5 = vld [vmem:[%s2663_s6 + $0x90] sm:$0xff] }
  0x99   : > { %v2013_v11 = vcombine.high %v552_v5, %v556_v6  ;;  %v2012_v17 = vcombine.low %v552_v5, %v556_v6  ;;  %v613_v5 = vld [vmem:[%s2663_s6 + $0x278] sm:$0xff] }
  0x9b   : > { %1463 = vmatpush1.bf16.msra.mxu0 %v2088_v10  ;;  %1545 = vmatpush1.bf16.msra.mxu1 %v2090_v12  ;;  %v2006_v10 = vcombine.low %v545_v63, %v549_v0  ;;  %v2015_v12 = vcombine.high %v553_v7, %v557_v8 }
  0x9c   : > { %1464 = vmatprep.subr.bf16.mxu0 %v2097_v13  ;;  %1546 = vmatprep.subr.bf16.mxu1 %v2099_v14  ;;  %v560_v13 = vld [vmem:[%s2663_s6 + $0xd0] sm:$0xff] }
  0x9d   : > { %v564_v14 = vld [vmem:[%s2663_s6 + $0xf0] sm:$0xff] }
  0x9e   : > { %v2020_v28 = vcombine.low %v560_v13, %v564_v14 }
  0x9f   : > { %1465 = vmatpush1.bf16.msra.mxu0 %v2096_v20  ;;  %1547 = vmatpush1.bf16.msra.mxu1 %v2098_v23  ;;  %v2021_v20 = vcombine.high %v560_v13, %v564_v14  ;;  %v2023_v23 = vcombine.high %v561_v15, %v565_v16  ;;  %v621_v13 = vld [vmem:[%s2663_s6 + $0x2b8] sm:$0xff] }
  0xa0   : > { %1466 = vmatprep.subr.bf16.mxu0 %v2105_v24  ;;  %1548 = vmatprep.subr.bf16.mxu1 %v2107_v25  ;;  %v568_v24 = vld [vmem:[%s2663_s6 + $0x110] sm:$0xff] }
  0xa1   : > { %v572_v25 = vld [vmem:[%s2663_s6 + $0x130] sm:$0xff] }
  0xa2   : > { %v2029_v29 = vcombine.high %v568_v24, %v572_v25  ;;  %v2028_v35 = vcombine.low %v568_v24, %v572_v25  ;;  %v629_v24 = vld [vmem:[%s2663_s6 + $0x2f8] sm:$0xff] }
  0xa3   : > { %1467 = vmatpush1.bf16.msra.mxu0 %v2104_v30  ;;  %1549 = vmatpush1.bf16.msra.mxu1 %v2106_v31  ;;  %v2031_v30 = vcombine.high %v569_v26, %v573_v27  ;;  %v576_v31 = vld [vmem:[%s2663_s6 + $0x150] sm:$0xff] }
  0xa4   : > { %1468 = vmatprep.subr.bf16.mxu0 %v2113_v32  ;;  %1550 = vmatprep.subr.bf16.mxu1 %v2115_v33  ;;  %v580_v32 = vld [vmem:[%s2663_s6 + $0x170] sm:$0xff]  ;;  %v577_v33 = vld [vmem:[%s2663_s6 + $0x158] sm:$0xff] }
  0xa5   : > { %v2037_v37 = vcombine.high %v576_v31, %v580_v32  ;;  %v2036_v44 = vcombine.low %v576_v31, %v580_v32  ;;  %v2038_v46 = vcombine.low %v577_v33, %v581_v34  ;;  %v637_v31 = vld [vmem:[%s2663_s6 + $0x338] sm:$0xff] }
  0xa7   : > { %1469 = vmatpush1.bf16.msra.mxu0 %v2112_v38  ;;  %1551 = vmatpush1.bf16.msra.mxu1 %v2114_v39  ;;  %v2039_v38 = vcombine.high %v577_v33, %v581_v34  ;;  %v584_v39 = vld [vmem:[%s2663_s6 + $0x190] sm:$0xff] }
  0xa8   : > { %1479 = vmatprep.subr.bf16.mxu0 %v2121_v40  ;;  %1561 = vmatprep.subr.bf16.mxu1 %v2123_v41  ;;  %v588_v40 = vld [vmem:[%s2663_s6 + $0x1b0] sm:$0xff]  ;;  %v585_v41 = vld [vmem:[%s2663_s6 + $0x198] sm:$0xff] }
  0xa9   : > { %v2045_v47 = vcombine.high %v584_v39, %v588_v40  ;;  %v2044_v54 = vcombine.low %v584_v39, %v588_v40  ;;  %v2046_v55 = vcombine.low %v585_v41, %v589_v42  ;;  %v645_v39 = vld [vmem:[%s2663_s6 + $0x378] sm:$0xff] }
  0xaa   : > { %1471 = vmatmul.mubr.bf16.vlgmr.msra.gmra.mrb[0].mxu0 %v2747_v45  ;;  %1553 = vmatmul.mubr.bf16.vlgmr.msra.gmra.mrb[0].mxu1 %v2747_v45 }
  0xab   : > { %1480 = vmatpush1.bf16.msra.mxu0 %v2120_v48  ;;  %1562 = vmatpush1.bf16.msra.mxu1 %v2122_v49  ;;  %v2047_v48 = vcombine.high %v585_v41, %v589_v42  ;;  %v592_v49 = vld [vmem:[%s2663_s6 + $0x1d0] sm:$0xff] }
  0xac   : > { %1481 = vmatprep.subr.bf16.mxu0 %v2129_v50  ;;  %1563 = vmatprep.subr.bf16.mxu1 %v2131_v51  ;;  %v596_v50 = vld [vmem:[%s2663_s6 + $0x1f0] sm:$0xff]  ;;  %v593_v51 = vld [vmem:[%s2663_s6 + $0x1d8] sm:$0xff] }
  0xad   : > { %1511 = vmatprep.mubr.bf16.mxu0 %v2292_v18  ;;  %1593 = vmatprep.mubr.bf16.mxu1 %v2292_v18  ;;  %v2053_v56 = vcombine.high %v592_v49, %v596_v50  ;;  %v2052_v61 = vcombine.low %v592_v49, %v596_v50  ;;  %v2054_v63 = vcombine.low %v593_v51, %v597_v53  ;;  %v653_v49 = vld [vmem:[%s2663_s6 + $0x3b8] sm:$0xff] }
  0xaf   : > { %1482 = vmatpush1.bf16.msra.mxu0 %v2128_v21  ;;  %1564 = vmatpush1.bf16.msra.mxu1 %v2130_v57  ;;  %v2055_v21 = vcombine.high %v593_v51, %v597_v53  ;;  %v600_v57 = vld [vmem:[%s2663_s6 + $0x210] sm:$0xff] }
  0xb0   : > { %1602 = vmatprep.subr.bf16.mxu0 %v1997_v58  ;;  %1684 = vmatprep.subr.bf16.mxu1 %v1999_v59  ;;  %v604_v58 = vld [vmem:[%s2663_s6 + $0x230] sm:$0xff]  ;;  %v601_v59 = vld [vmem:[%s2663_s6 + $0x218] sm:$0xff] }
  0xb1   : > { %v2061_v0 = vcombine.high %v600_v57, %v604_v58  ;;  %v2060_v6 = vcombine.low %v600_v57, %v604_v58  ;;  %v2062_v7 = vcombine.low %v601_v59, %v605_v60  ;;  %v661_v57 = vld [vmem:[%s2663_s6 + $0x3f8] sm:$0xff] }
  0xb6   : > { %2136 = vmatmul.mubr.msk.bf16.vlgmr.msra.gmra.mrb[0].mxu0 %vm1434_vm0, %v2763_v62  ;;  %2137 = vmatmul.mubr.msk.bf16.vlgmr.msra.gmra.mrb[0].mxu1 %vm1434_vm0, %v2763_v62 }
  0xb7   : > { %1603 = vmatpush1.bf16.msra.mxu0 %v1996_v1  ;;  %1685 = vmatpush1.bf16.msra.mxu1 %v1998_v2  ;;  %v2063_v1 = vcombine.high %v601_v59, %v605_v60  ;;  %v608_v2 = vld [vmem:[%s2663_s6 + $0x250] sm:$0xff] }
  0xb8   : > { %1604 = vmatprep.subr.bf16.mxu0 %v2005_v3  ;;  %1686 = vmatprep.subr.bf16.mxu1 %v2007_v4  ;;  %v612_v3 = vld [vmem:[%s2663_s6 + $0x270] sm:$0xff]  ;;  %v609_v4 = vld [vmem:[%s2663_s6 + $0x258] sm:$0xff] }
  0xb9   : > { %1634 = vmatprep.mubr.bf16.mxu0 %v2687_v52  ;;  %1716 = vmatprep.mubr.bf16.mxu1 %v2687_v52  ;;  %v2022_v52 = vcombine.low %v561_v15, %v565_v16  ;;  %v2069_v8 = vcombine.high %v608_v2, %v612_v3  ;;  %v2068_v14 = vcombine.low %v608_v2, %v612_v3  ;;  %v669_v2 = vld [vmem:[%s2663_s6 + $0x438] sm:$0xff] }
  0xba   : > { %v2070_v15 = vcombine.low %v609_v4, %v613_v5 }
  0xbb   : > { %1605 = vmatpush1.bf16.msra.mxu0 %v2004_v9  ;;  %1687 = vmatpush1.bf16.msra.mxu1 %v2006_v10  ;;  %v2071_v9 = vcombine.high %v609_v4, %v613_v5  ;;  %v616_v10 = vld [vmem:[%s2663_s6 + $0x290] sm:$0xff] }
  0xbc   : > { %1606 = vmatprep.subr.bf16.mxu0 %v2013_v11  ;;  %1688 = vmatprep.subr.bf16.mxu1 %v2015_v12  ;;  %v620_v11 = vld [vmem:[%s2663_s6 + $0x2b0] sm:$0xff]  ;;  %v617_v12 = vld [vmem:[%s2663_s6 + $0x298] sm:$0xff] }
  0xbd   : > { %v2077_v16 = vcombine.high %v616_v10, %v620_v11  ;;  %v2076_v25 = vcombine.low %v616_v10, %v620_v11  ;;  %v2078_v26 = vcombine.low %v617_v12, %v621_v13  ;;  %v677_v10 = vld [vmem:[%s2663_s6 + $0x478] sm:$0xff] }
  0xbf   : > { %1607 = vmatpush1.bf16.msra.mxu0 %v2012_v17  ;;  %1689 = vmatpush1.bf16.msra.mxu1 %v2014_v19  ;;  %v2079_v17 = vcombine.high %v617_v12, %v621_v13  ;;  %v624_v19 = vld [vmem:[%s2663_s6 + $0x2d0] sm:$0xff] }
  0xc0   : > { %1608 = vmatprep.subr.bf16.mxu0 %v2021_v20  ;;  %1690 = vmatprep.subr.bf16.mxu1 %v2023_v23  ;;  %v628_v20 = vld [vmem:[%s2663_s6 + $0x2f0] sm:$0xff]  ;;  %v625_v23 = vld [vmem:[%s2663_s6 + $0x2d8] sm:$0xff] }
  0xc1   : > { %v2085_v27 = vcombine.high %v624_v19, %v628_v20  ;;  %v2084_v32 = vcombine.low %v624_v19, %v628_v20  ;;  %v2086_v33 = vcombine.low %v625_v23, %v629_v24 }
  0xc3   : > { %1609 = vmatpush1.bf16.msra.mxu0 %v2020_v28  ;;  %1691 = vmatpush1.bf16.msra.mxu1 %v2022_v52  ;;  %v2087_v28 = vcombine.high %v625_v23, %v629_v24  ;;  %v632_v52 = vld [vmem:[%s2663_s6 + $0x310] sm:$0xff] }
  0xc4   : > { %1610 = vmatprep.subr.bf16.mxu0 %v2029_v29  ;;  %1692 = vmatprep.subr.bf16.mxu1 %v2031_v30  ;;  %v636_v29 = vld [vmem:[%s2663_s6 + $0x330] sm:$0xff]  ;;  %v633_v30 = vld [vmem:[%s2663_s6 + $0x318] sm:$0xff] }
  0xc5   : > { %v2093_v34 = vcombine.high %v632_v52, %v636_v29  ;;  %v2092_v40 = vcombine.low %v632_v52, %v636_v29  ;;  %v2094_v41 = vcombine.low %v633_v30, %v637_v31 }
  0xc7   : > { %1611 = vmatpush1.bf16.msra.mxu0 %v2028_v35  ;;  %1693 = vmatpush1.bf16.msra.mxu1 %v2030_v36  ;;  %v2095_v35 = vcombine.high %v633_v30, %v637_v31  ;;  %v640_v36 = vld [vmem:[%s2663_s6 + $0x350] sm:$0xff] }
  0xc8   : > { %1612 = vmatprep.subr.bf16.mxu0 %v2037_v37  ;;  %1694 = vmatprep.subr.bf16.mxu1 %v2039_v38  ;;  %v644_v37 = vld [vmem:[%s2663_s6 + $0x370] sm:$0xff]  ;;  %v641_v38 = vld [vmem:[%s2663_s6 + $0x358] sm:$0xff] }
  0xc9   : > { %v2101_v42 = vcombine.high %v640_v36, %v644_v37  ;;  %v2100_v50 = vcombine.low %v640_v36, %v644_v37  ;;  %v2102_v51 = vcombine.low %v641_v38, %v645_v39 }
  0xcb   : > { %1613 = vmatpush1.bf16.msra.mxu0 %v2036_v44  ;;  %1695 = vmatpush1.bf16.msra.mxu1 %v2038_v46  ;;  %v2103_v44 = vcombine.high %v641_v38, %v645_v39  ;;  %v648_v46 = vld [vmem:[%s2663_s6 + $0x390] sm:$0xff] }
  0xcc   : > { %1614 = vmatprep.subr.bf16.mxu0 %v2045_v47  ;;  %1696 = vmatprep.subr.bf16.mxu1 %v2047_v48  ;;  %v652_v47 = vld [vmem:[%s2663_s6 + $0x3b0] sm:$0xff]  ;;  %v649_v48 = vld [vmem:[%s2663_s6 + $0x398] sm:$0xff] }
  0xcd   : > { %v2109_v53 = vcombine.high %v648_v46, %v652_v47  ;;  %v2108_v58 = vcombine.low %v648_v46, %v652_v47  ;;  %v2110_v59 = vcombine.low %v649_v48, %v653_v49 }
  0xcf   : > { %1615 = vmatpush1.bf16.msra.mxu0 %v2044_v54  ;;  %1697 = vmatpush1.bf16.msra.mxu1 %v2046_v55  ;;  %v2111_v54 = vcombine.high %v649_v48, %v653_v49  ;;  %v656_v55 = vld [vmem:[%s2663_s6 + $0x3d0] sm:$0xff] }
  0xd0   : > { %1616 = vmatprep.subr.bf16.mxu0 %v2053_v56  ;;  %1698 = vmatprep.subr.bf16.mxu1 %v2055_v21  ;;  %v660_v56 = vld [vmem:[%s2663_s6 + $0x3f0] sm:$0xff]  ;;  %v657_v21 = vld [vmem:[%s2663_s6 + $0x3d8] sm:$0xff] }
  0xd1   : > { %v2117_v60 = vcombine.high %v656_v55, %v660_v56  ;;  %v2116_v3 = vcombine.low %v656_v55, %v660_v56  ;;  %v2118_v4 = vcombine.low %v657_v21, %v661_v57 }
  0xd3   : > { %1617 = vmatpush1.bf16.msra.mxu0 %v2052_v61  ;;  %1699 = vmatpush1.bf16.msra.mxu1 %v2054_v63  ;;  %v2119_v61 = vcombine.high %v657_v21, %v661_v57  ;;  %v664_v63 = vld [vmem:[%s2663_s6 + $0x410] sm:$0xff] }
  0xd4   : > { %1618 = vmatprep.subr.bf16.mxu0 %v2061_v0  ;;  %1700 = vmatprep.subr.bf16.mxu1 %v2063_v1  ;;  %v668_v0 = vld [vmem:[%s2663_s6 + $0x430] sm:$0xff]  ;;  %v665_v1 = vld [vmem:[%s2663_s6 + $0x418] sm:$0xff] }
  0xd5   : > { %v2125_v5 = vcombine.high %v664_v63, %v668_v0  ;;  %v2124_v11 = vcombine.low %v664_v63, %v668_v0  ;;  %v2126_v12 = vcombine.low %v665_v1, %v669_v2 }
  0xd7   : > { %1619 = vmatpush1.bf16.msra.mxu0 %v2060_v6  ;;  %1701 = vmatpush1.bf16.msra.mxu1 %v2062_v7  ;;  %v2127_v6 = vcombine.high %v665_v1, %v669_v2  ;;  %v672_v7 = vld [vmem:[%s2663_s6 + $0x450] sm:$0xff] }
  0xd8   : > { %1620 = vmatprep.subr.bf16.mxu0 %v2069_v8  ;;  %1702 = vmatprep.subr.bf16.mxu1 %v2071_v9  ;;  %v676_v8 = vld [vmem:[%s2663_s6 + $0x470] sm:$0xff]  ;;  %v673_v9 = vld [vmem:[%s2663_s6 + $0x458] sm:$0xff] }
  0xd9   : > { %v2133_v13 = vcombine.high %v672_v7, %v676_v8 }
  0xdb   : > { %1621 = vmatpush1.bf16.msra.mxu0 %v2068_v14  ;;  %1703 = vmatpush1.bf16.msra.mxu1 %v2070_v15  ;;  %v2135_v14 = vcombine.high %v673_v9, %v677_v10  ;;  %v2132_v15 = vcombine.low %v672_v7, %v676_v8 }
  0xdc   : > { %1622 = vmatprep.subr.bf16.mxu0 %v2077_v16  ;;  %1704 = vmatprep.subr.bf16.mxu1 %v2079_v17  ;;  %v2134_v16 = vcombine.low %v673_v9, %v677_v10 }
  0xdf   : > { %1623 = vmatpush1.bf16.msra.mxu0 %v2076_v25  ;;  %1705 = vmatpush1.bf16.msra.mxu1 %v2078_v26 }
  0xe0   : > { %1624 = vmatprep.subr.bf16.mxu0 %v2085_v27  ;;  %1706 = vmatprep.subr.bf16.mxu1 %v2087_v28 }
  0xe3   : > { %1625 = vmatpush1.bf16.msra.mxu0 %v2084_v32  ;;  %1707 = vmatpush1.bf16.msra.mxu1 %v2086_v33 }
  0xe4   : > { %1626 = vmatprep.subr.bf16.mxu0 %v2093_v34  ;;  %1708 = vmatprep.subr.bf16.mxu1 %v2095_v35 }
  0xe7   : > { %1627 = vmatpush1.bf16.msra.mxu0 %v2092_v40  ;;  %1709 = vmatpush1.bf16.msra.mxu1 %v2094_v41 }
  0xe8   : > { %1628 = vmatprep.subr.bf16.mxu0 %v2101_v42  ;;  %1710 = vmatprep.subr.bf16.mxu1 %v2103_v44 }
  0xeb   : > { %1629 = vmatpush1.bf16.msra.mxu0 %v2100_v50  ;;  %1711 = vmatpush1.bf16.msra.mxu1 %v2102_v51 }
  0xec   : > { %1630 = vmatprep.subr.bf16.mxu0 %v2109_v53  ;;  %1712 = vmatprep.subr.bf16.mxu1 %v2111_v54 }
  0xef   : > { %1631 = vmatpush1.bf16.msra.mxu0 %v2108_v58  ;;  %1713 = vmatpush1.bf16.msra.mxu1 %v2110_v59 }
  0xf0   : > { %1632 = vmatprep.subr.bf16.mxu0 %v2117_v60  ;;  %1714 = vmatprep.subr.bf16.mxu1 %v2119_v61 }
  0xf3   : > { %1633 = vmatpush1.bf16.msra.mxu0 %v2116_v3  ;;  %1715 = vmatpush1.bf16.msra.mxu1 %v2118_v4 }
  0xf4   : > { %1643 = vmatprep.subr.bf16.mxu0 %v2125_v5  ;;  %1725 = vmatprep.subr.bf16.mxu1 %v2127_v6 }
  0xf5   : > { %v682_v17 = vpop.permute.xlu0 %681 }
  0xf6   : > { %1635 = vmatmul.mubr.bf16.vlgmr.msra.gmra.mrb[4].mxu0 %v2747_v45  ;;  %1717 = vmatmul.mubr.bf16.vlgmr.msra.gmra.mrb[4].mxu1 %v2747_v45  ;;  %v686_v45 = vsub.s32 0, %v2661_v22 }
  0xf7   : > { %1644 = vmatpush1.bf16.msra.mxu0 %v2124_v11  ;;  %1726 = vmatpush1.bf16.msra.mxu1 %v2126_v12 }
  0xf8   : > { %1645 = vmatprep.subr.bf16.mxu0 %v2133_v13  ;;  %1727 = vmatprep.subr.bf16.mxu1 %v2135_v14  ;;  %v687_v19 = vrot.slane %v682_v17, %v686_v45 }
  0xf9   : > { %1675 = vmatprep.mubr.bf16.mxu0 %v2292_v18  ;;  %1757 = vmatprep.mubr.bf16.mxu1 %v2292_v18 }
  0xfb   : > { %1646 = vmatpush1.bf16.msra.mxu0 %v2132_v15  ;;  %1728 = vmatpush1.bf16.msra.mxu1 %v2134_v16 }
 0x102   : > { %2138 = vmatmul.mubr.msk.bf16.vlgmr.msra.gmra.mrb[4].mxu0 %vm1434_vm0, %v2763_v62  ;;  %2139 = vmatmul.mubr.msk.bf16.vlgmr.msra.gmra.mrb[4].mxu1 %vm1434_vm0, %v2763_v62 }
 0x189   : > { %v1513_v20 = vpop.f32.mrb[0].mxu0  ;;  %v1595_v24 = vpop.f32.mrb[0].mxu1 }
 0x18a   : > { %v2151_v23 = vadd.f32 %v1513_v20, %v687_v19  ;;  %v1515_v25 = vpop.f32.mrb[1].mxu0  ;;  %v2153_v26 = vadd.f32 %v1595_v24, %v687_v19  ;;  %v1597_v28 = vpop.f32.mrb[1].mxu1 }
 0x18b   : > { %v2152_v27 = vadd.f32 %v1515_v25, %v687_v19  ;;  %v1517_v18 = vpop.f32.mrb[2].mxu0  ;;  %v2154_v29 = vadd.f32 %v1597_v28, %v687_v19  ;;  %v1599_v30 = vpop.f32.mrb[2].mxu1 }
 0x18c   : > { %v2140_v52 = vmul.f32 -1.442695, %v2151_v23  ;;  %v1518_v31 = vpop.f32.mrb[3].mxu0  ;;  %v2142_v32 = vmul.f32 -1.442695, %v2153_v26  ;;  %v1600_v34 = vpop.f32.mrb[3].mxu1 }
 0x18d   : > { %v2141_v33 = vmul.f32 -1.442695, %v2152_v27  ;;  %v2143_v62 = vmul.f32 -1.442695, %v2154_v29 }
 0x18e   : > { %2220 = vpow2.f32 %v2140_v52 }
 0x18f   : > { %2222 = vpow2.f32 %v2142_v32 }
 0x190   : > { %2224 = vpow2.f32 %v2141_v33 }
 0x191   : > { %2226 = vpow2.f32 %v2143_v62 }
 0x198   : > { %v2221_v22 = vpop.eup %2220 }
 0x199   : > { %v2223_v35 = vpop.eup %2222  ;;  %v1790_v36 = vadd.f32 1.0, %v2221_v22 }
 0x19a   : > { %v2225_v37 = vpop.eup %2224  ;;  %v1792_v38 = vadd.f32 1.0, %v2223_v35 }
 0x19b   : > { %v2227_v39 = vpop.eup %2226  ;;  %2228 = vrcp.f32 %v1790_v36  ;;  %v1791_v40 = vadd.f32 1.0, %v2225_v37 }
 0x19c   : > { %2230 = vrcp.f32 %v1792_v38  ;;  %v1793_v41 = vadd.f32 1.0, %v2227_v39 }
 0x19d   : > { %2232 = vrcp.f32 %v1791_v40 }
 0x19e   : > { %2234 = vrcp.f32 %v1793_v41 }
 0x1a5   : > { %v2229_v42 = vpop.eup %2228 }
 0x1a6   : > { %v2231_v44 = vpop.eup %2230 }
 0x1a7   : > { %v2233_v46 = vpop.eup %2232 }
 0x1a8   : > { %v2235_v47 = vpop.eup %2234  ;;  %v1822_v48 = vcombine.low %v2229_v42, %v2233_v46 }
 0x1a9   : > { %v1823_v49 = vcombine.low %v2231_v44, %v2235_v47 }
 0x1aa   : > { %v1832_v50 = vrot.slane %v1822_v48, %v2680_v43 }
 0x1ab   : > { %v1839_v51 = vrot.slane %v1823_v49, %v2680_v43 }
 0x1ad   : > { %v1854_v53 = vcombine.low %v1832_v50, %v1839_v51 }
 0x1af   : > { %v1862_v25 = vrot.slane %v1854_v53, %v2680_v43 }
 0x1d5   : > { %v1677_v54 = vpop.f32.mrb[4].mxu0  ;;  %v1759_v56 = vpop.f32.mrb[4].mxu1 }
 0x1d6   : > { %v2155_v55 = vadd.f32 %v1677_v54, %v687_v19  ;;  %v1679_v21 = vpop.f32.mrb[5].mxu0  ;;  %v2157_v57 = vadd.f32 %v1759_v56, %v687_v19  ;;  %v1761_v59 = vpop.f32.mrb[5].mxu1 }
 0x1d7   : > { %v2156_v58 = vadd.f32 %v1679_v21, %v687_v19  ;;  %v1681_v60 = vpop.f32.mrb[6].mxu0  ;;  %v2158_v63 = vadd.f32 %v1761_v59, %v687_v19  ;;  %v1763_v0 = vpop.f32.mrb[6].mxu1 }
 0x1d8   : > { %v2144_v61 = vmul.f32 -1.442695, %v2155_v55  ;;  %v1682_v1 = vpop.f32.mrb[7].mxu0  ;;  %v2146_v2 = vmul.f32 -1.442695, %v2157_v57  ;;  %v1764_v4 = vpop.f32.mrb[7].mxu1 }
 0x1d9   : > { %v2145_v3 = vmul.f32 -1.442695, %v2156_v58  ;;  %v2147_v5 = vmul.f32 -1.442695, %v2158_v63 }
 0x1da   : > { %2236 = vpow2.f32 %v2144_v61 }
 0x1db   : > { %2238 = vpow2.f32 %v2146_v2 }
 0x1dc   : > { %2240 = vpow2.f32 %v2145_v3 }
 0x1dd   : > { %2242 = vpow2.f32 %v2147_v5 }
 0x1e4   : > { %v2237_v6 = vpop.eup %2236 }
 0x1e5   : > { %v2239_v7 = vpop.eup %2238  ;;  %v1794_v8 = vadd.f32 1.0, %v2237_v6 }
 0x1e6   : > { %v2241_v9 = vpop.eup %2240  ;;  %v1796_v10 = vadd.f32 1.0, %v2239_v7 }
 0x1e7   : > { %v2243_v11 = vpop.eup %2242  ;;  %2244 = vrcp.f32 %v1794_v8  ;;  %v1795_v12 = vadd.f32 1.0, %v2241_v9 }
 0x1e8   : > { %2246 = vrcp.f32 %v1796_v10  ;;  %v1797_v13 = vadd.f32 1.0, %v2243_v11 }
 0x1e9   : > { %2248 = vrcp.f32 %v1795_v12 }
 0x1ea   : > { %2250 = vrcp.f32 %v1797_v13 }
 0x1f1   : > { %v2245_v14 = vpop.eup %2244 }
 0x1f2   : > { %v2247_v15 = vpop.eup %2246 }
 0x1f3   : > { %v2249_v16 = vpop.eup %2248 }
 0x1f4   : > { %v2251_v45 = vpop.eup %2250  ;;  %v1824_v17 = vcombine.low %v2245_v14, %v2249_v16 }
 0x1f5   : > { %v1825_v19 = vcombine.low %v2247_v15, %v2251_v45 }
 0x1f6   : > { %v1846_v20 = vrot.slane %v1824_v17, %v2680_v43 }
 0x1f7   : > { %v1853_v23 = vrot.slane %v1825_v19, %v2680_v43 }
 0x1f9   : > { %v1855_v24 = vcombine.low %v1846_v20, %v1853_v23 }
 0x1fb   : > { %v1869_v26 = vrot.slane %v1855_v24, %v2680_v43 }
 0x1fd   : > { %v1870_v27 = vcombine.low %v1862_v25, %v1869_v26 }
 0x1ff   : > { %1872 = vst [vmem:[%s530_s10] sm:$0xff] %v1870_v27 }
 0x200 PF: > { %s15_s18 = sadd.s32 1, %s2290_s18   ;;  %s2875_s14 = smov %s2278_s15 }
 0x201   : > { %p12_p10 = scmp.ge.s32.totalorder %s15_s18, 4   ;;  %s2876_s15 = smov %s2352_s21 }
 0x202   : > { %s2877_s16 = smov %s2286_s17  ;;  %s2878_s17 = smov %s2880_s2 }
 0x203   :  { %14 = sbr.rel (!%p12_p10) target bundleno = 6 (0x6), region = 96 }

</bundles_post_ra>
